<compile_context>
chip_gen: v6e
topology: v6e:2x2x1
jax: 0.10.0
libtpu: 0.0.40
codegen_flags: <defaults>
</compile_context>

<pallas_src>
import functools

import jax
import jax.numpy as jnp
from jax import lax
from jax.experimental import pallas as pl
from jax.experimental.pallas import tpu as pltpu

LRELU_SLOPE = 0.1    # F.leaky_relu(x, LRELU_SLOPE)
INNER_SLOPE = 0.01   # nn.LeakyReLU() default inside ResidualStack

HALO_BLK = 16        # halo block rows (covers max halo: dilation-9 res unit -> 10)


# ----------------------------------------------------------------------------
# Hardware-aware knobs
# ----------------------------------------------------------------------------
@functools.lru_cache(maxsize=None)
def _vmem_limit():
    cap = None
    try:
        cap = getattr(pltpu.get_tpu_info(), "vmem_capacity_bytes", None)
    except Exception:
        cap = None
    if not cap:
        cap = 64 * 1024 * 1024            # conservative (v7x per-core VMEM)
    return int(min(cap * 3 // 4, 112 * 1024 * 1024))


def _compiler_params():
    return pltpu.CompilerParams(
        dimension_semantics=("parallel", "parallel"),   # batch AND time megacore
        vmem_limit_bytes=_vmem_limit(),
    )


def _pick_tm(t_rows, per_row_bytes, budget=12 << 20, cap=8192):
    """Largest power-of-two time tile (>= HALO_BLK) within the byte budget."""
    tm = HALO_BLK
    while tm * 2 <= min(cap, t_rows) and tm * 2 * per_row_bytes <= budget:
        tm *= 2
    return tm


def _halo_specs(t_rows, c, tm):
    """Three views of one (B, t_rows, c) array: prev-tile tail / body / next-tile head."""
    R = tm // HALO_BLK
    NB = pl.cdiv(t_rows, HALO_BLK)
    return [
        pl.BlockSpec((1, HALO_BLK, c),
                     lambda b, t: (b, jnp.maximum(t * R - 1, 0), 0)),
        pl.BlockSpec((1, tm, c), lambda b, t: (b, t, 0)),
        pl.BlockSpec((1, HALO_BLK, c),
                     lambda b, t: (b, jnp.minimum((t + 1) * R, NB - 1), 0)),
    ]


# ----------------------------------------------------------------------------
# Kernel 1: fused (uv-mix ->) (LeakyReLU ->) 'same' Conv1d (+ bias) (-> tanh)
# ----------------------------------------------------------------------------
def _conv_kernel(*refs, K, dil, TM, HB, plft, prgt, T, slope, tanh, mix):
    if mix:
        (xl, xb, xr, vl, vb, vr, ul, ub, ur, w_ref, b_ref, o_ref) = refs
    else:
        (xl, xb, xr, w_ref, b_ref, o_ref) = refs
    ti = pl.program_id(1)
    rows = TM + plft + prgt

    def window(l, c, r):
        parts = []
        if plft:
            parts.append(l[0, HB - plft:, :])
        parts.append(c[0])
        if prgt:
            parts.append(r[0, :prgt, :])
        return jnp.concatenate(parts, axis=0) if len(parts) > 1 else parts[0]

    if mix:
        u = window(ul, ub, ur).astype(jnp.float32)                     # (rows, 1)
        x = (window(xl, xb, xr).astype(jnp.float32) * u
             + window(vl, vb, vr).astype(jnp.float32) * (1.0 - u))
    else:
        x = window(xl, xb, xr)                                         # (rows, Cin)

    if slope is not None:
        # exact: leaky_relu(0) == 0, so activation commutes with zero padding
        x = jnp.where(x >= 0, x, x * slope)

    # zero-padding semantics + ragged-edge garbage suppression
    g = ti * TM - plft + lax.broadcasted_iota(jnp.int32, (rows, 1), 0)
    x = jnp.where((g >= 0) & (g < T), x, 0).astype(jnp.bfloat16)

    # im2col: one MXU contraction over K*Cin
    slab = jnp.concatenate([x[k * dil: k * dil + TM, :] for k in range(K)], axis=1)
    acc = jnp.dot(slab, w_ref[...], preferred_element_type=jnp.float32)
    acc = acc + b_ref[...]                                             # fp32 bias
    if tanh:
        acc = jnp.tanh(acc)
    o_ref[0] = acc.astype(o_ref.dtype)


def conv1d(x, w, b, *, dilation=1, lrelu_slope=None, tanh=False,
           out_dtype=jnp.bfloat16, mix=None):
    """'same'-padded dilated Conv1d.  x:(B,T,Cin)  w:(K,Cin,Cout)  b:(Cout,).

    mix=(x2, uv): fuses x <- x*uv + x2*(1-uv) (uv: (B,T)) before the conv."""
    B, T, Cin = x.shape
    K, _, Cout = w.shape
    halo = dilation * (K - 1)
    plft = halo // 2
    prgt = halo - plft
    assert plft <= HALO_BLK and prgt <= HALO_BLK

    xs = [x.astype(jnp.bfloat16)]
    if mix is not None:
        x2, uv = mix
        xs.append(x2.astype(jnp.bfloat16))
        xs.append(uv.reshape(B, T, 1).astype(jnp.float32))

    Tw = T
    if T < HALO_BLK:                      # tiny sequences (first layers only)
        Tw = HALO_BLK
        xs = [jnp.pad(v, ((0, 0), (0, Tw - T), (0, 0))) for v in xs]

    per_row = 8 * Cout + 2 * K * Cin + (16 if mix is None else 26) * Cin
    TM = _pick_tm(Tw, per_row)
    nt = pl.cdiv(Tw, TM)

    in_specs, args = [], []
    for v in xs:
        in_specs += _halo_specs(Tw, v.shape[2], TM)
        args += [v, v, v]
    in_specs += [pl.BlockSpec((K * Cin, Cout), lambda b_, t_: (0, 0)),
                 pl.BlockSpec((1, Cout), lambda b_, t_: (0, 0))]
    args += [w.reshape(K * Cin, Cout).astype(jnp.bfloat16),
             b.reshape(1, Cout).astype(jnp.float32)]

    kernel = functools.partial(_conv_kernel, K=K, dil=dilation, TM=TM,
                               HB=HALO_BLK, plft=plft, prgt=prgt, T=T,
                               slope=lrelu_slope, tanh=tanh, mix=mix is not None)
    out = pl.pallas_call(
        kernel,
        out_shape=jax.ShapeDtypeStruct((B, Tw, Cout), out_dtype),
        grid=(B, nt),
        in_specs=in_specs,
        out_specs=pl.BlockSpec((1, TM, Cout), lambda b_, t_: (b_, t_, 0)),
        compiler_params=_compiler_params(),
    )(*args)
    return out[:, :T, :] if Tw != T else out


# ----------------------------------------------------------------------------
# Kernel 2: fused residual unit  x + conv2(lrelu(conv1(lrelu(x))))
# (conv1: K=3 dilation d, conv2: K=3 dilation 1, both 'same' padding)
# ----------------------------------------------------------------------------
def _res_unit_kernel(xl, xb, xr, w1_ref, b1_ref, w2_ref, b2_ref, o_ref, *,
                     d, TM, HB, T, slope):
    H = d + 1
    ti = pl.program_id(1)
    body = xb[0]                                                  # (TM, C) bf16
    win = jnp.concatenate([xl[0, HB - H:, :], body, xr[0, :H, :]], axis=0)
    rows = TM + 2 * H
    g = ti * TM - H + lax.broadcasted_iota(jnp.int32, (rows, 1), 0)
    a = jnp.where(win >= 0, win, win * slope)                     # LeakyReLU(0.01)
    a = jnp.where((g >= 0) & (g < T), a, 0).astype(jnp.bfloat16)

    # conv #1 (K=3, dilation d): h[i] == conv1 output at global time ti*TM - 1 + i
    L1 = TM + 2
    slab1 = jnp.concatenate([a[k * d: k * d + L1, :] for k in range(3)], axis=1)
    h = jnp.dot(slab1, w1_ref[...], preferred_element_type=jnp.float32)
    h = h + b1_ref[...]

    # Exact Conv1d zero-padding for conv #2: its input outside [0, T) is 0.
    g2 = ti * TM - 1 + lax.broadcasted_iota(jnp.int32, (L1, 1), 0)
    p = jnp.where(h >= 0, h, h * slope)
    p = jnp.where((g2 >= 0) & (g2 < T), p, 0).astype(jnp.bfloat16)

    # conv #2 (K=3, dilation 1) + residual add of the original (pre-lrelu) x
    slab2 = jnp.concatenate([p[k: k + TM, :] for k in range(3)], axis=1)
    acc = jnp.dot(slab2, w2_ref[...], preferred_element_type=jnp.float32)
    acc = acc + b2_ref[...] + body.astype(jnp.float32)
    o_ref[0] = acc.astype(o_ref.dtype)


def res_unit(x, w1, b1, d, w2, b2):
    B, T, C = x.shape
    H = d + 1
    assert H <= HALO_BLK
    xb = x.astype(jnp.bfloat16)
    Tw = T
    if T < HALO_BLK:
        Tw = HALO_BLK
        xb = jnp.pad(xb, ((0, 0), (0, Tw - T), (0, 0)))
    TM = _pick_tm(Tw, 36 * C)
    nt = pl.cdiv(Tw, TM)

    in_specs = _halo_specs(Tw, C, TM) + [
        pl.BlockSpec((3 * C, C), lambda b_, t_: (0, 0)),
        pl.BlockSpec((1, C), lambda b_, t_: (0, 0)),
        pl.BlockSpec((3 * C, C), lambda b_, t_: (0, 0)),
        pl.BlockSpec((1, C), lambda b_, t_: (0, 0)),
    ]
    kernel = functools.partial(_res_unit_kernel, d=d, TM=TM, HB=HALO_BLK,
                               T=T, slope=INNER_SLOPE)
    out = pl.pallas_call(
        kernel,
        out_shape=jax.ShapeDtypeStruct((B, Tw, C), jnp.bfloat16),
        grid=(B, nt),
        in_specs=in_specs,
        out_specs=pl.BlockSpec((1, TM, C), lambda b_, t_: (b_, t_, 0)),
        compiler_params=_compiler_params(),
    )(xb, xb, xb,
      w1.reshape(3 * C, C).astype(jnp.bfloat16),
      b1.reshape(1, C).astype(jnp.float32),
      w2.reshape(3 * C, C).astype(jnp.bfloat16),
      b2.reshape(1, C).astype(jnp.float32))
    return out[:, :T, :] if Tw != T else out


# ----------------------------------------------------------------------------
# Polyphase decomposition of ConvTranspose1d (K = 2*stride, padding = stride//2)
# ----------------------------------------------------------------------------
def convT_to_polyphase(wt, s, p):
    """wt: (Ci, Co, K) torch ConvTranspose1d weight -> (3, Ci, s*Co) conv weight
    for a stride-1, kernel-3, padding-1 conv whose (B,T,s*Co) output, reshaped
    row-major to (B, T*s, Co), equals the transposed convolution output."""
    Ci, Co, K = wt.shape
    assert K == 2 * s and p == s // 2
    w = jnp.zeros((3, Ci, s * Co), jnp.float32)
    for r in range(s):                       # output phase r
        k0 = (r + p) % s
        t0 = (r + p) // s                    # 0 or 1
        col = slice(r * Co, (r + 1) * Co)
        w = w.at[t0 + 1, :, col].set(wt[:, :, k0])       # tap at input offset t0
        w = w.at[t0, :, col].set(wt[:, :, k0 + s])       # tap at input offset t0-1
    return w


# ----------------------------------------------------------------------------
# Model forward (plain-JAX glue between Pallas kernels)
# ----------------------------------------------------------------------------
def residual_stack_forward(x, units):
    for (w1, b1, d, w2, b2) in units:
        x = res_unit(x, w1, b1, d, w2, b2)
    return x


def melgan_forward(x, gp):
    # pre: Conv1d(n_mel, 512, 7, padding=3)
    x = conv1d(x, gp["pre_w"], gp["pre_b"])
    for blk in gp["blocks"]:
        B, T, _ = x.shape
        s, co = blk["stride"], blk["out_ch"]
        # ResidualBlock: leaky_relu(x, 0.1) -> ConvTranspose1d (polyphase form)
        x = conv1d(x, blk["pre_w"], blk["pre_b"], lrelu_slope=LRELU_SLOPE)
        x = x.reshape(B, T * s, co)                      # free row-major reshape
        x = residual_stack_forward(x, blk["res"])
    return x


def split_forward(x_c, x_v, y_tmpl_c, y_tmpl_v, uv_ex, params):
    """Inputs in PyTorch NCL convention: x_* (B, n_mel, T), uv_ex (B, L_out).
    y_tmpl_* are unused (as in the torch module).  Returns (B, 1, L_out)."""
    del y_tmpl_c, y_tmpl_v
    xc = jnp.transpose(x_c, (0, 2, 1))
    xv = jnp.transpose(x_v, (0, 2, 1))
    E_c = melgan_forward(xc, params["g_c"])              # (B, L_out, 32)
    E_v = melgan_forward(xv, params["g_v"])
    # fused: z = conv( E_c*uv + E_v*(1-uv) )   (mix blended inside the kernel)
    z = conv1d(E_c, params["conv_w"], params["conv_b"], mix=(E_v, uv_ex))
    z = residual_stack_forward(z, params["res"])
    z = conv1d(z, params["post_w"], params["post_b"], lrelu_slope=LRELU_SLOPE,
               tanh=True, out_dtype=jnp.float32)
    return jnp.transpose(z, (0, 2, 1))                   # NCL: (B, 1, L_out)


# ----------------------------------------------------------------------------
# Deterministic parameter construction (weight_norm == identity at init)
# ----------------------------------------------------------------------------
def _conv_params(key, cin, cout, k):
    kw, kb = jax.random.split(key)
    w = jax.random.normal(kw, (k, cin, cout), jnp.float32) / jnp.sqrt(float(cin * k))
    b = jax.random.normal(kb, (cout,), jnp.float32) * 0.01
    return w.astype(jnp.bfloat16), b


def _convT_polyphase_params(key, cin, cout, k, s):
    kw, kb = jax.random.split(key)
    wt = jax.random.normal(kw, (cin, cout, k), jnp.float32) / jnp.sqrt(float(cin * k))
    b = jax.random.normal(kb, (cout,), jnp.float32) * 0.01
    w = convT_to_polyphase(wt, s, s // 2).astype(jnp.bfloat16)   # (3, cin, s*cout)
    return w, jnp.tile(b, s)                                     # (s*cout,)


def _res_stack_params(key, ch):
    keys = jax.random.split(key, 6)
    units = []
    for i, d in enumerate((1, 3, 9)):
        w1, b1 = _conv_params(keys[2 * i], ch, ch, 3)
        w2, b2 = _conv_params(keys[2 * i + 1], ch, ch, 3)
        units.append((w1, b1, d, w2, b2))
    return units


def _melgan_params(key, n_mel):
    keys = jax.random.split(key, 5)
    pre_w, pre_b = _conv_params(keys[0], n_mel, 512, 7)
    cfg = [(512, 256, 16, 8), (256, 128, 16, 8), (128, 64, 4, 2), (64, 32, 4, 2)]
    blocks = []
    for i, (ci, co, kk, s) in enumerate(cfg):
        k1, k2 = jax.random.split(keys[i + 1])
        pw, pb = _convT_polyphase_params(k1, ci, co, kk, s)
        rs = _res_stack_params(k2, co)
        blocks.append(dict(stride=s, out_ch=co, pre_w=pw, pre_b=pb, res=rs))
    return dict(pre_w=pre_w, pre_b=pre_b, blocks=blocks)


def make_params(key, n_mel):
    kc_, kv_, ks_ = (jax.random.fold_in(key, i) for i in range(3))
    params = dict(g_c=_melgan_params(kc_, n_mel), g_v=_melgan_params(kv_, n_mel))
    kc, kr, kp = jax.random.split(ks_, 3)
    params["conv_w"], params["conv_b"] = _conv_params(kc, 32, 32, 7)
    params["res"] = _res_stack_params(kr, 32)
    params["post_w"], params["post_b"] = _conv_params(kp, 32, 1, 7)
    return params


# ----------------------------------------------------------------------------
# Self-test: Pallas kernels vs. plain-JAX fp32 references (loose bf16 tolerance)
# ----------------------------------------------------------------------------
def _ref_conv1d(x, w, b, dilation, padding, slope=None, tanh=False):
    if slope is not None:
        x = jnp.where(x >= 0, x, x * slope)
    K = w.shape[0]
    T_out = x.shape[1] + 2 * padding - dilation * (K - 1)
    xp = jnp.pad(x, ((0, 0), (padding, padding), (0, 0)))
    out = b
    for k in range(K):
        out = out + jnp.einsum("btc,cd->btd",
                               xp[:, k * dilation: k * dilation + T_out, :], w[k])
    return jnp.tanh(out) if tanh else out


def _ref_convT(x, wt, b, s, p):
    B, T, Ci = x.shape
    K = wt.shape[2]
    xz = jnp.zeros((B, (T - 1) * s + 1, Ci), x.dtype).at[:, ::s, :].set(x)
    wf = jnp.transpose(wt[:, :, ::-1], (2, 0, 1))        # flipped, (K, Ci, Co)
    return _ref_conv1d(xz, wf, b, 1, K - 1 - p)


def _selftest():
    ks = jax.random.split(jax.random.PRNGKey(42), 10)
    B, T, C = 2, 1200, 32                       # multi-tile + ragged last tile
    x = jax.random.normal(ks[0], (B, T, C), jnp.float32)

    # 1) fused lrelu + K=7 conv + tanh
    w, b = _conv_params(ks[1], C, C, 7)
    got = conv1d(x, w, b, lrelu_slope=LRELU_SLOPE, tanh=True, out_dtype=jnp.float32)
    ref = _ref_conv1d(x, w.astype(jnp.float32), b, 1, 3, slope=LRELU_SLOPE, tanh=True)
    assert got.shape == ref.shape and float(jnp.max(jnp.abs(got - ref))) < 0.15

    # 2) fused residual unit (dilation 9)
    w1, b1 = _conv_params(ks[2], C, C, 3)
    w2, b2 = _conv_params(ks[3], C, C, 3)
    got = res_unit(x, w1, b1, 9, w2, b2).astype(jnp.float32)
    ref = x + _ref_conv1d(
        _ref_conv1d(x, w1.astype(jnp.float32), b1, 9, 9, slope=INNER_SLOPE),
        w2.astype(jnp.float32), b2, 1, 1, slope=INNER_SLOPE)
    assert got.shape == ref.shape and float(jnp.max(jnp.abs(got - ref))) < 0.15

    # 3) polyphase ConvTranspose1d vs zero-insertion reference
    Ci, Co, K, s = 32, 16, 16, 8
    xt = jax.random.normal(ks[4], (B, 40, Ci), jnp.float32)
    wt = jax.random.normal(ks[5], (Ci, Co, K), jnp.float32) / jnp.sqrt(float(Ci * K))
    bt = jax.random.normal(ks[6], (Co,), jnp.float32) * 0.01
    wp = convT_to_polyphase(wt, s, s // 2).astype(jnp.bfloat16)
    got = conv1d(xt, wp, jnp.tile(bt, s), lrelu_slope=LRELU_SLOPE,
                 out_dtype=jnp.float32).reshape(B, 40 * s, Co)
    ref = _ref_convT(jnp.where(xt >= 0, xt, xt * LRELU_SLOPE), wt, bt, s, s // 2)
    assert got.shape == ref.shape and float(jnp.max(jnp.abs(got - ref))) < 0.15

    # 4) fused uv-mix + K=7 conv
    ev = jax.random.normal(ks[7], (B, T, C), jnp.float32)
    uv = jax.random.bernoulli(ks[8], 0.5, (B, T)).astype(jnp.float32)
    wz, bz = _conv_params(ks[9], C, C, 7)
    got = conv1d(x, wz, bz, mix=(ev, uv), out_dtype=jnp.float32)
    zf = x * uv[:, :, None] + ev * (1.0 - uv[:, :, None])
    ref = _ref_conv1d(zf, wz.astype(jnp.float32), bz, 1, 3)
    assert got.shape == ref.shape and float(jnp.max(jnp.abs(got - ref))) < 0.15


# ----------------------------------------------------------------------------
if __name__ == "__main__":
    _selftest()

    key = jax.random.PRNGKey(0)
    B, n_mel, T = 2, 80, 8
    UP = 8 * 8 * 2 * 2                   # total upsampling factor = 256
    L_out = T * UP

    kparams, kdata = jax.random.split(key)
    params = make_params(kparams, n_mel)

    k1, k2, k3 = jax.random.split(kdata, 3)
    x_c = jax.random.normal(k1, (B, n_mel, T), jnp.float32)   # PyTorch NCL
    x_v = jax.random.normal(k2, (B, n_mel, T), jnp.float32)
    uv_ex = jax.random.bernoulli(k3, 0.5, (B, L_out)).astype(jnp.float32)
    y_tmpl_c = jnp.zeros((B, 1, L_out), jnp.float32)          # unused by forward
    y_tmpl_v = jnp.zeros((B, 1, L_out), jnp.float32)          # unused by forward

    out = split_forward(x_c, x_v, y_tmpl_c, y_tmpl_v, uv_ex, params)
    out = jax.block_until_ready(out)

    assert out.shape == (B, 1, L_out), out.shape
    assert bool(jnp.all(jnp.isfinite(out)))
    assert bool(jnp.all(jnp.abs(out) <= 1.0))                 # tanh output range
    print("KERNEL_OK")
</pallas_src>

<mosaic_0001>
module attributes {stable_mosaic.version = 11 : i64} {
  func.func @_conv_kernel(%arg0: i32, %arg1: i32, %arg2: memref<1x16x32xbf16, #tpu.memory_space<vmem>>, %arg3: memref<1x1024x32xbf16, #tpu.memory_space<vmem>>, %arg4: memref<1x16x32xbf16, #tpu.memory_space<vmem>>, %arg5: memref<224x32xbf16, #tpu.memory_space<vmem>>, %arg6: memref<1x32xf32, #tpu.memory_space<vmem>>, %arg7: memref<1x1024x32xf32, #tpu.memory_space<vmem>>) attributes {dimension_semantics = [#tpu.dimension_semantics<parallel>, #tpu.dimension_semantics<parallel>], iteration_bounds = array<i64: 2, 2>, scalar_prefetch = 0 : i64, scratch_operands = 0 : i64, tpu.core_type = #tpu.core_type<tc>, window_params = [{transform_indices = @transform_0, window_bounds = array<i64: 1, 16, 32>}, {transform_indices = @transform_1, window_bounds = array<i64: 1, 1024, 32>}, {transform_indices = @transform_2, window_bounds = array<i64: 1, 16, 32>}, {pipeline_mode = #tpu.pipeline_mode<synchronous>, transform_indices = @transform_3, window_bounds = array<i64: 224, 32>}, {pipeline_mode = #tpu.pipeline_mode<synchronous>, transform_indices = @transform_4, window_bounds = array<i64: 1, 32>}, {transform_indices = @transform_5, window_bounds = array<i64: 1, 1024, 32>}]} {
    %c0 = arith.constant 0 : index
    %c13 = arith.constant 13 : index
    %c0_0 = arith.constant 0 : index
    %0 = vector.load %arg2[%c0, %c13, %c0_0] : memref<1x16x32xbf16, #tpu.memory_space<vmem>>, vector<1x3x32xbf16>
    %1 = vector.shape_cast %0 : vector<1x3x32xbf16> to vector<3x32xbf16>
    %c0_1 = arith.constant 0 : index
    %c0_2 = arith.constant 0 : index
    %c0_3 = arith.constant 0 : index
    %2 = vector.load %arg3[%c0_1, %c0_2, %c0_3] : memref<1x1024x32xbf16, #tpu.memory_space<vmem>>, vector<1x1024x32xbf16>
    %3 = vector.shape_cast %2 : vector<1x1024x32xbf16> to vector<1024x32xbf16>
    %c0_4 = arith.constant 0 : index
    %c0_5 = arith.constant 0 : index
    %c0_6 = arith.constant 0 : index
    %4 = vector.load %arg4[%c0_4, %c0_5, %c0_6] : memref<1x16x32xbf16, #tpu.memory_space<vmem>>, vector<1x3x32xbf16>
    %5 = vector.shape_cast %4 : vector<1x3x32xbf16> to vector<3x32xbf16>
    %6 = tpu.concatenate %1, %3, %5 in 0 : vector<3x32xbf16>, vector<1024x32xbf16>, vector<3x32xbf16> -> vector<1030x32xbf16>
    %cst = arith.constant 0.000000e+00 : bf16
    %7 = vector.broadcast %cst : bf16 to vector<1030x32xbf16>
    %8 = arith.cmpf oge, %6, %7 : vector<1030x32xbf16>
    %cst_7 = arith.constant 1.000980e-01 : bf16
    %9 = vector.broadcast %cst_7 : bf16 to vector<1030x32xbf16>
    %10 = arith.mulf %6, %9 : vector<1030x32xbf16>
    %11 = arith.select %8, %6, %10 : vector<1030x32xi1>, vector<1030x32xbf16>
    %c1024_i32 = arith.constant 1024 : i32
    %12 = arith.muli %arg1, %c1024_i32 : i32
    %c3_i32 = arith.constant 3 : i32
    %13 = arith.subi %12, %c3_i32 : i32
    %14 = tpu.iota {dimensions = array<i32: 0>} : vector<1030x1xi32>
    %15 = vector.broadcast %13 : i32 to vector<1030x1xi32>
    %16 = arith.addi %15, %14 : vector<1030x1xi32>
    %c0_i32 = arith.constant 0 : i32
    %17 = vector.broadcast %c0_i32 : i32 to vector<1030x1xi32>
    %18 = arith.cmpi sge, %16, %17 : vector<1030x1xi32>
    %c1200_i32 = arith.constant 1200 : i32
    %19 = vector.broadcast %c1200_i32 : i32 to vector<1030x1xi32>
    %20 = arith.cmpi slt, %16, %19 : vector<1030x1xi32>
    %21 = arith.andi %18, %20 : vector<1030x1xi1>
    %c0_i32_8 = arith.constant 0 : i32
    %22 = arith.sitofp %c0_i32_8 : i32 to bf16
    %23 = vector.shape_cast %21 : vector<1030x1xi1> to vector<1030x1xi1>
    %24 = vector.broadcast %23 : vector<1030x1xi1> to vector<1030x32xi1>
    %25 = vector.broadcast %22 : bf16 to vector<1030x32xbf16>
    %26 = arith.select %24, %11, %25 : vector<1030x32xi1>, vector<1030x32xbf16>
    %27 = vector.extract_strided_slice %26 {offsets = [0, 0], sizes = [1024, 32], strides = [1, 1]} : vector<1030x32xbf16> to vector<1024x32xbf16>
    %28 = vector.extract_strided_slice %26 {offsets = [1, 0], sizes = [1024, 32], strides = [1, 1]} : vector<1030x32xbf16> to vector<1024x32xbf16>
    %29 = vector.extract_strided_slice %26 {offsets = [2, 0], sizes = [1024, 32], strides = [1, 1]} : vector<1030x32xbf16> to vector<1024x32xbf16>
    %30 = vector.extract_strided_slice %26 {offsets = [3, 0], sizes = [1024, 32], strides = [1, 1]} : vector<1030x32xbf16> to vector<1024x32xbf16>
    %31 = vector.extract_strided_slice %26 {offsets = [4, 0], sizes = [1024, 32], strides = [1, 1]} : vector<1030x32xbf16> to vector<1024x32xbf16>
    %32 = vector.extract_strided_slice %26 {offsets = [5, 0], sizes = [1024, 32], strides = [1, 1]} : vector<1030x32xbf16> to vector<1024x32xbf16>
    %33 = vector.extract_strided_slice %26 {offsets = [6, 0], sizes = [1024, 32], strides = [1, 1]} : vector<1030x32xbf16> to vector<1024x32xbf16>
    %34 = tpu.concatenate %27, %28, %29, %30, %31, %32, %33 in 1 : vector<1024x32xbf16>, vector<1024x32xbf16>, vector<1024x32xbf16>, vector<1024x32xbf16>, vector<1024x32xbf16>, vector<1024x32xbf16>, vector<1024x32xbf16> -> vector<1024x224xbf16>
    %c0_9 = arith.constant 0 : index
    %c0_10 = arith.constant 0 : index
    %35 = vector.load %arg5[%c0_9, %c0_10] : memref<224x32xbf16, #tpu.memory_space<vmem>>, vector<224x32xbf16>
    %cst_11 = arith.constant dense<0.000000e+00> : vector<1024x32xf32>
    %36 = tpu.matmul %34, %35, %cst_11 {dimension_numbers = #tpu.dot_dimension_numbers<[1], [0], [0], [1], [0, 0, 1, 1], [], []>} : vector<1024x224xbf16>, vector<224x32xbf16>, vector<1024x32xf32> -> vector<1024x32xf32>
    %c0_12 = arith.constant 0 : index
    %c0_13 = arith.constant 0 : index
    %37 = vector.load %arg6[%c0_12, %c0_13] : memref<1x32xf32, #tpu.memory_space<vmem>>, vector<1x32xf32>
    %38 = vector.broadcast %37 : vector<1x32xf32> to vector<1024x32xf32>
    %39 = arith.addf %36, %38 : vector<1024x32xf32>
    %40 = math.tanh %39 : vector<1024x32xf32>
    %c0_14 = arith.constant 0 : index
    %c0_15 = arith.constant 0 : index
    %c0_16 = arith.constant 0 : index
    %41 = vector.load %arg7[%c0_14, %c0_15, %c0_16] : memref<1x1024x32xf32, #tpu.memory_space<vmem>>, vector<1x1024x32xf32>
    %42 = vector.shape_cast %41 : vector<1x1024x32xf32> to vector<1024x32xf32>
    %43 = vector.shape_cast %40 : vector<1024x32xf32> to vector<1x1024x32xf32>
    tpu.vector_store %arg7[%c0_14, %c0_15, %c0_16], %43 {strides = array<i32>} : memref<1x1024x32xf32, #tpu.memory_space<vmem>>, vector<1x1024x32xf32>,
    return
  }
  func.func @transform_0(%arg0: i32, %arg1: i32) -> (i32, i32, i32) {
    %c64_i32 = arith.constant 64 : i32
    %0 = arith.muli %arg1, %c64_i32 : i32
    %c1_i32 = arith.constant 1 : i32
    %1 = arith.subi %0, %c1_i32 : i32
    %c0_i32 = arith.constant 0 : i32
    %2 = arith.maxsi %1, %c0_i32 : i32
    %c0_i32_0 = arith.constant 0 : i32
    %c0_i32_1 = arith.constant 0 : i32
    return %arg0, %2, %c0_i32_0 : i32, i32, i32
  }
  func.func @transform_1(%arg0: i32, %arg1: i32) -> (i32, i32, i32) {
    %c0_i32 = arith.constant 0 : i32
    %c0_i32_0 = arith.constant 0 : i32
    return %arg0, %arg1, %c0_i32 : i32, i32, i32
  }
  func.func @transform_2(%arg0: i32, %arg1: i32) -> (i32, i32, i32) {
    %c1_i32 = arith.constant 1 : i32
    %0 = arith.addi %arg1, %c1_i32 : i32
    %c64_i32 = arith.constant 64 : i32
    %1 = arith.muli %0, %c64_i32 : i32
    %c74_i32 = arith.constant 74 : i32
    %2 = arith.minsi %1, %c74_i32 : i32
    %c0_i32 = arith.constant 0 : i32
    %c0_i32_0 = arith.constant 0 : i32
    return %arg0, %2, %c0_i32 : i32, i32, i32
  }
  func.func @transform_3(%arg0: i32, %arg1: i32) -> (i32, i32) {
    %c0_i32 = arith.constant 0 : i32
    %c0_i32_0 = arith.constant 0 : i32
    %c0_i32_1 = arith.constant 0 : i32
    return %c0_i32, %c0_i32_0 : i32, i32
  }
  func.func @transform_4(%arg0: i32, %arg1: i32) -> (i32, i32) {
    %c0_i32 = arith.constant 0 : i32
    %c0_i32_0 = arith.constant 0 : i32
    %c0_i32_1 = arith.constant 0 : i32
    return %c0_i32, %c0_i32_0 : i32, i32
  }
  func.func @transform_5(%arg0: i32, %arg1: i32) -> (i32, i32, i32) {
    %c0_i32 = arith.constant 0 : i32
    %c0_i32_0 = arith.constant 0 : i32
    return %arg0, %arg1, %c0_i32 : i32, i32, i32
  }
}

</mosaic_0001>

<bundles_post_ra>
// kernel: tpu_custom_call.1
= control target key start
LH: loop header
LB: loop body
LE: loop exit
PB: predicated region body
PF: predicated region fallthrough
CT: control target
= control target key end

     0   :  { %s8593_s18 = smov 0   ;;  %s8595_s19 = smov 0   ;;  %s14646_s0 = inlined_call_operand.vmem [shape: bf16[2,1200,32], index: 0, kind: input, shape index: {}]   ;;  %s14647_s1 = inlined_call_operand.vmem [shape: bf16[2,1200,32], index: 1, kind: input, shape index: {}]   ;;  %s14648_s2 = inlined_call_operand.vmem [shape: bf16[2,1200,32], index: 2, kind: input, shape index: {}]   ;;  %s14649_s3 = inlined_call_operand.vmem [shape: bf16[224,32], index: 3, kind: input, shape index: {}]   ;;  %s14650_s4 = inlined_call_operand.vmem [shape: f32[1,32], index: 4, kind: input, shape index: {}]   ;;  %s14651_s5 = inlined_call_operand.vmem [shape: f32[2,1200,32], index: 5, kind: output, shape index: {}]  }
   0x1   :  { %s8597_s20 = smov 0   ;;  %s8599_s21 = smov 0  }
   0x2   :  { %s8601_s22 = smov 0   ;;  %s8603_s23 = smov 0  }
   0x3   :  { %s8605_s24 = smov 0  }
   0x4 LB: > { %s24_s25 = sadd.s32 1, %s8517_s22  ;;  %s27_s26 = sadd.s32 1, %s8521_s23  ;;  %s8525_s24 = sphi %s8605_s24, %s15_s24   ;;  %s8521_s23 = sphi %s8603_s23, %s15686_s23   ;;  %s8517_s22 = sphi %s8601_s22, %s15685_s22   ;;  %s8513_s21 = sphi %s8599_s21, %s15684_s21   ;;  %s8509_s20 = sphi %s8597_s20, %s15683_s20   ;;  %s8505_s19 = sphi %s8595_s19, %s15682_s19   ;;  %s8501_s18 = sphi %s8593_s18, %s15681_s18  }
   0x5   : > { %p25_p0 = scmp.ge.s32.totalorder %s24_s25, 2  ;;  %s7688_s27 = sadd.s32 4294967295, %s8525_s24  }
   0x6   : > { %p188_p1 = scmp.ne.s32.totalorder %s8505_s19, %s8501_s18  ;;  %p189_p2 = scmp.eq.s32.totalorder %s7688_s27, 3 }
   0x7   : > { %s15688_s25 = smov (%p25_p0, %s24_s25), 0  ;;  %s15690_s26 = smov (!%p25_p0, %s27_s26), %s8521_s23 }
   0x8   : > { %s174_s28 = ssub.s32 %s8517_s22, %s15688_s25  ;;  %p29_p3 = scmp.ge.s32.totalorder %s15690_s26, 2 }
   0x9   : > { %p7698_p4 = scmp.ge.s32.totalorder %s8525_s24, 1  ;;  %p8639_p5 = por %p189_p2, %p188_p1 }
   0xa   : > { %p282_p6 = scmp.lt.s32.totalorder %s8525_s24, 5  ;;  %s15692_s26 = smov (%p29_p3, %s15690_s26), 0 }
   0xb   : > { %s173_s30 = ssub.s32 %s8521_s23, %s15692_s26  ;;  %s178_s7 = sadd.s32 1, %s8505_s19 }
   0xc   : > { %p283_p7 = pnand %p7698_p4, %p282_p6  ;;  %s175_s6 = sor.u32 %s174_s28, %s173_s30 }
   0xd   : > { %p176_p8 = scmp.eq.s32.totalorder %s175_s6, 0 }
   0xe   : > { %286 = sbr.rel (%p283_p7) target bundleno = 1357 (0x54d), region = 40 }
   0xf   : > { %s8650_s8 = scalar_select %p176_p8, %s8505_s19, %s178_s7  }
  0x13   : > { %p348_p9 = scmp.lt.s32.totalorder %s8513_s21, 1  ;;  %s8654_s9 = sshll.u32 %s8509_s20, 7  ;;  %v1722_v0 = vlaneseq  ;;  %v14655_v1 = vmov 0   ;;  %vm868_vm0 = vsmask.f32 1280 }
  0x14   : > { %p368_p10 = scmp.lt.s32.totalorder %s8654_s9, 149  ;;  %s7775_s10 = sshll.u32 %s8509_s20, 10  ;;  %6361 = vmatprep.subr.bf16.mxu0 %v14655_v1  ;;  %7946 = vmatprep.subr.bf16.mxu1 %v14655_v1 }
  0x15   : > { %s349_s11 = scalar_select %p348_p9, %s8513_s21, 1  ;;  %v8661_v2 = vshrl.u32 %v1722_v0, 7 }
  0x16   : > { %s369_s12 = scalar_select %p368_p10, %s8654_s9, 149 }
  0x17   : > { %14988 = vst [vmem:[#allocation3_spill] sm:$0xff] %v8661_v2  ;;  %s8664_s13 = smul.u32 150, %s349_s11  ;;  %s7776_s14 = sadd.s32 4294967293, %s7775_s10  ;;  %v1727_v3 = vadd.s32 32, %v8661_v2  ;;  %v1728_v4 = vadd.s32 40, %v8661_v2  ;;  %v1729_v5 = vadd.s32 48, %v8661_v2 }
  0x18   : > { %v1730_v6 = vadd.s32 56, %v8661_v2  ;;  %v8670_v7 = vstv %s7776_s14  ;;  %v1725_v8 = vadd.s32 16, %v8661_v2  ;;  %v1726_v9 = vadd.s32 24, %v8661_v2  ;;  %s7700_s30 = sshll.u32 %s8509_s20, 6  ;;  %s8560_s7 = smov 32  }
  0x19   : > { %14989 = vst [vmem:[#allocation4_spill] sm:$0xff] %v8670_v7  ;;  %s371_s15 = sadd.s32 %s8664_s13, %s369_s12  ;;  %v1857_v10 = vadd.s32 %v8670_v7, %v1727_v3  ;;  %v1858_v11 = vadd.s32 %v8670_v7, %v1728_v4  ;;  %v1859_v12 = vadd.s32 %v8670_v7, %v1729_v5  ;;  %v1731_v15 = vadd.s32 64, %v8661_v2  ;;  %s8791_s6 = sadd.s32 4294967295, %s7700_s30 }
  0x1a   : > { %v1860_v13 = vadd.s32 %v8670_v7, %v1730_v6  ;;  %s7705_s16 = sshll.u32 %s371_s15, 2  ;;  %v8680_v14 = vadd.s32 %v8670_v7, %v1725_v8  ;;  %v1732_v16 = vadd.s32 72, %v8661_v2  ;;  %v1856_v17 = vadd.s32 %v8670_v7, %v1726_v9  ;;  %p345_p11 = scmp.gt.s32.totalorder %s8791_s6, 0 }
  0x1b   : > { %s8687_s28 = scalar_lea.vmem %s14647_s1, %s7705_s16  ;;  %vm1986_vm1 = vcmp.ge.s32.totalorder %v1857_v10, 0  ;;  %vm1987_vm2 = vcmp.ge.s32.totalorder %v1858_v11, 0  ;;  %vm1988_vm3 = vcmp.ge.s32.totalorder %v1859_v12, 0  ;;  %vm2115_vm5 = vcmp.lt.s32.totalorder %v1857_v10, 1200  ;;  %s340_s15 = sand.u32 1, %s8501_s18  }
  0x1c   : > { %vm1989_vm4 = vcmp.ge.s32.totalorder %v1860_v13, 0  ;;  %v8100_v18 = vld [vmem:[%s8687_s28 + $0x8] sm:$0xff]   ;;  %v8101_v19 = vld [vmem:[%s8687_s28 + $0x10] sm:$0xff]   ;;  %v8102_v20 = vld [vmem:[%s8687_s28 + $0x18] sm:$0xff]   ;;  %vm2116_vm6 = vcmp.lt.s32.totalorder %v1858_v11, 1200  ;;  %vm2117_vm7 = vcmp.lt.s32.totalorder %v1859_v12, 1200  ;;  %v8694_v21 = vadd.s32 %v8670_v7, %v1731_v15 }
  0x1d   : > { %vm2118_vm8 = vcmp.lt.s32.totalorder %v1860_v13, 1200  ;;  %vm8696_vm9 = vmand %vm1986_vm1, %vm2115_vm5  ;;  %vm1984_vm10 = vcmp.ge.s32.totalorder %v8680_v14, 0  ;;  %v8702_v23 = vadd.s32 %v8670_v7, %v1732_v16  ;;  %v8706_v24 = vadd.s32 %v8670_v7, %v8661_v2  ;;  %v8103_v30 = vld [vmem:[%s8687_s28] sm:$0xff]   ;;  %v8105_v15 = vld [vmem:[%s8687_s28 + $0x28] sm:$0xff]   ;;  %s15694_s6 = smov (!%p345_p11, %s8791_s6), 0  ;;  %s7699_s18 = sshll.u32 %s340_s15, 10 }
  0x1e   : > { %v878_v25 = vshrl.u32 %v8100_v18, 16  ;;  %v881_v26 = vshll.u32 %v8100_v18, 16  ;;  %v887_v27 = vshrl.u32 %v8101_v19, 16  ;;  %v890_v28 = vshll.u32 %v8101_v19, 16  ;;  %vm8709_vm11 = vmand %vm1987_vm2, %vm2116_vm6  ;;  %v8715_v31 = vld [vmem:[%s8687_s28 + $0x20] sm:$0xff]   ;;  %s7702_s10 = sshll.u32 %s15694_s6, 1 }
  0x1f   : > { %v896_v32 = vshrl.u32 %v8102_v20, 16  ;;  %v899_v33 = vshll.u32 %v8102_v20, 16  ;;  %vm8719_vm12 = vmand %vm1988_vm3, %vm2117_vm7  ;;  %vm1985_vm13 = vcmp.ge.s32.totalorder %v1856_v17, 0  ;;  %vm2113_vm14 = vcmp.lt.s32.totalorder %v8680_v14, 1200  ;;  %p350_p12 = scmp.lt.s32.totalorder %s7702_s10, 149  ;;  %v8110_v29 = vld [vmem:[%s8687_s28 + $0x50] sm:$0xff]  }
  0x20   : > { %v880_v35 = vrot.slane %v878_v25, 6  ;;  %v883_v36 = vrot.slane %v881_v26, 7  ;;  %v889_v37 = vrot.slane %v887_v27, 6  ;;  %v892_v38 = vrot.slane %v890_v28, 7  ;;  %vm8726_vm15 = vmand %vm1989_vm4, %vm2118_vm8  ;;  %v8106_v27 = vld [vmem:[%s8687_s28 + $0x30] sm:$0xff]   ;;  %s7943_s17 = sadd.s32 64, %s7700_s30 }
  0x21   : > { %v898_v40 = vrot.slane %v896_v32, 6  ;;  %v901_v41 = vrot.slane %v899_v33, 7  ;;  %vm2631_vm1 = vmpackc.low %vm8696_vm9, %vm8696_vm9  ;;  %v870_v42 = vshrl.u32 %v8103_v30, 16  ;;  %v873_v43 = vshll.u32 %v8103_v30, 16  ;;  %s15696_s10 = smov (!%p350_p12, %s7702_s10), 149  ;;  %p381_p13 = scmp.lt.s32.totalorder %s7943_s17, 74 }
  0x22   : > { %v884_v44 = vor.u32 %v883_v36, %v880_v35  ;;  %v893_v45 = vor.u32 %v892_v38, %v889_v37  ;;  %vm2632_vm2 = vmpackc.low %vm8709_vm11, %vm8709_vm11  ;;  %v2760_v46 = vsel %vm2631_vm1, 65537, %v14655_v1  ;;  %vm2114_vm3 = vcmp.lt.s32.totalorder %v1856_v17, 1200  ;;  %s353_s11 = sadd.s32 %s8664_s13, %s15696_s10  ;;  %s8561_s10 = smov 64  }
  0x23   : > { %v8737_v47 = vor.u32 %v901_v41, %v898_v40  ;;  %vm2633_vm4 = vmpackc.low %vm8719_vm12, %vm8719_vm12  ;;  %v2761_v48 = vsel %vm2632_vm2, 65537, %v14655_v1  ;;  %v872_v49 = vrot.slane %v870_v42, 6  ;;  %v875_v50 = vrot.slane %v873_v43, 7  ;;  %s8910_s12 = sshll.u32 %s353_s11, 2  ;;  %s8562_s11 = smov 96  }
  0x24   : > { %v894_v51 = vsel %vm868_vm0, %v884_v44, %v893_v45  ;;  %vm2634_vm5 = vmpackc.low %vm8726_vm15, %vm8726_vm15  ;;  %v2762_v52 = vsel %vm2633_vm4, 65537, %v14655_v1  ;;  %v7779_v53 = vcombine.low %v2760_v46, %v2761_v48  ;;  %vm14975_vm6 = vsmask.f32 7424  ;;  %s355_s16 = scalar_lea.vmem %s14646_s0, %s8910_s12  ;;  %s15698_s17 = smov (!%p381_p13, %s7943_s17), 74 }
  0x25   : > { %v905_v54 = vshrl.u32 %v8715_v31, 16  ;;  %v903_v55 = vsel %vm868_vm0, %v893_v45, %v8737_v47  ;;  %vm1527_vm7 = vcmp.ge.bf16.partialorder %v894_v51, 0  ;;  %v1592_v56 = vmul.bf16 1036860877, %v894_v51  ;;  %vm8756_vm8 = vmand %vm1984_vm10, %vm2113_vm14  ;;  %s7707_s20 = sshll.u32 %s15698_s17, 1 }
  0x26   : > { %v2763_v57 = vsel %vm2634_vm5, 65537, %v14655_v1  ;;  %vm1528_vm9 = vcmp.ge.bf16.partialorder %v903_v55, 0  ;;  %v1593_v59 = vmul.bf16 1036860877, %v903_v55  ;;  %vm3081_vm11 = vcmp.ne.s16.totalorder %v7779_v53, 0  ;;  %vm8762_vm12 = vmand %vm1985_vm13, %vm2114_vm3  ;;  %p386_p0 = scmp.lt.s32.totalorder %s7707_s20, 149 }
  0x27   : > { %v7780_v60 = vcombine.low %v2762_v52, %v2763_v57  ;;  %v1657_v62 = vsel %vm1527_vm7, %v894_v51, %v1592_v56  ;;  %v8767_v63 = vor.u32 %v875_v50, %v872_v49  ;;  %vm2629_vm10 = vmpackc.low %vm8756_vm8, %vm8756_vm8  ;;  %v907_v0 = vrot.slane %v905_v54, 6  ;;  %v8107_v57 = vld [vmem:[%s8687_s28 + $0x38] sm:$0xff]  }
  0x28   : > { %v908_v3 = vshll.u32 %v8715_v31, 16  ;;  %v1658_v4 = vsel %vm1528_vm9, %v903_v55, %v1593_v59  ;;  %v8773_v5 = vsel %vm3081_vm11, %v1657_v62, 0  ;;  %vm2630_vm13 = vmpackc.low %vm8762_vm12, %vm8762_vm12  ;;  %v2758_v6 = vsel %vm2629_vm10, 65537, %v14655_v1  ;;  %s15700_s20 = smov (!%p386_p0, %s7707_s20), 149 }
  0x29   : > { %vm3082_vm14 = vcmp.ne.s16.totalorder %v7780_v60, 0  ;;  %v8782_v9 = vshll.u32 %v8773_v5, 16  ;;  %v8785_v10 = vshrl.u32 %v8773_v5, 16  ;;  %v885_v11 = vsel %vm868_vm0, %v8767_v63, %v884_v44  ;;  %s389_s30 = sadd.s32 %s8664_s13, %s15700_s20 }
  0x2a   : > { %v8779_v8 = vsel %vm3082_vm14, %v1658_v4, 0  ;;  %vm1526_vm15 = vcmp.ge.bf16.partialorder %v885_v11, 0  ;;  %v1591_v13 = vmul.bf16 1036860877, %v885_v11  ;;  %v2759_v14 = vsel %vm2630_vm13, 65537, %v14655_v1  ;;  %s12731_s27 = sshll.u32 %s389_s30, 2 }
  0x2b   : > { %v8794_v12 = vshll.u32 %v8779_v8, 16  ;;  %v3228_v16 = vrot.slane %v8782_v9, 1  ;;  %v7778_v17 = vcombine.low %v2758_v6, %v2759_v14  ;;  %v910_v18 = vrot.slane %v908_v3, 7  ;;  %v8872_v6 = vld [vmem:[%s8687_s28 + $0x40] sm:$0xff]   ;;  %s391_s12 = scalar_lea.vmem %s14648_s2, %s12731_s27  ;;  %s7975_s30 = smul.u32 (%p8639_p5), 150, %s8513_s21 }
  0x2c   : > { %vm1990_vm1 = vcmp.ge.s32.totalorder %v8694_v21, 0  ;;  %v1656_v20 = vsel %vm1526_vm15, %v885_v11, %v1591_v13  ;;  %vm1991_vm2 = vcmp.ge.s32.totalorder %v8702_v23, 0  ;;  %vm2119_vm3 = vcmp.lt.s32.totalorder %v8694_v21, 1200 }
  0x2d   : > { %v3236_v19 = vrot.slane %v8794_v12, 1  ;;  %v3232_v22 = vor.u32 %v8785_v10, %v3228_v16  ;;  %vm3080_vm4 = vcmp.ne.s16.totalorder %v7778_v17, 0  ;;  %v911_v25 = vor.u32 %v910_v18, %v907_v0  ;;  %vm8806_vm7 = vmand %vm1990_vm1, %vm2119_vm3  ;;  %s7176_s27 = sadd.s32 (%p8639_p5), %s7975_s30, %s8654_s9 }
  0x2e   : > { %vm2120_vm5 = vcmp.lt.s32.totalorder %v8702_v23, 1200  ;;  %v8811_v28 = vsel %vm3080_vm4, %v1656_v20, 0  ;;  %v8818_v21 = vshrl.u32 %v8779_v8, 16  ;;  %v914_v30 = vshrl.u32 %v8105_v15, 16  ;;  %vm2635_vm9 = vmpackc.low %vm8806_vm7, %vm8806_vm7  ;;  %s7925_s13 = sshll.u32 (%p8639_p5), %s7176_s27, 3 }
  0x2f   : > { %vm8813_vm8 = vmand %vm1991_vm2, %vm2120_vm5  ;;  %v917_v31 = vshll.u32 %v8105_v15, 16  ;;  %v3237_v32 = vsel %vm14975_vm6, %v3232_v22, %v3236_v19  ;;  %v8822_v23 = vshll.u32 %v8811_v28, 16  ;;  %v8825_v33 = vshrl.u32 %v8811_v28, 16  ;;  %s14439_s15 = scalar_lea.vmem (%p8639_p5), %s14651_s5, %s7925_s13  }
  0x30   : > { %v912_v34 = vsel %vm868_vm0, %v8737_v47, %v911_v25  ;;  %3730 = vrot.lane.b32.xlu1 %v3237_v32, %s8560_s7  ;;  %vm2636_vm12 = vmpackc.low %vm8813_vm8, %vm8813_vm8  ;;  %v2764_v36 = vsel %vm2635_vm9, 65537, %v14655_v1  ;;  %v3240_v37 = vor.u32 %v8818_v21, %v3236_v19  ;;  %v916_v40 = vrot.slane %v914_v30, 6 }
  0x31   : > { %vm1529_vm11 = vcmp.ge.bf16.partialorder %v912_v34, 0  ;;  %v1594_v35 = vmul.bf16 1036860877, %v912_v34  ;;  %v14652_v38 = vrot.slane %v8822_v23, 1  ;;  %v2765_v39 = vsel %vm2636_vm12, 65537, %v14655_v1 }
  0x32   : > { %v919_v41 = vrot.slane %v917_v31, 7  ;;  %v7781_v43 = vcombine.low %v2764_v36, %v2765_v39  ;;  %v1733_v44 = vadd.s32 80, %v8661_v2  ;;  %v1734_v45 = vadd.s32 88, %v8661_v2 }
  0x33   : > { %v1659_v42 = vsel %vm1529_vm11, %v912_v34, %v1594_v35  ;;  %v3224_v46 = vor.u32 %v8825_v33, %v14652_v38  ;;  %v923_v48 = vshrl.u32 %v8106_v27, 16  ;;  %v926_v49 = vshll.u32 %v8106_v27, 16 }
  0x34   : > { %v920_v47 = vor.u32 %v919_v41, %v916_v40  ;;  %vm3083_vm10 = vcmp.ne.s16.totalorder %v7781_v43, 0  ;;  %v1863_v50 = vadd.s32 %v8670_v7, %v1733_v44  ;;  %v1864_v51 = vadd.s32 %v8670_v7, %v1734_v45 }
  0x35   : > { %v1735_v52 = vadd.s32 96, %v8661_v2  ;;  %v3229_v53 = vsel %vm14975_vm6, %v3224_v46, %v3228_v16  ;;  %v8854_v54 = vsel %vm3083_vm10, %v1659_v42, 0  ;;  %v925_v56 = vrot.slane %v923_v48, 6 }
  0x36   : > { %v921_v55 = vsel %vm868_vm0, %v911_v25, %v920_v47  ;;  %3728 = vrot.lane.b32.xlu0 %v3229_v53, %s8560_s7  ;;  %v8860_v58 = vshll.u32 %v8854_v54, 16  ;;  %vm1992_vm13 = vcmp.ge.s32.totalorder %v1863_v50, 0  ;;  %vm1993_vm15 = vcmp.ge.s32.totalorder %v1864_v51, 0 }
  0x37   : > { %vm1530_vm14 = vcmp.ge.bf16.partialorder %v921_v55, 0  ;;  %v1595_v59 = vmul.bf16 1036860877, %v921_v55  ;;  %vm2121_vm1 = vcmp.lt.s32.totalorder %v1863_v50, 1200  ;;  %vm2122_vm2 = vcmp.lt.s32.totalorder %v1864_v51, 1200  ;;  %v8109_v51 = vld [vmem:[%s8687_s28 + $0x48] sm:$0xff]  }
  0x38   : > { %v8863_v60 = vshrl.u32 %v8854_v54, 16  ;;  %v3244_v61 = vrot.slane %v8860_v58, 1  ;;  %vm8866_vm3 = vmand %vm1992_vm13, %vm2121_vm1  ;;  %v928_v3 = vrot.slane %v926_v49, 7  ;;  %v1736_v4 = vadd.s32 104, %v8661_v2 }
  0x39   : > { %v1660_v62 = vsel %vm1530_vm14, %v921_v55, %v1595_v59  ;;  %vm8875_vm4 = vmand %vm1993_vm15, %vm2122_vm2  ;;  %v1865_v13 = vadd.s32 %v8670_v7, %v1735_v52  ;;  %v932_v14 = vshrl.u32 %v8107_v57, 16  ;;  %v935_v15 = vshll.u32 %v8107_v57, 16 }
  0x3a   : > { %v1737_v16 = vadd.s32 112, %v8661_v2  ;;  %v3245_v17 = vsel %vm14975_vm6, %v3240_v37, %v3244_v61  ;;  %vm2637_vm5 = vmpackc.low %vm8866_vm3, %vm8866_vm3  ;;  %v3248_v18 = vor.u32 %v8863_v60, %v3244_v61  ;;  %v929_v19 = vor.u32 %v928_v3, %v925_v56 }
  0x3b   : > { %v1866_v20 = vadd.s32 %v8670_v7, %v1736_v4  ;;  %3732 = vrot.lane.b32.xlu1 %v3245_v17, %s8560_s7  ;;  %vm2638_vm7 = vmpackc.low %vm8875_vm4, %vm8875_vm4  ;;  %v2766_v22 = vsel %vm2637_vm5, 65537, %v14655_v1  ;;  %vm1994_vm8 = vcmp.ge.s32.totalorder %v1865_v13, 0  ;;  %vm2123_vm9 = vcmp.lt.s32.totalorder %v1865_v13, 1200 }
  0x3c   : > { %v934_v25 = vrot.slane %v932_v14, 6  ;;  %v2767_v26 = vsel %vm2638_vm7, 65537, %v14655_v1  ;;  %v930_v27 = vsel %vm868_vm0, %v920_v47, %v929_v19  ;;  %vm8894_vm10 = vmand %vm1994_vm8, %vm2123_vm9  ;;  %v937_v34 = vrot.slane %v935_v15, 7 }
  0x3d   : > { %vm1995_vm11 = vcmp.ge.s32.totalorder %v1866_v20, 0  ;;  %vm2124_vm12 = vcmp.lt.s32.totalorder %v1866_v20, 1200  ;;  %v7782_v30 = vcombine.low %v2766_v22, %v2767_v26  ;;  %vm1531_vm14 = vcmp.ge.bf16.partialorder %v930_v27, 0  ;;  %vm2639_vm15 = vmpackc.low %vm8894_vm10, %vm8894_vm10 }
  0x3e   : > { %v1596_v31 = vmul.bf16 1036860877, %v930_v27  ;;  %vm8898_vm13 = vmand %vm1995_vm11, %vm2124_vm12  ;;  %v1738_v35 = vadd.s32 120, %v8661_v2  ;;  %v1867_v36 = vadd.s32 %v8670_v7, %v1737_v16  ;;  %v941_v37 = vshrl.u32 %v8872_v6, 16 }
  0x3f   : > { %v944_v39 = vshll.u32 %v8872_v6, 16  ;;  %vm3084_vm1 = vcmp.ne.s16.totalorder %v7782_v30, 0  ;;  %vm2640_vm2 = vmpackc.low %vm8898_vm13, %vm8898_vm13  ;;  %v2768_v41 = vsel %vm2639_vm15, 65537, %v14655_v1  ;;  %v938_v42 = vor.u32 %v937_v34, %v934_v25 }
  0x40   : > { %v1661_v40 = vsel %vm1531_vm14, %v930_v27, %v1596_v31  ;;  %v8920_v43 = vsel %vm3084_vm1, %v1660_v62, 0  ;;  %v2769_v44 = vsel %vm2640_vm2, 65537, %v14655_v1  ;;  %v1868_v45 = vadd.s32 %v8670_v7, %v1738_v35 }
  0x41   : > { %15014 = vst [vmem:[#allocation5_spill] sm:$0xff] %v8920_v43  ;;  %vm1996_vm3 = vcmp.ge.s32.totalorder %v1867_v36, 0  ;;  %v8925_v46 = vshll.u32 %v8920_v43, 16  ;;  %v7783_v47 = vcombine.low %v2768_v41, %v2769_v44  ;;  %v8928_v48 = vshrl.u32 %v8920_v43, 16 }
  0x42   : > { %v939_v49 = vsel %vm868_vm0, %v929_v19, %v938_v42  ;;  %vm1997_vm5 = vcmp.ge.s32.totalorder %v1868_v45, 0  ;;  %vm2125_vm7 = vcmp.lt.s32.totalorder %v1867_v36, 1200  ;;  %vm2126_vm9 = vcmp.lt.s32.totalorder %v1868_v45, 1200 }
  0x43   : > { %vm1532_vm4 = vcmp.ge.bf16.partialorder %v939_v49, 0  ;;  %v1597_v50 = vmul.bf16 1036860877, %v939_v49  ;;  %v3252_v52 = vrot.slane %v8925_v46, 1  ;;  %vm3085_vm8 = vcmp.ne.s16.totalorder %v7783_v47, 0  ;;  %vm2254_vm11 = vmand %vm1996_vm3, %vm2125_vm7 }
  0x44   : > { %v943_v53 = vrot.slane %v941_v37, 6  ;;  %v8933_v55 = vsel %vm3085_vm8, %v1661_v40, 0  ;;  %vm8935_vm12 = vmand %vm1997_vm5, %vm2126_vm9  ;;  %v946_v59 = vrot.slane %v944_v39, 7  ;;  %v1739_v61 = vadd.s32 128, %v8661_v2 }
  0x45   : > { %15015 = vst [vmem:[#allocation6_spill] sm:$0xff] %v8933_v55  ;;  %v1662_v56 = vsel %vm1532_vm4, %v939_v49, %v1597_v50  ;;  %v3253_v62 = vsel %vm14975_vm6, %v3248_v18, %v3252_v52  ;;  %v3256_v0 = vor.u32 %v8928_v48, %v3252_v52  ;;  %v8943_v3 = vshll.u32 %v8933_v55, 16  ;;  %vm2641_vm10 = vmpackc.low %vm2254_vm11, %vm2254_vm11 }
  0x46   : > { %v8946_v4 = vshrl.u32 %v8933_v55, 16  ;;  %3734 = vrot.lane.b32.xlu0 %v3253_v62, %s8560_s7  ;;  %vm2642_vm14 = vmpackc.low %vm8935_vm12, %vm8935_vm12  ;;  %v2770_v6 = vsel %vm2641_vm10, 65537, %v14655_v1  ;;  %v947_v11 = vor.u32 %v946_v59, %v943_v53  ;;  %v1740_v13 = vadd.s32 136, %v8661_v2  ;;  %v8111_v59 = vld [vmem:[%s8687_s28 + $0x58] sm:$0xff]  }
  0x47   : > { %15018 = vst [vmem:[#allocation7_spill] sm:$0xff] %v8943_v3  ;;  %v1869_v14 = vadd.s32 %v8670_v7, %v1739_v61  ;;  %v3260_v15 = vrot.slane %v8943_v3, 1  ;;  %v2771_v16 = vsel %vm2642_vm14, 65537, %v14655_v1  ;;  %v950_v17 = vshrl.u32 %v8109_v51, 16 }
  0x48   : > { %15019 = vst [vmem:[#allocation8_spill] sm:$0xff] %v8946_v4  ;;  %v953_v18 = vshll.u32 %v8109_v51, 16  ;;  %v7784_v19 = vcombine.low %v2770_v6, %v2771_v16  ;;  %v948_v20 = vsel %vm868_vm0, %v938_v42, %v947_v11  ;;  %v1870_v22 = vadd.s32 %v8670_v7, %v1740_v13 }
  0x49   : > { %vm1998_vm13 = vcmp.ge.s32.totalorder %v1869_v14, 0  ;;  %v3261_v25 = vsel %vm14975_vm6, %v3256_v0, %v3260_v15  ;;  %v3264_v26 = vor.u32 %v8946_v4, %v3260_v15  ;;  %vm1533_vm15 = vcmp.ge.bf16.partialorder %v948_v20, 0 }
  0x4a   : > { %v1598_v27 = vmul.bf16 1036860877, %v948_v20  ;;  %3736 = vrot.lane.b32.xlu1 %v3261_v25, %s8560_s7  ;;  %vm3086_vm1 = vcmp.ne.s16.totalorder %v7784_v19, 0  ;;  %vm1999_vm2 = vcmp.ge.s32.totalorder %v1870_v22, 0  ;;  %vm2127_vm3 = vcmp.lt.s32.totalorder %v1869_v14, 1200 }
  0x4b   : > { %vm2128_vm4 = vcmp.lt.s32.totalorder %v1870_v22, 1200  ;;  %v8963_v30 = vsel %vm3086_vm1, %v1662_v56, 0  ;;  %vm8965_vm5 = vmand %vm1998_vm13, %vm2127_vm3  ;;  %v952_v34 = vrot.slane %v950_v17, 6  ;;  %v955_v35 = vrot.slane %v953_v18, 7 }
  0x4c   : > { %15020 = vst [vmem:[#allocation9_spill] sm:$0xff] %v8963_v30  ;;  %v1663_v31 = vsel %vm1533_vm15, %v948_v20, %v1598_v27  ;;  %v8970_v36 = vshll.u32 %v8963_v30, 16  ;;  %vm2257_vm7 = vmand %vm1999_vm2, %vm2128_vm4  ;;  %v8973_v37 = vshrl.u32 %v8963_v30, 16  ;;  %v1741_v39 = vadd.s32 144, %v8661_v2 }
  0x4d   : > { %v1742_v40 = vadd.s32 152, %v8661_v2  ;;  %vm2643_vm8 = vmpackc.low %vm8965_vm5, %vm8965_vm5  ;;  %v956_v41 = vor.u32 %v955_v35, %v952_v34  ;;  %v959_v42 = vshrl.u32 %v8110_v29, 16  ;;  %v962_v44 = vshll.u32 %v8110_v29, 16  ;;  %v8112_v29 = vld [vmem:[%s8687_s28 + $0x60] sm:$0xff]  }
  0x4e   : > { %15023 = vst [vmem:[#allocation10_spill] sm:$0xff] %v8970_v36  ;;  %15024 = vst [vmem:[#allocation11_spill] sm:$0xff] %v8973_v37  ;;  %v1743_v45 = vadd.s32 160, %v8661_v2  ;;  %v3268_v47 = vrot.slane %v8970_v36, 1  ;;  %v2772_v49 = vsel %vm2643_vm8, 65537, %v14655_v1  ;;  %v1871_v50 = vadd.s32 %v8670_v7, %v1741_v39 }
  0x4f   : > { %vm2644_vm9 = vmpackc.low %vm2257_vm7, %vm2257_vm7  ;;  %v1872_v51 = vadd.s32 %v8670_v7, %v1742_v40  ;;  %v957_v53 = vsel %vm868_vm0, %v947_v11, %v956_v41  ;;  %v961_v56 = vrot.slane %v959_v42, 6  ;;  %v964_v57 = vrot.slane %v962_v44, 7 }
  0x50   : > { %v2773_v52 = vsel %vm2644_vm9, 65537, %v14655_v1  ;;  %v3269_v61 = vsel %vm14975_vm6, %v3264_v26, %v3268_v47  ;;  %v3272_v0 = vor.u32 %v8973_v37, %v3268_v47  ;;  %vm1534_vm11 = vcmp.ge.bf16.partialorder %v957_v53, 0 }
  0x51   : > { %v7785_v62 = vcombine.low %v2772_v49, %v2773_v52  ;;  %3738 = vrot.lane.b32.xlu0 %v3269_v61, %s8560_s7  ;;  %v1599_v6 = vmul.bf16 1036860877, %v957_v53  ;;  %vm2000_vm12 = vcmp.ge.s32.totalorder %v1871_v50, 0  ;;  %vm2001_vm10 = vcmp.ge.s32.totalorder %v1872_v51, 0 }
  0x52   : > { %vm2129_vm14 = vcmp.lt.s32.totalorder %v1871_v50, 1200  ;;  %vm2130_vm15 = vcmp.lt.s32.totalorder %v1872_v51, 1200  ;;  %v965_v13 = vor.u32 %v964_v57, %v961_v56  ;;  %v1744_v11 = vadd.s32 168, %v8661_v2 }
  0x53   : > { %vm3087_vm13 = vcmp.ne.s16.totalorder %v7785_v62, 0  ;;  %vm2258_vm1 = vmand %vm2000_vm12, %vm2129_vm14  ;;  %v1664_v15 = vsel %vm1534_vm11, %v957_v53, %v1599_v6  ;;  %v1873_v17 = vadd.s32 %v8670_v7, %v1743_v45  ;;  %v968_v18 = vshrl.u32 %v8111_v59, 16 }
  0x54   : > { %v8992_v14 = vsel %vm3087_vm13, %v1663_v31, 0  ;;  %vm8994_vm2 = vmand %vm2001_vm10, %vm2130_vm15  ;;  %v966_v22 = vsel %vm868_vm0, %v956_v41, %v965_v13  ;;  %v1874_v25 = vadd.s32 %v8670_v7, %v1744_v11  ;;  %v971_v45 = vshll.u32 %v8111_v59, 16 }
  0x55   : > { %15025 = vst [vmem:[#allocation12_spill] sm:$0xff] %v8992_v14  ;;  %v9000_v19 = vshll.u32 %v8992_v14, 16  ;;  %vm2645_vm3 = vmpackc.low %vm2258_vm1, %vm2258_vm1  ;;  %v9003_v20 = vshrl.u32 %v8992_v14, 16  ;;  %vm1535_vm5 = vcmp.ge.bf16.partialorder %v966_v22, 0  ;;  %v1600_v27 = vmul.bf16 1036860877, %v966_v22 }
  0x56   : > { %vm2646_vm4 = vmpackc.low %vm8994_vm2, %vm8994_vm2  ;;  %v2774_v26 = vsel %vm2645_vm3, 65537, %v14655_v1  ;;  %vm2002_vm7 = vcmp.ge.s32.totalorder %v1873_v17, 0  ;;  %vm2003_vm8 = vcmp.ge.s32.totalorder %v1874_v25, 0  ;;  %vm2131_vm9 = vcmp.lt.s32.totalorder %v1873_v17, 1200 }
  0x57   : > { %15028 = vst [vmem:[#allocation13_spill] sm:$0xff] %v9000_v19  ;;  %15029 = vst [vmem:[#allocation14_spill] sm:$0xff] %v9003_v20  ;;  %v3276_v31 = vrot.slane %v9000_v19, 1  ;;  %v2775_v32 = vsel %vm2646_vm4, 65537, %v14655_v1  ;;  %v1665_v35 = vsel %vm1535_vm5, %v966_v22, %v1600_v27  ;;  %vm2132_vm11 = vcmp.lt.s32.totalorder %v1874_v25, 1200  ;;  %v8113_v27 = vld [vmem:[%s8687_s28 + $0x68] sm:$0xff]  }
  0x58   : > { %v7786_v34 = vcombine.low %v2774_v26, %v2775_v32  ;;  %vm9014_vm12 = vmand %vm2002_vm7, %vm2131_vm9  ;;  %v970_v40 = vrot.slane %v968_v18, 6  ;;  %v1745_v47 = vadd.s32 176, %v8661_v2  ;;  %v1746_v49 = vadd.s32 184, %v8661_v2 }
  0x59   : > { %v3277_v41 = vsel %vm14975_vm6, %v3272_v0, %v3276_v31  ;;  %v3280_v42 = vor.u32 %v9003_v20, %v3276_v31  ;;  %vm9020_vm10 = vmand %vm2003_vm8, %vm2132_vm11  ;;  %v977_v50 = vshrl.u32 %v8112_v29, 16  ;;  %v980_v51 = vshll.u32 %v8112_v29, 16 }
  0x5a   : > { %3740 = vrot.lane.b32.xlu1 %v3277_v41, %s8560_s7  ;;  %vm3088_vm14 = vcmp.ne.s16.totalorder %v7786_v34, 0  ;;  %vm2647_vm13 = vmpackc.low %vm9014_vm12, %vm9014_vm12  ;;  %v973_v56 = vrot.slane %v971_v45, 7  ;;  %v1875_v57 = vadd.s32 %v8670_v7, %v1745_v47  ;;  %v1876_v0 = vadd.s32 %v8670_v7, %v1746_v49 }
  0x5b   : > { %v9030_v52 = vsel %vm3088_vm14, %v1664_v15, 0  ;;  %vm2648_vm15 = vmpackc.low %vm9020_vm10, %vm9020_vm10  ;;  %v2776_v53 = vsel %vm2647_vm13, 65537, %v14655_v1  ;;  %v979_v17 = vrot.slane %v977_v50, 6  ;;  %v982_v25 = vrot.slane %v980_v51, 7 }
  0x5c   : > { %15034 = vst [vmem:[#allocation15_spill] sm:$0xff] %v9030_v52  ;;  %v9038_v59 = vshll.u32 %v9030_v52, 16  ;;  %v2777_v61 = vsel %vm2648_vm15, 65537, %v14655_v1  ;;  %v9042_v62 = vshrl.u32 %v9030_v52, 16  ;;  %v974_v11 = vor.u32 %v973_v56, %v970_v40 }
  0x5d   : > { %v7787_v6 = vcombine.low %v2776_v53, %v2777_v61  ;;  %vm2004_vm1 = vcmp.ge.s32.totalorder %v1875_v57, 0  ;;  %vm2133_vm2 = vcmp.lt.s32.totalorder %v1875_v57, 1200  ;;  %vm2005_vm3 = vcmp.ge.s32.totalorder %v1876_v0, 0  ;;  %v8114_v61 = vld [vmem:[%s8687_s28 + $0x70] sm:$0xff]  }
  0x5e   : > { %15035 = vst [vmem:[#allocation16_spill] sm:$0xff] %v9038_v59  ;;  %15036 = vst [vmem:[#allocation17_spill] sm:$0xff] %v9042_v62  ;;  %v3284_v15 = vrot.slane %v9038_v59, 1  ;;  %vm2134_vm4 = vcmp.lt.s32.totalorder %v1876_v0, 1200  ;;  %v975_v18 = vsel %vm868_vm0, %v965_v13, %v974_v11  ;;  %v1747_v26 = vadd.s32 192, %v8661_v2 }
  0x5f   : > { %vm9046_vm5 = vmand %vm2004_vm1, %vm2133_vm2  ;;  %vm3089_vm7 = vcmp.ne.s16.totalorder %v7787_v6, 0  ;;  %vm1536_vm9 = vcmp.ge.bf16.partialorder %v975_v18, 0  ;;  %v1601_v34 = vmul.bf16 1036860877, %v975_v18  ;;  %v983_v41 = vor.u32 %v982_v25, %v979_v17 }
  0x60   : > { %vm9051_vm8 = vmand %vm2005_vm3, %vm2134_vm4  ;;  %v3285_v29 = vsel %vm14975_vm6, %v3280_v42, %v3284_v15  ;;  %v9058_v31 = vsel %vm3089_vm7, %v1665_v35, 0  ;;  %v3288_v32 = vor.u32 %v9042_v62, %v3284_v15  ;;  %v1748_v42 = vadd.s32 200, %v8661_v2 }
  0x61   : > { %15041 = vst [vmem:[#allocation18_spill] sm:$0xff] %v9058_v31  ;;  %vm2649_vm11 = vmpackc.low %vm9046_vm5, %vm9046_vm5  ;;  %3742 = vrot.lane.b32.xlu0 %v3285_v29, %s8560_s7  ;;  %v9066_v13 = vshll.u32 %v9058_v31, 16  ;;  %v9073_v39 = vshrl.u32 %v9058_v31, 16  ;;  %v1877_v44 = vadd.s32 %v8670_v7, %v1747_v26  ;;  %v1666_v47 = vsel %vm1536_vm9, %v975_v18, %v1601_v34 }
  0x62   : > { %vm2650_vm12 = vmpackc.low %vm9051_vm8, %vm9051_vm8  ;;  %v2778_v35 = vsel %vm2649_vm11, 65537, %v14655_v1  ;;  %v986_v50 = vshrl.u32 %v8113_v27, 16  ;;  %v984_v51 = vsel %vm868_vm0, %v974_v11, %v983_v41  ;;  %v1878_v53 = vadd.s32 %v8670_v7, %v1748_v42 }
  0x63   : > { %15042 = vst [vmem:[#allocation19_spill] sm:$0xff] %v9066_v13  ;;  %15043 = vst [vmem:[#allocation20_spill] sm:$0xff] %v9073_v39  ;;  %v2779_v40 = vsel %vm2650_vm12, 65537, %v14655_v1  ;;  %v3292_v45 = vrot.slane %v9066_v13, 1  ;;  %vm2006_vm10 = vcmp.ge.s32.totalorder %v1877_v44, 0  ;;  %vm2135_vm14 = vcmp.lt.s32.totalorder %v1877_v44, 1200 }
  0x64   : > { %v7788_v49 = vcombine.low %v2778_v35, %v2779_v40  ;;  %vm1537_vm15 = vcmp.ge.bf16.partialorder %v984_v51, 0  ;;  %vm2264_vm1 = vmand %vm2006_vm10, %vm2135_vm14  ;;  %v1602_v6 = vmul.bf16 1036860877, %v984_v51  ;;  %vm2007_vm2 = vcmp.ge.s32.totalorder %v1878_v53, 0 }
  0x65   : > { %v3293_v56 = vsel %vm14975_vm6, %v3288_v32, %v3292_v45  ;;  %v3296_v57 = vor.u32 %v9073_v39, %v3292_v45  ;;  %vm2136_vm3 = vcmp.lt.s32.totalorder %v1878_v53, 1200  ;;  %vm2651_vm4 = vmpackc.low %vm2264_vm1, %vm2264_vm1  ;;  %v988_v17 = vrot.slane %v986_v50, 6 }
  0x66   : > { %vm3090_vm13 = vcmp.ne.s16.totalorder %v7788_v49, 0  ;;  %3744 = vrot.lane.b32.xlu1 %v3293_v56, %s8560_s7  ;;  %vm2265_vm5 = vmand %vm2007_vm2, %vm2136_vm3  ;;  %v2780_v15 = vsel %vm2651_vm4, 65537, %v14655_v1  ;;  %v1667_v18 = vsel %vm1537_vm15, %v984_v51, %v1602_v6  ;;  %v989_v22 = vshll.u32 %v8113_v27, 16 }
  0x67   : > { %v9085_v0 = vsel %vm3090_vm13, %v1666_v47, 0  ;;  %vm2652_vm7 = vmpackc.low %vm2265_vm5, %vm2265_vm5  ;;  %v1749_v25 = vadd.s32 208, %v8661_v2  ;;  %v1750_v26 = vadd.s32 216, %v8661_v2  ;;  %v995_v34 = vshrl.u32 %v8114_v61, 16 }
  0x68   : > { %15044 = vst [vmem:[#allocation21_spill] sm:$0xff] %v9085_v0  ;;  %v9088_v11 = vshll.u32 %v9085_v0, 16  ;;  %v9092_v16 = vshrl.u32 %v9085_v0, 16  ;;  %v2781_v32 = vsel %vm2652_vm7, 65537, %v14655_v1  ;;  %v998_v35 = vshll.u32 %v8114_v61, 16  ;;  %v8115_v61 = vld [vmem:[%s8687_s28 + $0x78] sm:$0xff]  }
  0x69   : > { %v7789_v40 = vcombine.low %v2780_v15, %v2781_v32  ;;  %v991_v42 = vrot.slane %v989_v22, 7  ;;  %v1879_v44 = vadd.s32 %v8670_v7, %v1749_v25  ;;  %v1880_v45 = vadd.s32 %v8670_v7, %v1750_v26 }
  0x6a   : > { %15045 = vst [vmem:[#allocation22_spill] sm:$0xff] %v9088_v11  ;;  %15046 = vst [vmem:[#allocation23_spill] sm:$0xff] %v9092_v16  ;;  %v3300_v29 = vrot.slane %v9088_v11, 1  ;;  %v997_v49 = vrot.slane %v995_v34, 6  ;;  %v1000_v50 = vrot.slane %v998_v35, 7  ;;  %v1751_v22 = vadd.s32 224, %v8661_v2 }
  0x6b   : > { %vm3091_vm8 = vcmp.ne.s16.totalorder %v7789_v40, 0  ;;  %v992_v51 = vor.u32 %v991_v42, %v988_v17  ;;  %vm2008_vm9 = vcmp.ge.s32.totalorder %v1879_v44, 0  ;;  %vm2009_vm11 = vcmp.ge.s32.totalorder %v1880_v45, 0 }
  0x6c   : > { %v3301_v47 = vsel %vm14975_vm6, %v3296_v57, %v3300_v29  ;;  %v3304_v27 = vor.u32 %v9092_v16, %v3300_v29  ;;  %v9103_v53 = vsel %vm3091_vm8, %v1667_v18, 0  ;;  %vm2137_vm12 = vcmp.lt.s32.totalorder %v1879_v44, 1200 }
  0x6d   : > { %3746 = vrot.lane.b32.xlu0 %v3301_v47, %s8560_s7  ;;  %15047 = vst [vmem:[#allocation24_spill] sm:$0xff] %v9103_v53  ;;  %vm2138_vm10 = vcmp.lt.s32.totalorder %v1880_v45, 1200  ;;  %v1001_v56 = vor.u32 %v1000_v50, %v997_v49  ;;  %v9107_v6 = vshll.u32 %v9103_v53, 16  ;;  %v993_v57 = vsel %vm868_vm0, %v983_v41, %v992_v51  ;;  %vm9110_vm14 = vmand %vm2008_vm9, %vm2137_vm12  ;;  %v8116_v41 = vld [vmem:[%s8687_s28 + $0x80] sm:$0xff]  }
  0x6e   : > { %v9115_v17 = vshrl.u32 %v9103_v53, 16  ;;  %vm1538_vm13 = vcmp.ge.bf16.partialorder %v993_v57, 0  ;;  %v1603_v18 = vmul.bf16 1036860877, %v993_v57  ;;  %vm9118_vm15 = vmand %vm2009_vm11, %vm2138_vm10  ;;  %v1752_v29 = vadd.s32 232, %v8661_v2 }
  0x6f   : > { %15048 = vst [vmem:[#allocation25_spill] sm:$0xff] %v9107_v6  ;;  %v1002_v26 = vsel %vm868_vm0, %v992_v51, %v1001_v56  ;;  %v3308_v32 = vrot.slane %v9107_v6, 1  ;;  %vm2653_vm1 = vmpackc.low %vm9110_vm14, %vm9110_vm14  ;;  %v1881_v35 = vadd.s32 %v8670_v7, %v1751_v22  ;;  %v1004_v45 = vshrl.u32 %v8115_v61, 16 }
  0x70   : > { %15051 = vst [vmem:[#allocation26_spill] sm:$0xff] %v9115_v17  ;;  %vm1539_vm2 = vcmp.ge.bf16.partialorder %v1002_v26, 0  ;;  %v1604_v34 = vmul.bf16 1036860877, %v1002_v26  ;;  %v1668_v40 = vsel %vm1538_vm13, %v993_v57, %v1603_v18  ;;  %vm2654_vm3 = vmpackc.low %vm9118_vm15, %vm9118_vm15  ;;  %v2782_v42 = vsel %vm2653_vm1, 65537, %v14655_v1 }
  0x71   : > { %v1882_v44 = vadd.s32 %v8670_v7, %v1752_v29  ;;  %v3309_v47 = vsel %vm14975_vm6, %v3304_v27, %v3308_v32  ;;  %v2783_v49 = vsel %vm2654_vm3, 65537, %v14655_v1  ;;  %v3312_v50 = vor.u32 %v9115_v17, %v3308_v32 }
  0x72   : > { %v1669_v51 = vsel %vm1539_vm2, %v1002_v26, %v1604_v34  ;;  %3748 = vrot.lane.b32.xlu1 %v3309_v47, %s8560_s7  ;;  %v7790_v15 = vcombine.low %v2782_v42, %v2783_v49  ;;  %vm2010_vm4 = vcmp.ge.s32.totalorder %v1881_v35, 0  ;;  %vm2139_vm7 = vcmp.lt.s32.totalorder %v1881_v35, 1200 }
  0x73   : > { %vm2011_vm5 = vcmp.ge.s32.totalorder %v1882_v44, 0  ;;  %vm2140_vm8 = vcmp.lt.s32.totalorder %v1882_v44, 1200  ;;  %vm9139_vm9 = vmand %vm2010_vm4, %vm2139_vm7  ;;  %v1006_v22 = vrot.slane %v1004_v45, 6  ;;  %v1007_v18 = vshll.u32 %v8115_v61, 16 }
  0x74   : > { %v1753_v27 = vadd.s32 240, %v8661_v2  ;;  %vm3092_vm11 = vcmp.ne.s16.totalorder %v7790_v15, 0  ;;  %vm2269_vm12 = vmand %vm2011_vm5, %vm2140_vm8  ;;  %v1754_v25 = vadd.s32 248, %v8661_v2  ;;  %v1013_v26 = vshrl.u32 %v8116_v41, 16 }
  0x75   : > { %v1016_v29 = vshll.u32 %v8116_v41, 16  ;;  %v9145_v32 = vsel %vm3092_vm11, %v1668_v40, 0  ;;  %vm2655_vm10 = vmpackc.low %vm9139_vm9, %vm9139_vm9  ;;  %v1009_v34 = vrot.slane %v1007_v18, 7  ;;  %v1755_v42 = vadd.s32 256, %v8661_v2 }
  0x76   : > { %15056 = vst [vmem:[#allocation27_spill] sm:$0xff] %v9145_v32  ;;  %v1883_v35 = vadd.s32 %v8670_v7, %v1753_v27  ;;  %v9153_v61 = vshll.u32 %v9145_v32, 16  ;;  %vm2656_vm14 = vmpackc.low %vm2269_vm12, %vm2269_vm12  ;;  %v2784_v44 = vsel %vm2655_vm10, 65537, %v14655_v1  ;;  %v9157_v45 = vshrl.u32 %v9145_v32, 16 }
  0x77   : > { %v1884_v41 = vadd.s32 %v8670_v7, %v1754_v25  ;;  %v2785_v40 = vsel %vm2656_vm14, 65537, %v14655_v1  ;;  %v1010_v47 = vor.u32 %v1009_v34, %v1006_v22  ;;  %v1015_v25 = vrot.slane %v1013_v26, 6 }
  0x78   : > { %15057 = vst [vmem:[#allocation28_spill] sm:$0xff] %v9153_v61  ;;  %15058 = vst [vmem:[#allocation29_spill] sm:$0xff] %v9157_v45  ;;  %vm2012_vm13 = vcmp.ge.s32.totalorder %v1883_v35, 0  ;;  %vm2141_vm15 = vcmp.lt.s32.totalorder %v1883_v35, 1200  ;;  %v3316_v49 = vrot.slane %v9153_v61, 1  ;;  %v7791_v15 = vcombine.low %v2784_v44, %v2785_v40 }
  0x79   : > { %vm2013_vm1 = vcmp.ge.s32.totalorder %v1884_v41, 0  ;;  %vm2142_vm2 = vcmp.lt.s32.totalorder %v1884_v41, 1200  ;;  %vm9162_vm3 = vmand %vm2012_vm13, %vm2141_vm15  ;;  %v1011_v18 = vsel %vm868_vm0, %v1001_v56, %v1010_v47  ;;  %v1018_v38 = vrot.slane %v1016_v29, 7 }
  0x7a   : > { %vm9167_vm4 = vmand %vm2013_vm1, %vm2142_vm2  ;;  %v1756_v22 = vadd.s32 264, %v8661_v2  ;;  %v3317_v34 = vsel %vm14975_vm6, %v3312_v50, %v3316_v49  ;;  %vm3093_vm5 = vcmp.ne.s16.totalorder %v7791_v15, 0  ;;  %v3320_v35 = vor.u32 %v9157_v45, %v3316_v49  ;;  %v8117_v49 = vld [vmem:[%s8687_s28 + $0x88] sm:$0xff]  }
  0x7b   : > { %vm1540_vm7 = vcmp.ge.bf16.partialorder %v1011_v18, 0  ;;  %vm2657_vm8 = vmpackc.low %vm9162_vm3, %vm9162_vm3  ;;  %3750 = vrot.lane.b32.xlu0 %v3317_v34, %s8560_s7  ;;  %v9178_v56 = vsel %vm3093_vm5, %v1669_v51, 0  ;;  %v1605_v44 = vmul.bf16 1036860877, %v1011_v18  ;;  %v1019_v26 = vor.u32 %v1018_v38, %v1015_v25  ;;  %v8118_v25 = vld [vmem:[%s8687_s28 + $0x90] sm:$0xff]  }
  0x7c   : > { %15063 = vst [vmem:[#allocation30_spill] sm:$0xff] %v9178_v56  ;;  %vm2658_vm9 = vmpackc.low %vm9167_vm4, %vm9167_vm4  ;;  %v2786_v50 = vsel %vm2657_vm8, 65537, %v14655_v1  ;;  %v9185_v29 = vshll.u32 %v9178_v56, 16  ;;  %v9189_v40 = vshrl.u32 %v9178_v56, 16  ;;  %v1885_v51 = vadd.s32 %v8670_v7, %v1755_v42 }
  0x7d   : > { %v2787_v41 = vsel %vm2658_vm9, 65537, %v14655_v1  ;;  %v1670_v15 = vsel %vm1540_vm7, %v1011_v18, %v1605_v44  ;;  %v1020_v27 = vsel %vm868_vm0, %v1010_v47, %v1019_v26  ;;  %v1886_v34 = vadd.s32 %v8670_v7, %v1756_v22 }
  0x7e   : > { %15064 = vst [vmem:[#allocation31_spill] sm:$0xff] %v9185_v29  ;;  %15065 = vst [vmem:[#allocation32_spill] sm:$0xff] %v9189_v40  ;;  %v7792_v57 = vcombine.low %v2786_v50, %v2787_v41  ;;  %v3324_v32 = vrot.slane %v9185_v29, 1  ;;  %vm1541_vm11 = vcmp.ge.bf16.partialorder %v1020_v27, 0  ;;  %v1606_v38 = vmul.bf16 1036860877, %v1020_v27 }
  0x7f   : > { %vm2014_vm12 = vcmp.ge.s32.totalorder %v1885_v51, 0  ;;  %vm2015_vm14 = vcmp.ge.s32.totalorder %v1886_v34, 0  ;;  %vm2143_vm13 = vcmp.lt.s32.totalorder %v1885_v51, 1200  ;;  %vm2144_vm15 = vcmp.lt.s32.totalorder %v1886_v34, 1200 }
  0x80   : > { %vm3094_vm10 = vcmp.ne.s16.totalorder %v7792_v57, 0  ;;  %v3325_v1 = vsel %vm14975_vm6, %v3320_v35, %v3324_v32  ;;  %v3328_v18 = vor.u32 %v9189_v40, %v3324_v32  ;;  %v1671_v44 = vsel %vm1541_vm11, %v1020_v27, %v1606_v38  ;;  %vm9201_vm1 = vmand %vm2014_vm12, %vm2143_vm13 }
  0x81   : > { %v9198_v42 = vsel %vm3094_vm10, %v1670_v15, 0  ;;  %3752 = vrot.lane.b32.xlu1 %v3325_v1, %s8560_s7  ;;  %vm9209_vm2 = vmand %vm2015_vm14, %vm2144_vm15  ;;  %v1022_v41 = vshrl.u32 %v8117_v49, 16  ;;  %v1025_v51 = vshll.u32 %v8117_v49, 16  ;;  %v1757_v32 = vadd.s32 272, %v8661_v2 }
  0x82   : > { %15066 = vst [vmem:[#allocation33_spill] sm:$0xff] %v9198_v42  ;;  %v9207_v22 = vshll.u32 %v9198_v42, 16  ;;  %v9214_v35 = vshrl.u32 %v9198_v42, 16  ;;  %vm2659_vm3 = vmpackc.low %vm9201_vm1, %vm9201_vm1  ;;  %v1758_v1 = vadd.s32 280, %v8661_v2  ;;  %v1031_v15 = vshrl.u32 %v8118_v25, 16 }
  0x83   : > { %v1034_v57 = vshll.u32 %v8118_v25, 16  ;;  %vm1521_vm4 = vcmask 1041408   ;;  %vm2660_vm5 = vmpackc.low %vm9209_vm2, %vm9209_vm2  ;;  %v15073_v34 = vmov 0   ;;  %v1024_v38 = vrot.slane %v1022_v41, 6 }
  0x84   : > { %15069 = vst [vmem:[#allocation34_spill] sm:$0xff] %v9207_v22  ;;  %15072 = vst [vmem:[#allocation35_spill] sm:$0xff] %v9214_v35  ;;  %v3332_v27 = vrot.slane %v9207_v22, 1  ;;  %v2788_v49 = vsel %vm2659_vm3, 65537, %v15073_v34  ;;  %v1027_v47 = vrot.slane %v1025_v51, 7  ;;  %v2789_v42 = vsel %vm2660_vm5, 65537, %v15073_v34 }
  0x85   : > { %v1887_v56 = vadd.s32 %v8670_v7, %v1757_v32  ;;  %v1888_v29 = vadd.s32 %v8670_v7, %v1758_v1  ;;  %v1033_v40 = vrot.slane %v1031_v15, 6  ;;  %v8119_v25 = vld [vmem:[%s355_s16 + $0x4] ss:$0 sps:$4 sm:$0xcc]   ;;  %v7793_v22 = vcombine.low %v2788_v49, %v2789_v42  ;;  %s12588_s16 = scalar_lea.vmem [#allocation2], %s7699_s18  }
  0x86   : > { %v3333_v50 = vsel %vm14975_vm6, %v3328_v18, %v3332_v27  ;;  %v3336_v61 = vor.u32 %v9214_v35, %v3332_v27  ;;  %v1028_v45 = vor.u32 %v1027_v47, %v1024_v38  ;;  %v1036_v32 = vrot.slane %v1034_v57, 7 }
  0x87   : > { %3754 = vrot.lane.b32.xlu0 %v3333_v50, %s8560_s7  ;;  %vm2016_vm7 = vcmp.ge.s32.totalorder %v1887_v56, 0  ;;  %vm2017_vm8 = vcmp.ge.s32.totalorder %v1888_v29, 0  ;;  %vm2145_vm9 = vcmp.lt.s32.totalorder %v1887_v56, 1200  ;;  %vm2146_vm11 = vcmp.lt.s32.totalorder %v1888_v29, 1200 }
  0x88   : > { %vm3095_vm12 = vcmp.ne.s16.totalorder %v7793_v22, 0  ;;  %v1029_v41 = vsel %vm868_vm0, %v1019_v26, %v1028_v45  ;;  %vm9238_vm10 = vmand %vm2016_vm7, %vm2145_vm9  ;;  %v1759_v18 = vadd.s32 288, %v8661_v2  ;;  %v1760_v15 = vadd.s32 296, %v8661_v2 }
  0x89   : > { %v9243_v42 = vsel %vm3095_vm12, %v1671_v44, 0  ;;  %vm1542_vm14 = vcmp.ge.bf16.partialorder %v1029_v41, 0  ;;  %v1607_v1 = vmul.bf16 1036860877, %v1029_v41  ;;  %vm2275_vm13 = vmand %vm2017_vm8, %vm2146_vm11  ;;  %v9255_v29 = vor.u32 %v1036_v32, %v1033_v40  ;;  %v8120_v40 = vld [vmem:[%s8687_s28 + $0x98] sm:$0xff]  }
  0x8a   : > { %15076 = vst [vmem:[#allocation36_spill] sm:$0xff] %v9243_v42  ;;  %v9247_v56 = vshll.u32 %v9243_v42, 16  ;;  %vm2661_vm15 = vmpackc.low %vm9238_vm10, %vm9238_vm10  ;;  %v9253_v26 = vshrl.u32 %v9243_v42, 16  ;;  %v1889_v44 = vadd.s32 %v8670_v7, %v1759_v18  ;;  %v1890_v27 = vadd.s32 %v8670_v7, %v1760_v15  ;;  %v8121_v15 = vld [vmem:[%s8687_s28 + $0xa0] sm:$0xff]  }
  0x8b   : > { %v1672_v22 = vsel %vm1542_vm14, %v1029_v41, %v1607_v1  ;;  %vm2662_vm1 = vmpackc.low %vm2275_vm13, %vm2275_vm13  ;;  %v2790_v57 = vsel %vm2661_vm15, 65537, %v15073_v34  ;;  %v540_v49 = vshrl.u32 %v8119_v25, 16  ;;  %v1038_v50 = vsel %vm868_vm0, %v1028_v45, %v9255_v29 }
  0x8c   : > { %15077 = vst [vmem:[#allocation37_spill] sm:$0xff] %v9247_v56  ;;  %15078 = vst [vmem:[#allocation38_spill] sm:$0xff] %v9253_v26  ;;  %v3340_v38 = vrot.slane %v9247_v56, 1  ;;  %v2791_v47 = vsel %vm2662_vm1, 65537, %v15073_v34  ;;  %vm2018_vm2 = vcmp.ge.s32.totalorder %v1889_v44, 0  ;;  %vm1543_vm3 = vcmp.ge.bf16.partialorder %v1038_v50, 0 }
  0x8d   : > { %v7794_v51 = vcombine.low %v2790_v57, %v2791_v47  ;;  %v1608_v32 = vmul.bf16 1036860877, %v1038_v50  ;;  %vm2019_vm5 = vcmp.ge.s32.totalorder %v1890_v27, 0  ;;  %vm2147_vm7 = vcmp.lt.s32.totalorder %v1889_v44, 1200  ;;  %vm9269_vm9 = vmand %vm1521_vm4, %vm868_vm0 }
  0x8e   : > { %v3341_v41 = vsel %vm14975_vm6, %v3336_v61, %v3340_v38  ;;  %v3344_v18 = vor.u32 %v9253_v26, %v3340_v38  ;;  %vm2148_vm8 = vcmp.lt.s32.totalorder %v1890_v27, 1200  ;;  %v15079_v1 = vmov 0  ;;  %vm2276_vm12 = vmand %vm2018_vm2, %vm2147_vm7 }
  0x8f   : > { %v15080_v1 = vsel %vm9269_vm9, 4294967295, %v15079_v1  ;;  %3756 = vrot.lane.b32.xlu1 %v3341_v41, %s8560_s7  ;;  %vm3096_vm11 = vcmp.ne.s16.totalorder %v7794_v51, 0  ;;  %v1673_v45 = vsel %vm1543_vm3, %v1038_v50, %v1608_v32  ;;  %v542_v57 = vrot.slane %v540_v49, 2  ;;  %vm9278_vm10 = vmand %vm2019_vm5, %vm2148_vm8 }
  0x90   : > { %15081 = vst [vmem:[#allocation39_spill] sm:$0xff] %v15080_v1  ;;  %v543_v47 = vshll.u32 %v8119_v25, 16  ;;  %v9276_v61 = vsel %vm3096_vm11, %v1672_v22, 0  ;;  %v1724_v27 = vadd.s32 8, %v8661_v2  ;;  %vm1982_vm4 = vcmp.ge.s32.totalorder %v8706_v24, 0  ;;  %vm2663_vm13 = vmpackc.low %vm2276_vm12, %vm2276_vm12  ;;  %v8123_v1 = vld [vmem:[%s8687_s28 + $0xb0] sm:$0xff]  }
  0x91   : > { %15082 = vst [vmem:[#allocation40_spill] sm:$0xff] %v9276_v61  ;;  %vm2111_vm14 = vcmp.lt.s32.totalorder %v8706_v24, 1200  ;;  %v9286_v41 = vshll.u32 %v9276_v61, 16  ;;  %v9289_v44 = vshrl.u32 %v9276_v61, 16  ;;  %v1040_v22 = vshrl.u32 %v8120_v40, 16  ;;  %vm2664_vm15 = vmpackc.low %vm9278_vm10, %vm9278_vm10 }
  0x92   : > { %v545_v25 = vrot.slane %v543_v47, 3  ;;  %v2792_v49 = vsel %vm2663_vm13, 65537, %v15073_v34  ;;  %v1854_v50 = vadd.s32 %v8670_v7, %v1724_v27  ;;  %v1043_v51 = vshll.u32 %v8120_v40, 16  ;;  %vm2240_vm1 = vmand %vm1982_vm4, %vm2111_vm14 }
  0x93   : > { %15085 = vst [vmem:[#allocation41_spill] sm:$0xff] %v9286_v41  ;;  %15086 = vst [vmem:[#allocation42_spill] sm:$0xff] %v9289_v44  ;;  %v1049_v32 = vshrl.u32 %v8121_v15, 16  ;;  %v3348_v42 = vrot.slane %v9286_v41, 1  ;;  %v2793_v56 = vsel %vm2664_vm15, 65537, %v15073_v34  ;;  %v1042_v47 = vrot.slane %v1040_v22, 6 }
  0x94   : > { %v546_v26 = vor.u32 %v545_v25, %v542_v57  ;;  %v7795_v61 = vcombine.low %v2792_v49, %v2793_v56  ;;  %vm1983_vm2 = vcmp.ge.s32.totalorder %v1854_v50, 0  ;;  %vm2112_vm3 = vcmp.lt.s32.totalorder %v1854_v50, 1200  ;;  %vm2627_vm5 = vmpackc.low %vm2240_vm1, %vm2240_vm1 }
  0x95   : > { %v1045_v38 = vrot.slane %v1043_v51, 7  ;;  %v3349_v35 = vsel %vm14975_vm6, %v3344_v18, %v3348_v42  ;;  %v3352_v27 = vor.u32 %v9289_v44, %v3348_v42  ;;  %vm2241_vm7 = vmand %vm1983_vm2, %vm2112_vm3  ;;  %v2756_v57 = vsel %vm2627_vm5, 65537, %v15073_v34 }
  0x96   : > { %v1523_v40 = vsel %vm9269_vm9, %v546_v26, %v8767_v63  ;;  %3758 = vrot.lane.b32.xlu0 %v3349_v35, %s8560_s7  ;;  %vm3097_vm8 = vcmp.ne.s16.totalorder %v7795_v61, 0  ;;  %vm2628_vm12 = vmpackc.low %vm2241_vm7, %vm2241_vm7  ;;  %v1051_v22 = vrot.slane %v1049_v32, 6  ;;  %v1052_v42 = vshll.u32 %v8121_v15, 16 }
  0x97   : > { %vm1525_vm11 = vcmp.ge.bf16.partialorder %v1523_v40, 0  ;;  %v1590_v24 = vmul.bf16 1036860877, %v1523_v40  ;;  %v1046_v56 = vor.u32 %v1045_v38, %v1042_v47  ;;  %v9307_v25 = vsel %vm3097_vm8, %v1673_v45, 0 }
  0x98   : > { %15087 = vst [vmem:[#allocation43_spill] sm:$0xff] %v9307_v25  ;;  %v2757_v18 = vsel %vm2628_vm12, 65537, %v15073_v34  ;;  %v9311_v49 = vshll.u32 %v9307_v25, 16  ;;  %v1054_v35 = vrot.slane %v1052_v42, 7  ;;  %v1761_v61 = vadd.s32 304, %v8661_v2 }
  0x99   : > { %v1655_v63 = vsel %vm1525_vm11, %v1523_v40, %v1590_v24  ;;  %v7777_v26 = vcombine.low %v2756_v57, %v2757_v18  ;;  %v1047_v50 = vsel %vm868_vm0, %v9255_v29, %v1046_v56  ;;  %v1762_v45 = vadd.s32 312, %v8661_v2 }
  0x9a   : > { %15088 = vst [vmem:[#allocation44_spill] sm:$0xff] %v9311_v49  ;;  %v3356_v51 = vrot.slane %v9311_v49, 1  ;;  %v1763_v32 = vadd.s32 320, %v8661_v2  ;;  %v1055_v47 = vor.u32 %v1054_v35, %v1051_v22  ;;  %vm1544_vm4 = vcmp.ge.bf16.partialorder %v1047_v50, 0 }
  0x9b   : > { %vm3079_vm10 = vcmp.ne.s16.totalorder %v7777_v26, 0  ;;  %v1764_v38 = vadd.s32 328, %v8661_v2  ;;  %v1891_v24 = vadd.s32 %v8670_v7, %v1761_v61  ;;  %v1892_v22 = vadd.s32 %v8670_v7, %v1762_v45  ;;  %v8122_v26 = vld [vmem:[%s8687_s28 + $0xa8] sm:$0xff]  }
  0x9c   : > { %v9319_v15 = vsel %vm3079_vm10, %v1655_v63, 0  ;;  %v3357_v29 = vsel %vm14975_vm6, %v3352_v27, %v3356_v51  ;;  %v1056_v18 = vsel %vm868_vm0, %v1046_v56, %v1055_v47  ;;  %v1893_v42 = vadd.s32 %v8670_v7, %v1763_v32 }
  0x9d   : > { %v9324_v40 = vshrl.u32 %v9319_v15, 16  ;;  %v9327_v57 = vshll.u32 %v9319_v15, 16  ;;  %3760 = vrot.lane.b32.xlu1 %v3357_v29, %s8560_s7  ;;  %v1894_v63 = vadd.s32 %v8670_v7, %v1764_v38  ;;  %vm1545_vm14 = vcmp.ge.bf16.partialorder %v1056_v18, 0 }
  0x9e   : > { %v1609_v35 = vmul.bf16 1036860877, %v1047_v50  ;;  %vm2020_vm13 = vcmp.ge.s32.totalorder %v1891_v24, 0  ;;  %v1610_v49 = vmul.bf16 1036860877, %v1056_v18  ;;  %vm2021_vm15 = vcmp.ge.s32.totalorder %v1892_v22, 0 }
  0x9f   : > { %v3215_v27 = vrot.slane %v9327_v57, 1  ;;  %vm2022_vm1 = vcmp.ge.s32.totalorder %v1893_v42, 0  ;;  %vm2149_vm2 = vcmp.lt.s32.totalorder %v1891_v24, 1200  ;;  %vm2023_vm3 = vcmp.ge.s32.totalorder %v1894_v63, 0 }
  0xa0   : > { %vm2150_vm5 = vcmp.lt.s32.totalorder %v1892_v22, 1200  ;;  %vm2151_vm7 = vcmp.lt.s32.totalorder %v1893_v42, 1200  ;;  %vm9339_vm8 = vmand %vm2020_vm13, %vm2149_vm2  ;;  %vm2152_vm11 = vcmp.lt.s32.totalorder %v1894_v63, 1200  ;;  %v9348_v32 = vshrl.u32 %v9307_v25, 16 }
  0xa1   : > { %v3216_v61 = vor.u32 %v3215_v27, %v9324_v40  ;;  %vm9343_vm12 = vmand %vm2021_vm15, %vm2150_vm5  ;;  %v1058_v38 = vshrl.u32 %v8122_v26, 16  ;;  %v1061_v29 = vshll.u32 %v8122_v26, 16  ;;  %v15094_v24 = vrot.slane %v8822_v23, 1 }
  0xa2   : > { %15093 = vst [vmem:[#allocation45_spill] sm:$0xff] %v9348_v32  ;;  %vm9353_vm10 = vmand %vm2022_vm1, %vm2151_vm7  ;;  %v1067_v42 = vshrl.u32 %v8123_v1, 16  ;;  %v1070_v41 = vshll.u32 %v8123_v1, 16  ;;  %v1765_v44 = vadd.s32 336, %v8661_v2  ;;  %v1674_v53 = vsel %vm1544_vm4, %v1047_v50, %v1609_v35 }
  0xa3   : > { %v3221_v27 = vsel %vm14975_vm6, %v3216_v61, %v15094_v24  ;;  %vm9361_vm13 = vmand %vm2023_vm3, %vm2152_vm11  ;;  %v1060_v26 = vrot.slane %v1058_v38, 6  ;;  %v1063_v6 = vrot.slane %v1061_v29, 7  ;;  %v1766_v61 = vadd.s32 344, %v8661_v2 }
  0xa4   : > { %3726 = vrot.lane.b32.xlu0 %v3221_v27, %s8560_s7  ;;  %vm2665_vm15 = vmpackc.low %vm9339_vm8, %vm9339_vm8  ;;  %v1069_v1 = vrot.slane %v1067_v42, 6  ;;  %v1072_v24 = vrot.slane %v1070_v41, 7  ;;  %v1767_v17 = vadd.s32 352, %v8661_v2  ;;  %v1768_v27 = vadd.s32 360, %v8661_v2 }
  0xa5   : > { %v1675_v50 = vsel %vm1545_vm14, %v1056_v18, %v1610_v49  ;;  %vm2666_vm4 = vmpackc.low %vm9343_vm12, %vm9343_vm12  ;;  %v2794_v63 = vsel %vm2665_vm15, 65537, %v15073_v34  ;;  %v1064_v35 = vor.u32 %v1063_v6, %v1060_v26  ;;  %v1895_v38 = vadd.s32 %v8670_v7, %v1765_v44 }
  0xa6   : > { %vm2667_vm1 = vmpackc.low %vm9353_vm10, %vm9353_vm10  ;;  %v2795_v41 = vsel %vm2666_vm4, 65537, %v15073_v34  ;;  %v3360_v56 = vor.u32 %v9348_v32, %v3356_v51  ;;  %v9382_v29 = vor.u32 %v1072_v24, %v1069_v1  ;;  %v1896_v49 = vadd.s32 %v8670_v7, %v1766_v61  ;;  %v8124_v61 = vld [vmem:[%s8687_s28 + $0xb8] sm:$0xff]  }
  0xa7   : > { %vm2668_vm14 = vmpackc.low %vm9361_vm13, %vm9361_vm13  ;;  %v2796_v6 = vsel %vm2667_vm1, 65537, %v15073_v34  ;;  %v7796_v44 = vcombine.low %v2794_v63, %v2795_v41  ;;  %v1065_v18 = vsel %vm868_vm0, %v1055_v47, %v1064_v35  ;;  %v1897_v45 = vadd.s32 %v8670_v7, %v1767_v17  ;;  %v8125_v47 = vld [vmem:[%s8687_s28 + $0xc0] sm:$0xff]  }
  0xa8   : > { %v2797_v22 = vsel %vm2668_vm14, 65537, %v15073_v34  ;;  %v1074_v51 = vsel %vm868_vm0, %v1064_v35, %v9382_v29  ;;  %v1898_v42 = vadd.s32 %v8670_v7, %v1768_v27  ;;  %vm2024_vm2 = vcmp.ge.s32.totalorder %v1895_v38, 0 }
  0xa9   : > { %v7797_v26 = vcombine.low %v2796_v6, %v2797_v22  ;;  %vm3098_vm3 = vcmp.ne.s16.totalorder %v7796_v44, 0  ;;  %vm1546_vm5 = vcmp.ge.bf16.partialorder %v1065_v18, 0  ;;  %v1611_v25 = vmul.bf16 1036860877, %v1065_v18 }
  0xaa   : > { %v9396_v1 = vsel %vm3098_vm3, %v1674_v53, 0  ;;  %vm1547_vm7 = vcmp.ge.bf16.partialorder %v1074_v51, 0  ;;  %v1612_v24 = vmul.bf16 1036860877, %v1074_v51  ;;  %vm2025_vm8 = vcmp.ge.s32.totalorder %v1896_v49, 0 }
  0xab   : > { %15099 = vst [vmem:[#allocation46_spill] sm:$0xff] %v9396_v1  ;;  %vm3099_vm11 = vcmp.ne.s16.totalorder %v7797_v26, 0  ;;  %v9400_v17 = vshll.u32 %v9396_v1, 16  ;;  %v9403_v63 = vshrl.u32 %v9396_v1, 16  ;;  %vm2026_vm12 = vcmp.ge.s32.totalorder %v1897_v45, 0 }
  0xac   : > { %v9405_v27 = vsel %vm3099_vm11, %v1675_v50, 0  ;;  %vm2027_vm10 = vcmp.ge.s32.totalorder %v1898_v42, 0  ;;  %vm2153_vm13 = vcmp.lt.s32.totalorder %v1895_v38, 1200  ;;  %vm2154_vm15 = vcmp.lt.s32.totalorder %v1896_v49, 1200 }
  0xad   : > { %15100 = vst [vmem:[#allocation47_spill] sm:$0xff] %v9400_v17  ;;  %15101 = vst [vmem:[#allocation48_spill] sm:$0xff] %v9403_v63  ;;  %v3364_v53 = vrot.slane %v9400_v17, 1  ;;  %v9409_v35 = vshll.u32 %v9405_v27, 16  ;;  %vm2155_vm4 = vcmp.lt.s32.totalorder %v1897_v45, 1200  ;;  %vm2156_vm1 = vcmp.lt.s32.totalorder %v1898_v42, 1200 }
  0xae   : > { %15102 = vst [vmem:[#allocation49_spill] sm:$0xff] %v9405_v27  ;;  %vm9412_vm14 = vmand %vm2024_vm2, %vm2153_vm13  ;;  %v9422_v50 = vshrl.u32 %v9405_v27, 16  ;;  %v1076_v44 = vshrl.u32 %v8124_v61, 16  ;;  %v1079_v22 = vshll.u32 %v8124_v61, 16  ;;  %v1085_v26 = vshrl.u32 %v8125_v47, 16 }
  0xaf   : > { %15103 = vst [vmem:[#allocation50_spill] sm:$0xff] %v9409_v35  ;;  %vm9417_vm3 = vmand %vm2025_vm8, %vm2154_vm15  ;;  %v3368_v1 = vor.u32 %v9403_v63, %v3364_v53  ;;  %v3372_v17 = vrot.slane %v9409_v35, 1  ;;  %v3365_v38 = vsel %vm14975_vm6, %v3360_v56, %v3364_v53  ;;  %v1088_v49 = vshll.u32 %v8125_v47, 16 }
  0xb0   : > { %15108 = vst [vmem:[#allocation51_spill] sm:$0xff] %v9422_v50  ;;  %vm9428_vm2 = vmand %vm2026_vm12, %vm2155_vm4  ;;  %3762 = vrot.lane.b32.xlu0 %v3365_v38, %s8560_s7  ;;  %v1078_v61 = vrot.slane %v1076_v44, 6  ;;  %v1081_v0 = vrot.slane %v1079_v22, 7  ;;  %v1087_v63 = vrot.slane %v1085_v26, 6  ;;  %v1769_v35 = vadd.s32 368, %v8661_v2 }
  0xb1   : > { %vm9434_vm8 = vmand %vm2027_vm10, %vm2156_vm1  ;;  %v3373_v56 = vsel %vm14975_vm6, %v3368_v1, %v3372_v17  ;;  %v1676_v45 = vsel %vm1546_vm5, %v1065_v18, %v1611_v25  ;;  %v1090_v47 = vrot.slane %v1088_v49, 7  ;;  %v1770_v42 = vadd.s32 376, %v8661_v2 }
  0xb2   : > { %vm2669_vm11 = vmpackc.low %vm9412_vm14, %vm9412_vm14  ;;  %3764 = vrot.lane.b32.xlu1 %v3373_v56, %s8560_s7  ;;  %v1677_v53 = vsel %vm1547_vm7, %v1074_v51, %v1612_v24  ;;  %v1082_v1 = vor.u32 %v1081_v0, %v1078_v61  ;;  %v1771_v18 = vadd.s32 384, %v8661_v2  ;;  %v3376_v41 = vor.u32 %v9422_v50, %v3372_v17  ;;  %v8126_v56 = vld [vmem:[%s8687_s28 + $0xc8] sm:$0xff]  }
  0xb3   : > { %vm2670_vm12 = vmpackc.low %vm9417_vm3, %vm9417_vm3  ;;  %v2798_v44 = vsel %vm2669_vm11, 65537, %v15073_v34  ;;  %v9457_v22 = vor.u32 %v1090_v47, %v1087_v63  ;;  %v1772_v51 = vadd.s32 392, %v8661_v2  ;;  %v1899_v6 = vadd.s32 %v8670_v7, %v1769_v35 }
  0xb4   : > { %vm2671_vm5 = vmpackc.low %vm9428_vm2, %vm9428_vm2  ;;  %v2799_v25 = vsel %vm2670_vm12, 65537, %v15073_v34  ;;  %v1083_v32 = vsel %vm868_vm0, %v9382_v29, %v1082_v1  ;;  %v1900_v63 = vadd.s32 %v8670_v7, %v1770_v42  ;;  %v1901_v27 = vadd.s32 %v8670_v7, %v1771_v18 }
  0xb5   : > { %vm2672_vm7 = vmpackc.low %vm9434_vm8, %vm9434_vm8  ;;  %v2800_v0 = vsel %vm2671_vm5, 65537, %v15073_v34  ;;  %v7798_v24 = vcombine.low %v2798_v44, %v2799_v25  ;;  %v1092_v17 = vsel %vm868_vm0, %v1082_v1, %v9457_v22  ;;  %vm1548_vm13 = vcmp.ge.bf16.partialorder %v1083_v32, 0 }
  0xb6   : > { %v2801_v26 = vsel %vm2672_vm7, 65537, %v15073_v34  ;;  %v1613_v49 = vmul.bf16 1036860877, %v1083_v32  ;;  %vm1549_vm15 = vcmp.ge.bf16.partialorder %v1092_v17, 0  ;;  %v1614_v29 = vmul.bf16 1036860877, %v1092_v17 }
  0xb7   : > { %v7799_v38 = vcombine.low %v2800_v0, %v2801_v26  ;;  %vm3100_vm10 = vcmp.ne.s16.totalorder %v7798_v24, 0  ;;  %v1902_v35 = vadd.s32 %v8670_v7, %v1772_v51  ;;  %vm2028_vm1 = vcmp.ge.s32.totalorder %v1899_v6, 0 }
  0xb8   : > { %v9472_v61 = vsel %vm3100_vm10, %v1676_v45, 0  ;;  %vm2029_vm14 = vcmp.ge.s32.totalorder %v1900_v63, 0  ;;  %vm2030_vm3 = vcmp.ge.s32.totalorder %v1901_v27, 0  ;;  %v8127_v45 = vld [vmem:[%s8687_s28 + $0xd0] sm:$0xff]   ;;  %vm2157_vm8 = vcmp.lt.s32.totalorder %v1899_v6, 1200 }
  0xb9   : > { %15113 = vst [vmem:[#allocation52_spill] sm:$0xff] %v9472_v61  ;;  %vm3101_vm4 = vcmp.ne.s16.totalorder %v7799_v38, 0  ;;  %v9477_v47 = vshll.u32 %v9472_v61, 16  ;;  %v9480_v42 = vshrl.u32 %v9472_v61, 16  ;;  %vm2031_vm2 = vcmp.ge.s32.totalorder %v1902_v35, 0  ;;  %vm9489_vm7 = vmand %vm2028_vm1, %vm2157_vm8 }
  0xba   : > { %v9482_v44 = vsel %vm3101_vm4, %v1677_v53, 0  ;;  %vm2158_vm11 = vcmp.lt.s32.totalorder %v1900_v63, 1200  ;;  %vm2159_vm12 = vcmp.lt.s32.totalorder %v1901_v27, 1200  ;;  %vm2160_vm5 = vcmp.lt.s32.totalorder %v1902_v35, 1200 }
  0xbb   : > { %15114 = vst [vmem:[#allocation53_spill] sm:$0xff] %v9477_v47  ;;  %15115 = vst [vmem:[#allocation54_spill] sm:$0xff] %v9480_v42  ;;  %v3380_v1 = vrot.slane %v9477_v47, 1  ;;  %v9487_v18 = vshll.u32 %v9482_v44, 16  ;;  %v9494_v53 = vshrl.u32 %v9482_v44, 16  ;;  %v1094_v51 = vshrl.u32 %v8126_v56, 16 }
  0xbc   : > { %15116 = vst [vmem:[#allocation55_spill] sm:$0xff] %v9482_v44  ;;  %vm9500_vm10 = vmand %vm2029_vm14, %vm2158_vm11  ;;  %v1097_v38 = vshll.u32 %v8126_v56, 16  ;;  %v1103_v47 = vshrl.u32 %v8127_v45, 16  ;;  %v1678_v63 = vsel %vm1548_vm13, %v1083_v32, %v1613_v49  ;;  %v1776_v32 = vadd.s32 424, %v8661_v2 }
  0xbd   : > { %15117 = vst [vmem:[#allocation56_spill] sm:$0xff] %v9487_v18  ;;  %15120 = vst [vmem:[#allocation57_spill] sm:$0xff] %v9494_v53  ;;  %v3384_v0 = vor.u32 %v9480_v42, %v3380_v1  ;;  %v3388_v24 = vrot.slane %v9487_v18, 1  ;;  %v3381_v26 = vsel %vm14975_vm6, %v3376_v41, %v3380_v1  ;;  %v1096_v44 = vrot.slane %v1094_v51, 6 }
  0xbe   : > { %3766 = vrot.lane.b32.xlu0 %v3381_v26, %s8560_s7  ;;  %vm9506_vm4 = vmand %vm2030_vm3, %vm2159_vm12  ;;  %v1106_v42 = vshll.u32 %v8127_v45, 16  ;;  %v1773_v18 = vadd.s32 400, %v8661_v2  ;;  %v1099_v27 = vrot.slane %v1097_v38, 7  ;;  %v1774_v1 = vadd.s32 408, %v8661_v2 }
  0xbf   : > { %v3389_v41 = vsel %vm14975_vm6, %v3384_v0, %v3388_v24  ;;  %vm9515_vm1 = vmand %vm2031_vm2, %vm2160_vm5  ;;  %v1105_v45 = vrot.slane %v1103_v47, 6  ;;  %v1775_v0 = vadd.s32 416, %v8661_v2  ;;  %v1679_v49 = vsel %vm1549_vm15, %v1092_v17, %v1614_v29 }
  0xc0   : > { %3768 = vrot.lane.b32.xlu1 %v3389_v41, %s8560_s7  ;;  %vm2673_vm14 = vmpackc.low %vm9489_vm7, %vm9489_vm7  ;;  %v1108_v51 = vrot.slane %v1106_v42, 7  ;;  %v1100_v26 = vor.u32 %v1099_v27, %v1096_v44  ;;  %v1903_v38 = vadd.s32 %v8670_v7, %v1773_v18  ;;  %v3392_v42 = vor.u32 %v9494_v53, %v3388_v24 }
  0xc1   : > { %vm2674_vm13 = vmpackc.low %vm9500_vm10, %vm9500_vm10  ;;  %v2802_v35 = vsel %vm2673_vm14, 65537, %v15073_v34  ;;  %v1904_v17 = vadd.s32 %v8670_v7, %v1774_v1  ;;  %v1905_v18 = vadd.s32 %v8670_v7, %v1775_v0  ;;  %v1906_v41 = vadd.s32 %v8670_v7, %v1776_v32  ;;  %v8128_v1 = vld [vmem:[%s8687_s28 + $0xd8] sm:$0xff]  }
  0xc2   : > { %vm2675_vm3 = vmpackc.low %vm9506_vm4, %vm9506_vm4  ;;  %v2803_v47 = vsel %vm2674_vm13, 65537, %v15073_v34  ;;  %v9537_v25 = vor.u32 %v1108_v51, %v1105_v45  ;;  %v1101_v61 = vsel %vm868_vm0, %v9457_v22, %v1100_v26  ;;  %vm2032_vm2 = vcmp.ge.s32.totalorder %v1903_v38, 0  ;;  %v8129_v22 = vld [vmem:[%s8687_s28 + $0xe0] sm:$0xff]  }
  0xc3   : > { %vm2676_vm15 = vmpackc.low %vm9515_vm1, %vm9515_vm1  ;;  %v2804_v29 = vsel %vm2675_vm3, 65537, %v15073_v34  ;;  %v7800_v44 = vcombine.low %v2802_v35, %v2803_v47  ;;  %vm1550_vm11 = vcmp.ge.bf16.partialorder %v1101_v61, 0  ;;  %v1615_v27 = vmul.bf16 1036860877, %v1101_v61 }
  0xc4   : > { %v2805_v24 = vsel %vm2676_vm15, 65537, %v15073_v34  ;;  %v1110_v6 = vsel %vm868_vm0, %v1100_v26, %v9537_v25  ;;  %vm2033_vm5 = vcmp.ge.s32.totalorder %v1904_v17, 0  ;;  %vm2034_vm10 = vcmp.ge.s32.totalorder %v1905_v18, 0 }
  0xc5   : > { %v7801_v56 = vcombine.low %v2804_v29, %v2805_v24  ;;  %vm3102_vm8 = vcmp.ne.s16.totalorder %v7800_v44, 0  ;;  %vm1551_vm12 = vcmp.ge.bf16.partialorder %v1110_v6, 0  ;;  %v1616_v51 = vmul.bf16 1036860877, %v1110_v6 }
  0xc6   : > { %v9552_v45 = vsel %vm3102_vm8, %v1678_v63, 0  ;;  %vm2035_vm4 = vcmp.ge.s32.totalorder %v1906_v41, 0  ;;  %vm2161_vm1 = vcmp.lt.s32.totalorder %v1903_v38, 1200  ;;  %vm2162_vm14 = vcmp.lt.s32.totalorder %v1904_v17, 1200 }
  0xc7   : > { %15127 = vst [vmem:[#allocation58_spill] sm:$0xff] %v9552_v45  ;;  %vm3103_vm7 = vcmp.ne.s16.totalorder %v7801_v56, 0  ;;  %v9556_v0 = vshll.u32 %v9552_v45, 16  ;;  %v9559_v35 = vshrl.u32 %v9552_v45, 16  ;;  %vm2163_vm13 = vcmp.lt.s32.totalorder %v1905_v18, 1200  ;;  %vm9568_vm15 = vmand %vm2032_vm2, %vm2161_vm1 }
  0xc8   : > { %v9561_v32 = vsel %vm3103_vm7, %v1679_v49, 0  ;;  %vm2164_vm3 = vcmp.lt.s32.totalorder %v1906_v41, 1200  ;;  %vm9573_vm8 = vmand %vm2033_vm5, %vm2162_vm14  ;;  %v1112_v44 = vshrl.u32 %v8128_v1, 16  ;;  %v1115_v24 = vshll.u32 %v8128_v1, 16 }
  0xc9   : > { %15128 = vst [vmem:[#allocation59_spill] sm:$0xff] %v9556_v0  ;;  %15129 = vst [vmem:[#allocation60_spill] sm:$0xff] %v9559_v35  ;;  %v3396_v63 = vrot.slane %v9556_v0, 1  ;;  %v9565_v26 = vshll.u32 %v9561_v32, 16  ;;  %v9578_v49 = vshrl.u32 %v9561_v32, 16  ;;  %v1121_v56 = vshrl.u32 %v8129_v22, 16 }
  0xca   : > { %15130 = vst [vmem:[#allocation61_spill] sm:$0xff] %v9561_v32  ;;  %vm9584_vm2 = vmand %vm2034_vm10, %vm2163_vm13  ;;  %v1124_v17 = vshll.u32 %v8129_v22, 16  ;;  %v1114_v1 = vrot.slane %v1112_v44, 6  ;;  %v1117_v50 = vrot.slane %v1115_v24, 7  ;;  %v1680_v18 = vsel %vm1550_vm11, %v1101_v61, %v1615_v27 }
  0xcb   : > { %15131 = vst [vmem:[#allocation62_spill] sm:$0xff] %v9565_v26  ;;  %15136 = vst [vmem:[#allocation63_spill] sm:$0xff] %v9578_v49  ;;  %v3400_v45 = vor.u32 %v9559_v35, %v3396_v63  ;;  %v3404_v0 = vrot.slane %v9565_v26, 1  ;;  %v3397_v38 = vsel %vm14975_vm6, %v3392_v42, %v3396_v63  ;;  %v1123_v35 = vrot.slane %v1121_v56, 6 }
  0xcc   : > { %3770 = vrot.lane.b32.xlu0 %v3397_v38, %s8560_s7  ;;  %vm9590_vm5 = vmand %vm2035_vm4, %vm2164_vm3  ;;  %v1777_v26 = vadd.s32 432, %v8661_v2  ;;  %v1126_v22 = vrot.slane %v1124_v17, 7  ;;  %v1778_v41 = vadd.s32 440, %v8661_v2  ;;  %v1681_v63 = vsel %vm1551_vm12, %v1110_v6, %v1616_v51 }
  0xcd   : > { %v3405_v42 = vsel %vm14975_vm6, %v3400_v45, %v3404_v0  ;;  %vm2677_vm7 = vmpackc.low %vm9568_vm15, %vm9568_vm15  ;;  %v1118_v45 = vor.u32 %v1117_v50, %v1114_v1  ;;  %v1779_v61 = vadd.s32 448, %v8661_v2  ;;  %v3408_v47 = vor.u32 %v9578_v49, %v3404_v0 }
  0xce   : > { %3772 = vrot.lane.b32.xlu1 %v3405_v42, %s8560_s7  ;;  %vm2678_vm10 = vmpackc.low %vm9573_vm8, %vm9573_vm8  ;;  %v2806_v44 = vsel %vm2677_vm7, 65537, %v15073_v34  ;;  %v9613_v24 = vor.u32 %v1126_v22, %v1123_v35  ;;  %v1780_v6 = vadd.s32 456, %v8661_v2  ;;  %v1907_v29 = vadd.s32 %v8670_v7, %v1777_v26  ;;  %v8130_v42 = vld [vmem:[%s8687_s28 + $0xe8] sm:$0xff]  }
  0xcf   : > { %vm2679_vm11 = vmpackc.low %vm9584_vm2, %vm9584_vm2  ;;  %v2807_v27 = vsel %vm2678_vm10, 65537, %v15073_v34  ;;  %v1119_v53 = vsel %vm868_vm0, %v9537_v25, %v1118_v45  ;;  %v1908_v35 = vadd.s32 %v8670_v7, %v1778_v41  ;;  %v1909_v32 = vadd.s32 %v8670_v7, %v1779_v61 }
  0xd0   : > { %vm2680_vm12 = vmpackc.low %vm9590_vm5, %vm9590_vm5  ;;  %v2808_v50 = vsel %vm2679_vm11, 65537, %v15073_v34  ;;  %v7802_v51 = vcombine.low %v2806_v44, %v2807_v27  ;;  %v1128_v0 = vsel %vm868_vm0, %v1118_v45, %v9613_v24  ;;  %vm1552_vm1 = vcmp.ge.bf16.partialorder %v1119_v53, 0 }
  0xd1   : > { %v2809_v56 = vsel %vm2680_vm12, 65537, %v15073_v34  ;;  %v1617_v17 = vmul.bf16 1036860877, %v1119_v53  ;;  %vm1553_vm14 = vcmp.ge.bf16.partialorder %v1128_v0, 0  ;;  %v1618_v25 = vmul.bf16 1036860877, %v1128_v0 }
  0xd2   : > { %v7803_v38 = vcombine.low %v2808_v50, %v2809_v56  ;;  %vm3104_vm4 = vcmp.ne.s16.totalorder %v7802_v51, 0  ;;  %v1910_v26 = vadd.s32 %v8670_v7, %v1780_v6  ;;  %vm2036_vm3 = vcmp.ge.s32.totalorder %v1907_v29, 0 }
  0xd3   : > { %v9628_v1 = vsel %vm3104_vm4, %v1680_v18, 0  ;;  %vm2037_vm15 = vcmp.ge.s32.totalorder %v1908_v35, 0  ;;  %vm2038_vm8 = vcmp.ge.s32.totalorder %v1909_v32, 0  ;;  %v8131_v18 = vld [vmem:[%s8687_s28 + $0xf0] sm:$0xff]   ;;  %vm2165_vm5 = vcmp.lt.s32.totalorder %v1907_v29, 1200 }
  0xd4   : > { %15141 = vst [vmem:[#allocation64_spill] sm:$0xff] %v9628_v1  ;;  %vm3105_vm13 = vcmp.ne.s16.totalorder %v7803_v38, 0  ;;  %v9633_v22 = vshll.u32 %v9628_v1, 16  ;;  %v9636_v41 = vshrl.u32 %v9628_v1, 16  ;;  %vm2039_vm2 = vcmp.ge.s32.totalorder %v1910_v26, 0  ;;  %vm9645_vm12 = vmand %vm2036_vm3, %vm2165_vm5 }
  0xd5   : > { %v9638_v44 = vsel %vm3105_vm13, %v1681_v63, 0  ;;  %vm2166_vm7 = vcmp.lt.s32.totalorder %v1908_v35, 1200  ;;  %vm2167_vm10 = vcmp.lt.s32.totalorder %v1909_v32, 1200  ;;  %vm2168_vm11 = vcmp.lt.s32.totalorder %v1910_v26, 1200 }
  0xd6   : > { %15142 = vst [vmem:[#allocation65_spill] sm:$0xff] %v9633_v22  ;;  %15143 = vst [vmem:[#allocation66_spill] sm:$0xff] %v9636_v41  ;;  %v3412_v45 = vrot.slane %v9633_v22, 1  ;;  %v9643_v61 = vshll.u32 %v9638_v44, 16  ;;  %v9650_v63 = vshrl.u32 %v9638_v44, 16  ;;  %v1130_v6 = vshrl.u32 %v8130_v42, 16 }
  0xd7   : > { %15144 = vst [vmem:[#allocation67_spill] sm:$0xff] %v9638_v44  ;;  %vm9656_vm4 = vmand %vm2037_vm15, %vm2166_vm7  ;;  %v1133_v38 = vshll.u32 %v8130_v42, 16  ;;  %v1139_v22 = vshrl.u32 %v8131_v18, 16  ;;  %v1682_v35 = vsel %vm1552_vm1, %v1119_v53, %v1617_v17  ;;  %v1784_v53 = vadd.s32 488, %v8661_v2 }
  0xd8   : > { %15145 = vst [vmem:[#allocation68_spill] sm:$0xff] %v9643_v61  ;;  %15148 = vst [vmem:[#allocation69_spill] sm:$0xff] %v9650_v63  ;;  %v3416_v50 = vor.u32 %v9636_v41, %v3412_v45  ;;  %v3420_v51 = vrot.slane %v9643_v61, 1  ;;  %v3413_v56 = vsel %vm14975_vm6, %v3408_v47, %v3412_v45  ;;  %v1132_v44 = vrot.slane %v1130_v6, 6 }
  0xd9   : > { %3774 = vrot.lane.b32.xlu0 %v3413_v56, %s8560_s7  ;;  %vm9662_vm13 = vmand %vm2038_vm8, %vm2167_vm10  ;;  %v1142_v41 = vshll.u32 %v8131_v18, 16  ;;  %v1781_v61 = vadd.s32 464, %v8661_v2  ;;  %v1135_v32 = vrot.slane %v1133_v38, 7  ;;  %v1782_v45 = vadd.s32 472, %v8661_v2 }
  0xda   : > { %v3421_v47 = vsel %vm14975_vm6, %v3416_v50, %v3420_v51  ;;  %vm9671_vm3 = vmand %vm2039_vm2, %vm2168_vm11  ;;  %v1141_v18 = vrot.slane %v1139_v22, 6  ;;  %v1783_v50 = vadd.s32 480, %v8661_v2  ;;  %v1683_v17 = vsel %vm1553_vm14, %v1128_v0, %v1618_v25 }
  0xdb   : > { %3776 = vrot.lane.b32.xlu1 %v3421_v47, %s8560_s7  ;;  %vm2681_vm15 = vmpackc.low %vm9645_vm12, %vm9645_vm12  ;;  %v1144_v6 = vrot.slane %v1142_v41, 7  ;;  %v1136_v56 = vor.u32 %v1135_v32, %v1132_v44  ;;  %v1911_v38 = vadd.s32 %v8670_v7, %v1781_v61  ;;  %v3424_v41 = vor.u32 %v9650_v63, %v3420_v51 }
  0xdc   : > { %vm2682_vm1 = vmpackc.low %vm9656_vm4, %vm9656_vm4  ;;  %v2810_v26 = vsel %vm2681_vm15, 65537, %v15073_v34  ;;  %v1912_v0 = vadd.s32 %v8670_v7, %v1782_v45  ;;  %v1913_v61 = vadd.s32 %v8670_v7, %v1783_v50  ;;  %v1914_v47 = vadd.s32 %v8670_v7, %v1784_v53  ;;  %v8132_v45 = vld [vmem:[%s8687_s28 + $0xf8] sm:$0xff]  }
  0xdd   : > { %vm2683_vm8 = vmpackc.low %vm9662_vm13, %vm9662_vm13  ;;  %v2811_v22 = vsel %vm2682_vm1, 65537, %v15073_v34  ;;  %v9693_v27 = vor.u32 %v1144_v6, %v1141_v18  ;;  %v1137_v1 = vsel %vm868_vm0, %v9613_v24, %v1136_v56  ;;  %vm2040_vm2 = vcmp.ge.s32.totalorder %v1911_v38, 0  ;;  %v8133_v24 = vld [vmem:[%s8687_s28 + $0x100] sm:$0xff]  }
  0xde   : > { %vm2684_vm14 = vmpackc.low %vm9671_vm3, %vm9671_vm3  ;;  %v2812_v25 = vsel %vm2683_vm8, 65537, %v15073_v34  ;;  %v7804_v44 = vcombine.low %v2810_v26, %v2811_v22  ;;  %vm1554_vm7 = vcmp.ge.bf16.partialorder %v1137_v1, 0  ;;  %v1619_v32 = vmul.bf16 1036860877, %v1137_v1 }
  0xdf   : > { %v2813_v51 = vsel %vm2684_vm14, 65537, %v15073_v34  ;;  %v1146_v29 = vsel %vm868_vm0, %v1136_v56, %v9693_v27  ;;  %vm2041_vm11 = vcmp.ge.s32.totalorder %v1912_v0, 0  ;;  %vm2042_vm4 = vcmp.ge.s32.totalorder %v1913_v61, 0 }
  0xe0   : > { %v7805_v42 = vcombine.low %v2812_v25, %v2813_v51  ;;  %vm3106_vm5 = vcmp.ne.s16.totalorder %v7804_v44, 0  ;;  %vm1555_vm10 = vcmp.ge.bf16.partialorder %v1146_v29, 0  ;;  %v1620_v6 = vmul.bf16 1036860877, %v1146_v29 }
  0xe1   : > { %v9708_v18 = vsel %vm3106_vm5, %v1682_v35, 0  ;;  %vm2043_vm13 = vcmp.ge.s32.totalorder %v1914_v47, 0  ;;  %vm2169_vm3 = vcmp.lt.s32.totalorder %v1911_v38, 1200  ;;  %vm2170_vm15 = vcmp.lt.s32.totalorder %v1912_v0, 1200 }
  0xe2   : > { %15155 = vst [vmem:[#allocation70_spill] sm:$0xff] %v9708_v18  ;;  %vm3107_vm12 = vcmp.ne.s16.totalorder %v7805_v42, 0  ;;  %v9712_v50 = vshll.u32 %v9708_v18, 16  ;;  %v9715_v26 = vshrl.u32 %v9708_v18, 16  ;;  %vm2171_vm1 = vcmp.lt.s32.totalorder %v1913_v61, 1200  ;;  %vm9724_vm14 = vmand %vm2040_vm2, %vm2169_vm3 }
  0xe3   : > { %v9717_v53 = vsel %vm3107_vm12, %v1683_v17, 0  ;;  %vm2172_vm8 = vcmp.lt.s32.totalorder %v1914_v47, 1200  ;;  %vm9729_vm5 = vmand %vm2041_vm11, %vm2170_vm15  ;;  %v1148_v44 = vshrl.u32 %v8132_v45, 16  ;;  %v1151_v51 = vshll.u32 %v8132_v45, 16 }
  0xe4   : > { %15156 = vst [vmem:[#allocation71_spill] sm:$0xff] %v9712_v50  ;;  %15157 = vst [vmem:[#allocation72_spill] sm:$0xff] %v9715_v26  ;;  %v3428_v35 = vrot.slane %v9712_v50, 1  ;;  %v9721_v56 = vshll.u32 %v9717_v53, 16  ;;  %v9734_v17 = vshrl.u32 %v9717_v53, 16  ;;  %v1157_v42 = vshrl.u32 %v8133_v24, 16 }
  0xe5   : > { %15158 = vst [vmem:[#allocation73_spill] sm:$0xff] %v9717_v53  ;;  %vm9740_vm2 = vmand %vm2042_vm4, %vm2171_vm1  ;;  %v1160_v0 = vshll.u32 %v8133_v24, 16  ;;  %v1150_v45 = vrot.slane %v1148_v44, 6  ;;  %v1153_v49 = vrot.slane %v1151_v51, 7  ;;  %v1684_v61 = vsel %vm1554_vm7, %v1137_v1, %v1619_v32 }
  0xe6   : > { %15159 = vst [vmem:[#allocation74_spill] sm:$0xff] %v9721_v56  ;;  %15164 = vst [vmem:[#allocation75_spill] sm:$0xff] %v9734_v17  ;;  %v3432_v18 = vor.u32 %v9715_v26, %v3428_v35  ;;  %v3436_v50 = vrot.slane %v9721_v56, 1  ;;  %v3429_v38 = vsel %vm14975_vm6, %v3424_v41, %v3428_v35  ;;  %v1159_v26 = vrot.slane %v1157_v42, 6 }
  0xe7   : > { %3778 = vrot.lane.b32.xlu0 %v3429_v38, %s8560_s7  ;;  %vm9746_vm11 = vmand %vm2043_vm13, %vm2172_vm8  ;;  %v1785_v56 = vadd.s32 496, %v8661_v2  ;;  %v1162_v24 = vrot.slane %v1160_v0, 7  ;;  %v1786_v47 = vadd.s32 504, %v8661_v2  ;;  %v1685_v35 = vsel %vm1555_vm10, %v1146_v29, %v1620_v6 }
  0xe8   : > { %v3437_v41 = vsel %vm14975_vm6, %v3432_v18, %v3436_v50  ;;  %vm2685_vm12 = vmpackc.low %vm9724_vm14, %vm9724_vm14  ;;  %v1154_v18 = vor.u32 %v1153_v49, %v1150_v45  ;;  %v1787_v1 = vadd.s32 512, %v8661_v2  ;;  %v3440_v22 = vor.u32 %v9734_v17, %v3436_v50 }
  0xe9   : > { %3780 = vrot.lane.b32.xlu1 %v3437_v41, %s8560_s7  ;;  %vm2686_vm4 = vmpackc.low %vm9729_vm5, %vm9729_vm5  ;;  %v2814_v44 = vsel %vm2685_vm12, 65537, %v15073_v34  ;;  %v9769_v51 = vor.u32 %v1162_v24, %v1159_v26  ;;  %v1788_v29 = vadd.s32 520, %v8661_v2  ;;  %v1915_v25 = vadd.s32 %v8670_v7, %v1785_v56  ;;  %v8134_v41 = vld [vmem:[%s8687_s28 + $0x108] sm:$0xff]  }
  0xea   : > { %vm2687_vm7 = vmpackc.low %vm9740_vm2, %vm9740_vm2  ;;  %v2815_v32 = vsel %vm2686_vm4, 65537, %v15073_v34  ;;  %v1155_v63 = vsel %vm868_vm0, %v9693_v27, %v1154_v18  ;;  %v1916_v26 = vadd.s32 %v8670_v7, %v1786_v47  ;;  %v1917_v53 = vadd.s32 %v8670_v7, %v1787_v1 }
  0xeb   : > { %vm2688_vm10 = vmpackc.low %vm9746_vm11, %vm9746_vm11  ;;  %v2816_v49 = vsel %vm2687_vm7, 65537, %v15073_v34  ;;  %v7806_v6 = vcombine.low %v2814_v44, %v2815_v32  ;;  %v1164_v50 = vsel %vm868_vm0, %v1154_v18, %v9769_v51  ;;  %vm1556_vm3 = vcmp.ge.bf16.partialorder %v1155_v63, 0 }
  0xec   : > { %v2817_v42 = vsel %vm2688_vm10, 65537, %v15073_v34  ;;  %v1621_v0 = vmul.bf16 1036860877, %v1155_v63  ;;  %vm1557_vm15 = vcmp.ge.bf16.partialorder %v1164_v50, 0  ;;  %v1622_v27 = vmul.bf16 1036860877, %v1164_v50 }
  0xed   : > { %v7807_v38 = vcombine.low %v2816_v49, %v2817_v42  ;;  %vm3108_vm13 = vcmp.ne.s16.totalorder %v7806_v6, 0  ;;  %v1918_v56 = vadd.s32 %v8670_v7, %v1788_v29  ;;  %vm2044_vm8 = vcmp.ge.s32.totalorder %v1915_v25, 0 }
  0xee   : > { %v9784_v45 = vsel %vm3108_vm13, %v1684_v61, 0  ;;  %vm2045_vm14 = vcmp.ge.s32.totalorder %v1916_v26, 0  ;;  %vm2046_vm5 = vcmp.ge.s32.totalorder %v1917_v53, 0  ;;  %v8135_v61 = vld [vmem:[%s8687_s28 + $0x110] sm:$0xff]   ;;  %vm2173_vm11 = vcmp.lt.s32.totalorder %v1915_v25, 1200 }
  0xef   : > { %15169 = vst [vmem:[#allocation76_spill] sm:$0xff] %v9784_v45  ;;  %vm3109_vm1 = vcmp.ne.s16.totalorder %v7807_v38, 0  ;;  %v9789_v24 = vshll.u32 %v9784_v45, 16  ;;  %v9792_v47 = vshrl.u32 %v9784_v45, 16  ;;  %vm2047_vm2 = vcmp.ge.s32.totalorder %v1918_v56, 0  ;;  %vm9801_vm10 = vmand %vm2044_vm8, %vm2173_vm11 }
  0xf0   : > { %v9794_v44 = vsel %vm3109_vm1, %v1685_v35, 0  ;;  %vm2174_vm12 = vcmp.lt.s32.totalorder %v1916_v26, 1200  ;;  %vm2175_vm4 = vcmp.lt.s32.totalorder %v1917_v53, 1200  ;;  %vm2176_vm7 = vcmp.lt.s32.totalorder %v1918_v56, 1200 }
  0xf1   : > { %15170 = vst [vmem:[#allocation77_spill] sm:$0xff] %v9789_v24  ;;  %15171 = vst [vmem:[#allocation78_spill] sm:$0xff] %v9792_v47  ;;  %v3444_v18 = vrot.slane %v9789_v24, 1  ;;  %v9799_v1 = vshll.u32 %v9794_v44, 16  ;;  %v9806_v35 = vshrl.u32 %v9794_v44, 16  ;;  %v1166_v29 = vshrl.u32 %v8134_v41, 16 }
  0xf2   : > { %15172 = vst [vmem:[#allocation79_spill] sm:$0xff] %v9794_v44  ;;  %vm9812_vm13 = vmand %vm2045_vm14, %vm2174_vm12  ;;  %v1169_v38 = vshll.u32 %v8134_v41, 16  ;;  %v1175_v24 = vshrl.u32 %v8135_v61, 16  ;;  %v1686_v26 = vsel %vm1556_vm3, %v1155_v63, %v1621_v0  ;;  %v1792_v63 = vadd.s32 552, %v8661_v2 }
  0xf3   : > { %15173 = vst [vmem:[#allocation80_spill] sm:$0xff] %v9799_v1  ;;  %15176 = vst [vmem:[#allocation81_spill] sm:$0xff] %v9806_v35  ;;  %v3448_v49 = vor.u32 %v9792_v47, %v3444_v18  ;;  %v3452_v6 = vrot.slane %v9799_v1, 1  ;;  %v3445_v42 = vsel %vm14975_vm6, %v3440_v22, %v3444_v18  ;;  %v1168_v44 = vrot.slane %v1166_v29, 6 }
  0xf4   : > { %3782 = vrot.lane.b32.xlu0 %v3445_v42, %s8560_s7  ;;  %vm9818_vm1 = vmand %vm2046_vm5, %vm2175_vm4  ;;  %v1178_v47 = vshll.u32 %v8135_v61, 16  ;;  %v1789_v1 = vadd.s32 528, %v8661_v2  ;;  %v1171_v53 = vrot.slane %v1169_v38, 7  ;;  %v1790_v18 = vadd.s32 536, %v8661_v2 }
  0xf5   : > { %v3453_v22 = vsel %vm14975_vm6, %v3448_v49, %v3452_v6  ;;  %vm9827_vm8 = vmand %vm2047_vm2, %vm2176_vm7  ;;  %v1177_v61 = vrot.slane %v1175_v24, 6  ;;  %v1791_v49 = vadd.s32 544, %v8661_v2  ;;  %v1687_v0 = vsel %vm1557_vm15, %v1164_v50, %v1622_v27 }
  0xf6   : > { %3784 = vrot.lane.b32.xlu1 %v3453_v22, %s8560_s7  ;;  %vm2689_vm14 = vmpackc.low %vm9801_vm10, %vm9801_vm10  ;;  %v1180_v29 = vrot.slane %v1178_v47, 7  ;;  %v1172_v42 = vor.u32 %v1171_v53, %v1168_v44  ;;  %v1919_v38 = vadd.s32 %v8670_v7, %v1789_v1  ;;  %v3456_v47 = vor.u32 %v9806_v35, %v3452_v6 }
  0xf7   : > { %vm2690_vm3 = vmpackc.low %vm9812_vm13, %vm9812_vm13  ;;  %v2818_v56 = vsel %vm2689_vm14, 65537, %v15073_v34  ;;  %v1920_v50 = vadd.s32 %v8670_v7, %v1790_v18  ;;  %v1921_v1 = vadd.s32 %v8670_v7, %v1791_v49  ;;  %v1922_v22 = vadd.s32 %v8670_v7, %v1792_v63  ;;  %v8136_v18 = vld [vmem:[%s8687_s28 + $0x118] sm:$0xff]  }
  0xf8   : > { %vm2691_vm5 = vmpackc.low %vm9818_vm1, %vm9818_vm1  ;;  %v2819_v24 = vsel %vm2690_vm3, 65537, %v15073_v34  ;;  %v9849_v32 = vor.u32 %v1180_v29, %v1177_v61  ;;  %v1173_v45 = vsel %vm868_vm0, %v9769_v51, %v1172_v42  ;;  %vm2048_vm2 = vcmp.ge.s32.totalorder %v1919_v38, 0  ;;  %v8137_v51 = vld [vmem:[%s8687_s28 + $0x120] sm:$0xff]  }
  0xf9   : > { %vm2692_vm15 = vmpackc.low %vm9827_vm8, %vm9827_vm8  ;;  %v2820_v27 = vsel %vm2691_vm5, 65537, %v15073_v34  ;;  %v7808_v44 = vcombine.low %v2818_v56, %v2819_v24  ;;  %vm1558_vm12 = vcmp.ge.bf16.partialorder %v1173_v45, 0  ;;  %v1623_v53 = vmul.bf16 1036860877, %v1173_v45 }
  0xfa   : > { %v2821_v6 = vsel %vm2692_vm15, 65537, %v15073_v34  ;;  %v1182_v25 = vsel %vm868_vm0, %v1172_v42, %v9849_v32  ;;  %vm2049_vm7 = vcmp.ge.s32.totalorder %v1920_v50, 0  ;;  %vm2050_vm13 = vcmp.ge.s32.totalorder %v1921_v1, 0 }
  0xfb   : > { %v7809_v41 = vcombine.low %v2820_v27, %v2821_v6  ;;  %vm3110_vm11 = vcmp.ne.s16.totalorder %v7808_v44, 0  ;;  %vm1559_vm4 = vcmp.ge.bf16.partialorder %v1182_v25, 0  ;;  %v1624_v29 = vmul.bf16 1036860877, %v1182_v25 }
  0xfc   : > { %v9864_v61 = vsel %vm3110_vm11, %v1686_v26, 0  ;;  %vm2051_vm1 = vcmp.ge.s32.totalorder %v1922_v22, 0  ;;  %vm2177_vm8 = vcmp.lt.s32.totalorder %v1919_v38, 1200  ;;  %vm2178_vm14 = vcmp.lt.s32.totalorder %v1920_v50, 1200 }
  0xfd   : > { %15183 = vst [vmem:[#allocation82_spill] sm:$0xff] %v9864_v61  ;;  %vm3111_vm10 = vcmp.ne.s16.totalorder %v7809_v41, 0  ;;  %v9868_v49 = vshll.u32 %v9864_v61, 16  ;;  %v9871_v56 = vshrl.u32 %v9864_v61, 16  ;;  %vm2179_vm3 = vcmp.lt.s32.totalorder %v1921_v1, 1200  ;;  %vm9880_vm15 = vmand %vm2048_vm2, %vm2177_vm8 }
  0xfe   : > { %v9873_v63 = vsel %vm3111_vm10, %v1687_v0, 0  ;;  %vm2180_vm5 = vcmp.lt.s32.totalorder %v1922_v22, 1200  ;;  %vm9885_vm11 = vmand %vm2049_vm7, %vm2178_vm14  ;;  %v1184_v44 = vshrl.u32 %v8136_v18, 16  ;;  %v1187_v6 = vshll.u32 %v8136_v18, 16 }
  0xff   : > { %15184 = vst [vmem:[#allocation83_spill] sm:$0xff] %v9868_v49  ;;  %15185 = vst [vmem:[#allocation84_spill] sm:$0xff] %v9871_v56  ;;  %v3460_v26 = vrot.slane %v9868_v49, 1  ;;  %v9877_v42 = vshll.u32 %v9873_v63, 16  ;;  %v9890_v0 = vshrl.u32 %v9873_v63, 16  ;;  %v1193_v41 = vshrl.u32 %v8137_v51, 16 }
 0x100   : > { %15186 = vst [vmem:[#allocation85_spill] sm:$0xff] %v9873_v63  ;;  %vm9896_vm2 = vmand %vm2050_vm13, %vm2179_vm3  ;;  %v1196_v50 = vshll.u32 %v8137_v51, 16  ;;  %v1186_v18 = vrot.slane %v1184_v44, 6  ;;  %v1189_v11 = vrot.slane %v1187_v6, 7  ;;  %v1793_v16 = vadd.s32 560, %v8661_v2 }
 0x101   : > { %v3464_v61 = vor.u32 %v9871_v56, %v3460_v26  ;;  %v3468_v49 = vrot.slane %v9877_v42, 1  ;;  %v3461_v38 = vsel %vm14975_vm6, %v3456_v47, %v3460_v26  ;;  %vm9902_vm7 = vmand %vm2051_vm1, %vm2180_vm5  ;;  %v1195_v56 = vrot.slane %v1193_v41, 6 }
 0x102   : > { %3786 = vrot.lane.b32.xlu0 %v3461_v38, %s8560_s7  ;;  %v1688_v1 = vsel %vm1558_vm12, %v1173_v45, %v1623_v53  ;;  %vm2693_vm10 = vmpackc.low %vm9880_vm15, %vm9880_vm15  ;;  %v1198_v51 = vrot.slane %v1196_v50, 7  ;;  %v1794_v22 = vadd.s32 568, %v8661_v2  ;;  %v1689_v26 = vsel %vm1559_vm4, %v1182_v25, %v1624_v29 }
 0x103   : > { %v3469_v47 = vsel %vm14975_vm6, %v3464_v61, %v3468_v49  ;;  %vm2694_vm13 = vmpackc.low %vm9885_vm11, %vm9885_vm11  ;;  %v2822_v44 = vsel %vm2693_vm10, 65537, %v15073_v34  ;;  %v1190_v61 = vor.u32 %v1189_v11, %v1186_v18  ;;  %v1795_v45 = vadd.s32 576, %v8661_v2 }
 0x104   : > { %3788 = vrot.lane.b32.xlu1 %v3469_v47, %s8560_s7  ;;  %vm2695_vm12 = vmpackc.low %vm9896_vm2, %vm9896_vm2  ;;  %v2823_v53 = vsel %vm2694_vm13, 65537, %v15073_v34  ;;  %v3472_v24 = vor.u32 %v9890_v0, %v3468_v49  ;;  %v9925_v6 = vor.u32 %v1198_v51, %v1195_v56  ;;  %v1796_v25 = vadd.s32 584, %v8661_v2  ;;  %v8138_v47 = vld [vmem:[%s8687_s28 + $0x128] sm:$0xff]  }
 0x105   : > { %vm2696_vm4 = vmpackc.low %vm9902_vm7, %vm9902_vm7  ;;  %v2824_v11 = vsel %vm2695_vm12, 65537, %v15073_v34  ;;  %v7810_v29 = vcombine.low %v2822_v44, %v2823_v53  ;;  %v1191_v35 = vsel %vm868_vm0, %v9849_v32, %v1190_v61  ;;  %v1923_v27 = vadd.s32 %v8670_v7, %v1793_v16 }
 0x106   : > { %v2825_v41 = vsel %vm2696_vm4, 65537, %v15073_v34  ;;  %v1200_v49 = vsel %vm868_vm0, %v1190_v61, %v9925_v6  ;;  %v1924_v56 = vadd.s32 %v8670_v7, %v1794_v22  ;;  %v1925_v17 = vadd.s32 %v8670_v7, %v1795_v45 }
 0x107   : > { %v7811_v38 = vcombine.low %v2824_v11, %v2825_v41  ;;  %vm3112_vm1 = vcmp.ne.s16.totalorder %v7810_v29, 0  ;;  %vm1560_vm8 = vcmp.ge.bf16.partialorder %v1191_v35, 0  ;;  %v1625_v50 = vmul.bf16 1036860877, %v1191_v35 }
 0x108   : > { %v9940_v18 = vsel %vm3112_vm1, %v1688_v1, 0  ;;  %vm1561_vm14 = vcmp.ge.bf16.partialorder %v1200_v49, 0  ;;  %v1626_v32 = vmul.bf16 1036860877, %v1200_v49  ;;  %v1926_v16 = vadd.s32 %v8670_v7, %v1796_v25  ;;  %v8139_v1 = vld [vmem:[%s8687_s28 + $0x130] sm:$0xff]  }
 0x109   : > { %vm3113_vm3 = vcmp.ne.s16.totalorder %v7811_v38, 0  ;;  %v9945_v51 = vshll.u32 %v9940_v18, 16  ;;  %v9948_v22 = vshrl.u32 %v9940_v18, 16  ;;  %vm2052_vm5 = vcmp.ge.s32.totalorder %v1923_v27, 0 }
 0x10a   : > { %v9950_v44 = vsel %vm3113_vm3, %v1689_v26, 0  ;;  %vm2053_vm15 = vcmp.ge.s32.totalorder %v1924_v56, 0  ;;  %vm2054_vm11 = vcmp.ge.s32.totalorder %v1925_v17, 0  ;;  %vm2055_vm2 = vcmp.ge.s32.totalorder %v1926_v16, 0 }
 0x10b   : > { %v3476_v61 = vrot.slane %v9945_v51, 1  ;;  %v9955_v45 = vshll.u32 %v9950_v44, 16  ;;  %vm2181_vm7 = vcmp.lt.s32.totalorder %v1923_v27, 1200  ;;  %vm2182_vm10 = vcmp.lt.s32.totalorder %v1924_v56, 1200 }
 0x10c   : > { %vm2183_vm13 = vcmp.lt.s32.totalorder %v1925_v17, 1200  ;;  %vm2184_vm12 = vcmp.lt.s32.totalorder %v1926_v16, 1200  ;;  %vm9957_vm4 = vmand %vm2052_vm5, %vm2181_vm7  ;;  %v9962_v26 = vshrl.u32 %v9950_v44, 16  ;;  %v1202_v25 = vshrl.u32 %v8138_v47, 16 }
 0x10d   : > { %v3480_v11 = vor.u32 %v9948_v22, %v3476_v61  ;;  %v3484_v29 = vrot.slane %v9955_v45, 1  ;;  %v3477_v41 = vsel %vm14975_vm6, %v3472_v24, %v3476_v61  ;;  %vm9968_vm1 = vmand %vm2053_vm15, %vm2182_vm10  ;;  %v1205_v38 = vshll.u32 %v8138_v47, 16 }
 0x10e   : > { %3790 = vrot.lane.b32.xlu0 %v3477_v41, %s8560_s7  ;;  %vm9974_vm3 = vmand %vm2054_vm11, %vm2183_vm13  ;;  %v1204_v13 = vrot.slane %v1202_v25, 6  ;;  %v1211_v39 = vshrl.u32 %v8139_v1, 16  ;;  %v1214_v52 = vshll.u32 %v8139_v1, 16  ;;  %v1797_v59 = vadd.s32 592, %v8661_v2 }
 0x10f   : > { %v3485_v24 = vsel %vm14975_vm6, %v3480_v11, %v3484_v29  ;;  %v1690_v56 = vsel %vm1560_vm8, %v1191_v35, %v1625_v50  ;;  %vm9983_vm5 = vmand %vm2055_vm2, %vm2184_vm12  ;;  %v1207_v17 = vrot.slane %v1205_v38, 7  ;;  %v1798_v61 = vadd.s32 600, %v8661_v2 }
 0x110   : > { %3792 = vrot.lane.b32.xlu1 %v3485_v24, %s8560_s7  ;;  %vm2697_vm15 = vmpackc.low %vm9957_vm4, %vm9957_vm4  ;;  %v1213_v1 = vrot.slane %v1211_v39, 6  ;;  %v1216_v25 = vrot.slane %v1214_v52, 7  ;;  %v1799_v11 = vadd.s32 608, %v8661_v2  ;;  %v1800_v35 = vadd.s32 616, %v8661_v2 }
 0x111   : > { %v1691_v50 = vsel %vm1561_vm14, %v1200_v49, %v1626_v32  ;;  %vm2698_vm8 = vmpackc.low %vm9968_vm1, %vm9968_vm1  ;;  %v2826_v16 = vsel %vm2697_vm15, 65537, %v15073_v34  ;;  %v1208_v41 = vor.u32 %v1207_v17, %v1204_v13  ;;  %v1927_v38 = vadd.s32 %v8670_v7, %v1797_v59 }
 0x112   : > { %vm2699_vm11 = vmpackc.low %vm9974_vm3, %vm9974_vm3  ;;  %v2827_v52 = vsel %vm2698_vm8, 65537, %v15073_v34  ;;  %v3488_v39 = vor.u32 %v9962_v26, %v3484_v29  ;;  %v10005_v53 = vor.u32 %v1216_v25, %v1213_v1  ;;  %v1928_v49 = vadd.s32 %v8670_v7, %v1798_v61  ;;  %v8140_v61 = vld [vmem:[%s8687_s28 + $0x138] sm:$0xff]  }
 0x113   : > { %vm2700_vm14 = vmpackc.low %vm9983_vm5, %vm9983_vm5  ;;  %v2828_v13 = vsel %vm2699_vm11, 65537, %v15073_v34  ;;  %v7812_v59 = vcombine.low %v2826_v16, %v2827_v52  ;;  %v1209_v31 = vsel %vm868_vm0, %v9925_v6, %v1208_v41  ;;  %v1929_v32 = vadd.s32 %v8670_v7, %v1799_v11  ;;  %v8141_v6 = vld [vmem:[%s8687_s28 + $0x140] sm:$0xff]  }
 0x114   : > { %v2829_v29 = vsel %vm2700_vm14, 65537, %v15073_v34  ;;  %v1218_v27 = vsel %vm868_vm0, %v1208_v41, %v10005_v53  ;;  %v1930_v24 = vadd.s32 %v8670_v7, %v1800_v35  ;;  %vm2056_vm2 = vcmp.ge.s32.totalorder %v1927_v38, 0 }
 0x115   : > { %v7813_v47 = vcombine.low %v2828_v13, %v2829_v29  ;;  %vm3114_vm7 = vcmp.ne.s16.totalorder %v7812_v59, 0  ;;  %vm1562_vm10 = vcmp.ge.bf16.partialorder %v1209_v31, 0  ;;  %v1627_v17 = vmul.bf16 1036860877, %v1209_v31 }
 0x116   : > { %v10020_v1 = vsel %vm3114_vm7, %v1690_v56, 0  ;;  %vm1563_vm13 = vcmp.ge.bf16.partialorder %v1218_v27, 0  ;;  %v1628_v25 = vmul.bf16 1036860877, %v1218_v27  ;;  %vm2057_vm12 = vcmp.ge.s32.totalorder %v1928_v49, 0 }
 0x117   : > { %vm3115_vm4 = vcmp.ne.s16.totalorder %v7813_v47, 0  ;;  %v10024_v11 = vshll.u32 %v10020_v1, 16  ;;  %v10027_v16 = vshrl.u32 %v10020_v1, 16  ;;  %vm2058_vm1 = vcmp.ge.s32.totalorder %v1929_v32, 0 }
 0x118   : > { %v10029_v35 = vsel %vm3115_vm4, %v1691_v50, 0  ;;  %vm2059_vm3 = vcmp.ge.s32.totalorder %v1930_v24, 0  ;;  %vm2185_vm5 = vcmp.lt.s32.totalorder %v1927_v38, 1200  ;;  %vm2186_vm15 = vcmp.lt.s32.totalorder %v1928_v49, 1200 }
 0x119   : > { %v3492_v56 = vrot.slane %v10024_v11, 1  ;;  %v10033_v41 = vshll.u32 %v10029_v35, 16  ;;  %vm2187_vm8 = vcmp.lt.s32.totalorder %v1929_v32, 1200  ;;  %vm2188_vm11 = vcmp.lt.s32.totalorder %v1930_v24, 1200  ;;  %vm10036_vm14 = vmand %vm2056_vm2, %vm2185_vm5 }
 0x11a   : > { %vm10041_vm7 = vmand %vm2057_vm12, %vm2186_vm15  ;;  %v10046_v50 = vshrl.u32 %v10029_v35, 16  ;;  %v1220_v59 = vshrl.u32 %v8140_v61, 16  ;;  %v1223_v29 = vshll.u32 %v8140_v61, 16  ;;  %v1229_v47 = vshrl.u32 %v8141_v6, 16 }
 0x11b   : > { %v3496_v62 = vor.u32 %v10027_v16, %v3492_v56  ;;  %v3500_v14 = vrot.slane %v10033_v41, 1  ;;  %v3493_v38 = vsel %vm14975_vm6, %v3488_v39, %v3492_v56  ;;  %vm10052_vm2 = vmand %vm2058_vm1, %vm2187_vm8  ;;  %v1232_v49 = vshll.u32 %v8141_v6, 16 }
 0x11c   : > { %3794 = vrot.lane.b32.xlu0 %v3493_v38, %s8560_s7  ;;  %vm10058_vm12 = vmand %vm2059_vm3, %vm2188_vm11  ;;  %v1222_v61 = vrot.slane %v1220_v59, 6  ;;  %v1225_v30 = vrot.slane %v1223_v29, 7  ;;  %v1231_v36 = vrot.slane %v1229_v47, 6  ;;  %v1801_v37 = vadd.s32 624, %v8661_v2 }
 0x11d   : > { %v3501_v39 = vsel %vm14975_vm6, %v3496_v62, %v3500_v14  ;;  %v1692_v32 = vsel %vm1562_vm10, %v1209_v31, %v1627_v17  ;;  %vm2701_vm4 = vmpackc.low %vm10036_vm14, %vm10036_vm14  ;;  %v1234_v6 = vrot.slane %v1232_v49, 7  ;;  %v1802_v24 = vadd.s32 632, %v8661_v2 }
 0x11e   : > { %3796 = vrot.lane.b32.xlu1 %v3501_v39, %s8560_s7  ;;  %v1693_v56 = vsel %vm1563_vm13, %v1218_v27, %v1628_v25  ;;  %vm2702_vm1 = vmpackc.low %vm10041_vm7, %vm10041_vm7  ;;  %v2830_v59 = vsel %vm2701_vm4, 65537, %v15073_v34  ;;  %v1226_v62 = vor.u32 %v1225_v30, %v1222_v61  ;;  %v1803_v31 = vadd.s32 640, %v8661_v2  ;;  %v8142_v39 = vld [vmem:[%s8687_s28 + $0x148] sm:$0xff]  }
 0x11f   : > { %vm2703_vm10 = vmpackc.low %vm10052_vm2, %vm10052_vm2  ;;  %v2831_v17 = vsel %vm2702_vm1, 65537, %v15073_v34  ;;  %v3504_v52 = vor.u32 %v10046_v50, %v3500_v14  ;;  %v10081_v29 = vor.u32 %v1234_v6, %v1231_v36  ;;  %v1804_v27 = vadd.s32 648, %v8661_v2 }
 0x120   : > { %vm2704_vm13 = vmpackc.low %vm10058_vm12, %vm10058_vm12  ;;  %v2832_v30 = vsel %vm2703_vm10, 65537, %v15073_v34  ;;  %v7814_v25 = vcombine.low %v2830_v59, %v2831_v17  ;;  %v1227_v19 = vsel %vm868_vm0, %v10005_v53, %v1226_v62  ;;  %v1931_v13 = vadd.s32 %v8670_v7, %v1801_v37 }
 0x121   : > { %v2833_v47 = vsel %vm2704_vm13, 65537, %v15073_v34  ;;  %v1236_v36 = vsel %vm868_vm0, %v1226_v62, %v10081_v29  ;;  %v1932_v14 = vadd.s32 %v8670_v7, %v1802_v24  ;;  %v1933_v20 = vadd.s32 %v8670_v7, %v1803_v31 }
 0x122   : > { %v7815_v38 = vcombine.low %v2832_v30, %v2833_v47  ;;  %vm3116_vm3 = vcmp.ne.s16.totalorder %v7814_v25, 0  ;;  %vm1564_vm5 = vcmp.ge.bf16.partialorder %v1227_v19, 0  ;;  %v1629_v49 = vmul.bf16 1036860877, %v1227_v19 }
 0x123   : > { %v10096_v61 = vsel %vm3116_vm3, %v1692_v32, 0  ;;  %vm1565_vm15 = vcmp.ge.bf16.partialorder %v1236_v36, 0  ;;  %v1630_v53 = vmul.bf16 1036860877, %v1236_v36  ;;  %v1934_v37 = vadd.s32 %v8670_v7, %v1804_v27  ;;  %v8143_v32 = vld [vmem:[%s8687_s28 + $0x150] sm:$0xff]  }
 0x124   : > { %15211 = vst [vmem:[#allocation86_spill] sm:$0xff] %v10096_v61  ;;  %vm3117_vm8 = vcmp.ne.s16.totalorder %v7815_v38, 0  ;;  %v10101_v6 = vshll.u32 %v10096_v61, 16  ;;  %v10104_v24 = vshrl.u32 %v10096_v61, 16  ;;  %vm2060_vm11 = vcmp.ge.s32.totalorder %v1931_v13, 0 }
 0x125   : > { %v10106_v59 = vsel %vm3117_vm8, %v1693_v56, 0  ;;  %vm2061_vm14 = vcmp.ge.s32.totalorder %v1932_v14, 0  ;;  %vm2062_vm7 = vcmp.ge.s32.totalorder %v1933_v20, 0  ;;  %vm2063_vm2 = vcmp.ge.s32.totalorder %v1934_v37, 0 }
 0x126   : > { %15212 = vst [vmem:[#allocation87_spill] sm:$0xff] %v10106_v59  ;;  %v3508_v62 = vrot.slane %v10101_v6, 1  ;;  %v10111_v31 = vshll.u32 %v10106_v59, 16  ;;  %vm2189_vm12 = vcmp.lt.s32.totalorder %v1931_v13, 1200  ;;  %vm2190_vm4 = vcmp.lt.s32.totalorder %v1932_v14, 1200 }
 0x127   : > { %vm2191_vm1 = vcmp.lt.s32.totalorder %v1933_v20, 1200  ;;  %vm2192_vm10 = vcmp.lt.s32.totalorder %v1934_v37, 1200  ;;  %vm10113_vm13 = vmand %vm2060_vm11, %vm2189_vm12  ;;  %v10118_v56 = vshrl.u32 %v10106_v59, 16  ;;  %v1238_v27 = vshrl.u32 %v8142_v39, 16 }
 0x128   : > { %15213 = vst [vmem:[#allocation88_spill] sm:$0xff] %v10111_v31  ;;  %v3512_v30 = vor.u32 %v10104_v24, %v3508_v62  ;;  %v3516_v25 = vrot.slane %v10111_v31, 1  ;;  %v3509_v47 = vsel %vm14975_vm6, %v3504_v52, %v3508_v62  ;;  %vm10124_vm3 = vmand %vm2061_vm14, %vm2190_vm4  ;;  %v1241_v38 = vshll.u32 %v8142_v39, 16 }
 0x129   : > { %15216 = vst [vmem:[#allocation89_spill] sm:$0xff] %v10118_v56  ;;  %3798 = vrot.lane.b32.xlu0 %v3509_v47, %s8560_s7  ;;  %vm10130_vm8 = vmand %vm2062_vm7, %vm2191_vm1  ;;  %v1240_v59 = vrot.slane %v1238_v27, 6  ;;  %v1247_v3 = vshrl.u32 %v8143_v32, 16  ;;  %v1250_v4 = vshll.u32 %v8143_v32, 16  ;;  %v1805_v31 = vadd.s32 656, %v8661_v2 }
 0x12a   : > { %v3517_v52 = vsel %vm14975_vm6, %v3512_v30, %v3516_v25  ;;  %v1694_v14 = vsel %vm1564_vm5, %v1227_v19, %v1629_v49  ;;  %vm10139_vm11 = vmand %vm2063_vm2, %vm2192_vm10  ;;  %v1243_v20 = vrot.slane %v1241_v38, 7  ;;  %v1806_v62 = vadd.s32 664, %v8661_v2 }
 0x12b   : > { %3800 = vrot.lane.b32.xlu1 %v3517_v52, %s8560_s7  ;;  %vm2705_vm14 = vmpackc.low %vm10113_vm13, %vm10113_vm13  ;;  %v1249_v32 = vrot.slane %v1247_v3, 6  ;;  %v1252_v27 = vrot.slane %v1250_v4, 7  ;;  %v1807_v30 = vadd.s32 672, %v8661_v2  ;;  %v1808_v19 = vadd.s32 680, %v8661_v2 }
 0x12c   : > { %v1695_v49 = vsel %vm1565_vm15, %v1236_v36, %v1630_v53  ;;  %vm2706_vm5 = vmpackc.low %vm10124_vm3, %vm10124_vm3  ;;  %v2834_v37 = vsel %vm2705_vm14, 65537, %v15073_v34  ;;  %v1244_v47 = vor.u32 %v1243_v20, %v1240_v59  ;;  %v1935_v38 = vadd.s32 %v8670_v7, %v1805_v31 }
 0x12d   : > { %vm2707_vm7 = vmpackc.low %vm10130_vm8, %vm10130_vm8  ;;  %v2835_v3 = vsel %vm2706_vm5, 65537, %v15073_v34  ;;  %v3520_v4 = vor.u32 %v10118_v56, %v3516_v25  ;;  %v10161_v17 = vor.u32 %v1252_v27, %v1249_v32  ;;  %v1936_v36 = vadd.s32 %v8670_v7, %v1806_v62  ;;  %v8144_v62 = vld [vmem:[%s8687_s28 + $0x158] sm:$0xff]  }
 0x12e   : > { %vm2708_vm15 = vmpackc.low %vm10139_vm11, %vm10139_vm11  ;;  %v2836_v53 = vsel %vm2707_vm7, 65537, %v15073_v34  ;;  %v7816_v59 = vcombine.low %v2834_v37, %v2835_v3  ;;  %v1245_v55 = vsel %vm868_vm0, %v10081_v29, %v1244_v47  ;;  %v1937_v31 = vadd.s32 %v8670_v7, %v1807_v30  ;;  %v8145_v29 = vld [vmem:[%s8687_s28 + $0x160] sm:$0xff]  }
 0x12f   : > { %v2837_v25 = vsel %vm2708_vm15, 65537, %v15073_v34  ;;  %v1254_v13 = vsel %vm868_vm0, %v1244_v47, %v10161_v17  ;;  %v1938_v52 = vadd.s32 %v8670_v7, %v1808_v19  ;;  %vm2064_vm2 = vcmp.ge.s32.totalorder %v1935_v38, 0 }
 0x130   : > { %v7817_v39 = vcombine.low %v2836_v53, %v2837_v25  ;;  %vm3118_vm12 = vcmp.ne.s16.totalorder %v7816_v59, 0  ;;  %vm1566_vm4 = vcmp.ge.bf16.partialorder %v1245_v55, 0  ;;  %v1631_v20 = vmul.bf16 1036860877, %v1245_v55 }
 0x131   : > { %v10176_v32 = vsel %vm3118_vm12, %v1694_v14, 0  ;;  %vm1567_vm1 = vcmp.ge.bf16.partialorder %v1254_v13, 0  ;;  %v1632_v27 = vmul.bf16 1036860877, %v1254_v13  ;;  %vm2065_vm10 = vcmp.ge.s32.totalorder %v1936_v36, 0 }
 0x132   : > { %15223 = vst [vmem:[#allocation90_spill] sm:$0xff] %v10176_v32  ;;  %vm3119_vm13 = vcmp.ne.s16.totalorder %v7817_v39, 0  ;;  %v10180_v30 = vshll.u32 %v10176_v32, 16  ;;  %v10183_v37 = vshrl.u32 %v10176_v32, 16  ;;  %vm2066_vm3 = vcmp.ge.s32.totalorder %v1937_v31, 0 }
 0x133   : > { %v10185_v19 = vsel %vm3119_vm13, %v1695_v49, 0  ;;  %vm2067_vm8 = vcmp.ge.s32.totalorder %v1938_v52, 0  ;;  %vm2193_vm11 = vcmp.lt.s32.totalorder %v1935_v38, 1200  ;;  %vm2194_vm14 = vcmp.lt.s32.totalorder %v1936_v36, 1200 }
 0x134   : > { %15224 = vst [vmem:[#allocation91_spill] sm:$0xff] %v10180_v30  ;;  %15225 = vst [vmem:[#allocation92_spill] sm:$0xff] %v10183_v37  ;;  %v3524_v14 = vrot.slane %v10180_v30, 1  ;;  %v10189_v47 = vshll.u32 %v10185_v19, 16  ;;  %vm2195_vm5 = vcmp.lt.s32.totalorder %v1937_v31, 1200  ;;  %vm2196_vm7 = vcmp.lt.s32.totalorder %v1938_v52, 1200 }
 0x135   : > { %15226 = vst [vmem:[#allocation93_spill] sm:$0xff] %v10185_v19  ;;  %vm10192_vm15 = vmand %vm2064_vm2, %vm2193_vm11  ;;  %v10202_v49 = vshrl.u32 %v10185_v19, 16  ;;  %v1256_v59 = vshrl.u32 %v8144_v62, 16  ;;  %v1259_v25 = vshll.u32 %v8144_v62, 16  ;;  %v1265_v39 = vshrl.u32 %v8145_v29, 16 }
 0x136   : > { %15227 = vst [vmem:[#allocation94_spill] sm:$0xff] %v10189_v47  ;;  %vm10197_vm12 = vmand %vm2065_vm10, %vm2194_vm14  ;;  %v3528_v32 = vor.u32 %v10183_v37, %v3524_v14  ;;  %v3532_v30 = vrot.slane %v10189_v47, 1  ;;  %v3525_v38 = vsel %vm14975_vm6, %v3520_v4, %v3524_v14  ;;  %v1268_v36 = vshll.u32 %v8145_v29, 16 }
 0x137   : > { %15232 = vst [vmem:[#allocation95_spill] sm:$0xff] %v10202_v49  ;;  %vm10208_vm2 = vmand %vm2066_vm3, %vm2195_vm5  ;;  %3802 = vrot.lane.b32.xlu0 %v3525_v38, %s8560_s7  ;;  %v1258_v62 = vrot.slane %v1256_v59, 6  ;;  %v1261_v61 = vrot.slane %v1259_v25, 7  ;;  %v1267_v37 = vrot.slane %v1265_v39, 6  ;;  %v1809_v47 = vadd.s32 688, %v8661_v2 }
 0x138   : > { %vm10214_vm10 = vmand %vm2067_vm8, %vm2196_vm7  ;;  %v3533_v4 = vsel %vm14975_vm6, %v3528_v32, %v3532_v30  ;;  %v1696_v31 = vsel %vm1566_vm4, %v1245_v55, %v1631_v20  ;;  %v1270_v29 = vrot.slane %v1268_v36, 7  ;;  %v1810_v52 = vadd.s32 696, %v8661_v2 }
 0x139   : > { %vm2709_vm13 = vmpackc.low %vm10192_vm15, %vm10192_vm15  ;;  %3804 = vrot.lane.b32.xlu1 %v3533_v4, %s8560_s7  ;;  %v1697_v14 = vsel %vm1567_vm1, %v1254_v13, %v1632_v27  ;;  %v1262_v32 = vor.u32 %v1261_v61, %v1258_v62  ;;  %v1811_v55 = vadd.s32 704, %v8661_v2  ;;  %v3536_v3 = vor.u32 %v10202_v49, %v3532_v30  ;;  %v8146_v4 = vld [vmem:[%s8687_s28 + $0x168] sm:$0xff]  }
 0x13a   : > { %vm2710_vm3 = vmpackc.low %vm10197_vm12, %vm10197_vm12  ;;  %v2838_v59 = vsel %vm2709_vm13, 65537, %v15073_v34  ;;  %v10237_v25 = vor.u32 %v1270_v29, %v1267_v37  ;;  %v1812_v13 = vadd.s32 712, %v8661_v2  ;;  %v1939_v53 = vadd.s32 %v8670_v7, %v1809_v47 }
 0x13b   : > { %vm2711_vm4 = vmpackc.low %vm10208_vm2, %vm10208_vm2  ;;  %v2839_v20 = vsel %vm2710_vm3, 65537, %v15073_v34  ;;  %v1263_v56 = vsel %vm868_vm0, %v10161_v17, %v1262_v32  ;;  %v1940_v37 = vadd.s32 %v8670_v7, %v1810_v52  ;;  %v1941_v19 = vadd.s32 %v8670_v7, %v1811_v55 }
 0x13c   : > { %vm2712_vm1 = vmpackc.low %vm10214_vm10, %vm10214_vm10  ;;  %v2840_v61 = vsel %vm2711_vm4, 65537, %v15073_v34  ;;  %v7818_v27 = vcombine.low %v2838_v59, %v2839_v20  ;;  %v1272_v30 = vsel %vm868_vm0, %v1262_v32, %v10237_v25  ;;  %vm1568_vm11 = vcmp.ge.bf16.partialorder %v1263_v56, 0 }
 0x13d   : > { %v2841_v39 = vsel %vm2712_vm1, 65537, %v15073_v34  ;;  %v1633_v36 = vmul.bf16 1036860877, %v1263_v56  ;;  %vm1569_vm14 = vcmp.ge.bf16.partialorder %v1272_v30, 0  ;;  %v1634_v17 = vmul.bf16 1036860877, %v1272_v30 }
 0x13e   : > { %v7819_v38 = vcombine.low %v2840_v61, %v2841_v39  ;;  %vm3120_vm8 = vcmp.ne.s16.totalorder %v7818_v27, 0  ;;  %v1942_v47 = vadd.s32 %v8670_v7, %v1812_v13  ;;  %vm2068_vm7 = vcmp.ge.s32.totalorder %v1939_v53, 0 }
 0x13f   : > { %v10252_v62 = vsel %vm3120_vm8, %v1696_v31, 0  ;;  %vm2069_vm15 = vcmp.ge.s32.totalorder %v1940_v37, 0  ;;  %vm2070_vm12 = vcmp.ge.s32.totalorder %v1941_v19, 0  ;;  %v8147_v31 = vld [vmem:[%s8687_s28 + $0x170] sm:$0xff]   ;;  %vm2197_vm10 = vcmp.lt.s32.totalorder %v1939_v53, 1200 }
 0x140   : > { %15237 = vst [vmem:[#allocation96_spill] sm:$0xff] %v10252_v62  ;;  %vm3121_vm5 = vcmp.ne.s16.totalorder %v7819_v38, 0  ;;  %v10257_v29 = vshll.u32 %v10252_v62, 16  ;;  %v10260_v52 = vshrl.u32 %v10252_v62, 16  ;;  %vm2071_vm2 = vcmp.ge.s32.totalorder %v1942_v47, 0  ;;  %vm10269_vm1 = vmand %vm2068_vm7, %vm2197_vm10 }
 0x141   : > { %v10262_v59 = vsel %vm3121_vm5, %v1697_v14, 0  ;;  %vm2198_vm13 = vcmp.lt.s32.totalorder %v1940_v37, 1200  ;;  %vm2199_vm3 = vcmp.lt.s32.totalorder %v1941_v19, 1200  ;;  %vm2200_vm4 = vcmp.lt.s32.totalorder %v1942_v47, 1200 }
 0x142   : > { %15238 = vst [vmem:[#allocation97_spill] sm:$0xff] %v10257_v29  ;;  %15239 = vst [vmem:[#allocation98_spill] sm:$0xff] %v10260_v52  ;;  %v3540_v32 = vrot.slane %v10257_v29, 1  ;;  %v10267_v55 = vshll.u32 %v10262_v59, 16  ;;  %v10274_v14 = vshrl.u32 %v10262_v59, 16  ;;  %v1274_v13 = vshrl.u32 %v8146_v4, 16 }
 0x143   : > { %15240 = vst [vmem:[#allocation99_spill] sm:$0xff] %v10262_v59  ;;  %vm10280_vm8 = vmand %vm2069_vm15, %vm2198_vm13  ;;  %v1277_v38 = vshll.u32 %v8146_v4, 16  ;;  %v1283_v29 = vshrl.u32 %v8147_v31, 16  ;;  %v1698_v37 = vsel %vm1568_vm11, %v1263_v56, %v1633_v36  ;;  %v1816_v56 = vadd.s32 744, %v8661_v2 }
 0x144   : > { %15241 = vst [vmem:[#allocation100_spill] sm:$0xff] %v10267_v55  ;;  %15244 = vst [vmem:[#allocation101_spill] sm:$0xff] %v10274_v14  ;;  %v3544_v61 = vor.u32 %v10260_v52, %v3540_v32  ;;  %v3548_v27 = vrot.slane %v10267_v55, 1  ;;  %v3541_v39 = vsel %vm14975_vm6, %v3536_v3, %v3540_v32  ;;  %v1276_v59 = vrot.slane %v1274_v13, 6 }
 0x145   : > { %3806 = vrot.lane.b32.xlu0 %v3541_v39, %s8560_s7  ;;  %vm10286_vm5 = vmand %vm2070_vm12, %vm2199_vm3  ;;  %v1286_v52 = vshll.u32 %v8147_v31, 16  ;;  %v1813_v55 = vadd.s32 720, %v8661_v2  ;;  %v1279_v19 = vrot.slane %v1277_v38, 7  ;;  %v1814_v32 = vadd.s32 728, %v8661_v2 }
 0x146   : > { %v3549_v3 = vsel %vm14975_vm6, %v3544_v61, %v3548_v27  ;;  %vm10295_vm7 = vmand %vm2071_vm2, %vm2200_vm4  ;;  %v1285_v31 = vrot.slane %v1283_v29, 6  ;;  %v1815_v61 = vadd.s32 736, %v8661_v2  ;;  %v1699_v36 = vsel %vm1569_vm14, %v1272_v30, %v1634_v17 }
 0x147   : > { %3808 = vrot.lane.b32.xlu1 %v3549_v3, %s8560_s7  ;;  %vm2713_vm15 = vmpackc.low %vm10269_vm1, %vm10269_vm1  ;;  %v1288_v13 = vrot.slane %v1286_v52, 7  ;;  %v1280_v39 = vor.u32 %v1279_v19, %v1276_v59  ;;  %v1943_v38 = vadd.s32 %v8670_v7, %v1813_v55  ;;  %v3552_v52 = vor.u32 %v10274_v14, %v3548_v27 }
 0x148   : > { %vm2714_vm11 = vmpackc.low %vm10280_vm8, %vm10280_vm8  ;;  %v2842_v47 = vsel %vm2713_vm15, 65537, %v15073_v34  ;;  %v1944_v30 = vadd.s32 %v8670_v7, %v1814_v32  ;;  %v1945_v55 = vadd.s32 %v8670_v7, %v1815_v61  ;;  %v1946_v3 = vadd.s32 %v8670_v7, %v1816_v56  ;;  %v8148_v32 = vld [vmem:[%s8687_s28 + $0x178] sm:$0xff]  }
 0x149   : > { %vm2715_vm12 = vmpackc.low %vm10286_vm5, %vm10286_vm5  ;;  %v2843_v29 = vsel %vm2714_vm11, 65537, %v15073_v34  ;;  %v10317_v20 = vor.u32 %v1288_v13, %v1285_v31  ;;  %v1281_v62 = vsel %vm868_vm0, %v10237_v25, %v1280_v39  ;;  %vm2072_vm2 = vcmp.ge.s32.totalorder %v1943_v38, 0  ;;  %v8149_v25 = vld [vmem:[%s8687_s28 + $0x180] sm:$0xff]  }
 0x14a   : > { %vm2716_vm14 = vmpackc.low %vm10295_vm7, %vm10295_vm7  ;;  %v2844_v17 = vsel %vm2715_vm12, 65537, %v15073_v34  ;;  %v7820_v59 = vcombine.low %v2842_v47, %v2843_v29  ;;  %vm1570_vm13 = vcmp.ge.bf16.partialorder %v1281_v62, 0  ;;  %v1635_v19 = vmul.bf16 1036860877, %v1281_v62 }
 0x14b   : > { %v2845_v27 = vsel %vm2716_vm14, 65537, %v15073_v34  ;;  %v1290_v53 = vsel %vm868_vm0, %v1280_v39, %v10317_v20  ;;  %vm2073_vm4 = vcmp.ge.s32.totalorder %v1944_v30, 0  ;;  %vm2074_vm8 = vcmp.ge.s32.totalorder %v1945_v55, 0 }
 0x14c   : > { %v7821_v4 = vcombine.low %v2844_v17, %v2845_v27  ;;  %vm3122_vm10 = vcmp.ne.s16.totalorder %v7820_v59, 0  ;;  %vm1571_vm3 = vcmp.ge.bf16.partialorder %v1290_v53, 0  ;;  %v1636_v13 = vmul.bf16 1036860877, %v1290_v53 }
 0x14d   : > { %v10332_v31 = vsel %vm3122_vm10, %v1698_v37, 0  ;;  %vm2075_vm5 = vcmp.ge.s32.totalorder %v1946_v3, 0  ;;  %vm2201_vm7 = vcmp.lt.s32.totalorder %v1943_v38, 1200  ;;  %vm2202_vm15 = vcmp.lt.s32.totalorder %v1944_v30, 1200 }
 0x14e   : > { %15251 = vst [vmem:[#allocation102_spill] sm:$0xff] %v10332_v31  ;;  %vm3123_vm1 = vcmp.ne.s16.totalorder %v7821_v4, 0  ;;  %v10336_v61 = vshll.u32 %v10332_v31, 16  ;;  %v10339_v47 = vshrl.u32 %v10332_v31, 16  ;;  %vm2203_vm11 = vcmp.lt.s32.totalorder %v1945_v55, 1200  ;;  %vm10348_vm14 = vmand %vm2072_vm2, %vm2201_vm7 }
 0x14f   : > { %v10341_v56 = vsel %vm3123_vm1, %v1699_v36, 0  ;;  %vm2204_vm12 = vcmp.lt.s32.totalorder %v1946_v3, 1200  ;;  %vm10353_vm10 = vmand %vm2073_vm4, %vm2202_vm15  ;;  %v1292_v59 = vshrl.u32 %v8148_v32, 16  ;;  %v1295_v27 = vshll.u32 %v8148_v32, 16 }
 0x150   : > { %15252 = vst [vmem:[#allocation103_spill] sm:$0xff] %v10336_v61  ;;  %15253 = vst [vmem:[#allocation104_spill] sm:$0xff] %v10339_v47  ;;  %v3556_v37 = vrot.slane %v10336_v61, 1  ;;  %v10345_v39 = vshll.u32 %v10341_v56, 16  ;;  %v10358_v36 = vshrl.u32 %v10341_v56, 16  ;;  %v1301_v4 = vshrl.u32 %v8149_v25, 16 }
 0x151   : > { %15254 = vst [vmem:[#allocation105_spill] sm:$0xff] %v10341_v56  ;;  %vm10364_vm2 = vmand %vm2074_vm8, %vm2203_vm11  ;;  %v1304_v30 = vshll.u32 %v8149_v25, 16  ;;  %v1294_v32 = vrot.slane %v1292_v59, 6  ;;  %v1297_v49 = vrot.slane %v1295_v27, 7  ;;  %v1700_v55 = vsel %vm1570_vm13, %v1281_v62, %v1635_v19 }
 0x152   : > { %15255 = vst [vmem:[#allocation106_spill] sm:$0xff] %v10345_v39  ;;  %15260 = vst [vmem:[#allocation107_spill] sm:$0xff] %v10358_v36  ;;  %v3560_v31 = vor.u32 %v10339_v47, %v3556_v37  ;;  %v3564_v61 = vrot.slane %v10345_v39, 1  ;;  %v3557_v38 = vsel %vm14975_vm6, %v3552_v52, %v3556_v37  ;;  %v1303_v47 = vrot.slane %v1301_v4, 6 }
 0x153   : > { %3810 = vrot.lane.b32.xlu0 %v3557_v38, %s8560_s7  ;;  %vm10370_vm4 = vmand %vm2075_vm5, %vm2204_vm12  ;;  %v1817_v39 = vadd.s32 752, %v8661_v2  ;;  %v1306_v25 = vrot.slane %v1304_v30, 7  ;;  %v1818_v3 = vadd.s32 760, %v8661_v2  ;;  %v1701_v37 = vsel %vm1571_vm3, %v1290_v53, %v1636_v13 }
 0x154   : > { %v3565_v52 = vsel %vm14975_vm6, %v3560_v31, %v3564_v61  ;;  %vm2717_vm1 = vmpackc.low %vm10348_vm14, %vm10348_vm14  ;;  %v1298_v31 = vor.u32 %v1297_v49, %v1294_v32  ;;  %v1819_v62 = vadd.s32 768, %v8661_v2  ;;  %v3568_v29 = vor.u32 %v10358_v36, %v3564_v61 }
 0x155   : > { %3812 = vrot.lane.b32.xlu1 %v3565_v52, %s8560_s7  ;;  %vm2718_vm8 = vmpackc.low %vm10353_vm10, %vm10353_vm10  ;;  %v2846_v59 = vsel %vm2717_vm1, 65537, %v15073_v34  ;;  %v10393_v27 = vor.u32 %v1306_v25, %v1303_v47  ;;  %v1820_v53 = vadd.s32 776, %v8661_v2  ;;  %v1947_v17 = vadd.s32 %v8670_v7, %v1817_v39  ;;  %v8150_v52 = vld [vmem:[%s8687_s28 + $0x188] sm:$0xff]  }
 0x156   : > { %vm2719_vm13 = vmpackc.low %vm10364_vm2, %vm10364_vm2  ;;  %v2847_v19 = vsel %vm2718_vm8, 65537, %v15073_v34  ;;  %v1299_v14 = vsel %vm868_vm0, %v10317_v20, %v1298_v31  ;;  %v1948_v47 = vadd.s32 %v8670_v7, %v1818_v3  ;;  %v1949_v56 = vadd.s32 %v8670_v7, %v1819_v62 }
 0x157   : > { %vm2720_vm3 = vmpackc.low %vm10370_vm4, %vm10370_vm4  ;;  %v2848_v49 = vsel %vm2719_vm13, 65537, %v15073_v34  ;;  %v7822_v13 = vcombine.low %v2846_v59, %v2847_v19  ;;  %v1308_v61 = vsel %vm868_vm0, %v1298_v31, %v10393_v27  ;;  %vm1572_vm7 = vcmp.ge.bf16.partialorder %v1299_v14, 0 }
 0x158   : > { %v2849_v4 = vsel %vm2720_vm3, 65537, %v15073_v34  ;;  %v1637_v30 = vmul.bf16 1036860877, %v1299_v14  ;;  %vm1573_vm15 = vcmp.ge.bf16.partialorder %v1308_v61, 0  ;;  %v1638_v20 = vmul.bf16 1036860877, %v1308_v61 }
 0x159   : > { %v7823_v38 = vcombine.low %v2848_v49, %v2849_v4  ;;  %vm3124_vm5 = vcmp.ne.s16.totalorder %v7822_v13, 0  ;;  %v1950_v39 = vadd.s32 %v8670_v7, %v1820_v53  ;;  %vm2076_vm12 = vcmp.ge.s32.totalorder %v1947_v17, 0 }
 0x15a   : > { %v10408_v32 = vsel %vm3124_vm5, %v1700_v55, 0  ;;  %vm2077_vm14 = vcmp.ge.s32.totalorder %v1948_v47, 0  ;;  %vm2078_vm10 = vcmp.ge.s32.totalorder %v1949_v56, 0  ;;  %v8151_v55 = vld [vmem:[%s8687_s28 + $0x190] sm:$0xff]   ;;  %vm2205_vm4 = vcmp.lt.s32.totalorder %v1947_v17, 1200 }
 0x15b   : > { %15265 = vst [vmem:[#allocation108_spill] sm:$0xff] %v10408_v32  ;;  %vm3125_vm11 = vcmp.ne.s16.totalorder %v7823_v38, 0  ;;  %v10413_v25 = vshll.u32 %v10408_v32, 16  ;;  %v10416_v3 = vshrl.u32 %v10408_v32, 16  ;;  %vm2079_vm2 = vcmp.ge.s32.totalorder %v1950_v39, 0  ;;  %vm10425_vm3 = vmand %vm2076_vm12, %vm2205_vm4 }
 0x15c   : > { %v10418_v59 = vsel %vm3125_vm11, %v1701_v37, 0  ;;  %vm2206_vm1 = vcmp.lt.s32.totalorder %v1948_v47, 1200  ;;  %vm2207_vm8 = vcmp.lt.s32.totalorder %v1949_v56, 1200  ;;  %vm2208_vm13 = vcmp.lt.s32.totalorder %v1950_v39, 1200 }
 0x15d   : > { %15266 = vst [vmem:[#allocation109_spill] sm:$0xff] %v10413_v25  ;;  %15267 = vst [vmem:[#allocation110_spill] sm:$0xff] %v10416_v3  ;;  %v3572_v31 = vrot.slane %v10413_v25, 1  ;;  %v10423_v62 = vshll.u32 %v10418_v59, 16  ;;  %v10430_v37 = vshrl.u32 %v10418_v59, 16  ;;  %v1310_v53 = vshrl.u32 %v8150_v52, 16 }
 0x15e   : > { %15268 = vst [vmem:[#allocation111_spill] sm:$0xff] %v10418_v59  ;;  %vm10436_vm5 = vmand %vm2077_vm14, %vm2206_vm1  ;;  %v1313_v38 = vshll.u32 %v8150_v52, 16  ;;  %v1319_v25 = vshrl.u32 %v8151_v55, 16  ;;  %v1702_v47 = vsel %vm1572_vm7, %v1299_v14, %v1637_v30  ;;  %v1824_v14 = vadd.s32 808, %v8661_v2 }
 0x15f   : > { %15269 = vst [vmem:[#allocation112_spill] sm:$0xff] %v10423_v62  ;;  %15272 = vst [vmem:[#allocation113_spill] sm:$0xff] %v10430_v37  ;;  %v3576_v49 = vor.u32 %v10416_v3, %v3572_v31  ;;  %v3580_v13 = vrot.slane %v10423_v62, 1  ;;  %v3573_v4 = vsel %vm14975_vm6, %v3568_v29, %v3572_v31  ;;  %v1312_v59 = vrot.slane %v1310_v53, 6 }
 0x160   : > { %3814 = vrot.lane.b32.xlu0 %v3573_v4, %s8560_s7  ;;  %vm10442_vm11 = vmand %vm2078_vm10, %vm2207_vm8  ;;  %v1322_v3 = vshll.u32 %v8151_v55, 16  ;;  %v1821_v62 = vadd.s32 784, %v8661_v2  ;;  %v1315_v56 = vrot.slane %v1313_v38, 7  ;;  %v1822_v31 = vadd.s32 792, %v8661_v2 }
 0x161   : > { %v3581_v29 = vsel %vm14975_vm6, %v3576_v49, %v3580_v13  ;;  %vm10451_vm12 = vmand %vm2079_vm2, %vm2208_vm13  ;;  %v1321_v55 = vrot.slane %v1319_v25, 6  ;;  %v1823_v49 = vadd.s32 800, %v8661_v2  ;;  %v1703_v30 = vsel %vm1573_vm15, %v1308_v61, %v1638_v20 }
 0x162   : > { %3816 = vrot.lane.b32.xlu1 %v3581_v29, %s8560_s7  ;;  %vm2721_vm14 = vmpackc.low %vm10425_vm3, %vm10425_vm3  ;;  %v1324_v53 = vrot.slane %v1322_v3, 7  ;;  %v1316_v4 = vor.u32 %v1315_v56, %v1312_v59  ;;  %v1951_v38 = vadd.s32 %v8670_v7, %v1821_v62  ;;  %v3584_v3 = vor.u32 %v10430_v37, %v3580_v13 }
 0x163   : > { %vm2722_vm7 = vmpackc.low %vm10436_vm5, %vm10436_vm5  ;;  %v2850_v39 = vsel %vm2721_vm14, 65537, %v15073_v34  ;;  %v1952_v61 = vadd.s32 %v8670_v7, %v1822_v31  ;;  %v1953_v62 = vadd.s32 %v8670_v7, %v1823_v49  ;;  %v1954_v29 = vadd.s32 %v8670_v7, %v1824_v14  ;;  %v8152_v31 = vld [vmem:[%s8687_s28 + $0x198] sm:$0xff]  }
 0x164   : > { %vm2723_vm10 = vmpackc.low %vm10442_vm11, %vm10442_vm11  ;;  %v2851_v25 = vsel %vm2722_vm7, 65537, %v15073_v34  ;;  %v10473_v19 = vor.u32 %v1324_v53, %v1321_v55  ;;  %v1317_v32 = vsel %vm868_vm0, %v10393_v27, %v1316_v4  ;;  %vm2080_vm2 = vcmp.ge.s32.totalorder %v1951_v38, 0  ;;  %v8153_v27 = vld [vmem:[%s8687_s28 + $0x1a0] sm:$0xff]  }
 0x165   : > { %vm2724_vm15 = vmpackc.low %vm10451_vm12, %vm10451_vm12  ;;  %v2852_v20 = vsel %vm2723_vm10, 65537, %v15073_v34  ;;  %v7824_v59 = vcombine.low %v2850_v39, %v2851_v25  ;;  %vm1574_vm1 = vcmp.ge.bf16.partialorder %v1317_v32, 0  ;;  %v1639_v56 = vmul.bf16 1036860877, %v1317_v32 }
 0x166   : > { %v2853_v13 = vsel %vm2724_vm15, 65537, %v15073_v34  ;;  %v1326_v17 = vsel %vm868_vm0, %v1316_v4, %v10473_v19  ;;  %vm2081_vm13 = vcmp.ge.s32.totalorder %v1952_v61, 0  ;;  %vm2082_vm5 = vcmp.ge.s32.totalorder %v1953_v62, 0 }
 0x167   : > { %v7825_v52 = vcombine.low %v2852_v20, %v2853_v13  ;;  %vm3126_vm4 = vcmp.ne.s16.totalorder %v7824_v59, 0  ;;  %vm1575_vm8 = vcmp.ge.bf16.partialorder %v1326_v17, 0  ;;  %v1640_v53 = vmul.bf16 1036860877, %v1326_v17 }
 0x168   : > { %v10488_v55 = vsel %vm3126_vm4, %v1702_v47, 0  ;;  %vm2083_vm11 = vcmp.ge.s32.totalorder %v1954_v29, 0  ;;  %vm2209_vm12 = vcmp.lt.s32.totalorder %v1951_v38, 1200  ;;  %vm2210_vm14 = vcmp.lt.s32.totalorder %v1952_v61, 1200 }
 0x169   : > { %15279 = vst [vmem:[#allocation114_spill] sm:$0xff] %v10488_v55  ;;  %vm3127_vm3 = vcmp.ne.s16.totalorder %v7825_v52, 0  ;;  %v10492_v49 = vshll.u32 %v10488_v55, 16  ;;  %v10495_v39 = vshrl.u32 %v10488_v55, 16  ;;  %vm2211_vm7 = vcmp.lt.s32.totalorder %v1953_v62, 1200  ;;  %vm10504_vm15 = vmand %vm2080_vm2, %vm2209_vm12 }
 0x16a   : > { %v10497_v14 = vsel %vm3127_vm3, %v1703_v30, 0  ;;  %vm2212_vm10 = vcmp.lt.s32.totalorder %v1954_v29, 1200  ;;  %vm10509_vm4 = vmand %vm2081_vm13, %vm2210_vm14  ;;  %v1328_v59 = vshrl.u32 %v8152_v31, 16  ;;  %v1331_v13 = vshll.u32 %v8152_v31, 16 }
 0x16b   : > { %15280 = vst [vmem:[#allocation115_spill] sm:$0xff] %v10492_v49  ;;  %15281 = vst [vmem:[#allocation116_spill] sm:$0xff] %v10495_v39  ;;  %v3588_v47 = vrot.slane %v10492_v49, 1  ;;  %v10501_v4 = vshll.u32 %v10497_v14, 16  ;;  %v10514_v30 = vshrl.u32 %v10497_v14, 16  ;;  %v1337_v52 = vshrl.u32 %v8153_v27, 16 }
 0x16c   : > { %15282 = vst [vmem:[#allocation117_spill] sm:$0xff] %v10497_v14  ;;  %vm10520_vm2 = vmand %vm2082_vm5, %vm2211_vm7  ;;  %v1340_v61 = vshll.u32 %v8153_v27, 16  ;;  %v1330_v31 = vrot.slane %v1328_v59, 6  ;;  %v1333_v36 = vrot.slane %v1331_v13, 7  ;;  %v1704_v62 = vsel %vm1574_vm1, %v1317_v32, %v1639_v56 }
 0x16d   : > { %15283 = vst [vmem:[#allocation118_spill] sm:$0xff] %v10501_v4  ;;  %15288 = vst [vmem:[#allocation119_spill] sm:$0xff] %v10514_v30  ;;  %v3592_v55 = vor.u32 %v10495_v39, %v3588_v47  ;;  %v3596_v49 = vrot.slane %v10501_v4, 1  ;;  %v3589_v38 = vsel %vm14975_vm6, %v3584_v3, %v3588_v47  ;;  %v1339_v39 = vrot.slane %v1337_v52, 6 }
 0x16e   : > { %3818 = vrot.lane.b32.xlu0 %v3589_v38, %s8560_s7  ;;  %vm10526_vm13 = vmand %vm2083_vm11, %vm2212_vm10  ;;  %v1825_v4 = vadd.s32 816, %v8661_v2  ;;  %v1342_v27 = vrot.slane %v1340_v61, 7  ;;  %v1826_v29 = vadd.s32 824, %v8661_v2  ;;  %v1705_v47 = vsel %vm1575_vm8, %v1326_v17, %v1640_v53 }
 0x16f   : > { %v3597_v3 = vsel %vm14975_vm6, %v3592_v55, %v3596_v49  ;;  %vm2725_vm3 = vmpackc.low %vm10504_vm15, %vm10504_vm15  ;;  %v1334_v55 = vor.u32 %v1333_v36, %v1330_v31  ;;  %v1827_v32 = vadd.s32 832, %v8661_v2  ;;  %v3600_v25 = vor.u32 %v10514_v30, %v3596_v49 }
 0x170   : > { %3820 = vrot.lane.b32.xlu1 %v3597_v3, %s8560_s7  ;;  %vm2726_vm5 = vmpackc.low %vm10509_vm4, %vm10509_vm4  ;;  %v2854_v59 = vsel %vm2725_vm3, 65537, %v15073_v34  ;;  %v10549_v13 = vor.u32 %v1342_v27, %v1339_v39  ;;  %v1828_v17 = vadd.s32 840, %v8661_v2  ;;  %v1955_v20 = vadd.s32 %v8670_v7, %v1825_v4  ;;  %v8154_v3 = vld [vmem:[%s8687_s28 + $0x1a8] sm:$0xff]  }
 0x171   : > { %vm2727_vm1 = vmpackc.low %vm10520_vm2, %vm10520_vm2  ;;  %v2855_v56 = vsel %vm2726_vm5, 65537, %v15073_v34  ;;  %v1335_v37 = vsel %vm868_vm0, %v10473_v19, %v1334_v55  ;;  %v1956_v39 = vadd.s32 %v8670_v7, %v1826_v29  ;;  %v1957_v14 = vadd.s32 %v8670_v7, %v1827_v32 }
 0x172   : > { %vm2728_vm8 = vmpackc.low %vm10526_vm13, %vm10526_vm13  ;;  %v2856_v36 = vsel %vm2727_vm1, 65537, %v15073_v34  ;;  %v7826_v53 = vcombine.low %v2854_v59, %v2855_v56  ;;  %v1344_v49 = vsel %vm868_vm0, %v1334_v55, %v10549_v13  ;;  %vm1576_vm12 = vcmp.ge.bf16.partialorder %v1335_v37, 0 }
 0x173   : > { %v2857_v52 = vsel %vm2728_vm8, 65537, %v15073_v34  ;;  %v1641_v61 = vmul.bf16 1036860877, %v1335_v37  ;;  %vm1577_vm14 = vcmp.ge.bf16.partialorder %v1344_v49, 0  ;;  %v1642_v19 = vmul.bf16 1036860877, %v1344_v49 }
 0x174   : > { %v7827_v38 = vcombine.low %v2856_v36, %v2857_v52  ;;  %vm3128_vm11 = vcmp.ne.s16.totalorder %v7826_v53, 0  ;;  %v1958_v4 = vadd.s32 %v8670_v7, %v1828_v17  ;;  %vm2084_vm10 = vcmp.ge.s32.totalorder %v1955_v20, 0 }
 0x175   : > { %v10564_v31 = vsel %vm3128_vm11, %v1704_v62, 0  ;;  %vm2085_vm15 = vcmp.ge.s32.totalorder %v1956_v39, 0  ;;  %vm2086_vm4 = vcmp.ge.s32.totalorder %v1957_v14, 0  ;;  %v8155_v62 = vld [vmem:[%s8687_s28 + $0x1b0] sm:$0xff]   ;;  %vm2213_vm13 = vcmp.lt.s32.totalorder %v1955_v20, 1200 }
 0x176   : > { %15293 = vst [vmem:[#allocation120_spill] sm:$0xff] %v10564_v31  ;;  %vm3129_vm7 = vcmp.ne.s16.totalorder %v7827_v38, 0  ;;  %v10569_v27 = vshll.u32 %v10564_v31, 16  ;;  %v10572_v29 = vshrl.u32 %v10564_v31, 16  ;;  %vm2087_vm2 = vcmp.ge.s32.totalorder %v1958_v4, 0  ;;  %vm10581_vm8 = vmand %vm2084_vm10, %vm2213_vm13 }
 0x177   : > { %v10574_v59 = vsel %vm3129_vm7, %v1705_v47, 0  ;;  %vm2214_vm3 = vcmp.lt.s32.totalorder %v1956_v39, 1200  ;;  %vm2215_vm5 = vcmp.lt.s32.totalorder %v1957_v14, 1200  ;;  %vm2216_vm1 = vcmp.lt.s32.totalorder %v1958_v4, 1200  ;;  %v10620_v4 = vpop.permute.xlu0 %3728 }
 0x178   : > { %15294 = vst [vmem:[#allocation121_spill] sm:$0xff] %v10569_v27  ;;  %15295 = vst [vmem:[#allocation122_spill] sm:$0xff] %v10572_v29  ;;  %v3604_v55 = vrot.slane %v10569_v27, 1  ;;  %v10579_v32 = vshll.u32 %v10574_v59, 16  ;;  %v10586_v47 = vshrl.u32 %v10574_v59, 16  ;;  %v1346_v17 = vshrl.u32 %v8154_v3, 16 }
 0x179   : > { %15296 = vst [vmem:[#allocation123_spill] sm:$0xff] %v10574_v59  ;;  %vm10592_vm11 = vmand %vm2085_vm15, %vm2214_vm3  ;;  %v1349_v38 = vshll.u32 %v8154_v3, 16  ;;  %v1355_v27 = vshrl.u32 %v8155_v62, 16  ;;  %v1706_v39 = vsel %vm1576_vm12, %v1335_v37, %v1641_v61  ;;  %v1832_v37 = vadd.s32 872, %v8661_v2  ;;  %v10618_v61 = vpop.permute.xlu1 %3730 }
 0x17a   : > { %15297 = vst [vmem:[#allocation124_spill] sm:$0xff] %v10579_v32  ;;  %15300 = vst [vmem:[#allocation125_spill] sm:$0xff] %v10586_v47  ;;  %v3608_v36 = vor.u32 %v10572_v29, %v3604_v55  ;;  %v3612_v53 = vrot.slane %v10579_v32, 1  ;;  %v3605_v52 = vsel %vm14975_vm6, %v3600_v25, %v3604_v55  ;;  %v1348_v59 = vrot.slane %v1346_v17, 6 }
 0x17b   : > { %3822 = vrot.lane.b32.xlu0 %v3605_v52, %s8560_s7  ;;  %vm10598_vm7 = vmand %vm2086_vm4, %vm2215_vm5  ;;  %v1358_v29 = vshll.u32 %v8155_v62, 16  ;;  %v1829_v32 = vadd.s32 848, %v8661_v2  ;;  %v1351_v14 = vrot.slane %v1349_v38, 7  ;;  %v1830_v55 = vadd.s32 856, %v8661_v2  ;;  %15307 = vst [vmem:[#allocation126_spill] sm:$0xff] %v10618_v61 }
 0x17c   : > { %v3613_v25 = vsel %vm14975_vm6, %v3608_v36, %v3612_v53  ;;  %vm10607_vm10 = vmand %vm2087_vm2, %vm2216_vm1  ;;  %v1357_v62 = vrot.slane %v1355_v27, 6  ;;  %v1831_v36 = vadd.s32 864, %v8661_v2  ;;  %15308 = vst [vmem:[#allocation127_spill] sm:$0xff] %v10620_v4  ;;  %v1707_v52 = vsel %vm1577_vm14, %v1344_v49, %v1642_v19 }
 0x17d   : > { %3824 = vrot.lane.b32.xlu1 %v3613_v25, %s8560_s7  ;;  %vm2729_vm15 = vmpackc.low %vm10581_vm8, %vm10581_vm8  ;;  %v1360_v17 = vrot.slane %v1358_v29, 7  ;;  %v1352_v38 = vor.u32 %v1351_v14, %v1348_v59  ;;  %v1959_v27 = vadd.s32 %v8670_v7, %v1829_v32  ;;  %v3616_v25 = vor.u32 %v10586_v47, %v3612_v53  ;;  %v8161_v53 = vld [vmem:[%s14649_s3 + $0x38] sm:$0xff]  }
 0x17e   : > { %vm2730_vm12 = vmpackc.low %vm10592_vm11, %vm10592_vm11  ;;  %v2858_v56 = vsel %vm2729_vm15, 65537, %v15073_v34  ;;  %v1960_v49 = vadd.s32 %v8670_v7, %v1830_v55  ;;  %v1961_v32 = vadd.s32 %v8670_v7, %v1831_v36  ;;  %v1962_v14 = vadd.s32 %v8670_v7, %v1832_v37  ;;  %6362 = vmatpush1.bf16.msra.mxu0 %v8161_v53  ;;  %7960 = vmatpush1.bf16.msra.mxu1 %v8161_v53 }
 0x17f   : > { %vm2731_vm4 = vmpackc.low %vm10598_vm7, %vm10598_vm7  ;;  %v2859_v29 = vsel %vm2730_vm12, 65537, %v15073_v34  ;;  %v10633_v30 = vor.u32 %v1360_v17, %v1357_v62  ;;  %v1353_v31 = vsel %vm868_vm0, %v10549_v13, %v1352_v38  ;;  %vm2088_vm2 = vcmp.ge.s32.totalorder %v1959_v27, 0  ;;  %v8156_v62 = vld [vmem:[%s8687_s28 + $0x1b8] sm:$0xff]   ;;  %6363 = vmatprep.subr.bf16.mxu0 %v15073_v34  ;;  %7947 = vmatprep.subr.bf16.mxu1 %v15073_v34 }
 0x180   : > { %vm2732_vm14 = vmpackc.low %vm10607_vm10, %vm10607_vm10  ;;  %v2860_v19 = vsel %vm2731_vm4, 65537, %v15073_v34  ;;  %v7828_v59 = vcombine.low %v2858_v56, %v2859_v29  ;;  %vm1578_vm3 = vcmp.ge.bf16.partialorder %v1353_v31, 0  ;;  %v1643_v13 = vmul.bf16 1036860877, %v1353_v31  ;;  %v8157_v56 = vld [vmem:[%s8687_s28 + $0x1c0] sm:$0xff]   ;;  %v10660_v29 = vpop.permute.xlu0 %3734 }
 0x181   : > { %v2861_v20 = vsel %vm2732_vm14, 65537, %v15073_v34  ;;  %v10649_v3 = vsel %vm868_vm0, %v1352_v38, %v10633_v30  ;;  %vm2089_vm1 = vcmp.ge.s32.totalorder %v1960_v49, 0  ;;  %v10658_v38 = vpop.permute.xlu1 %3732  ;;  %15311 = vst [vmem:[#allocation130_spill] sm:$0xff] %v10660_v29  ;;  %vm2090_vm11 = vcmp.ge.s32.totalorder %v1961_v32, 0 }
 0x182   : > { %v7829_v55 = vcombine.low %v2860_v19, %v2861_v20  ;;  %vm3130_vm13 = vcmp.ne.s16.totalorder %v7828_v59, 0  ;;  %vm1579_vm5 = vcmp.ge.bf16.partialorder %v10649_v3, 0  ;;  %v1644_v36 = vmul.bf16 1036860877, %v10649_v3  ;;  %15310 = vst [vmem:[#allocation129_spill] sm:$0xff] %v10658_v38  ;;  %v8162_v19 = vld [vmem:[%s14649_s3 + $0x30] sm:$0xff]  }
 0x183   : > { %v10653_v17 = vsel %vm3130_vm13, %v1706_v39, 0  ;;  %vm2091_vm7 = vcmp.ge.s32.totalorder %v1962_v14, 0  ;;  %vm2217_vm10 = vcmp.lt.s32.totalorder %v1959_v27, 1200  ;;  %vm2218_vm15 = vcmp.lt.s32.totalorder %v1960_v49, 1200  ;;  %6364 = vmatpush1.bf16.msra.mxu0 %v8162_v19  ;;  %7961 = vmatpush1.bf16.msra.mxu1 %v8162_v19 }
 0x184   : > { %15309 = vst [vmem:[#allocation128_spill] sm:$0xff] %v10653_v17  ;;  %vm3131_vm8 = vcmp.ne.s16.totalorder %v7829_v55, 0  ;;  %v10665_v37 = vshll.u32 %v10653_v17, 16  ;;  %v10668_v39 = vshrl.u32 %v10653_v17, 16  ;;  %vm2219_vm12 = vcmp.lt.s32.totalorder %v1961_v32, 1200  ;;  %vm10680_vm14 = vmand %vm2088_vm2, %vm2217_vm10  ;;  %6365 = vmatprep.subr.bf16.mxu0 %v15073_v34  ;;  %7948 = vmatprep.subr.bf16.mxu1 %v15073_v34 }
 0x185   : > { %v10673_v59 = vsel %vm3131_vm8, %v1707_v52, 0  ;;  %vm2220_vm4 = vcmp.lt.s32.totalorder %v1962_v14, 1200  ;;  %vm10685_vm13 = vmand %vm2089_vm1, %vm2218_vm15  ;;  %v1367_v47 = vshll.u32 %v8156_v62, 16  ;;  %v1373_v29 = vshrl.u32 %v8157_v56, 16  ;;  %v10714_v61 = vpop.permute.xlu1 %3736 }
 0x186   : > { %15312 = vst [vmem:[#allocation131_spill] sm:$0xff] %v10665_v37  ;;  %15313 = vst [vmem:[#allocation132_spill] sm:$0xff] %v10668_v39  ;;  %v3620_v53 = vrot.slane %v10665_v37, 1  ;;  %v10677_v20 = vshll.u32 %v10673_v59, 16  ;;  %v10690_v17 = vshrl.u32 %v10673_v59, 16  ;;  %v1364_v37 = vshrl.u32 %v8156_v62, 16 }
 0x187   : > { %15314 = vst [vmem:[#allocation133_spill] sm:$0xff] %v10673_v59  ;;  %vm10699_vm2 = vmand %vm2090_vm11, %vm2219_vm12  ;;  %v1376_v59 = vshll.u32 %v8157_v56, 16  ;;  %v8163_v62 = vld [vmem:[%s14649_s3 + $0x28] sm:$0xff]   ;;  %v1375_v32 = vrot.slane %v1373_v29, 6  ;;  %v10716_v56 = vpop.permute.xlu0 %3738  ;;  %v1708_v43 = vsel %vm1578_vm3, %v1353_v31, %v1643_v13  ;;  %v1835_v29 = vadd.s32 896, %v8661_v2 }
 0x188   : > { %15315 = vst [vmem:[#allocation134_spill] sm:$0xff] %v10677_v20  ;;  %15320 = vst [vmem:[#allocation135_spill] sm:$0xff] %v10690_v17  ;;  %v3624_v27 = vor.u32 %v10668_v39, %v3620_v53  ;;  %v3628_v38 = vrot.slane %v10677_v20, 1  ;;  %v3621_v49 = vsel %vm14975_vm6, %v3616_v25, %v3620_v53  ;;  %v1366_v25 = vrot.slane %v1364_v37, 6  ;;  %6366 = vmatpush1.bf16.msra.mxu0 %v8163_v62 }
 0x189   : > { %3826 = vrot.lane.b32.xlu0 %v3621_v49, %s8560_s7  ;;  %vm10709_vm1 = vmand %vm2091_vm7, %vm2220_vm4  ;;  %v1369_v53 = vrot.slane %v1367_v47, 7  ;;  %v1833_v20 = vadd.s32 880, %v8661_v2  ;;  %15325 = vst [vmem:[#allocation136_spill] sm:$0xff] %v10716_v56  ;;  %v1378_v14 = vrot.slane %v1376_v59, 7  ;;  %v1834_v49 = vadd.s32 888, %v8661_v2  ;;  %7962 = vmatpush1.bf16.msra.mxu1 %v8163_v62  ;;  %v8164_v59 = vld [vmem:[%s14649_s3 + $0x20] sm:$0xff]  }
 0x18a   : > { %v3629_v4 = vsel %vm14975_vm6, %v3624_v27, %v3628_v38  ;;  %vm2733_vm8 = vmpackc.low %vm10680_vm14, %vm10680_vm14  ;;  %v1709_v47 = vsel %vm1579_vm5, %v10649_v3, %v1644_v36  ;;  %6367 = vmatprep.subr.bf16.mxu0 %v15073_v34  ;;  %v3632_v37 = vor.u32 %v10690_v17, %v3628_v38  ;;  %v1836_v36 = vadd.s32 904, %v8661_v2  ;;  %7949 = vmatprep.subr.bf16.mxu1 %v15073_v34 }
 0x18b   : > { %3828 = vrot.lane.b32.xlu1 %v3629_v4, %s8560_s7  ;;  %vm2734_vm11 = vmpackc.low %vm10685_vm13, %vm10685_vm13  ;;  %v2862_v31 = vsel %vm2733_vm8, 65537, %v15073_v34  ;;  %v1370_v13 = vor.u32 %v1369_v53, %v1366_v25  ;;  %v10739_v3 = vor.u32 %v1378_v14, %v1375_v32  ;;  %v1963_v27 = vadd.s32 %v8670_v7, %v1833_v20  ;;  %v10762_v20 = vpop.permute.xlu0 %3742 }
 0x18c   : > { %vm2735_vm3 = vmpackc.low %vm10699_vm2, %vm10699_vm2  ;;  %v2863_v4 = vsel %vm2734_vm11, 65537, %v15073_v34  ;;  %v1964_v25 = vadd.s32 %v8670_v7, %v1834_v49  ;;  %v1965_v39 = vadd.s32 %v8670_v7, %v1835_v29  ;;  %6368 = vmatpush1.bf16.msra.mxu0 %v8164_v59  ;;  %15327 = vst [vmem:[#allocation138_spill] sm:$0xff] %v10762_v20  ;;  %v8165_v29 = vld [vmem:[%s14649_s3 + $0x18] sm:$0xff]  }
 0x18d   : > { %vm2736_vm5 = vmpackc.low %vm10709_vm1, %vm10709_vm1  ;;  %v2864_v55 = vsel %vm2735_vm3, 65537, %v15073_v34  ;;  %v7830_v52 = vcombine.low %v2862_v31, %v2863_v4  ;;  %v1371_v38 = vsel %vm868_vm0, %v10633_v30, %v1370_v13  ;;  %v10756_v62 = vsel %vm868_vm0, %v1370_v13, %v10739_v3  ;;  %7963 = vmatpush1.bf16.msra.mxu1 %v8164_v59  ;;  %v10760_v30 = vpop.permute.xlu1 %3740  ;;  %6369 = vmatprep.subr.bf16.mxu0 %v15073_v34  ;;  %v8158_v13 = vld [vmem:[%s8687_s28 + $0x1c8] sm:$0xff]  }
 0x18e   : > { %v2865_v19 = vsel %vm2736_vm5, 65537, %v15073_v34  ;;  %vm1580_vm10 = vcmp.ge.bf16.partialorder %v1371_v38, 0  ;;  %v1645_v32 = vmul.bf16 1036860877, %v1371_v38  ;;  %15326 = vst [vmem:[#allocation137_spill] sm:$0xff] %v10760_v30  ;;  %7950 = vmatprep.subr.bf16.mxu1 %v15073_v34  ;;  %vm1581_vm15 = vcmp.ge.bf16.partialorder %v10756_v62, 0 }
 0x18f   : > { %v7831_v53 = vcombine.low %v2864_v55, %v2865_v19  ;;  %vm3132_vm7 = vcmp.ne.s16.totalorder %v7830_v52, 0  ;;  %v1646_v49 = vmul.bf16 1036860877, %v10756_v62  ;;  %v1966_v31 = vadd.s32 %v8670_v7, %v1836_v36  ;;  %v8159_v55 = vld [vmem:[%s8687_s28 + $0x1d0] sm:$0xff]  }
 0x190   : > { %v10766_v14 = vsel %vm3132_vm7, %v1708_v43, 0  ;;  %vm2092_vm4 = vcmp.ge.s32.totalorder %v1963_v27, 0  ;;  %vm2093_vm14 = vcmp.ge.s32.totalorder %v1964_v25, 0  ;;  %vm2094_vm13 = vcmp.ge.s32.totalorder %v1965_v39, 0  ;;  %6370 = vmatpush1.bf16.msra.mxu0 %v8165_v29 }
 0x191   : > { %15328 = vst [vmem:[#allocation139_spill] sm:$0xff] %v10766_v14  ;;  %vm3133_vm12 = vcmp.ne.s16.totalorder %v7831_v53, 0  ;;  %v10776_v4 = vshll.u32 %v10766_v14, 16  ;;  %v10779_v59 = vshrl.u32 %v10766_v14, 16  ;;  %vm2095_vm2 = vcmp.ge.s32.totalorder %v1966_v31, 0  ;;  %7964 = vmatpush1.bf16.msra.mxu1 %v8165_v29  ;;  %6371 = vmatprep.subr.bf16.mxu0 %v15073_v34  ;;  %v8166_v29 = vld [vmem:[%s14649_s3 + $0x10] sm:$0xff]   ;;  %v10809_v30 = vpop.permute.xlu1 %3744 }
 0x192   : > { %v10781_v43 = vsel %vm3133_vm12, %v1709_v47, 0  ;;  %vm2221_vm1 = vcmp.lt.s32.totalorder %v1963_v27, 1200  ;;  %vm2222_vm8 = vcmp.lt.s32.totalorder %v1964_v25, 1200  ;;  %7951 = vmatprep.subr.bf16.mxu1 %v15073_v34  ;;  %vm2223_vm11 = vcmp.lt.s32.totalorder %v1965_v39, 1200 }
 0x193   : > { %15329 = vst [vmem:[#allocation140_spill] sm:$0xff] %v10776_v4  ;;  %15330 = vst [vmem:[#allocation141_spill] sm:$0xff] %v10779_v59  ;;  %v3636_v36 = vrot.slane %v10776_v4, 1  ;;  %v10786_v52 = vshll.u32 %v10781_v43, 16  ;;  %vm2224_vm3 = vcmp.lt.s32.totalorder %v1966_v31, 1200  ;;  %v10796_v19 = vshrl.u32 %v10781_v43, 16 }
 0x194   : > { %15331 = vst [vmem:[#allocation142_spill] sm:$0xff] %v10781_v43  ;;  %vm10791_vm5 = vmand %vm2092_vm4, %vm2221_vm1  ;;  %v1382_v53 = vshrl.u32 %v8158_v13, 16  ;;  %v1385_v20 = vshll.u32 %v8158_v13, 16  ;;  %v10811_v43 = vpop.permute.xlu0 %3746  ;;  %v1837_v25 = vadd.s32 912, %v8661_v2  ;;  %6372 = vmatpush1.bf16.msra.mxu0 %v8166_v29  ;;  %v1710_v13 = vsel %vm1580_vm10, %v1371_v38, %v1645_v32 }
 0x195   : > { %15332 = vst [vmem:[#allocation143_spill] sm:$0xff] %v10786_v52  ;;  %15335 = vst [vmem:[#allocation144_spill] sm:$0xff] %v10796_v19  ;;  %v3640_v14 = vor.u32 %v10779_v59, %v3636_v36  ;;  %v3644_v4 = vrot.slane %v10786_v52, 1  ;;  %v3637_v17 = vsel %vm14975_vm6, %v3632_v37, %v3636_v36  ;;  %v1391_v59 = vshrl.u32 %v8159_v55, 16  ;;  %6373 = vmatprep.subr.bf16.mxu0 %v15073_v34 }
 0x196   : > { %vm10805_vm7 = vmand %vm2093_vm14, %vm2222_vm8  ;;  %15338 = vst [vmem:[#allocation145_spill] sm:$0xff] %v10811_v43  ;;  %3830 = vrot.lane.b32.xlu0 %v3637_v17, %s8560_s7  ;;  %v1384_v52 = vrot.slane %v1382_v53, 6  ;;  %v1394_v37 = vshll.u32 %v8159_v55, 16  ;;  %v1387_v17 = vrot.slane %v1385_v20, 7  ;;  %v1838_v39 = vadd.s32 920, %v8661_v2  ;;  %7965 = vmatpush1.bf16.msra.mxu1 %v8166_v29  ;;  %v8167_v20 = vld [vmem:[%s14649_s3 + $0x8] sm:$0xff]  }
 0x197   : > { %vm10815_vm12 = vmand %vm2094_vm13, %vm2223_vm11  ;;  %v3645_v36 = vsel %vm14975_vm6, %v3640_v14, %v3644_v4  ;;  %v1393_v14 = vrot.slane %v1391_v59, 6  ;;  %v1839_v32 = vadd.s32 928, %v8661_v2  ;;  %v1840_v31 = vadd.s32 936, %v8661_v2  ;;  %7952 = vmatprep.subr.bf16.mxu1 %v15073_v34 }
 0x198   : > { %vm10824_vm4 = vmand %vm2095_vm2, %vm2224_vm3  ;;  %3832 = vrot.lane.b32.xlu1 %v3645_v36, %s8560_s7  ;;  %v1396_v38 = vrot.slane %v1394_v37, 7  ;;  %v1711_v55 = vsel %vm1581_vm15, %v10756_v62, %v1646_v49  ;;  %v1388_v47 = vor.u32 %v1387_v17, %v1384_v52  ;;  %v1967_v53 = vadd.s32 %v8670_v7, %v1837_v25  ;;  %6374 = vmatpush1.bf16.msra.mxu0 %v8167_v20  ;;  %v10863_v25 = vpop.permute.xlu1 %3748 }
 0x199   : > { %vm2737_vm14 = vmpackc.low %vm10791_vm5, %vm10791_vm5  ;;  %v3648_v37 = vor.u32 %v10796_v19, %v3644_v4  ;;  %v1968_v62 = vadd.s32 %v8670_v7, %v1838_v39  ;;  %v1969_v27 = vadd.s32 %v8670_v7, %v1839_v32  ;;  %v10865_v4 = vpop.permute.xlu0 %3750  ;;  %6375 = vmatprep.subr.bf16.mxu0 %v15073_v34  ;;  %v1970_v39 = vadd.s32 %v8670_v7, %v1840_v31 }
 0x19a   : > { %vm2738_vm10 = vmpackc.low %vm10805_vm7, %vm10805_vm7  ;;  %v2866_v59 = vsel %vm2737_vm14, 65537, %v15073_v34  ;;  %v10853_v36 = vor.u32 %v1396_v38, %v1393_v14  ;;  %v1389_v56 = vsel %vm868_vm0, %v10739_v3, %v1388_v47  ;;  %7966 = vmatpush1.bf16.msra.mxu1 %v8167_v20  ;;  %vm2096_vm2 = vcmp.ge.s32.totalorder %v1967_v53, 0  ;;  %v8168_v3 = vld [vmem:[%s14649_s3] sm:$0xff]  }
 0x19b   : > { %vm2739_vm13 = vmpackc.low %vm10815_vm12, %vm10815_vm12  ;;  %v2867_v29 = vsel %vm2738_vm10, 65537, %v15073_v34  ;;  %7953 = vmatprep.subr.bf16.mxu1 %v15073_v34  ;;  %vm1582_vm8 = vcmp.ge.bf16.partialorder %v1389_v56, 0  ;;  %v1647_v38 = vmul.bf16 1036860877, %v1389_v56  ;;  %vm2097_vm3 = vcmp.ge.s32.totalorder %v1968_v62, 0 }
 0x19c   : > { %vm2740_vm15 = vmpackc.low %vm10824_vm4, %vm10824_vm4  ;;  %v2868_v49 = vsel %vm2739_vm13, 65537, %v15073_v34  ;;  %v7832_v52 = vcombine.low %v2866_v59, %v2867_v29  ;;  %v1398_v43 = vsel %vm868_vm0, %v1388_v47, %v10853_v36  ;;  %6376 = vmatpush1.bf16.msra.mxu0 %v8168_v3  ;;  %vm2098_vm7 = vcmp.ge.s32.totalorder %v1969_v27, 0 }
 0x19d   : > { %v2869_v17 = vsel %vm2740_vm15, 65537, %v15073_v34  ;;  %vm1583_vm11 = vcmp.ge.bf16.partialorder %v1398_v43, 0  ;;  %v1648_v20 = vmul.bf16 1036860877, %v1398_v43  ;;  %6381 = vmatprep.subr.bf16.mxu0 %v15073_v34  ;;  %vm2099_vm12 = vcmp.ge.s32.totalorder %v1970_v39, 0 }
 0x19e   : > { %v7833_v14 = vcombine.low %v2868_v49, %v2869_v17  ;;  %vm3134_vm1 = vcmp.ne.s16.totalorder %v7832_v52, 0  ;;  %7967 = vmatpush1.bf16.msra.mxu1 %v8168_v3  ;;  %vm2225_vm4 = vcmp.lt.s32.totalorder %v1967_v53, 1200  ;;  %vm2226_vm14 = vcmp.lt.s32.totalorder %v1968_v62, 1200  ;;  %v8160_v52 = vld [vmem:[%s8687_s28 + $0x1d8] sm:$0xff]   ;;  %v10901_v17 = vpop.permute.xlu1 %3752  ;;  %v10903_v3 = vpop.permute.xlu0 %3754 }
 0x19f   : > { %v10876_v32 = vsel %vm3134_vm1, %v1710_v13, 0  ;;  %v8169_v13 = vld [vmem:[%s14649_s3 + $0x68] sm:$0xff]   ;;  %7954 = vmatprep.subr.bf16.mxu1 %v15073_v34  ;;  %vm2227_vm10 = vcmp.lt.s32.totalorder %v1969_v27, 1200  ;;  %vm2228_vm13 = vcmp.lt.s32.totalorder %v1970_v39, 1200  ;;  %vm10896_vm15 = vmand %vm2096_vm2, %vm2225_vm4  ;;  %15350 = vst [vmem:[#allocation151_spill] sm:$0xff] %v10901_v17  ;;  %v1712_v62 = vsel %vm1582_vm8, %v1389_v56, %v1647_v38  ;;  %v8170_v27 = vld [vmem:[%s14649_s3 + $0x60] sm:$0xff]  }
 0x1a0   : > { %15343 = vst [vmem:[#allocation146_spill] sm:$0xff] %v10876_v32  ;;  %vm3135_vm5 = vcmp.ne.s16.totalorder %v7833_v14, 0  ;;  %v10879_v31 = vshll.u32 %v10876_v32, 16  ;;  %v10882_v59 = vshrl.u32 %v10876_v32, 16  ;;  %15351 = vst [vmem:[#allocation152_spill] sm:$0xff] %v10903_v3  ;;  %6382 = vmatpush2.bf16.msra.mxu0 %v8169_v13  ;;  %v1713_v3 = vsel %vm1583_vm11, %v1398_v43, %v1648_v20 }
 0x1a1   : > { %v10885_v47 = vsel %vm3135_vm5, %v1711_v55, 0  ;;  %vm10906_vm1 = vmand %vm2097_vm3, %vm2226_vm14  ;;  %6383 = vmatprep.subr.bf16.mxu0 %v15073_v34  ;;  %v4698_v56 = vrot.slane %v9324_v40, 2  ;;  %v1400_v43 = vshrl.u32 %v8160_v52, 16  ;;  %v1403_v39 = vshll.u32 %v8160_v52, 16 }
 0x1a2   : > { %15344 = vst [vmem:[#allocation147_spill] sm:$0xff] %v10879_v31  ;;  %15345 = vst [vmem:[#allocation148_spill] sm:$0xff] %v10882_v59  ;;  %v3652_v29 = vrot.slane %v10879_v31, 1  ;;  %v10893_v49 = vshll.u32 %v10885_v47, 16  ;;  %7968 = vmatpush2.bf16.msra.mxu1 %v8169_v13  ;;  %v4699_v20 = vrot.slane %v9327_v57, 3  ;;  %v1842_v14 = vadd.s32 952, %v8661_v2 }
 0x1a3   : > { %15346 = vst [vmem:[#allocation149_spill] sm:$0xff] %v10885_v47  ;;  %vm10914_vm2 = vmand %vm2098_vm7, %vm2227_vm10  ;;  %7955 = vmatprep.subr.bf16.mxu1 %v15073_v34  ;;  %v1402_v52 = vrot.slane %v1400_v43, 6  ;;  %v4702_v17 = vrot.slane %v8822_v23, 3 }
 0x1a4   : > { %15347 = vst [vmem:[#allocation150_spill] sm:$0xff] %v10893_v49  ;;  %v3656_v32 = vor.u32 %v10882_v59, %v3652_v29  ;;  %v3660_v31 = vrot.slane %v10893_v49, 1  ;;  %v3653_v53 = vsel %vm14975_vm6, %v3648_v37, %v3652_v29  ;;  %vm10924_vm3 = vmand %vm2099_vm12, %vm2228_vm13  ;;  %v10929_v37 = vshrl.u32 %v10885_v47, 16  ;;  %6384 = vmatpush2.bf16.msra.mxu0 %v8170_v27  ;;  %v10955_v47 = vpop.permute.xlu0 %3758 }
 0x1a5   : > { %3834 = vrot.lane.b32.xlu0 %v3653_v53, %s8560_s7  ;;  %vm2741_vm8 = vmpackc.low %vm10896_vm15, %vm10896_vm15  ;;  %v1841_v29 = vadd.s32 944, %v8661_v2  ;;  %v1405_v53 = vrot.slane %v1403_v39, 7  ;;  %15360 = vst [vmem:[#allocation155_spill] sm:$0xff] %v10955_v47  ;;  %6385 = vmatprep.subr.bf16.mxu0 %v15073_v34  ;;  %v8171_v39 = vld [vmem:[%s14649_s3 + $0x58] sm:$0xff]   ;;  %v1972_v47 = vadd.s32 %v8670_v7, %v1842_v14 }
 0x1a6   : > { %15358 = vst [vmem:[#allocation153_spill] sm:$0xff] %v10929_v37  ;;  %v3661_v13 = vsel %vm14975_vm6, %v3656_v32, %v3660_v31  ;;  %vm2742_vm11 = vmpackc.low %vm10906_vm1, %vm10906_vm1  ;;  %v2870_v38 = vsel %vm2741_vm8, 65537, %v15073_v34  ;;  %v4701_v32 = vrot.slane %v8825_v33, 2  ;;  %7969 = vmatpush2.bf16.msra.mxu1 %v8170_v27  ;;  %v3664_v27 = vor.u32 %v10929_v37, %v3660_v31 }
 0x1a7   : > { %3836 = vrot.lane.b32.xlu1 %v3661_v13, %s8560_s7  ;;  %vm2743_vm5 = vmpackc.low %vm10914_vm2, %vm10914_vm2  ;;  %v2871_v55 = vsel %vm2742_vm11, 65537, %v15073_v34  ;;  %v10953_v13 = vpop.permute.xlu1 %3756  ;;  %v1971_v43 = vadd.s32 %v8670_v7, %v1841_v29  ;;  %7956 = vmatprep.subr.bf16.mxu1 %v15073_v34  ;;  %v10970_v49 = vor.u32 %v1405_v53, %v1402_v52  ;;  %vm2101_vm10 = vcmp.ge.s32.totalorder %v1972_v47, 0 }
 0x1a8   : > { %15359 = vst [vmem:[#allocation154_spill] sm:$0xff] %v10953_v13  ;;  %vm2744_vm7 = vmpackc.low %vm10924_vm3, %vm10924_vm3  ;;  %v2872_v19 = vsel %vm2743_vm5, 65537, %v15073_v34  ;;  %v7834_v59 = vcombine.low %v2870_v38, %v2871_v55  ;;  %6386 = vmatpush2.bf16.msra.mxu0 %v8171_v39  ;;  %vm2230_vm13 = vcmp.lt.s32.totalorder %v1972_v47, 1200  ;;  %vm4697_vm8 = vsmask.f32 5376  ;;  %v11004_v53 = vpop.permute.xlu0 %3726 }
 0x1a9   : > { %v2873_v2 = vsel %vm2744_vm7, 65537, %v15073_v34  ;;  %15361 = vst [vmem:[#allocation156_spill] sm:$0xff] %v10970_v49  ;;  %vm2100_vm4 = vcmp.ge.s32.totalorder %v1971_v43, 0  ;;  %vm2229_vm14 = vcmp.lt.s32.totalorder %v1971_v43, 1200  ;;  %v1407_v29 = vsel %vm868_vm0, %v10853_v36, %v10970_v49  ;;  %6387 = vmatprep.subr.bf16.mxu0 %v15073_v34  ;;  %vm10989_vm3 = vmand %vm2101_vm10, %vm2230_vm13  ;;  %v8172_v36 = vld [vmem:[%s14649_s3 + $0x50] sm:$0xff]  }
 0x1aa   : > { %v7835_v13 = vcombine.low %v2872_v19, %v2873_v2  ;;  %vm3136_vm12 = vcmp.ne.s16.totalorder %v7834_v59, 0  ;;  %vm10978_vm15 = vmand %vm2100_vm4, %vm2229_vm14  ;;  %7970 = vmatpush2.bf16.msra.mxu1 %v8171_v39  ;;  %vm1584_vm2 = vcmp.ge.bf16.partialorder %v1407_v29, 0  ;;  %v4700_v19 = vor.u32 %v4699_v20, %v4698_v56 }
 0x1ab   : > { %v10973_v38 = vsel %vm3136_vm12, %v1712_v62, 0  ;;  %7957 = vmatprep.subr.bf16.mxu1 %v15073_v34  ;;  %v1649_v62 = vmul.bf16 1036860877, %v1407_v29  ;;  %vm2745_vm11 = vmpackc.low %vm10978_vm15, %vm10978_vm15  ;;  %v11002_v52 = vpop.permute.xlu1 %3760  ;;  %v11014_v43 = vor.u32 %v4702_v17, %v4701_v32  ;;  %v8173_v17 = vld [vmem:[%s14649_s3 + $0x48] sm:$0xff]   ;;  %v3920_v32 = vrot.slane %v9319_v15, 1 }
 0x1ac   : > { %15362 = vst [vmem:[#allocation157_spill] sm:$0xff] %v10973_v38  ;;  %vm3137_vm1 = vcmp.ne.s16.totalorder %v7835_v13, 0  ;;  %v10984_v2 = vshll.u32 %v10973_v38, 16  ;;  %v10987_v31 = vshrl.u32 %v10973_v38, 16  ;;  %15370 = vst [vmem:[#allocation161_spill] sm:$0xff] %v11002_v52  ;;  %6388 = vmatpush2.bf16.msra.mxu0 %v8172_v36  ;;  %vm3919_vm12 = vcmask 1046528  }
 0x1ad   : > { %v10997_v47 = vsel %vm3137_vm1, %v1713_v3, 0  ;;  %vm2746_vm5 = vmpackc.low %vm10989_vm3, %vm10989_vm3  ;;  %v2874_v3 = vsel %vm2745_vm11, 65537, %v15073_v34  ;;  %v1714_v39 = vsel %vm1584_vm2, %v1407_v29, %v1649_v62  ;;  %6389 = vmatprep.subr.bf16.mxu0 %v15073_v34  ;;  %v4826_v62 = vrot.slane %v9877_v42, 3 }
 0x1ae   : > { %15365 = vst [vmem:[#allocation158_spill] sm:$0xff] %v10984_v2  ;;  %15366 = vst [vmem:[#allocation159_spill] sm:$0xff] %v10987_v31  ;;  %v3668_v14 = vrot.slane %v10984_v2, 1  ;;  %v11008_v13 = vshll.u32 %v10997_v47, 16  ;;  %v2875_v55 = vsel %vm2746_vm5, 65537, %v15073_v34  ;;  %v11019_v49 = vshrl.u32 %v10997_v47, 16  ;;  %7971 = vmatpush2.bf16.msra.mxu1 %v8172_v36 }
 0x1af   : > { %15369 = vst [vmem:[#allocation160_spill] sm:$0xff] %v10997_v47  ;;  %v7836_v7 = vcombine.low %v2874_v3, %v2875_v55  ;;  %7958 = vmatprep.subr.bf16.mxu1 %v15073_v34  ;;  %v4825_v36 = vrot.slane %v9890_v0, 2  ;;  %v11040_v55 = vpop.permute.xlu1 %3764  ;;  %vm5085_vm4 = vcmask 1044480   ;;  %vm4177_vm14 = vsmask.f32 6400 }
 0x1b0   : > { %15371 = vst [vmem:[#allocation162_spill] sm:$0xff] %v11008_v13  ;;  %15372 = vst [vmem:[#allocation163_spill] sm:$0xff] %v11019_v49  ;;  %v3672_v56 = vor.u32 %v10987_v31, %v3668_v14  ;;  %v3676_v20 = vrot.slane %v11008_v13, 1  ;;  %v3669_v59 = vsel %vm14975_vm6, %v3664_v27, %v3668_v14  ;;  %v4829_v27 = vrot.slane %v9948_v22, 2  ;;  %6390 = vmatpush2.bf16.msra.mxu0 %v8173_v17  ;;  %v15409_v31 = vld [vmem:[#allocation91_spill] sm:$0xff] }
 0x1b1   : > { %3838 = vrot.lane.b32.xlu0 %v3669_v59, %s8560_s7  ;;  %vm3138_vm7 = vcmp.ne.s16.totalorder %v7836_v7, 0  ;;  %v4830_v14 = vrot.slane %v9945_v51, 3  ;;  %15374 = vst [vmem:[#allocation165_spill] sm:$0xff] %v11040_v55  ;;  %v11042_v59 = vpop.permute.xlu0 %3762  ;;  %6391 = vmatprep.subr.bf16.mxu0 %v15073_v34  ;;  %v15377_v13 = vrot.slane %v8811_v28, 1  ;;  %vm4567_vm10 = vcmask 1045504  }
 0x1b2   : > { %v3677_v47 = vsel %vm14975_vm6, %v3672_v56, %v3676_v20  ;;  %v11038_v3 = vsel %vm3138_vm7, %v1714_v39, 0  ;;  %15375 = vst [vmem:[#allocation166_spill] sm:$0xff] %v11042_v59  ;;  %v4704_v56 = vsel %vm4697_vm8, %v4700_v19, %v11014_v43  ;;  %v3680_v7 = vor.u32 %v11019_v49, %v3676_v20  ;;  %7972 = vmatpush2.bf16.msra.mxu1 %v8173_v17 }
 0x1b3   : > { %3840 = vrot.lane.b32.xlu1 %v3677_v47, %s8560_s7  ;;  %15373 = vst [vmem:[#allocation164_spill] sm:$0xff] %v11038_v3  ;;  %v11049_v29 = vshll.u32 %v11038_v3, 16  ;;  %v8174_v47 = vld [vmem:[%s14649_s3 + $0x40] sm:$0xff]   ;;  %7959 = vmatprep.subr.bf16.mxu1 %v15073_v34  ;;  %v3922_v38 = vsel %vm3919_vm12, %v3920_v32, %v15377_v13  ;;  %v11059_v59 = vor.u32 %v4826_v62, %v4825_v36  ;;  %v5086_v20 = vrot.slane %v9319_v15, 3 }
 0x1b4   : > { %v4831_v19 = vor.u32 %v4830_v14, %v4829_v27  ;;  %6392 = vmatpush2.bf16.msra.mxu0 %v8174_v47  ;;  %v5087_v17 = vrot.slane %v8811_v28, 3  ;;  %v4178_v3 = vrot.slane %v9324_v40, 1  ;;  %v4179_v49 = vrot.slane %v9327_v57, 2  ;;  %v11074_v27 = vpop.permute.xlu1 %3768 }
 0x1b5   : > { %15376 = vst [vmem:[#allocation167_spill] sm:$0xff] %v11049_v29  ;;  %v14944_v39 = vrot.slane %v11049_v29, 1  ;;  %15378 = vst [vmem:[#allocation168_spill] sm:$0xff] %v11059_v59  ;;  %v4181_v13 = vrot.slane %v8825_v33, 1  ;;  %v4182_v32 = vrot.slane %v8822_v23, 2  ;;  %v14945_v36 = vrot.slane %v9873_v63, 1  ;;  %v11076_v40 = vpop.permute.xlu0 %3766 }
 0x1b6   : > { %7973 = vmatpush2.bf16.msra.mxu1 %v8174_v47  ;;  %v3985_v62 = vrot.slane %v9940_v18, 1  ;;  %15379 = vst [vmem:[#allocation169_spill] sm:$0xff] %v11074_v27  ;;  %15380 = vst [vmem:[#allocation170_spill] sm:$0xff] %v11076_v40  ;;  %v4832_v14 = vsel %vm4697_vm8, %v11059_v59, %v4831_v19  ;;  %v5088_v33 = vsel %vm5085_vm4, %v5086_v20, %v5087_v17  ;;  %v14946_v47 = vrot.slane %v9873_v63, 3  ;;  %v15399_v29 = vld [vmem:[#allocation88_spill] sm:$0xff]  ;;  %v15404_v27 = vld [vmem:[#allocation11_spill] sm:$0xff] }
 0x1b7   : > { %4957 = vrot.lane.b32.xlu1 %v4704_v56, %s8560_s7  ;;  %v3685_v34 = vsel %vm14975_vm6, %v3680_v7, %v14944_v39  ;;  %v4180_v23 = vor.u32 %v4179_v49, %v4178_v3  ;;  %v4183_v57 = vor.u32 %v4182_v32, %v4181_v13  ;;  %v4706_v56 = vrot.slane %v8782_v9, 3 }
 0x1b8   : > { %3842 = vrot.lane.b32.xlu0 %v3685_v34, %s8560_s7  ;;  %v4705_v34 = vrot.slane %v8785_v10, 2  ;;  %v3986_v7 = vsel %vm3919_vm12, %v14945_v36, %v3985_v62  ;;  %v5151_v39 = vrot.slane %v9940_v18, 3  ;;  %v4306_v49 = vrot.slane %v9877_v42, 2  ;;  %v11095_v13 = vpop.permute.xlu1 %3772 }
 0x1b9   : > { %v4309_v3 = vrot.slane %v9948_v22, 1  ;;  %v4310_v20 = vrot.slane %v9945_v51, 2  ;;  %15381 = vst [vmem:[#allocation171_spill] sm:$0xff] %v11095_v13  ;;  %v11097_v32 = vpop.permute.xlu0 %3770  ;;  %v4833_v51 = vrot.slane %v9962_v26, 2  ;;  %v4725_v55 = vrot.slane %v15404_v27, 2 }
 0x1ba   : > { %15382 = vst [vmem:[#allocation172_spill] sm:$0xff] %v11097_v32  ;;  %v4707_v36 = vor.u32 %v4706_v56, %v4705_v34  ;;  %v3923_v34 = vrot.slane %v8773_v5, 1  ;;  %v15398_v32 = vld [vmem:[#allocation89_spill] sm:$0xff]  ;;  %vm5343_vm13 = vcmask 261120   ;;  %vm5601_vm15 = vcmask 785408  }
 0x1bb   : > { %4049 = vrot.lane.b32.xlu1 %v3922_v38, %s8561_s10  ;;  %v4305_v38 = vrot.slane %v9890_v0, 1  ;;  %v5152_v0 = vsel %vm5085_vm4, %v14946_v47, %v5151_v39  ;;  %v4311_v22 = vor.u32 %v4310_v20, %v4309_v3  ;;  %v15386_v3 = vrot.slane %v8811_v28, 1 }
 0x1bc   : > { %5021 = vrot.lane.b32.xlu0 %v4832_v14, %s8560_s7  ;;  %v4184_v14 = vsel %vm4177_vm14, %v4180_v23, %v4183_v57  ;;  %v4708_v23 = vsel %vm4697_vm8, %v11014_v43, %v4707_v36  ;;  %v11113_v56 = vpop.permute.xlu1 %3776  ;;  %v5089_v43 = vrot.slane %v8773_v5, 3  ;;  %v4849_v40 = vrot.slane %v15398_v32, 2 }
 0x1bd   : > { %v11104_v42 = vor.u32 %v4306_v49, %v4305_v38  ;;  %15384 = vst [vmem:[#allocation174_spill] sm:$0xff] %v11113_v56  ;;  %v3924_v20 = vsel %vm3919_vm12, %v15386_v3, %v3923_v34  ;;  %v3987_v56 = vrot.slane %v9950_v44, 1  ;;  %v4329_v2 = vrot.slane %v15398_v32, 1 }
 0x1be   : > { %vm5472_vm1 = vcmask 523264  }
 0x1bf   : > { %5215 = vrot.lane.b32.xlu1 %v5088_v33, %s8561_s10  ;;  %15383 = vst [vmem:[#allocation173_spill] sm:$0xff] %v11104_v42  ;;  %v4834_v33 = vrot.slane %v9955_v45, 3  ;;  %v4312_v38 = vsel %vm4177_vm14, %v11104_v42, %v4311_v22  ;;  %v4709_v42 = vrot.slane %v8818_v21, 2 }
 0x1c0   : > { %4113 = vrot.lane.b32.xlu0 %v3986_v7, %s8561_s10  ;;  %v11115_v7 = vpop.permute.xlu0 %3774 }
 0x1c1   : > { %15385 = vst [vmem:[#allocation175_spill] sm:$0xff] %v11115_v7  ;;  %v4835_v49 = vor.u32 %v4834_v33, %v4833_v51  ;;  %v11130_v51 = vpop.permute.xlu1 %3780 }
 0x1c2   : > { %15387 = vst [vmem:[#allocation176_spill] sm:$0xff] %v11130_v51 }
 0x1c3   : > { %4439 = vrot.lane.b32.xlu1 %v4184_v14, %s8562_s11  ;;  %v4185_v14 = vrot.slane %v8785_v10, 1  ;;  %v4836_v47 = vsel %vm4697_vm8, %v4831_v19, %v4835_v49  ;;  %v4710_v10 = vrot.slane %v8794_v12, 3  ;;  %v5153_v19 = vrot.slane %v9950_v44, 3 }
 0x1c4   : > { %5279 = vrot.lane.b32.xlu0 %v5152_v0, %s8561_s10  ;;  %v4186_v0 = vrot.slane %v8782_v9, 2  ;;  %v11132_v33 = vpop.permute.xlu0 %3778  ;;  %v3988_v9 = vsel %vm3919_vm12, %v3985_v62, %v3987_v56 }
 0x1c5   : > { %15388 = vst [vmem:[#allocation177_spill] sm:$0xff] %v11132_v33  ;;  %v4837_v33 = vrot.slane %v10027_v16, 2 }
 0x1c6   : > { %v4187_v3 = vor.u32 %v4186_v0, %v4185_v14  ;;  %v11145_v14 = vpop.permute.xlu1 %3784 }
 0x1c7   : > { %4959 = vrot.lane.b32.xlu1 %v4708_v23, %s8560_s7  ;;  %v5090_v23 = vsel %vm5085_vm4, %v5087_v17, %v5089_v43  ;;  %v4711_v17 = vor.u32 %v4710_v10, %v4709_v42  ;;  %15389 = vst [vmem:[#allocation178_spill] sm:$0xff] %v11145_v14 }
 0x1c8   : > { %4503 = vrot.lane.b32.xlu0 %v4312_v38, %s8562_s11  ;;  %v4313_v38 = vrot.slane %v9962_v26, 1  ;;  %v4188_v51 = vsel %vm4177_vm14, %v4183_v57, %v4187_v3  ;;  %v11147_v0 = vpop.permute.xlu0 %3782  ;;  %v4838_v26 = vrot.slane %v10024_v11, 3  ;;  %v3925_v57 = vrot.slane %v8779_v8, 1 }
 0x1c9   : > { %15390 = vst [vmem:[#allocation179_spill] sm:$0xff] %v11147_v0 }
 0x1ca   : > { %v11158_v10 = vpop.permute.xlu1 %3788 }
 0x1cb   : > { %4051 = vrot.lane.b32.xlu1 %v3924_v20, %s8561_s10  ;;  %v4314_v20 = vrot.slane %v9955_v45, 2  ;;  %v4712_v45 = vsel %vm4697_vm8, %v4707_v36, %v4711_v17  ;;  %15391 = vst [vmem:[#allocation180_spill] sm:$0xff] %v11158_v10  ;;  %v4190_v36 = vrot.slane %v8794_v12, 2  ;;  %v4841_v10 = vrot.slane %v10046_v50, 2 }
 0x1cc   : > { %5023 = vrot.lane.b32.xlu0 %v4836_v47, %s8560_s7  ;;  %v5154_v47 = vsel %vm5085_vm4, %v5151_v39, %v5153_v19  ;;  %v11160_v39 = vpop.permute.xlu0 %3786 }
 0x1cd   : > { %v4315_v62 = vor.u32 %v4314_v20, %v4313_v38  ;;  %15392 = vst [vmem:[#allocation181_spill] sm:$0xff] %v11160_v39  ;;  %v5091_v38 = vrot.slane %v8779_v8, 3 }
 0x1cf   : > { %5217 = vrot.lane.b32.xlu1 %v5090_v23, %s8561_s10  ;;  %v4316_v42 = vsel %vm4177_vm14, %v4311_v22, %v4315_v62  ;;  %v4839_v23 = vor.u32 %v4838_v26, %v4837_v33  ;;  %v3989_v22 = vrot.slane %v10020_v1, 1  ;;  %v5092_v33 = vsel %vm5085_vm4, %v5089_v43, %v5091_v38 }
 0x1d0   : > { %4115 = vrot.lane.b32.xlu0 %v3988_v9, %s8561_s10  ;;  %v3926_v9 = vsel %vm3919_vm12, %v3923_v34, %v3925_v57  ;;  %v4713_v26 = vrot.slane %v8863_v60, 2  ;;  %v4714_v34 = vrot.slane %v8860_v58, 3  ;;  %v11176_v12 = vpop.permute.xlu0 %3790 }
 0x1d1   : > { %v4840_v20 = vsel %vm4697_vm8, %v4835_v49, %v4839_v23  ;;  %v5155_v49 = vrot.slane %v10020_v1, 3 }
 0x1d3   : > { %4441 = vrot.lane.b32.xlu1 %v4188_v51, %s8562_s11  ;;  %v4189_v51 = vrot.slane %v8818_v21, 1  ;;  %v11174_v21 = vpop.permute.xlu1 %3792 }
 0x1d4   : > { %5281 = vrot.lane.b32.xlu0 %v5154_v47, %s8561_s10 }
 0x1d5   : > { %v4191_v47 = vor.u32 %v4190_v36, %v4189_v51  ;;  %v4715_v51 = vor.u32 %v4714_v34, %v4713_v26  ;;  %v5156_v36 = vsel %vm5085_vm4, %v5153_v19, %v5155_v49  ;;  %v5093_v34 = vrot.slane %v8854_v54, 3 }
 0x1d7   : > { %4961 = vrot.lane.b32.xlu1 %v4712_v45, %s8560_s7  ;;  %v3990_v45 = vsel %vm3919_vm12, %v3987_v56, %v3989_v22  ;;  %v4192_v43 = vsel %vm4177_vm14, %v4187_v3, %v4191_v47  ;;  %v4842_v56 = vrot.slane %v10033_v41, 3  ;;  %v11189_v39 = vpop.permute.xlu1 %3796  ;;  %v3927_v3 = vrot.slane %v8854_v54, 1 }
 0x1d8   : > { %4505 = vrot.lane.b32.xlu0 %v4316_v42, %s8562_s11  ;;  %v4317_v42 = vrot.slane %v10027_v16, 1  ;;  %v11191_v16 = vpop.permute.xlu0 %3794 }
 0x1d9   : > { %v4843_v19 = vor.u32 %v4842_v56, %v4841_v10  ;;  %v3928_v26 = vsel %vm3919_vm12, %v3925_v57, %v3927_v3  ;;  %v5094_v57 = vsel %vm5085_vm4, %v5091_v38, %v5093_v34  ;;  %v5157_v56 = vrot.slane %v10029_v35, 3 }
 0x1db   : > { %4053 = vrot.lane.b32.xlu1 %v3926_v9, %s8561_s10  ;;  %v4318_v9 = vrot.slane %v10024_v11, 2  ;;  %v4716_v11 = vsel %vm4697_vm8, %v4711_v17, %v4715_v51  ;;  %v11203_v17 = vpop.permute.xlu1 %3800 }
 0x1dc   : > { %5025 = vrot.lane.b32.xlu0 %v4840_v20, %s8560_s7 }
 0x1dd   : > { %v4319_v20 = vor.u32 %v4318_v9, %v4317_v42  ;;  %v4194_v42 = vrot.slane %v8860_v58, 2  ;;  %v11205_v9 = vpop.permute.xlu0 %3798 }
 0x1df   : > { %5219 = vrot.lane.b32.xlu1 %v5092_v33, %s8561_s10  ;;  %v4320_v33 = vsel %vm4177_vm14, %v4315_v62, %v4319_v20  ;;  %v3991_v62 = vrot.slane %v10029_v35, 1 }
 0x1e0   : > { %4117 = vrot.lane.b32.xlu0 %v3990_v45, %s8561_s10  ;;  %v4193_v45 = vrot.slane %v8863_v60, 1  ;;  %v4718_v60 = vrot.slane %v8925_v46, 3 }
 0x1e1   : > { %v3992_v58 = vsel %vm3919_vm12, %v3989_v22, %v3991_v62  ;;  %v11221_v38 = vpop.permute.xlu0 %3802 }
 0x1e2   : > { %v4195_v10 = vor.u32 %v4194_v42, %v4193_v45  ;;  %v5158_v42 = vsel %vm5085_vm4, %v5155_v49, %v5157_v56 }
 0x1e3   : > { %4443 = vrot.lane.b32.xlu1 %v4192_v43, %s8562_s11  ;;  %v4844_v43 = vsel %vm4697_vm8, %v4839_v23, %v4843_v19  ;;  %v4322_v23 = vrot.slane %v10033_v41, 2 }
 0x1e4   : > { %5283 = vrot.lane.b32.xlu0 %v5156_v36, %s8561_s10  ;;  %v4717_v36 = vrot.slane %v8928_v48, 2 }
 0x1e6   : > { %v4719_v45 = vor.u32 %v4718_v60, %v4717_v36 }
 0x1e7   : > { %4963 = vrot.lane.b32.xlu1 %v4716_v11, %s8560_s7  ;;  %v4321_v11 = vrot.slane %v10046_v50, 1  ;;  %v4846_v50 = vrot.slane %v10101_v6, 3 }
 0x1e8   : > { %4507 = vrot.lane.b32.xlu0 %v4320_v33, %s8562_s11  ;;  %v11219_v33 = vpop.permute.xlu1 %3804  ;;  %v4720_v41 = vsel %vm4697_vm8, %v4715_v51, %v4719_v45  ;;  %v4198_v51 = vrot.slane %v8925_v46, 2 }
 0x1e9   : > { %v4323_v22 = vor.u32 %v4322_v23, %v4321_v11  ;;  %v4197_v11 = vrot.slane %v8928_v48, 1  ;;  %v15396_v48 = vld [vmem:[#allocation7_spill] sm:$0xff] }
 0x1ea   : > { %v4722_v59 = vrot.slane %v15396_v48, 3 }
 0x1eb   : > { %4055 = vrot.lane.b32.xlu1 %v3928_v26, %s8561_s10  ;;  %v4196_v26 = vsel %vm4177_vm14, %v4191_v47, %v4195_v10  ;;  %v11234_v47 = vpop.permute.xlu0 %3806  ;;  %v4324_v36 = vsel %vm4177_vm14, %v4319_v20, %v4323_v22 }
 0x1ec   : > { %5027 = vrot.lane.b32.xlu0 %v4844_v43, %s8560_s7  ;;  %v4845_v43 = vrot.slane %v10104_v24, 2  ;;  %v11232_v0 = vpop.permute.xlu1 %3808 }
 0x1ee   : > { %v4847_v49 = vor.u32 %v4846_v50, %v4845_v43  ;;  %v4199_v50 = vor.u32 %v4198_v51, %v4197_v11 }
 0x1ef   : > { %5221 = vrot.lane.b32.xlu1 %v5094_v57, %s8561_s10  ;;  %v15393_v57 = vld [vmem:[#allocation5_spill] sm:$0xff]  ;;  %v11248_v43 = vpop.permute.xlu0 %3810 }
 0x1f0   : > { %4119 = vrot.lane.b32.xlu0 %v3992_v58, %s8561_s10  ;;  %v3929_v14 = vrot.slane %v15393_v57, 1  ;;  %v5095_v58 = vrot.slane %v15393_v57, 3  ;;  %v4848_v23 = vsel %vm4697_vm8, %v4843_v19, %v4847_v49  ;;  %v11246_v20 = vpop.permute.xlu1 %3812  ;;  %v4200_v13 = vsel %vm4177_vm14, %v4195_v10, %v4199_v50 }
 0x1f2   : > { %v3930_v60 = vsel %vm3919_vm12, %v3927_v3, %v3929_v14  ;;  %v5096_v3 = vsel %vm5085_vm4, %v5093_v34, %v5095_v58 }
 0x1f3   : > { %4445 = vrot.lane.b32.xlu1 %v4196_v26, %s8562_s11  ;;  %v15394_v26 = vld [vmem:[#allocation86_spill] sm:$0xff]  ;;  %v11263_v51 = vpop.permute.xlu0 %3814 }
 0x1f4   : > { %5285 = vrot.lane.b32.xlu0 %v5158_v42, %s8561_s10  ;;  %v3993_v42 = vrot.slane %v15394_v26, 1  ;;  %v5159_v19 = vrot.slane %v15394_v26, 3  ;;  %v11261_v11 = vpop.permute.xlu1 %3816 }
 0x1f5   : > { %15397 = vst [vmem:[#allocation5_spill] sm:$0xff] %v11261_v11  ;;  %v15432_v11 = vld [vmem:[#allocation97_spill] sm:$0xff] }
 0x1f6   : > { %v3994_v46 = vsel %vm3919_vm12, %v3991_v62, %v3993_v42 }
 0x1f7   : > { %4965 = vrot.lane.b32.xlu1 %v4720_v41, %s8560_s7  ;;  %v15395_v41 = vld [vmem:[#allocation8_spill] sm:$0xff] }
 0x1f8   : > { %4509 = vrot.lane.b32.xlu0 %v4324_v36, %s8562_s11  ;;  %v4721_v7 = vrot.slane %v15395_v41, 2  ;;  %v4325_v36 = vrot.slane %v10104_v24, 1  ;;  %v4850_v24 = vrot.slane %v15399_v29, 3 }
 0x1fa   : > { %v4723_v34 = vor.u32 %v4722_v59, %v4721_v7  ;;  %v4851_v7 = vor.u32 %v4850_v24, %v4849_v40 }
 0x1fb   : > { %4057 = vrot.lane.b32.xlu1 %v3930_v60, %s8561_s10  ;;  %v4326_v60 = vrot.slane %v10101_v6, 2 }
 0x1fc   : > { %5029 = vrot.lane.b32.xlu0 %v4848_v23, %s8560_s7  ;;  %v5160_v23 = vsel %vm5085_vm4, %v5157_v56, %v5159_v19  ;;  %v4724_v6 = vsel %vm4697_vm8, %v4719_v45, %v4723_v34  ;;  %v11276_v56 = vpop.permute.xlu0 %3818  ;;  %v4202_v45 = vrot.slane %v15396_v48, 2 }
 0x1fd   : > { %v4327_v62 = vor.u32 %v4326_v60, %v4325_v36  ;;  %15402 = vst [vmem:[#allocation8_spill] sm:$0xff] %v11276_v56 }
 0x1ff   : > { %5223 = vrot.lane.b32.xlu1 %v5096_v3, %s8561_s10  ;;  %v15400_v3 = vld [vmem:[#allocation6_spill] sm:$0xff]  ;;  %v4328_v59 = vsel %vm4177_vm14, %v4323_v22, %v4327_v62  ;;  %v15403_v22 = vld [vmem:[#allocation87_spill] sm:$0xff] }
 0x200   : > { %4121 = vrot.lane.b32.xlu0 %v3994_v46, %s8561_s10  ;;  %v3931_v10 = vrot.slane %v15400_v3, 1  ;;  %v11274_v46 = vpop.permute.xlu1 %3820  ;;  %v5097_v60 = vrot.slane %v15400_v3, 3  ;;  %v3995_v40 = vrot.slane %v15403_v22, 1  ;;  %v11292_v48 = vpop.permute.xlu0 %3822 }
 0x201   : > { %15401 = vst [vmem:[#allocation86_spill] sm:$0xff] %v11274_v46  ;;  %15407 = vst [vmem:[#allocation89_spill] sm:$0xff] %v11292_v48 }
 0x202   : > { %v3932_v36 = vsel %vm3919_vm12, %v3929_v14, %v3931_v10  ;;  %v5098_v24 = vsel %vm5085_vm4, %v5095_v58, %v5097_v60  ;;  %v15405_v14 = vld [vmem:[#allocation10_spill] sm:$0xff] }
 0x203   : > { %4447 = vrot.lane.b32.xlu1 %v4200_v13, %s8562_s11  ;;  %v4201_v13 = vrot.slane %v15395_v41, 1  ;;  %v4726_v52 = vrot.slane %v15405_v14, 3 }
 0x204   : > { %5287 = vrot.lane.b32.xlu0 %v5160_v23, %s8561_s10  ;;  %v4852_v23 = vsel %vm4697_vm8, %v4847_v49, %v4851_v7  ;;  %v11290_v41 = vpop.permute.xlu1 %3824  ;;  %v5161_v49 = vrot.slane %v15403_v22, 3  ;;  %v11307_v32 = vpop.permute.xlu0 %3826 }
 0x205   : > { %15406 = vst [vmem:[#allocation7_spill] sm:$0xff] %v11290_v41  ;;  %v15408_v41 = vld [vmem:[#allocation92_spill] sm:$0xff]  ;;  %15411 = vst [vmem:[#allocation6_spill] sm:$0xff] %v11307_v32 }
 0x206   : > { %v4853_v48 = vrot.slane %v15408_v41, 2 }
 0x207   : > { %4967 = vrot.lane.b32.xlu1 %v4724_v6, %s8560_s7  ;;  %v4203_v6 = vor.u32 %v4202_v45, %v4201_v13  ;;  %v4727_v13 = vor.u32 %v4726_v52, %v4725_v55  ;;  %v5162_v45 = vsel %vm5085_vm4, %v5159_v19, %v5161_v49 }
 0x208   : > { %4511 = vrot.lane.b32.xlu0 %v4328_v59, %s8562_s11  ;;  %v3996_v59 = vsel %vm3919_vm12, %v3993_v42, %v3995_v40  ;;  %v4854_v42 = vrot.slane %v15409_v31, 3  ;;  %v11305_v46 = vpop.permute.xlu1 %3828 }
 0x209   : > { %v4204_v58 = vsel %vm4177_vm14, %v4199_v50, %v4203_v6  ;;  %15410 = vst [vmem:[#allocation88_spill] sm:$0xff] %v11305_v46 }
 0x20a   : > { %v4855_v55 = vor.u32 %v4854_v42, %v4853_v48 }
 0x20b   : > { %4059 = vrot.lane.b32.xlu1 %v3932_v36, %s8561_s10  ;;  %v4330_v36 = vrot.slane %v15399_v29, 2  ;;  %v4728_v29 = vsel %vm4697_vm8, %v4723_v34, %v4727_v13 }
 0x20c   : > { %5031 = vrot.lane.b32.xlu0 %v4852_v23, %s8560_s7  ;;  %v11319_v34 = vpop.permute.xlu1 %3832 }
 0x20d   : > { %v4331_v23 = vor.u32 %v4330_v36, %v4329_v2  ;;  %v4206_v36 = vrot.slane %v15405_v14, 2  ;;  %15413 = vst [vmem:[#allocation87_spill] sm:$0xff] %v11319_v34  ;;  %v4333_v34 = vrot.slane %v15408_v41, 1  ;;  %v15421_v41 = vld [vmem:[#allocation94_spill] sm:$0xff] }
 0x20e   : > { %v4858_v56 = vrot.slane %v15421_v41, 3 }
 0x20f   : > { %5225 = vrot.lane.b32.xlu1 %v5098_v24, %s8561_s10  ;;  %v15412_v24 = vld [vmem:[#allocation9_spill] sm:$0xff]  ;;  %v4332_v52 = vsel %vm4177_vm14, %v4327_v62, %v4331_v23  ;;  %v15415_v62 = vld [vmem:[#allocation90_spill] sm:$0xff] }
 0x210   : > { %4123 = vrot.lane.b32.xlu0 %v3996_v59, %s8561_s10  ;;  %v3933_v50 = vrot.slane %v15412_v24, 1  ;;  %v5099_v19 = vrot.slane %v15412_v24, 3  ;;  %v4205_v59 = vrot.slane %v15404_v27, 1  ;;  %v3997_v48 = vrot.slane %v15415_v62, 1  ;;  %v15417_v27 = vld [vmem:[#allocation13_spill] sm:$0xff] }
 0x211   : > { %v4730_v32 = vrot.slane %v15417_v27, 3 }
 0x212   : > { %v3934_v2 = vsel %vm3919_vm12, %v3931_v10, %v3933_v50  ;;  %v5100_v10 = vsel %vm5085_vm4, %v5097_v60, %v5099_v19  ;;  %v4207_v42 = vor.u32 %v4206_v36, %v4205_v59  ;;  %v3998_v14 = vsel %vm3919_vm12, %v3995_v40, %v3997_v48 }
 0x213   : > { %4449 = vrot.lane.b32.xlu1 %v4204_v58, %s8562_s11  ;;  %v11321_v58 = vpop.permute.xlu0 %3830 }
 0x214   : > { %5289 = vrot.lane.b32.xlu0 %v5162_v45, %s8561_s10  ;;  %15414 = vst [vmem:[#allocation11_spill] sm:$0xff] %v11321_v58  ;;  %v4856_v45 = vsel %vm4697_vm8, %v4851_v7, %v4855_v55  ;;  %v4334_v7 = vrot.slane %v15409_v31, 2  ;;  %v4208_v59 = vsel %vm4177_vm14, %v4203_v6, %v4207_v42  ;;  %v15420_v58 = vld [vmem:[#allocation95_spill] sm:$0xff] }
 0x215   : > { %v4857_v37 = vrot.slane %v15420_v58, 2 }
 0x216   : > { %v11342_v40 = vor.u32 %v4334_v7, %v4333_v34  ;;  %v4210_v7 = vrot.slane %v15417_v27, 2 }
 0x217   : > { %4969 = vrot.lane.b32.xlu1 %v4728_v29, %s8560_s7  ;;  %v15416_v29 = vld [vmem:[#allocation14_spill] sm:$0xff]  ;;  %v11337_v60 = vpop.permute.xlu0 %3834 }
 0x218   : > { %4513 = vrot.lane.b32.xlu0 %v4332_v52, %s8562_s11  ;;  %v4729_v46 = vrot.slane %v15416_v29, 2  ;;  %v5163_v52 = vrot.slane %v15415_v62, 3  ;;  %15419 = vst [vmem:[#allocation92_spill] sm:$0xff] %v11337_v60 }
 0x21a   : > { %v4731_v36 = vor.u32 %v4730_v32, %v4729_v46  ;;  %v11356_v32 = vor.u32 %v4858_v56, %v4857_v37 }
 0x21b   : > { %4061 = vrot.lane.b32.xlu1 %v3934_v2, %s8561_s10  ;;  %v11335_v2 = vpop.permute.xlu1 %3836 }
 0x21c   : > { %5033 = vrot.lane.b32.xlu0 %v4856_v45, %s8560_s7  ;;  %15418 = vst [vmem:[#allocation10_spill] sm:$0xff] %v11335_v2  ;;  %v5164_v45 = vsel %vm5085_vm4, %v5161_v49, %v5163_v52  ;;  %v4732_v31 = vsel %vm4697_vm8, %v4727_v13, %v4731_v36  ;;  %v4336_v49 = vsel %vm4177_vm14, %v4331_v23, %v11342_v40  ;;  %v15425_v23 = vld [vmem:[#allocation93_spill] sm:$0xff] }
 0x21d   : > { %v4860_v56 = vsel %vm4697_vm8, %v4855_v55, %v11356_v32 }
 0x21f   : > { %5227 = vrot.lane.b32.xlu1 %v5100_v10, %s8561_s10  ;;  %v15422_v10 = vld [vmem:[#allocation12_spill] sm:$0xff] }
 0x220   : > { %4125 = vrot.lane.b32.xlu0 %v3998_v14, %s8561_s10  ;;  %v14957_v2 = vrot.slane %v15422_v10, 1  ;;  %v14958_v13 = vrot.slane %v15422_v10, 3  ;;  %v4209_v14 = vrot.slane %v15416_v29, 1 }
 0x222   : > { %v3936_v34 = vsel %vm3919_vm12, %v3933_v50, %v14957_v2  ;;  %v5102_v29 = vsel %vm5085_vm4, %v5099_v19, %v14958_v13  ;;  %v11377_v27 = vor.u32 %v4210_v7, %v4209_v14  ;;  %v4337_v19 = vrot.slane %v15420_v58, 1  ;;  %v15431_v7 = vld [vmem:[#allocation98_spill] sm:$0xff] }
 0x223   : > { %4451 = vrot.lane.b32.xlu1 %v4208_v59, %s8562_s11  ;;  %v11352_v46 = vpop.permute.xlu0 %3838  ;;  %v4338_v14 = vrot.slane %v15421_v41, 2 }
 0x224   : > { %5291 = vrot.lane.b32.xlu0 %v5164_v45, %s8561_s10  ;;  %15424 = vst [vmem:[#allocation9_spill] sm:$0xff] %v11352_v46  ;;  %v4568_v45 = vrot.slane %v9319_v15, 2  ;;  %v15429_v46 = vrot.slane %v8811_v28, 2 }
 0x225   : > { %v11350_v6 = vpop.permute.xlu1 %3840 }
 0x226   : > { %15423 = vst [vmem:[#allocation91_spill] sm:$0xff] %v11350_v6  ;;  %v15428_v6 = vld [vmem:[#allocation16_spill] sm:$0xff] }
 0x227   : > { %4971 = vrot.lane.b32.xlu1 %v4732_v31, %s8560_s7  ;;  %v4734_v37 = vrot.slane %v15428_v6, 3  ;;  %v5165_v31 = vrot.slane %v15425_v23, 3 }
 0x228   : > { %4515 = vrot.lane.b32.xlu0 %v4336_v49, %s8562_s11  ;;  %v15427_v49 = vld [vmem:[#allocation17_spill] sm:$0xff] }
 0x229   : > { %v4958_v59 = vpop.permute.xlu1 %4957  ;;  %v4733_v2 = vrot.slane %v15427_v49, 2  ;;  %v5166_v41 = vsel %vm5085_vm4, %v5163_v52, %v5165_v31  ;;  %v15434_v52 = vrot.slane %v9873_v63, 2 }
 0x22a   : > { %v11371_v50 = vpop.permute.xlu0 %3842 }
 0x22b   : > { %15426 = vst [vmem:[#allocation90_spill] sm:$0xff] %v11371_v50  ;;  %4063 = vrot.lane.b32.xlu1 %v3936_v34, %s8561_s10  ;;  %v4570_v50 = vsel %vm4567_vm10, %v4568_v45, %v15429_v46  ;;  %v15430_v34 = vrot.slane %v15425_v23, 1  ;;  %v4212_v46 = vsel %vm4177_vm14, %v4207_v42, %v11377_v27  ;;  %v11396_v45 = vor.u32 %v4734_v37, %v4733_v2 }
 0x22c   : > { %5035 = vrot.lane.b32.xlu0 %v4860_v56, %s8560_s7  ;;  %v4861_v56 = vrot.slane %v15431_v7, 2  ;;  %v4862_v42 = vrot.slane %v15432_v11, 3 }
 0x22d   : > { %v4050_v55 = vpop.permute.xlu1 %4049  ;;  %v4000_v60 = vsel %vm3919_vm12, %v3997_v48, %v15430_v34  ;;  %v5796_v48 = vsel %vm5343_vm13, %v4570_v50, %v4958_v59  ;;  %v11404_v34 = vor.u32 %v4338_v14, %v4337_v19  ;;  %v15433_v59 = vrot.slane %v9940_v18, 2  ;;  %v15435_v19 = vld [vmem:[#allocation15_spill] sm:$0xff] }
 0x22e   : > { %v5022_v13 = vpop.permute.xlu0 %5021  ;;  %v4736_v50 = vsel %vm4697_vm8, %v4731_v36, %v11396_v45  ;;  %v3937_v14 = vrot.slane %v15435_v19, 1  ;;  %v14961_v36 = vrot.slane %v15435_v19, 3 }
 0x22f   : > { %5229 = vrot.lane.b32.xlu1 %v5102_v29, %s8561_s10  ;;  %v4634_v37 = vsel %vm4567_vm10, %v15434_v52, %v15433_v59  ;;  %v14959_v52 = vrot.slane %v8773_v5, 2 }
 0x230   : > { %4127 = vrot.lane.b32.xlu0 %v4000_v60, %s8561_s10  ;;  %v5345_v60 = vsel %vm5343_vm13, %v9319_v15, %v11004_v53  ;;  %v4340_v15 = vsel %vm4177_vm14, %v11342_v40, %v11404_v34  ;;  %v11427_v53 = vor.u32 %v4862_v42, %v4861_v56  ;;  %v4213_v40 = vrot.slane %v15427_v49, 1 }
 0x231   : > { %v5216_v58 = vpop.permute.xlu1 %5215  ;;  %v4214_v56 = vrot.slane %v15428_v6, 2  ;;  %v5409_v42 = vsel %vm5343_vm13, %v9873_v63, %v11176_v12  ;;  %v15595_v63 = vld [vmem:[#allocation70_spill] sm:$0xff] }
 0x232   : > { %v5987_v29 = vsel %vm5472_vm1, %v5796_v48, %v5216_v58  ;;  %v4114_v2 = vpop.permute.xlu0 %4113  ;;  %v5474_v48 = vsel %vm5472_vm1, %v5345_v60, %v4050_v55 }
 0x233   : > { %7857 = vmatprep.mubr.msk.bf16.mxu0 %vm5601_vm15, %v5987_v29  ;;  %4453 = vrot.lane.b32.xlu1 %v4212_v46, %s8562_s11  ;;  %v5892_v29 = vsel %vm5343_vm13, %v4634_v37, %v5022_v13  ;;  %v4864_v37 = vsel %vm4697_vm8, %v11356_v32, %v11427_v53  ;;  %v5538_v49 = vsel %vm5472_vm1, %v5409_v42, %v4114_v2  ;;  %v15440_v32 = vld [vmem:[#allocation19_spill] sm:$0xff] }
 0x234   : > { %5293 = vrot.lane.b32.xlu0 %v5166_v41, %s8561_s10  ;;  %v15436_v41 = vrot.slane %v15422_v10, 1 }
 0x235   : > { %v4440_v46 = vpop.permute.xlu1 %4439 }
 0x236   : > { %v5603_v58 = vsel %vm5601_vm15, %v5474_v48, %v4440_v46  ;;  %v5280_v59 = vpop.permute.xlu0 %5279  ;;  %v3938_v60 = vsel %vm3919_vm12, %v15436_v41, %v3937_v14  ;;  %v15438_v46 = vrot.slane %v15422_v10, 3 }
 0x237   : > { %4973 = vrot.lane.b32.xlu1 %v4736_v50, %s8560_s7  ;;  %6394 = vmatmul.mubr.bf16.vlgmr.msra.gmra.mxu0 %v5603_v58  ;;  %v6051_v55 = vsel %vm5472_vm1, %v5892_v29, %v5280_v59  ;;  %v15437_v50 = vld [vmem:[#allocation96_spill] sm:$0xff] }
 0x238   : > { %4517 = vrot.lane.b32.xlu0 %v4340_v15, %s8562_s11  ;;  %7889 = vmatprep.mubr.msk.bf16.mxu1 %vm5601_vm15, %v6051_v55  ;;  %v14960_v48 = vrot.slane %v15437_v50, 1  ;;  %v5104_v58 = vsel %vm5085_vm4, %v15438_v46, %v14961_v36  ;;  %v11458_v15 = vor.u32 %v4214_v56, %v4213_v40  ;;  %v15439_v29 = vld [vmem:[#allocation20_spill] sm:$0xff]  ;;  %v4738_v55 = vrot.slane %v15440_v32, 3 }
 0x239   : > { %v4960_v13 = vpop.permute.xlu1 %4959  ;;  %v4737_v59 = vrot.slane %v15439_v29, 2  ;;  %v5167_v41 = vrot.slane %v15437_v50, 3  ;;  %v15442_v40 = vrot.slane %v15425_v23, 1  ;;  %v14962_v46 = vrot.slane %v9950_v44, 2 }
 0x23a   : > { %v4504_v6 = vpop.permute.xlu0 %4503 }
 0x23b   : > { %4065 = vrot.lane.b32.xlu1 %v3938_v60, %s8561_s10  ;;  %v5699_v12 = vsel %vm5601_vm15, %v5538_v49, %v4504_v6  ;;  %v15441_v60 = vrot.slane %v8811_v28, 2  ;;  %v4002_v56 = vsel %vm3919_vm12, %v15442_v40, %v14960_v48  ;;  %v4341_v49 = vrot.slane %v15431_v7, 1  ;;  %v15443_v48 = vld [vmem:[#allocation101_spill] sm:$0xff] }
 0x23c   : > { %5037 = vrot.lane.b32.xlu0 %v4864_v37, %s8560_s7  ;;  %6650 = vmatmul.mubr.bf16.vlgmr.msra.gmra.mxu1 %v5699_v12  ;;  %v4342_v37 = vrot.slane %v15432_v11, 2  ;;  %v4216_v12 = vsel %vm4177_vm14, %v11377_v27, %v11458_v15  ;;  %v5168_v11 = vsel %vm5085_vm4, %v5165_v31, %v5167_v41  ;;  %v4865_v36 = vrot.slane %v15443_v48, 2  ;;  %v15444_v27 = vld [vmem:[#allocation100_spill] sm:$0xff] }
 0x23d   : > { %v4052_v2 = vpop.permute.xlu1 %4051  ;;  %v4572_v42 = vsel %vm4567_vm10, %v15441_v60, %v14959_v52  ;;  %v11481_v60 = vor.u32 %v4738_v55, %v4737_v59  ;;  %v4866_v59 = vrot.slane %v15444_v27, 3  ;;  %v15446_v31 = vrot.slane %v9940_v18, 2 }
 0x23e   : > { %v5024_v6 = vpop.permute.xlu0 %5023  ;;  %v5799_v52 = vsel %vm5343_vm13, %v4572_v42, %v4960_v13  ;;  %v15445_v13 = vld [vmem:[#allocation127_spill] sm:$0xff] }
 0x23f   : > { %5231 = vrot.lane.b32.xlu1 %v5104_v58, %s8561_s10  ;;  %v11491_v58 = vor.u32 %v4342_v37, %v4341_v49  ;;  %v5347_v42 = vsel %vm5343_vm13, %v8811_v28, %v15445_v13  ;;  %v15447_v49 = vld [vmem:[#allocation18_spill] sm:$0xff]  ;;  %v11515_v13 = vor.u32 %v4866_v59, %v4865_v36  ;;  %v4218_v36 = vrot.slane %v15440_v32, 2 }
 0x240   : > { %4129 = vrot.lane.b32.xlu0 %v4002_v56, %s8561_s10  ;;  %v4740_v56 = vsel %vm4697_vm8, %v11396_v45, %v11481_v60  ;;  %v3939_v37 = vrot.slane %v15447_v49, 1  ;;  %v5105_v45 = vrot.slane %v15447_v49, 3  ;;  %v5411_v59 = vsel %vm5343_vm13, %v9940_v18, %v11174_v21 }
 0x241   : > { %v5218_v40 = vpop.permute.xlu1 %5217  ;;  %v4344_v28 = vsel %vm4177_vm14, %v11404_v34, %v11491_v58  ;;  %v4217_v34 = vrot.slane %v15439_v29, 1 }
 0x242   : > { %v5989_v7 = vsel %vm5472_vm1, %v5799_v52, %v5218_v40  ;;  %v4116_v55 = vpop.permute.xlu0 %4115  ;;  %v4636_v52 = vsel %vm4567_vm10, %v15446_v31, %v14962_v46 }
 0x243   : > { %4455 = vrot.lane.b32.xlu1 %v4216_v12, %s8562_s11  ;;  %7858 = vmatprep.mubr.msk.bf16.mxu0 %vm5601_vm15, %v5989_v7  ;;  %v5476_v12 = vsel %vm5472_vm1, %v5347_v42, %v4052_v2  ;;  %v5895_v31 = vsel %vm5343_vm13, %v4636_v52, %v5024_v6  ;;  %v4868_v42 = vsel %vm4697_vm8, %v11427_v53, %v11515_v13  ;;  %v15451_v53 = vld [vmem:[#allocation22_spill] sm:$0xff] }
 0x244   : > { %5295 = vrot.lane.b32.xlu0 %v5168_v11, %s8561_s10  ;;  %v3940_v11 = vsel %vm3919_vm12, %v3937_v14, %v3939_v37  ;;  %v15448_v14 = vld [vmem:[#allocation99_spill] sm:$0xff]  ;;  %v5540_v29 = vsel %vm5472_vm1, %v5411_v59, %v4116_v55  ;;  %v11546_v21 = vor.u32 %v4218_v36, %v4217_v34  ;;  %v15453_v34 = vrot.slane %v15437_v50, 1 }
 0x245   : > { %v4442_v40 = vpop.permute.xlu1 %4441  ;;  %v14963_v52 = vrot.slane %v15448_v14, 1  ;;  %v4345_v59 = vrot.slane %v15443_v48, 1 }
 0x246   : > { %v5606_v7 = vsel %vm5601_vm15, %v5476_v12, %v4442_v40  ;;  %v5282_v46 = vpop.permute.xlu0 %5281  ;;  %v15450_v40 = vld [vmem:[#allocation23_spill] sm:$0xff] }
 0x247   : > { %4975 = vrot.lane.b32.xlu1 %v4740_v56, %s8560_s7  ;;  %6402 = vmatmul.mubr.bf16.gmra.mxu0 %v5606_v7  ;;  %v6053_v2 = vsel %vm5472_vm1, %v5895_v31, %v5282_v46  ;;  %v14964_v46 = vrot.slane %v8779_v8, 2  ;;  %v15449_v56 = vrot.slane %v15435_v19, 3  ;;  %v4741_v7 = vrot.slane %v15450_v40, 2 }
 0x248   : > { %4519 = vrot.lane.b32.xlu0 %v4344_v28, %s8562_s11  ;;  %7890 = vmatprep.mubr.msk.bf16.mxu1 %vm5601_vm15, %v6053_v2  ;;  %v4742_v28 = vrot.slane %v15451_v53, 3  ;;  %v5169_v31 = vrot.slane %v15448_v14, 3  ;;  %v15452_v2 = vrot.slane %v8773_v5, 2  ;;  %v4004_v36 = vsel %vm3919_vm12, %v15453_v34, %v14963_v52  ;;  %v15454_v52 = vld [vmem:[#allocation104_spill] sm:$0xff] }
 0x249   : > { %v4962_v6 = vpop.permute.xlu1 %4961  ;;  %v5106_v12 = vsel %vm5085_vm4, %v15449_v56, %v5105_v45  ;;  %v4220_v56 = vsel %vm4177_vm14, %v11458_v15, %v11546_v21  ;;  %v15455_v15 = vld [vmem:[#allocation103_spill] sm:$0xff] }
 0x24a   : > { %v4506_v32 = vpop.permute.xlu0 %4505  ;;  %v5170_v48 = vsel %vm5085_vm4, %v5167_v41, %v5169_v31  ;;  %v15457_v41 = vrot.slane %v9950_v44, 2 }
 0x24b   : > { %4067 = vrot.lane.b32.xlu1 %v3940_v11, %s8561_s10  ;;  %v5702_v18 = vsel %vm5601_vm15, %v5540_v29, %v4506_v32  ;;  %v4574_v11 = vsel %vm4567_vm10, %v15452_v2, %v14964_v46  ;;  %v14965_v32 = vrot.slane %v10020_v1, 2  ;;  %v4869_v46 = vrot.slane %v15454_v52, 2 }
 0x24c   : > { %5039 = vrot.lane.b32.xlu0 %v4868_v42, %s8560_s7  ;;  %6658 = vmatmul.mubr.bf16.gmra.mxu1 %v5702_v18  ;;  %v4346_v42 = vrot.slane %v15444_v27, 2  ;;  %v11569_v18 = vor.u32 %v4742_v28, %v4741_v7  ;;  %v5802_v2 = vsel %vm5343_vm13, %v4574_v11, %v4962_v6  ;;  %v4870_v7 = vrot.slane %v15455_v15, 3  ;;  %v15456_v6 = vld [vmem:[#allocation126_spill] sm:$0xff] }
 0x24d   : > { %v4054_v55 = vpop.permute.xlu1 %4053  ;;  %v5349_v11 = vsel %vm5343_vm13, %v8773_v5, %v15456_v6 }
 0x24e   : > { %v5026_v29 = vpop.permute.xlu0 %5025  ;;  %v11603_v6 = vor.u32 %v4870_v7, %v4869_v46  ;;  %v4222_v46 = vrot.slane %v15451_v53, 2  ;;  %v5413_v7 = vsel %vm5343_vm13, %v9950_v44, %v11191_v16 }
 0x24f   : > { %5233 = vrot.lane.b32.xlu1 %v5106_v12, %s8561_s10  ;;  %v11579_v12 = vor.u32 %v4346_v42, %v4345_v59  ;;  %v4744_v59 = vsel %vm4697_vm8, %v11481_v60, %v11569_v18  ;;  %v15458_v42 = vld [vmem:[#allocation21_spill] sm:$0xff] }
 0x250   : > { %4131 = vrot.lane.b32.xlu0 %v4004_v36, %s8561_s10  ;;  %v4638_v36 = vsel %vm4567_vm10, %v15457_v41, %v14965_v32  ;;  %v5107_v60 = vrot.slane %v15458_v42, 3 }
 0x251   : > { %v5220_v34 = vpop.permute.xlu1 %5219  ;;  %v4348_v5 = vsel %vm4177_vm14, %v11491_v58, %v11579_v12  ;;  %v5898_v41 = vsel %vm5343_vm13, %v4638_v36, %v5026_v29  ;;  %v4221_v58 = vrot.slane %v15450_v40, 1 }
 0x252   : > { %v5991_v27 = vsel %vm5472_vm1, %v5802_v2, %v5220_v34  ;;  %v4118_v28 = vpop.permute.xlu0 %4117  ;;  %v3941_v2 = vrot.slane %v15458_v42, 1 }
 0x253   : > { %4457 = vrot.lane.b32.xlu1 %v4220_v56, %s8562_s11  ;;  %7859 = vmatprep.mubr.msk.bf16.mxu0 %vm5601_vm15, %v5991_v27  ;;  %v5478_v56 = vsel %vm5472_vm1, %v5349_v11, %v4054_v55  ;;  %v4872_v11 = vsel %vm4697_vm8, %v11515_v13, %v11603_v6  ;;  %v5542_v40 = vsel %vm5472_vm1, %v5413_v7, %v4118_v28  ;;  %v15461_v13 = vld [vmem:[#allocation25_spill] sm:$0xff] }
 0x254   : > { %5297 = vrot.lane.b32.xlu0 %v5170_v48, %s8561_s10  ;;  %v3942_v48 = vsel %vm3919_vm12, %v3939_v37, %v3941_v2  ;;  %v15459_v37 = vld [vmem:[#allocation102_spill] sm:$0xff]  ;;  %v11634_v16 = vor.u32 %v4222_v46, %v4221_v58  ;;  %v4349_v58 = vrot.slane %v15454_v52, 1  ;;  %v4350_v46 = vrot.slane %v15455_v15, 2 }
 0x255   : > { %v4444_v34 = vpop.permute.xlu1 %4443  ;;  %v14966_v36 = vrot.slane %v15459_v37, 1 }
 0x256   : > { %v5609_v27 = vsel %vm5601_vm15, %v5478_v56, %v4444_v34  ;;  %v5284_v32 = vpop.permute.xlu0 %5283  ;;  %v15460_v56 = vld [vmem:[#allocation26_spill] sm:$0xff] }
 0x257   : > { %4977 = vrot.lane.b32.xlu1 %v4744_v59, %s8560_s7  ;;  %6410 = vmatmul.mubr.bf16.gmra.mxu0 %v5609_v27  ;;  %v6055_v55 = vsel %vm5472_vm1, %v5898_v41, %v5284_v32  ;;  %v4575_v32 = vrot.slane %v8854_v54, 2  ;;  %v5108_v59 = vsel %vm5085_vm4, %v5105_v45, %v5107_v60  ;;  %v4745_v34 = vrot.slane %v15460_v56, 2 }
 0x258   : > { %4521 = vrot.lane.b32.xlu0 %v4348_v5, %s8562_s11  ;;  %7891 = vmatprep.mubr.msk.bf16.mxu1 %vm5601_vm15, %v6055_v55  ;;  %v4746_v27 = vrot.slane %v15461_v13, 3  ;;  %v5171_v5 = vrot.slane %v15459_v37, 3  ;;  %v15462_v41 = vrot.slane %v8779_v8, 2  ;;  %v15463_v55 = vrot.slane %v15448_v14, 1 }
 0x259   : > { %v4964_v29 = vpop.permute.xlu1 %4963 }
 0x25a   : > { %v4508_v53 = vpop.permute.xlu0 %4507  ;;  %v4576_v45 = vsel %vm4567_vm10, %v15462_v41, %v4575_v32  ;;  %v5172_v52 = vsel %vm5085_vm4, %v5169_v31, %v5171_v5  ;;  %v15467_v31 = vrot.slane %v10020_v1, 2 }
 0x25b   : > { %4069 = vrot.lane.b32.xlu1 %v3942_v48, %s8561_s10  ;;  %v5705_v44 = vsel %vm5601_vm15, %v5542_v40, %v4508_v53  ;;  %v4006_v48 = vsel %vm3919_vm12, %v15463_v55, %v14966_v36  ;;  %v4224_v40 = vsel %vm4177_vm14, %v11546_v21, %v11634_v16  ;;  %v11657_v53 = vor.u32 %v4746_v27, %v4745_v34  ;;  %v15464_v55 = vld [vmem:[#allocation107_spill] sm:$0xff]  ;;  %v15465_v21 = vld [vmem:[#allocation106_spill] sm:$0xff] }
 0x25c   : > { %5041 = vrot.lane.b32.xlu0 %v4872_v11, %s8560_s7  ;;  %6666 = vmatmul.mubr.bf16.gmra.mxu1 %v5705_v44  ;;  %v14967_v11 = vrot.slane %v10029_v35, 2  ;;  %v5805_v44 = vsel %vm5343_vm13, %v4576_v45, %v4964_v29  ;;  %v4873_v36 = vrot.slane %v15464_v55, 2  ;;  %v4874_v34 = vrot.slane %v15465_v21, 3  ;;  %v15466_v29 = vld [vmem:[#allocation129_spill] sm:$0xff] }
 0x25d   : > { %v4056_v28 = vpop.permute.xlu1 %4055  ;;  %v5351_v45 = vsel %vm5343_vm13, %v8779_v8, %v15466_v29 }
 0x25e   : > { %v5028_v7 = vpop.permute.xlu0 %5027  ;;  %v11691_v29 = vor.u32 %v4874_v34, %v4873_v36  ;;  %v4226_v36 = vrot.slane %v15461_v13, 2  ;;  %v5415_v34 = vsel %vm5343_vm13, %v10020_v1, %v11189_v39 }
 0x25f   : > { %5235 = vrot.lane.b32.xlu1 %v5108_v59, %s8561_s10  ;;  %v11667_v59 = vor.u32 %v4350_v46, %v4349_v58  ;;  %v4748_v58 = vsel %vm4697_vm8, %v11569_v18, %v11657_v53  ;;  %v15468_v46 = vld [vmem:[#allocation24_spill] sm:$0xff] }
 0x260   : > { %4133 = vrot.lane.b32.xlu0 %v4006_v48, %s8561_s10  ;;  %v4640_v48 = vsel %vm4567_vm10, %v15467_v31, %v14967_v11  ;;  %v5109_v18 = vrot.slane %v15468_v46, 3 }
 0x261   : > { %v5222_v41 = vpop.permute.xlu1 %5221  ;;  %v4352_v8 = vsel %vm4177_vm14, %v11579_v12, %v11667_v59  ;;  %v5901_v31 = vsel %vm5343_vm13, %v4640_v48, %v5028_v7  ;;  %v4225_v12 = vrot.slane %v15460_v56, 1 }
 0x262   : > { %v5993_v15 = vsel %vm5472_vm1, %v5805_v44, %v5222_v41  ;;  %v4120_v27 = vpop.permute.xlu0 %4119  ;;  %v3943_v44 = vrot.slane %v15468_v46, 1 }
 0x263   : > { %4459 = vrot.lane.b32.xlu1 %v4224_v40, %s8562_s11  ;;  %7860 = vmatprep.mubr.msk.bf16.mxu0 %vm5601_vm15, %v5993_v15  ;;  %v5480_v40 = vsel %vm5472_vm1, %v5351_v45, %v4056_v28  ;;  %v4876_v45 = vsel %vm4697_vm8, %v11603_v6, %v11691_v29  ;;  %v5544_v56 = vsel %vm5472_vm1, %v5415_v34, %v4120_v27  ;;  %v15471_v6 = vld [vmem:[#allocation28_spill] sm:$0xff]  ;;  %v14968_v34 = vrot.slane %v15394_v26, 2 }
 0x264   : > { %5299 = vrot.lane.b32.xlu0 %v5172_v52, %s8561_s10  ;;  %v3944_v52 = vsel %vm3919_vm12, %v3941_v2, %v3943_v44  ;;  %v15469_v2 = vld [vmem:[#allocation105_spill] sm:$0xff]  ;;  %v11722_v39 = vor.u32 %v4226_v36, %v4225_v12  ;;  %v4354_v12 = vrot.slane %v15465_v21, 2 }
 0x265   : > { %v4446_v41 = vpop.permute.xlu1 %4445  ;;  %v4007_v48 = vrot.slane %v15469_v2, 1 }
 0x266   : > { %v5612_v15 = vsel %vm5601_vm15, %v5480_v40, %v4446_v41  ;;  %v5286_v11 = vpop.permute.xlu0 %5285  ;;  %v15470_v40 = vld [vmem:[#allocation29_spill] sm:$0xff] }
 0x267   : > { %4979 = vrot.lane.b32.xlu1 %v4748_v58, %s8560_s7  ;;  %6418 = vmatmul.mubr.bf16.gmra.mxu0 %v5612_v15  ;;  %v6057_v28 = vsel %vm5472_vm1, %v5901_v31, %v5286_v11  ;;  %v4577_v11 = vrot.slane %v15393_v57, 2  ;;  %v5110_v58 = vsel %vm5085_vm4, %v5107_v60, %v5109_v18  ;;  %v4749_v41 = vrot.slane %v15470_v40, 2 }
 0x268   : > { %4523 = vrot.lane.b32.xlu0 %v4352_v8, %s8562_s11  ;;  %7892 = vmatprep.mubr.msk.bf16.mxu1 %vm5601_vm15, %v6057_v28  ;;  %v4750_v15 = vrot.slane %v15471_v6, 3  ;;  %v5173_v8 = vrot.slane %v15469_v2, 3  ;;  %v15472_v31 = vrot.slane %v15459_v37, 1 }
 0x269   : > { %v4966_v7 = vpop.permute.xlu1 %4965  ;;  %v4578_v60 = vsel %vm4567_vm10, %v4575_v32, %v4577_v11 }
 0x26a   : > { %v4510_v13 = vpop.permute.xlu0 %4509  ;;  %v4008_v28 = vsel %vm3919_vm12, %v15472_v31, %v4007_v48  ;;  %v11745_v32 = vor.u32 %v4750_v15, %v4749_v41 }
 0x26b   : > { %4071 = vrot.lane.b32.xlu1 %v3944_v52, %s8561_s10  ;;  %v5708_v1 = vsel %vm5601_vm15, %v5544_v56, %v4510_v13  ;;  %v4353_v52 = vrot.slane %v15464_v55, 1  ;;  %v5808_v56 = vsel %vm5343_vm13, %v4578_v60, %v4966_v7  ;;  %v5174_v55 = vsel %vm5085_vm4, %v5171_v5, %v5173_v8  ;;  %v15475_v7 = vld [vmem:[#allocation130_spill] sm:$0xff] }
 0x26c   : > { %5043 = vrot.lane.b32.xlu0 %v4876_v45, %s8560_s7  ;;  %6674 = vmatmul.mubr.bf16.gmra.mxu1 %v5708_v1  ;;  %v4228_v45 = vsel %vm4177_vm14, %v11634_v16, %v11722_v39  ;;  %v15473_v1 = vld [vmem:[#allocation110_spill] sm:$0xff]  ;;  %v15474_v16 = vld [vmem:[#allocation109_spill] sm:$0xff]  ;;  %v5353_v60 = vsel %vm5343_vm13, %v8854_v54, %v15475_v7  ;;  %v15476_v5 = vrot.slane %v10029_v35, 2 }
 0x26d   : > { %v4058_v27 = vpop.permute.xlu1 %4057  ;;  %v4877_v31 = vrot.slane %v15473_v1, 2  ;;  %v4878_v41 = vrot.slane %v15474_v16, 3 }
 0x26e   : > { %v5030_v36 = vpop.permute.xlu0 %5029 }
 0x26f   : > { %5237 = vrot.lane.b32.xlu1 %v5110_v58, %s8561_s10  ;;  %v11755_v58 = vor.u32 %v4354_v12, %v4353_v52  ;;  %v4752_v52 = vsel %vm4697_vm8, %v11657_v53, %v11745_v32  ;;  %v15477_v12 = vld [vmem:[#allocation27_spill] sm:$0xff]  ;;  %v11779_v7 = vor.u32 %v4878_v41, %v4877_v31  ;;  %v4230_v31 = vrot.slane %v15471_v6, 2 }
 0x270   : > { %4135 = vrot.lane.b32.xlu0 %v4008_v28, %s8561_s10  ;;  %v4642_v28 = vsel %vm4567_vm10, %v15476_v5, %v14968_v34  ;;  %v5111_v53 = vrot.slane %v15477_v12, 3  ;;  %v5417_v41 = vsel %vm5343_vm13, %v10029_v35, %v11205_v9 }
 0x271   : > { %v5224_v13 = vpop.permute.xlu1 %5223  ;;  %v4356_v54 = vsel %vm4177_vm14, %v11667_v59, %v11755_v58  ;;  %v5904_v5 = vsel %vm5343_vm13, %v4642_v28, %v5030_v36  ;;  %v4229_v59 = vrot.slane %v15470_v40, 1 }
 0x272   : > { %v5995_v21 = vsel %vm5472_vm1, %v5808_v56, %v5224_v13  ;;  %v4122_v15 = vpop.permute.xlu0 %4121  ;;  %v3945_v56 = vrot.slane %v15477_v12, 1 }
 0x273   : > { %4461 = vrot.lane.b32.xlu1 %v4228_v45, %s8562_s11  ;;  %7861 = vmatprep.mubr.msk.bf16.mxu0 %vm5601_vm15, %v5995_v21  ;;  %v5482_v45 = vsel %vm5472_vm1, %v5353_v60, %v4058_v27  ;;  %v4880_v60 = vsel %vm4697_vm8, %v11691_v29, %v11779_v7  ;;  %v5546_v40 = vsel %vm5472_vm1, %v5417_v41, %v4122_v15  ;;  %v15480_v29 = vld [vmem:[#allocation31_spill] sm:$0xff] }
 0x274   : > { %5301 = vrot.lane.b32.xlu0 %v5174_v55, %s8561_s10  ;;  %v3946_v55 = vsel %vm3919_vm12, %v3943_v44, %v3945_v56  ;;  %v15478_v44 = vld [vmem:[#allocation108_spill] sm:$0xff]  ;;  %v11810_v9 = vor.u32 %v4230_v31, %v4229_v59  ;;  %v4643_v31 = vrot.slane %v15403_v22, 2 }
 0x275   : > { %v4448_v13 = vpop.permute.xlu1 %4447  ;;  %v4009_v28 = vrot.slane %v15478_v44, 1 }
 0x276   : > { %v5615_v21 = vsel %vm5601_vm15, %v5482_v45, %v4448_v13  ;;  %v5288_v34 = vpop.permute.xlu0 %5287  ;;  %v15479_v45 = vld [vmem:[#allocation32_spill] sm:$0xff]  ;;  %v4232_v41 = vsel %vm4177_vm14, %v11722_v39, %v11810_v9 }
 0x277   : > { %4981 = vrot.lane.b32.xlu1 %v4752_v52, %s8560_s7  ;;  %6426 = vmatmul.mubr.bf16.gmra.mxu0 %v5615_v21  ;;  %v6059_v27 = vsel %vm5472_vm1, %v5904_v5, %v5288_v34  ;;  %v4579_v34 = vrot.slane %v15400_v3, 2  ;;  %v5112_v52 = vsel %vm5085_vm4, %v5109_v18, %v5111_v53  ;;  %v4753_v13 = vrot.slane %v15479_v45, 2  ;;  %v15482_v39 = vld [vmem:[#allocation112_spill] sm:$0xff] }
 0x278   : > { %4525 = vrot.lane.b32.xlu0 %v4356_v54, %s8562_s11  ;;  %7893 = vmatprep.mubr.msk.bf16.mxu1 %vm5601_vm15, %v6059_v27  ;;  %v4754_v21 = vrot.slane %v15480_v29, 3  ;;  %v5175_v54 = vrot.slane %v15478_v44, 3  ;;  %v4010_v5 = vsel %vm3919_vm12, %v4007_v48, %v4009_v28  ;;  %v4357_v27 = vrot.slane %v15473_v1, 1 }
 0x279   : > { %v4968_v36 = vpop.permute.xlu1 %4967  ;;  %v4580_v18 = vsel %vm4567_vm10, %v4577_v11, %v4579_v34 }
 0x27a   : > { %v4512_v6 = vpop.permute.xlu0 %4511  ;;  %v11833_v11 = vor.u32 %v4754_v21, %v4753_v13  ;;  %v5176_v1 = vsel %vm5085_vm4, %v5173_v8, %v5175_v54  ;;  %v15483_v8 = vrot.slane %v15394_v26, 2 }
 0x27b   : > { %4073 = vrot.lane.b32.xlu1 %v3946_v55, %s8561_s10  ;;  %v5711_v35 = vsel %vm5601_vm15, %v5546_v40, %v4512_v6  ;;  %v4358_v55 = vrot.slane %v15474_v16, 2  ;;  %v15481_v6 = vld [vmem:[#allocation113_spill] sm:$0xff] }
 0x27c   : > { %5045 = vrot.lane.b32.xlu0 %v4880_v60, %s8560_s7  ;;  %6682 = vmatmul.mubr.bf16.gmra.mxu1 %v5711_v35  ;;  %v5811_v60 = vsel %vm5343_vm13, %v4580_v18, %v4968_v36  ;;  %v4882_v35 = vrot.slane %v15482_v39, 3  ;;  %v5355_v36 = vsel %vm5343_vm13, %v15393_v57, %v10714_v61  ;;  %v4644_v21 = vsel %vm4567_vm10, %v15483_v8, %v4643_v31 }
 0x27d   : > { %v4060_v15 = vpop.permute.xlu1 %4059  ;;  %v11843_v40 = vor.u32 %v4358_v55, %v4357_v27  ;;  %v4756_v18 = vsel %vm4697_vm8, %v11745_v32, %v11833_v11 }
 0x27e   : > { %v5032_v59 = vpop.permute.xlu0 %5031  ;;  %v5484_v55 = vsel %vm5472_vm1, %v5355_v36, %v4060_v15  ;;  %v4581_v36 = vrot.slane %v15412_v24, 2 }
 0x27f   : > { %5239 = vrot.lane.b32.xlu1 %v5112_v52, %s8561_s10  ;;  %v4881_v52 = vrot.slane %v15481_v6, 2  ;;  %v4360_v61 = vsel %vm4177_vm14, %v11755_v58, %v11843_v40  ;;  %v4233_v58 = vrot.slane %v15479_v45, 1 }
 0x280   : > { %4137 = vrot.lane.b32.xlu0 %v4010_v5, %s8561_s10  ;;  %v15484_v5 = vld [vmem:[#allocation30_spill] sm:$0xff] }
 0x281   : > { %v5226_v48 = vpop.permute.xlu1 %5225  ;;  %v3947_v27 = vrot.slane %v15484_v5, 1  ;;  %v11867_v57 = vor.u32 %v4882_v35, %v4881_v52  ;;  %v5113_v32 = vrot.slane %v15484_v5, 3  ;;  %v4234_v52 = vrot.slane %v15480_v29, 2 }
 0x282   : > { %v5997_v16 = vsel %vm5472_vm1, %v5811_v60, %v5226_v48  ;;  %v4124_v13 = vpop.permute.xlu0 %4123  ;;  %v5907_v48 = vsel %vm5343_vm13, %v4644_v21, %v5032_v59  ;;  %v5419_v35 = vsel %vm5343_vm13, %v15394_v26, %v11203_v17 }
 0x283   : > { %4463 = vrot.lane.b32.xlu1 %v4232_v41, %s8562_s11  ;;  %7862 = vmatprep.mubr.msk.bf16.mxu0 %vm5601_vm15, %v5997_v16  ;;  %v4884_v8 = vsel %vm4697_vm8, %v11779_v7, %v11867_v57  ;;  %v5548_v45 = vsel %vm5472_vm1, %v5419_v35, %v4124_v13  ;;  %v11898_v26 = vor.u32 %v4234_v52, %v4233_v58  ;;  %v15487_v7 = vld [vmem:[#allocation34_spill] sm:$0xff]  ;;  %v4645_v58 = vrot.slane %v15415_v62, 2 }
 0x284   : > { %5303 = vrot.lane.b32.xlu0 %v5176_v1, %s8561_s10  ;;  %v3948_v1 = vsel %vm3919_vm12, %v3945_v56, %v3947_v27  ;;  %v15485_v56 = vld [vmem:[#allocation111_spill] sm:$0xff] }
 0x285   : > { %v4450_v41 = vpop.permute.xlu1 %4449  ;;  %v4011_v21 = vrot.slane %v15485_v56, 1  ;;  %v4236_v52 = vsel %vm4177_vm14, %v11810_v9, %v11898_v26  ;;  %v15489_v9 = vld [vmem:[#allocation115_spill] sm:$0xff] }
 0x286   : > { %v5618_v60 = vsel %vm5601_vm15, %v5484_v55, %v4450_v41  ;;  %v5290_v16 = vpop.permute.xlu0 %5289  ;;  %v15486_v55 = vld [vmem:[#allocation35_spill] sm:$0xff] }
 0x287   : > { %4983 = vrot.lane.b32.xlu1 %v4756_v18, %s8560_s7  ;;  %6434 = vmatmul.mubr.bf16.gmra.mxu0 %v5618_v60  ;;  %v6061_v15 = vsel %vm5472_vm1, %v5907_v48, %v5290_v16  ;;  %v5114_v18 = vsel %vm5085_vm4, %v5111_v53, %v5113_v32  ;;  %v4757_v41 = vrot.slane %v15486_v55, 2  ;;  %v4758_v60 = vrot.slane %v15487_v7, 3 }
 0x288   : > { %4527 = vrot.lane.b32.xlu0 %v4360_v61, %s8562_s11  ;;  %7894 = vmatprep.mubr.msk.bf16.mxu1 %vm5601_vm15, %v6061_v15  ;;  %v5177_v61 = vrot.slane %v15485_v56, 3  ;;  %v4582_v53 = vsel %vm4567_vm10, %v4579_v34, %v4581_v36  ;;  %v4012_v48 = vsel %vm3919_vm12, %v4009_v28, %v4011_v21  ;;  %v4361_v16 = vrot.slane %v15481_v6, 1 }
 0x289   : > { %v4970_v59 = vpop.permute.xlu1 %4969  ;;  %v4362_v15 = vrot.slane %v15482_v39, 2  ;;  %v11921_v34 = vor.u32 %v4758_v60, %v4757_v41 }
 0x28a   : > { %v4514_v29 = vpop.permute.xlu0 %4513  ;;  %v5814_v35 = vsel %vm5343_vm13, %v4582_v53, %v4970_v59  ;;  %v5178_v6 = vsel %vm5085_vm4, %v5175_v54, %v5177_v61  ;;  %v15490_v59 = vld [vmem:[#allocation136_spill] sm:$0xff]  ;;  %v4646_v54 = vsel %vm4567_vm10, %v4643_v31, %v4645_v58  ;;  %v15491_v53 = vld [vmem:[#allocation33_spill] sm:$0xff] }
 0x28b   : > { %4075 = vrot.lane.b32.xlu1 %v3948_v1, %s8561_s10  ;;  %v5714_v17 = vsel %vm5601_vm15, %v5548_v45, %v4514_v29  ;;  %v15488_v45 = vld [vmem:[#allocation116_spill] sm:$0xff]  ;;  %v5357_v41 = vsel %vm5343_vm13, %v15400_v3, %v15490_v59  ;;  %v4760_v60 = vsel %vm4697_vm8, %v11833_v11, %v11921_v34  ;;  %v5115_v11 = vrot.slane %v15491_v53, 3 }
 0x28c   : > { %5047 = vrot.lane.b32.xlu0 %v4884_v8, %s8560_s7  ;;  %6690 = vmatmul.mubr.bf16.gmra.mxu1 %v5714_v17  ;;  %v11931_v8 = vor.u32 %v4362_v15, %v4361_v16  ;;  %v4885_v29 = vrot.slane %v15488_v45, 2 }
 0x28d   : > { %v4062_v13 = vpop.permute.xlu1 %4061 }
 0x28e   : > { %v5034_v1 = vpop.permute.xlu0 %5033  ;;  %v5486_v16 = vsel %vm5472_vm1, %v5357_v41, %v4062_v13  ;;  %v4364_v3 = vsel %vm4177_vm14, %v11843_v40, %v11931_v8  ;;  %v4237_v40 = vrot.slane %v15486_v55, 1 }
 0x28f   : > { %5241 = vrot.lane.b32.xlu1 %v5114_v18, %s8561_s10  ;;  %v4886_v18 = vrot.slane %v15489_v9, 3  ;;  %v5910_v31 = vsel %vm5343_vm13, %v4646_v54, %v5034_v1  ;;  %v5116_v54 = vsel %vm5085_vm4, %v5113_v32, %v5115_v11 }
 0x290   : > { %4139 = vrot.lane.b32.xlu0 %v4012_v48, %s8561_s10  ;;  %v3949_v48 = vrot.slane %v15491_v53, 1 }
 0x291   : > { %v5228_v28 = vpop.permute.xlu1 %5227 }
 0x292   : > { %v5999_v39 = vsel %vm5472_vm1, %v5814_v35, %v5228_v28  ;;  %v4126_v17 = vpop.permute.xlu0 %4125  ;;  %v11955_v35 = vor.u32 %v4886_v18, %v4885_v29  ;;  %v5421_v29 = vsel %vm5343_vm13, %v15403_v22, %v11221_v38  ;;  %v4583_v18 = vrot.slane %v15422_v10, 2 }
 0x293   : > { %4465 = vrot.lane.b32.xlu1 %v4236_v52, %s8562_s11  ;;  %7863 = vmatprep.mubr.msk.bf16.mxu0 %vm5601_vm15, %v5999_v39  ;;  %v4238_v39 = vrot.slane %v15487_v7, 2  ;;  %v5550_v55 = vsel %vm5472_vm1, %v5421_v29, %v4126_v17 }
 0x294   : > { %5305 = vrot.lane.b32.xlu0 %v5178_v6, %s8561_s10  ;;  %v3950_v6 = vsel %vm3919_vm12, %v3947_v27, %v3949_v48  ;;  %v4888_v59 = vsel %vm4697_vm8, %v11867_v57, %v11955_v35  ;;  %v15492_v27 = vld [vmem:[#allocation114_spill] sm:$0xff]  ;;  %v15494_v57 = vld [vmem:[#allocation37_spill] sm:$0xff]  ;;  %v4584_v32 = vsel %vm4567_vm10, %v4581_v36, %v4583_v18 }
 0x295   : > { %v4452_v15 = vpop.permute.xlu1 %4451  ;;  %v4013_v41 = vrot.slane %v15492_v27, 1  ;;  %v11986_v22 = vor.u32 %v4238_v39, %v4237_v40 }
 0x296   : > { %v5621_v52 = vsel %vm5601_vm15, %v5486_v16, %v4452_v15  ;;  %v5292_v28 = vpop.permute.xlu0 %5291  ;;  %v4762_v15 = vrot.slane %v15494_v57, 3 }
 0x297   : > { %4985 = vrot.lane.b32.xlu1 %v4760_v60, %s8560_s7  ;;  %6442 = vmatmul.mubr.bf16.gmra.mxu0 %v5621_v52  ;;  %v6063_v13 = vsel %vm5472_vm1, %v5910_v31, %v5292_v28  ;;  %v15493_v60 = vld [vmem:[#allocation38_spill] sm:$0xff]  ;;  %v5179_v52 = vrot.slane %v15492_v27, 3  ;;  %v4365_v31 = vrot.slane %v15488_v45, 1  ;;  %v4366_v28 = vrot.slane %v15489_v9, 2 }
 0x298   : > { %4529 = vrot.lane.b32.xlu0 %v4364_v3, %s8562_s11  ;;  %7895 = vmatprep.mubr.msk.bf16.mxu1 %vm5601_vm15, %v6063_v13  ;;  %v4761_v16 = vrot.slane %v15493_v60, 2  ;;  %v4014_v3 = vsel %vm3919_vm12, %v4011_v21, %v4013_v41  ;;  %v4240_v40 = vsel %vm4177_vm14, %v11898_v26, %v11986_v22  ;;  %v15496_v26 = vld [vmem:[#allocation118_spill] sm:$0xff] }
 0x299   : > { %v4972_v1 = vpop.permute.xlu1 %4971  ;;  %v5180_v45 = vsel %vm5085_vm4, %v5177_v61, %v5179_v52  ;;  %v12019_v29 = vor.u32 %v4366_v28, %v4365_v31 }
 0x29a   : > { %v4516_v7 = vpop.permute.xlu0 %4515  ;;  %v12009_v36 = vor.u32 %v4762_v15, %v4761_v16  ;;  %v5817_v39 = vsel %vm5343_vm13, %v4584_v32, %v4972_v1  ;;  %v15497_v1 = vld [vmem:[#allocation137_spill] sm:$0xff]  ;;  %v15498_v15 = vld [vmem:[#allocation36_spill] sm:$0xff] }
 0x29b   : > { %4077 = vrot.lane.b32.xlu1 %v3950_v6, %s8561_s10  ;;  %v5717_v38 = vsel %vm5601_vm15, %v5550_v55, %v4516_v7  ;;  %v4647_v6 = vrot.slane %v15425_v23, 2  ;;  %v4890_v7 = vrot.slane %v15496_v26, 3  ;;  %v3951_v32 = vrot.slane %v15498_v15, 1 }
 0x29c   : > { %5049 = vrot.lane.b32.xlu0 %v4888_v59, %s8560_s7  ;;  %6698 = vmatmul.mubr.bf16.gmra.mxu1 %v5717_v38  ;;  %v15495_v59 = vld [vmem:[#allocation119_spill] sm:$0xff]  ;;  %v5359_v38 = vsel %vm5343_vm13, %v15412_v24, %v15497_v1  ;;  %v4764_v16 = vsel %vm4697_vm8, %v11921_v34, %v12009_v36  ;;  %v4368_v24 = vsel %vm4177_vm14, %v11931_v8, %v12019_v29  ;;  %v5117_v34 = vrot.slane %v15498_v15, 3 }
 0x29d   : > { %v4064_v17 = vpop.permute.xlu1 %4063  ;;  %v4889_v55 = vrot.slane %v15495_v59, 2  ;;  %v4648_v61 = vsel %vm4567_vm10, %v4645_v58, %v4647_v6  ;;  %v4241_v8 = vrot.slane %v15493_v60, 1 }
 0x29e   : > { %v5036_v13 = vpop.permute.xlu0 %5035 }
 0x29f   : > { %5243 = vrot.lane.b32.xlu1 %v5116_v54, %s8561_s10  ;;  %v5913_v58 = vsel %vm5343_vm13, %v4648_v61, %v5036_v13  ;;  %v15500_v61 = vld [vmem:[#allocation42_spill] sm:$0xff] }
 0x2a0   : > { %4141 = vrot.lane.b32.xlu0 %v4014_v3, %s8561_s10  ;;  %v5488_v3 = vsel %vm5472_vm1, %v5359_v38, %v4064_v17  ;;  %v5118_v38 = vsel %vm5085_vm4, %v5115_v11, %v5117_v34 }
 0x2a1   : > { %v5230_v21 = vpop.permute.xlu1 %5229 }
 0x2a2   : > { %v6001_v9 = vsel %vm5472_vm1, %v5817_v39, %v5230_v21  ;;  %v4128_v54 = vpop.permute.xlu0 %4127  ;;  %v3952_v21 = vsel %vm3919_vm12, %v3949_v48, %v3951_v32  ;;  %v15499_v48 = vld [vmem:[#allocation117_spill] sm:$0xff] }
 0x2a3   : > { %4467 = vrot.lane.b32.xlu1 %v4240_v40, %s8562_s11  ;;  %7864 = vmatprep.mubr.msk.bf16.mxu0 %vm5601_vm15, %v6001_v9  ;;  %v12043_v40 = vor.u32 %v4890_v7, %v4889_v55  ;;  %v5423_v9 = vsel %vm5343_vm13, %v15415_v62, %v11219_v33  ;;  %v4585_v55 = vrot.slane %v15435_v19, 2  ;;  %v4015_v1 = vrot.slane %v15499_v48, 1 }
 0x2a4   : > { %5307 = vrot.lane.b32.xlu0 %v5180_v45, %s8561_s10  ;;  %v4242_v45 = vrot.slane %v15494_v57, 2  ;;  %v5552_v60 = vsel %vm5472_vm1, %v5423_v9, %v4128_v54  ;;  %v15502_v9 = vld [vmem:[#allocation122_spill] sm:$0xff] }
 0x2a5   : > { %v4454_v31 = vpop.permute.xlu1 %4453  ;;  %v4892_v7 = vsel %vm4697_vm8, %v11955_v35, %v12043_v40  ;;  %v15501_v35 = vld [vmem:[#allocation41_spill] sm:$0xff]  ;;  %v4586_v11 = vsel %vm4567_vm10, %v4583_v18, %v4585_v55 }
 0x2a6   : > { %v5624_v28 = vsel %vm5601_vm15, %v5488_v3, %v4454_v31  ;;  %v5294_v39 = vpop.permute.xlu0 %5293  ;;  %v12074_v62 = vor.u32 %v4242_v45, %v4241_v8  ;;  %v4766_v3 = vrot.slane %v15501_v35, 3  ;;  %v5181_v31 = vrot.slane %v15499_v48, 3 }
 0x2a7   : > { %4987 = vrot.lane.b32.xlu1 %v4764_v16, %s8560_s7  ;;  %6450 = vmatmul.mubr.bf16.gmra.mxu0 %v5624_v28  ;;  %v6065_v17 = vsel %vm5472_vm1, %v5913_v58, %v5294_v39  ;;  %v4765_v16 = vrot.slane %v15500_v61, 2  ;;  %v4016_v28 = vsel %vm3919_vm12, %v4013_v41, %v4015_v1  ;;  %v4370_v58 = vrot.slane %v15496_v26, 2 }
 0x2a8   : > { %4531 = vrot.lane.b32.xlu0 %v4368_v24, %s8562_s11  ;;  %7896 = vmatprep.mubr.msk.bf16.mxu1 %vm5601_vm15, %v6065_v17  ;;  %v4369_v24 = vrot.slane %v15495_v59, 1  ;;  %v4649_v17 = vrot.slane %v15437_v50, 2  ;;  %v5182_v59 = vsel %vm5085_vm4, %v5179_v52, %v5181_v31 }
 0x2a9   : > { %v4974_v13 = vpop.permute.xlu1 %4973  ;;  %v12097_v18 = vor.u32 %v4766_v3, %v4765_v16  ;;  %v15505_v16 = vld [vmem:[#allocation40_spill] sm:$0xff] }
 0x2aa   : > { %v4518_v57 = vpop.permute.xlu0 %4517  ;;  %v5820_v8 = vsel %vm5343_vm13, %v4586_v11, %v4974_v13  ;;  %v12107_v45 = vor.u32 %v4370_v58, %v4369_v24  ;;  %v15504_v13 = vld [vmem:[#allocation138_spill] sm:$0xff]  ;;  %v4650_v52 = vsel %vm4567_vm10, %v4647_v6, %v4649_v17  ;;  %v3953_v3 = vrot.slane %v15505_v16, 1 }
 0x2ab   : > { %4079 = vrot.lane.b32.xlu1 %v3952_v21, %s8561_s10  ;;  %v5720_v33 = vsel %vm5601_vm15, %v5552_v60, %v4518_v57  ;;  %v4244_v21 = vsel %vm4177_vm14, %v11986_v22, %v12074_v62  ;;  %v15503_v22 = vld [vmem:[#allocation121_spill] sm:$0xff] }
 0x2ac   : > { %5051 = vrot.lane.b32.xlu0 %v4892_v7, %s8560_s7  ;;  %6706 = vmatmul.mubr.bf16.gmra.mxu1 %v5720_v33  ;;  %v4893_v7 = vrot.slane %v15502_v9, 2  ;;  %v4894_v60 = vrot.slane %v15503_v22, 3  ;;  %v4768_v33 = vsel %vm4697_vm8, %v12009_v36, %v12097_v18  ;;  %v5119_v36 = vrot.slane %v15505_v16, 3 }
 0x2ad   : > { %v4066_v54 = vpop.permute.xlu1 %4065 }
 0x2ae   : > { %v5038_v39 = vpop.permute.xlu0 %5037  ;;  %v12131_v58 = vor.u32 %v4894_v60, %v4893_v7 }
 0x2af   : > { %5245 = vrot.lane.b32.xlu1 %v5118_v38, %s8561_s10  ;;  %v5361_v38 = vsel %vm5343_vm13, %v15422_v10, %v15504_v13  ;;  %v4372_v10 = vsel %vm4177_vm14, %v12019_v29, %v12107_v45  ;;  %v5916_v6 = vsel %vm5343_vm13, %v4650_v52, %v5038_v39  ;;  %v4245_v29 = vrot.slane %v15500_v61, 1 }
 0x2b0   : > { %4143 = vrot.lane.b32.xlu0 %v4016_v28, %s8561_s10  ;;  %v5490_v11 = vsel %vm5472_vm1, %v5361_v38, %v4066_v54  ;;  %v4896_v7 = vsel %vm4697_vm8, %v12043_v40, %v12131_v58  ;;  %v5120_v13 = vsel %vm5085_vm4, %v5117_v34, %v5119_v36  ;;  %v15507_v38 = vld [vmem:[#allocation45_spill] sm:$0xff]  ;;  %v15508_v40 = vld [vmem:[#allocation44_spill] sm:$0xff] }
 0x2b1   : > { %v5232_v41 = vpop.permute.xlu1 %5231  ;;  %v4769_v52 = vrot.slane %v15507_v38, 2 }
 0x2b2   : > { %v6003_v26 = vsel %vm5472_vm1, %v5820_v8, %v5232_v41  ;;  %v4130_v57 = vpop.permute.xlu0 %4129  ;;  %v3954_v8 = vsel %vm3919_vm12, %v3951_v32, %v3953_v3  ;;  %v4246_v41 = vrot.slane %v15501_v35, 2  ;;  %v15506_v32 = vld [vmem:[#allocation120_spill] sm:$0xff] }
 0x2b3   : > { %4469 = vrot.lane.b32.xlu1 %v4244_v21, %s8562_s11  ;;  %7865 = vmatprep.mubr.msk.bf16.mxu0 %vm5601_vm15, %v6003_v26  ;;  %v4587_v26 = vrot.slane %v15447_v49, 2  ;;  %v4017_v60 = vrot.slane %v15506_v32, 1 }
 0x2b4   : > { %5309 = vrot.lane.b32.xlu0 %v5182_v59, %s8561_s10  ;;  %v5425_v59 = vsel %vm5343_vm13, %v15425_v23, %v11234_v47  ;;  %v12162_v23 = vor.u32 %v4246_v41, %v4245_v29  ;;  %v15509_v41 = vld [vmem:[#allocation125_spill] sm:$0xff] }
 0x2b5   : > { %v4456_v28 = vpop.permute.xlu1 %4455  ;;  %v5554_v61 = vsel %vm5472_vm1, %v5425_v59, %v4130_v57  ;;  %v4588_v34 = vsel %vm4567_vm10, %v4585_v55, %v4587_v26  ;;  %v4897_v59 = vrot.slane %v15509_v41, 2 }
 0x2b6   : > { %v5627_v24 = vsel %vm5601_vm15, %v5490_v11, %v4456_v28  ;;  %v5296_v21 = vpop.permute.xlu0 %5295  ;;  %v5183_v11 = vrot.slane %v15506_v32, 3  ;;  %v4018_v28 = vsel %vm3919_vm12, %v4015_v1, %v4017_v60 }
 0x2b7   : > { %4989 = vrot.lane.b32.xlu1 %v4768_v33, %s8560_s7  ;;  %6458 = vmatmul.mubr.bf16.gmra.mxu0 %v5627_v24  ;;  %v6067_v54 = vsel %vm5472_vm1, %v5916_v6, %v5296_v21  ;;  %v4770_v33 = vrot.slane %v15508_v40, 3  ;;  %v4373_v24 = vrot.slane %v15502_v9, 1  ;;  %v4651_v21 = vrot.slane %v15448_v14, 2 }
 0x2b8   : > { %4533 = vrot.lane.b32.xlu0 %v4372_v10, %s8562_s11  ;;  %7897 = vmatprep.mubr.msk.bf16.mxu1 %vm5601_vm15, %v6067_v54  ;;  %v4374_v10 = vrot.slane %v15503_v22, 2  ;;  %v4248_v54 = vsel %vm4177_vm14, %v12074_v62, %v12162_v23  ;;  %v5184_v9 = vsel %vm5085_vm4, %v5181_v31, %v5183_v11  ;;  %v15510_v62 = vld [vmem:[#allocation124_spill] sm:$0xff] }
 0x2b9   : > { %v4976_v39 = vpop.permute.xlu1 %4975  ;;  %v12185_v55 = vor.u32 %v4770_v33, %v4769_v52  ;;  %v4652_v31 = vsel %vm4567_vm10, %v4649_v17, %v4651_v21 }
 0x2ba   : > { %v4520_v35 = vpop.permute.xlu0 %4519  ;;  %v12195_v29 = vor.u32 %v4374_v10, %v4373_v24  ;;  %v4250_v10 = vrot.slane %v15508_v40, 2 }
 0x2bb   : > { %4081 = vrot.lane.b32.xlu1 %v3954_v8, %s8561_s10  ;;  %v5723_v47 = vsel %vm5601_vm15, %v5554_v61, %v4520_v35  ;;  %v5823_v8 = vsel %vm5343_vm13, %v4588_v34, %v4976_v39  ;;  %v5363_v39 = vsel %vm5343_vm13, %v15435_v19, %v10809_v30  ;;  %v4772_v35 = vsel %vm4697_vm8, %v12097_v18, %v12185_v55 }
 0x2bc   : > { %5053 = vrot.lane.b32.xlu0 %v4896_v7, %s8560_s7  ;;  %6714 = vmatmul.mubr.bf16.gmra.mxu1 %v5723_v47  ;;  %v4898_v7 = vrot.slane %v15510_v62, 3  ;;  %v4376_v30 = vsel %vm4177_vm14, %v12107_v45, %v12195_v29  ;;  %v4249_v45 = vrot.slane %v15507_v38, 1 }
 0x2bd   : > { %v4068_v57 = vpop.permute.xlu1 %4067 }
 0x2be   : > { %v5040_v6 = vpop.permute.xlu0 %5039  ;;  %v5492_v52 = vsel %vm5472_vm1, %v5363_v39, %v4068_v57  ;;  %v12219_v19 = vor.u32 %v4898_v7, %v4897_v59  ;;  %v15513_v59 = vld [vmem:[#allocation48_spill] sm:$0xff] }
 0x2bf   : > { %5247 = vrot.lane.b32.xlu1 %v5120_v13, %s8561_s10  ;;  %v15511_v13 = vld [vmem:[#allocation43_spill] sm:$0xff]  ;;  %v5919_v17 = vsel %vm5343_vm13, %v4652_v31, %v5040_v6  ;;  %v4773_v7 = vrot.slane %v15513_v59, 2 }
 0x2c0   : > { %4145 = vrot.lane.b32.xlu0 %v4018_v28, %s8561_s10  ;;  %v3955_v47 = vrot.slane %v15511_v13, 1  ;;  %v5121_v18 = vrot.slane %v15511_v13, 3 }
 0x2c1   : > { %v5234_v1 = vpop.permute.xlu1 %5233 }
 0x2c2   : > { %v6005_v22 = vsel %vm5472_vm1, %v5823_v8, %v5234_v1  ;;  %v4132_v61 = vpop.permute.xlu0 %4131  ;;  %v3956_v24 = vsel %vm3919_vm12, %v3953_v3, %v3955_v47  ;;  %v4589_v8 = vrot.slane %v15458_v42, 2  ;;  %v4900_v1 = vsel %vm4697_vm8, %v12131_v58, %v12219_v19  ;;  %v15512_v3 = vld [vmem:[#allocation123_spill] sm:$0xff] }
 0x2c3   : > { %4471 = vrot.lane.b32.xlu1 %v4248_v54, %s8562_s11  ;;  %7866 = vmatprep.mubr.msk.bf16.mxu0 %vm5601_vm15, %v6005_v22  ;;  %v5427_v54 = vsel %vm5343_vm13, %v15437_v50, %v11232_v0  ;;  %v5122_v22 = vsel %vm5085_vm4, %v5119_v36, %v5121_v18  ;;  %v12250_v50 = vor.u32 %v4250_v10, %v4249_v45  ;;  %v15514_v58 = vld [vmem:[#allocation47_spill] sm:$0xff]  ;;  %v5185_v31 = vrot.slane %v15512_v3, 3 }
 0x2c4   : > { %5311 = vrot.lane.b32.xlu0 %v5184_v9, %s8561_s10  ;;  %v4019_v9 = vrot.slane %v15512_v3, 1  ;;  %v5556_v38 = vsel %vm5472_vm1, %v5427_v54, %v4132_v61  ;;  %v4774_v39 = vrot.slane %v15514_v58, 3  ;;  %v4590_v36 = vsel %vm4567_vm10, %v4587_v26, %v4589_v8 }
 0x2c5   : > { %v4458_v33 = vpop.permute.xlu1 %4457 }
 0x2c6   : > { %v5630_v34 = vsel %vm5601_vm15, %v5492_v52, %v4458_v33  ;;  %v5298_v28 = vpop.permute.xlu0 %5297  ;;  %v4377_v52 = vrot.slane %v15509_v41, 1  ;;  %v4378_v33 = vrot.slane %v15510_v62, 2  ;;  %v12273_v26 = vor.u32 %v4774_v39, %v4773_v7 }
 0x2c7   : > { %4991 = vrot.lane.b32.xlu1 %v4772_v35, %s8560_s7  ;;  %6466 = vmatmul.mubr.bf16.gmra.mxu0 %v5630_v34  ;;  %v6069_v57 = vsel %vm5472_vm1, %v5919_v17, %v5298_v28  ;;  %v4020_v35 = vsel %vm3919_vm12, %v4017_v60, %v4019_v9  ;;  %v4252_v17 = vsel %vm4177_vm14, %v12162_v23, %v12250_v50  ;;  %v15516_v23 = vld [vmem:[#allocation131_spill] sm:$0xff] }
 0x2c8   : > { %4535 = vrot.lane.b32.xlu0 %v4376_v30, %s8562_s11  ;;  %7898 = vmatprep.mubr.msk.bf16.mxu1 %vm5601_vm15, %v6069_v57  ;;  %v4653_v30 = vrot.slane %v15459_v37, 2  ;;  %v5186_v41 = vsel %vm5085_vm4, %v5183_v11, %v5185_v31  ;;  %v12283_v57 = vor.u32 %v4378_v33, %v4377_v52  ;;  %v4902_v10 = vrot.slane %v15516_v23, 3 }
 0x2c9   : > { %v4978_v6 = vpop.permute.xlu1 %4977  ;;  %v4254_v33 = vrot.slane %v15514_v58, 2 }
 0x2ca   : > { %v4522_v40 = vpop.permute.xlu0 %4521  ;;  %v5826_v28 = vsel %vm5343_vm13, %v4590_v36, %v4978_v6  ;;  %v15517_v6 = vld [vmem:[#allocation145_spill] sm:$0xff]  ;;  %v4654_v11 = vsel %vm4567_vm10, %v4651_v21, %v4653_v30 }
 0x2cb   : > { %4083 = vrot.lane.b32.xlu1 %v3956_v24, %s8561_s10  ;;  %v5726_v0 = vsel %vm5601_vm15, %v5556_v38, %v4522_v40  ;;  %v15515_v24 = vld [vmem:[#allocation132_spill] sm:$0xff]  ;;  %v4776_v38 = vsel %vm4697_vm8, %v12185_v55, %v12273_v26  ;;  %v15518_v40 = vld [vmem:[#allocation46_spill] sm:$0xff] }
 0x2cc   : > { %5055 = vrot.lane.b32.xlu0 %v4900_v1, %s8560_s7  ;;  %6722 = vmatmul.mubr.bf16.gmra.mxu1 %v5726_v0  ;;  %v4901_v45 = vrot.slane %v15515_v24, 2  ;;  %v5365_v1 = vsel %vm5343_vm13, %v15447_v49, %v15517_v6  ;;  %v4380_v49 = vsel %vm4177_vm14, %v12195_v29, %v12283_v57  ;;  %v5123_v55 = vrot.slane %v15518_v40, 3 }
 0x2cd   : > { %v4070_v61 = vpop.permute.xlu1 %4069  ;;  %v4253_v29 = vrot.slane %v15513_v59, 1 }
 0x2ce   : > { %v5042_v34 = vpop.permute.xlu0 %5041  ;;  %v5494_v0 = vsel %vm5472_vm1, %v5365_v1, %v4070_v61  ;;  %v12307_v36 = vor.u32 %v4902_v10, %v4901_v45  ;;  %v15520_v45 = vld [vmem:[#allocation51_spill] sm:$0xff] }
 0x2cf   : > { %5249 = vrot.lane.b32.xlu1 %v5122_v22, %s8561_s10  ;;  %v3957_v22 = vrot.slane %v15518_v40, 1  ;;  %v5922_v21 = vsel %vm5343_vm13, %v4654_v11, %v5042_v34  ;;  %v4777_v10 = vrot.slane %v15520_v45, 2 }
 0x2d0   : > { %4147 = vrot.lane.b32.xlu0 %v4020_v35, %s8561_s10 }
 0x2d1   : > { %v5236_v60 = vpop.permute.xlu1 %5235  ;;  %v3958_v52 = vsel %vm3919_vm12, %v3955_v47, %v3957_v22  ;;  %v15519_v47 = vld [vmem:[#allocation128_spill] sm:$0xff] }
 0x2d2   : > { %v6007_v62 = vsel %vm5472_vm1, %v5826_v28, %v5236_v60  ;;  %v4134_v54 = vpop.permute.xlu0 %4133  ;;  %v4591_v28 = vrot.slane %v15468_v46, 2  ;;  %v4904_v60 = vsel %vm4697_vm8, %v12219_v19, %v12307_v36  ;;  %v15521_v19 = vld [vmem:[#allocation50_spill] sm:$0xff]  ;;  %v5187_v1 = vrot.slane %v15519_v47, 3 }
 0x2d3   : > { %4473 = vrot.lane.b32.xlu1 %v4252_v17, %s8562_s11  ;;  %7867 = vmatprep.mubr.msk.bf16.mxu0 %vm5601_vm15, %v6007_v62  ;;  %v5429_v17 = vsel %vm5343_vm13, %v15448_v14, %v11248_v43  ;;  %v5124_v62 = vsel %vm5085_vm4, %v5121_v18, %v5123_v55  ;;  %v12338_v14 = vor.u32 %v4254_v33, %v4253_v29  ;;  %v4778_v6 = vrot.slane %v15521_v19, 3 }
 0x2d4   : > { %5313 = vrot.lane.b32.xlu0 %v5186_v41, %s8561_s10  ;;  %v4021_v41 = vrot.slane %v15519_v47, 1  ;;  %v5558_v59 = vsel %vm5472_vm1, %v5429_v17, %v4134_v54  ;;  %v4592_v18 = vsel %vm4567_vm10, %v4589_v8, %v4591_v28 }
 0x2d5   : > { %v4460_v7 = vpop.permute.xlu1 %4459  ;;  %v12361_v8 = vor.u32 %v4778_v6, %v4777_v10 }
 0x2d6   : > { %v5633_v39 = vsel %vm5601_vm15, %v5494_v0, %v4460_v7  ;;  %v5300_v35 = vpop.permute.xlu0 %5299  ;;  %v4022_v11 = vsel %vm3919_vm12, %v4019_v9, %v4021_v41  ;;  %v4382_v0 = vrot.slane %v15516_v23, 2 }
 0x2d7   : > { %4993 = vrot.lane.b32.xlu1 %v4776_v38, %s8560_s7  ;;  %6474 = vmatmul.mubr.bf16.gmra.mxu0 %v5633_v39  ;;  %v6071_v61 = vsel %vm5472_vm1, %v5922_v21, %v5300_v35  ;;  %v4381_v38 = vrot.slane %v15515_v24, 1  ;;  %v4655_v39 = vrot.slane %v15469_v2, 2  ;;  %v5188_v24 = vsel %vm5085_vm4, %v5185_v31, %v5187_v1 }
 0x2d8   : > { %4537 = vrot.lane.b32.xlu0 %v4380_v49, %s8562_s11  ;;  %7899 = vmatprep.mubr.msk.bf16.mxu1 %vm5601_vm15, %v6071_v61  ;;  %v4256_v49 = vsel %vm4177_vm14, %v12250_v50, %v12338_v14  ;;  %v15522_v61 = vld [vmem:[#allocation135_spill] sm:$0xff]  ;;  %v15523_v50 = vld [vmem:[#allocation134_spill] sm:$0xff]  ;;  %v4780_v17 = vsel %vm4697_vm8, %v12273_v26, %v12361_v8 }
 0x2d9   : > { %v4980_v34 = vpop.permute.xlu1 %4979  ;;  %v12371_v35 = vor.u32 %v4382_v0, %v4381_v38  ;;  %v4906_v29 = vrot.slane %v15523_v50, 3  ;;  %v4656_v31 = vsel %vm4567_vm10, %v4653_v30, %v4655_v39  ;;  %v5431_v38 = vsel %vm5343_vm13, %v15459_v37, %v11246_v20 }
 0x2da   : > { %v4524_v58 = vpop.permute.xlu0 %4523  ;;  %v5829_v21 = vsel %vm5343_vm13, %v4592_v18, %v4980_v34  ;;  %v5367_v34 = vsel %vm5343_vm13, %v15458_v42, %v10863_v25  ;;  %v4258_v18 = vrot.slane %v15521_v19, 2  ;;  %v4593_v0 = vrot.slane %v15477_v12, 2 }
 0x2db   : > { %4085 = vrot.lane.b32.xlu1 %v3958_v52, %s8561_s10  ;;  %v5729_v43 = vsel %vm5601_vm15, %v5558_v59, %v4524_v58  ;;  %v4905_v52 = vrot.slane %v15522_v61, 2  ;;  %v4384_v25 = vsel %vm4177_vm14, %v12283_v57, %v12371_v35  ;;  %v4257_v57 = vrot.slane %v15520_v45, 1 }
 0x2dc   : > { %5057 = vrot.lane.b32.xlu0 %v4904_v60, %s8560_s7  ;;  %6730 = vmatmul.mubr.bf16.gmra.mxu1 %v5729_v43  ;;  %v15524_v60 = vld [vmem:[#allocation49_spill] sm:$0xff] }
 0x2dd   : > { %v4072_v54 = vpop.permute.xlu1 %4071  ;;  %v3959_v59 = vrot.slane %v15524_v60, 1  ;;  %v12395_v42 = vor.u32 %v4906_v29, %v4905_v52  ;;  %v5125_v26 = vrot.slane %v15524_v60, 3  ;;  %v12426_v37 = vor.u32 %v4258_v18, %v4257_v57 }
 0x2de   : > { %v5044_v7 = vpop.permute.xlu0 %5043  ;;  %v5496_v58 = vsel %vm5472_vm1, %v5367_v34, %v4072_v54  ;;  %v4385_v34 = vrot.slane %v15522_v61, 1  ;;  %v5369_v57 = vsel %vm5343_vm13, %v15468_v46, %v10865_v4  ;;  %v12482_v4 = vld [vmem:[%s14650_s4] ss:$0 sm:$0xff] }
 0x2df   : > { %5251 = vrot.lane.b32.xlu1 %v5124_v62, %s8561_s10  ;;  %v5925_v30 = vsel %vm5343_vm13, %v4656_v31, %v5044_v7  ;;  %v3960_v54 = vsel %vm3919_vm12, %v3957_v22, %v3959_v59  ;;  %v4908_v7 = vsel %vm4697_vm8, %v12307_v36, %v12395_v42  ;;  %v15525_v22 = vld [vmem:[#allocation133_spill] sm:$0xff]  ;;  %v4386_v31 = vrot.slane %v15523_v50, 2 }
 0x2e0   : > { %4149 = vrot.lane.b32.xlu0 %v4022_v11, %s8561_s10  ;;  %v15527_v36 = vld [vmem:[#allocation53_spill] sm:$0xff]  ;;  %v5189_v29 = vrot.slane %v15525_v22, 3 }
 0x2e1   : > { %v5238_v9 = vpop.permute.xlu1 %5237 }
 0x2e2   : > { %v6009_v23 = vsel %vm5472_vm1, %v5829_v21, %v5238_v9  ;;  %v4136_v33 = vpop.permute.xlu0 %4135  ;;  %v5126_v21 = vsel %vm5085_vm4, %v5123_v55, %v5125_v26  ;;  %v15526_v9 = vld [vmem:[#allocation54_spill] sm:$0xff]  ;;  %v4594_v55 = vsel %vm4567_vm10, %v4591_v28, %v4593_v0  ;;  %v5190_v61 = vsel %vm5085_vm4, %v5187_v1, %v5189_v29 }
 0x2e3   : > { %4475 = vrot.lane.b32.xlu1 %v4256_v49, %s8562_s11  ;;  %7868 = vmatprep.mubr.msk.bf16.mxu0 %vm5601_vm15, %v6009_v23  ;;  %v4023_v49 = vrot.slane %v15525_v22, 1  ;;  %v5560_v45 = vsel %vm5472_vm1, %v5431_v38, %v4136_v33  ;;  %v4782_v23 = vrot.slane %v15527_v36, 3 }
 0x2e4   : > { %5315 = vrot.lane.b32.xlu0 %v5188_v24, %s8561_s10  ;;  %v4781_v24 = vrot.slane %v15526_v9, 2 }
 0x2e5   : > { %v4462_v62 = vpop.permute.xlu1 %4461  ;;  %v4024_v33 = vsel %vm3919_vm12, %v4021_v41, %v4023_v49 }
 0x2e6   : > { %v5636_v43 = vsel %vm5601_vm15, %v5496_v58, %v4462_v62  ;;  %v5302_v10 = vpop.permute.xlu0 %5301  ;;  %v4657_v58 = vrot.slane %v15478_v44, 2  ;;  %v4260_v62 = vsel %vm4177_vm14, %v12338_v14, %v12426_v37  ;;  %v12449_v28 = vor.u32 %v4782_v23, %v4781_v24  ;;  %v15529_v14 = vld [vmem:[#allocation140_spill] sm:$0xff] }
 0x2e7   : > { %4995 = vrot.lane.b32.xlu1 %v4780_v17, %s8560_s7  ;;  %6482 = vmatmul.mubr.bf16.gmra.mxu0 %v5636_v43  ;;  %v6073_v6 = vsel %vm5472_vm1, %v5925_v30, %v5302_v10  ;;  %v15528_v30 = vld [vmem:[#allocation141_spill] sm:$0xff]  ;;  %v4261_v23 = vrot.slane %v15526_v9, 1 }
 0x2e8   : > { %4539 = vrot.lane.b32.xlu0 %v4384_v25, %s8562_s11  ;;  %7900 = vmatprep.mubr.msk.bf16.mxu1 %vm5601_vm15, %v6073_v6  ;;  %v12459_v25 = vor.u32 %v4386_v31, %v4385_v34  ;;  %v4909_v10 = vrot.slane %v15528_v30, 2  ;;  %v4910_v6 = vrot.slane %v15529_v14, 3  ;;  %v4658_v1 = vsel %vm4567_vm10, %v4655_v39, %v4657_v58 }
 0x2e9   : > { %v4982_v11 = vpop.permute.xlu1 %4981  ;;  %v4784_v18 = vsel %vm4697_vm8, %v12361_v8, %v12449_v28  ;;  %v5433_v34 = vsel %vm5343_vm13, %v15469_v2, %v11263_v51  ;;  %v4595_v31 = vrot.slane %v15484_v5, 2 }
 0x2ea   : > { %v4526_v19 = vpop.permute.xlu0 %4525  ;;  %v5832_v43 = vsel %vm5343_vm13, %v4594_v55, %v4982_v11  ;;  %v15530_v11 = vld [vmem:[#allocation52_spill] sm:$0xff]  ;;  %v4388_v39 = vsel %vm4177_vm14, %v12371_v35, %v12459_v25 }
 0x2eb   : > { %4087 = vrot.lane.b32.xlu1 %v3960_v54, %s8561_s10  ;;  %v5732_v20 = vsel %vm5601_vm15, %v5560_v45, %v4526_v19  ;;  %v3961_v38 = vrot.slane %v15530_v11, 1  ;;  %v12488_v19 = vor.u32 %v4910_v6, %v4909_v10  ;;  %v5127_v24 = vrot.slane %v15530_v11, 3  ;;  %v15532_v10 = vld [vmem:[#allocation57_spill] sm:$0xff] }
 0x2ec   : > { %5059 = vrot.lane.b32.xlu0 %v4908_v7, %s8560_s7  ;;  %6738 = vmatmul.mubr.bf16.gmra.mxu1 %v5732_v20  ;;  %v4785_v6 = vrot.slane %v15532_v10, 2 }
 0x2ed   : > { %v4074_v52 = vpop.permute.xlu1 %4073  ;;  %v3962_v35 = vsel %vm3919_vm12, %v3959_v59, %v3961_v38  ;;  %v5128_v2 = vsel %vm5085_vm4, %v5125_v26, %v5127_v24  ;;  %v4389_v26 = vrot.slane %v15528_v30, 1 }
 0x2ee   : > { %v5046_v17 = vpop.permute.xlu0 %5045  ;;  %v5498_v7 = vsel %vm5472_vm1, %v5369_v57, %v4074_v52  ;;  %v4262_v52 = vrot.slane %v15527_v36, 2 }
 0x2ef   : > { %5253 = vrot.lane.b32.xlu1 %v5126_v21, %s8561_s10  ;;  %v5928_v8 = vsel %vm5343_vm13, %v4658_v1, %v5046_v17  ;;  %v4912_v17 = vsel %vm4697_vm8, %v12395_v42, %v12488_v19 }
 0x2f0   : > { %4151 = vrot.lane.b32.xlu0 %v4024_v33, %s8561_s10 }
 0x2f1   : > { %v5240_v41 = vpop.permute.xlu1 %5239 }
 0x2f2   : > { %v6011_v50 = vsel %vm5472_vm1, %v5832_v43, %v5240_v41  ;;  %v4138_v54 = vpop.permute.xlu0 %4137 }
 0x2f3   : > { %4477 = vrot.lane.b32.xlu1 %v4260_v62, %s8562_s11  ;;  %7869 = vmatprep.mubr.msk.bf16.mxu0 %vm5601_vm15, %v6011_v50  ;;  %v15531_v62 = vld [vmem:[#allocation139_spill] sm:$0xff]  ;;  %v5562_v59 = vsel %vm5472_vm1, %v5433_v34, %v4138_v54  ;;  %v15533_v54 = vld [vmem:[#allocation56_spill] sm:$0xff] }
 0x2f4   : > { %5317 = vrot.lane.b32.xlu0 %v5190_v61, %s8561_s10  ;;  %v4025_v43 = vrot.slane %v15531_v62, 1  ;;  %v12519_v61 = vor.u32 %v4262_v52, %v4261_v23  ;;  %v4786_v57 = vrot.slane %v15533_v54, 3 }
 0x2f5   : > { %v4464_v45 = vpop.permute.xlu1 %4463 }
 0x2f6   : > { %v5639_v46 = vsel %vm5601_vm15, %v5498_v7, %v4464_v45  ;;  %v5304_v21 = vpop.permute.xlu0 %5303  ;;  %v5191_v7 = vrot.slane %v15531_v62, 3  ;;  %v4390_v45 = vrot.slane %v15529_v14, 2  ;;  %v4659_v14 = vrot.slane %v15485_v56, 2 }
 0x2f7   : > { %4997 = vrot.lane.b32.xlu1 %v4784_v18, %s8560_s7  ;;  %v6395_v20 = vpop.f32.mrf.mxu0  ;;  %6490 = vmatmul.mubr.bf16.gmra.mxu0 %v5639_v46  ;;  %v6075_v55 = vsel %vm5472_vm1, %v5928_v8, %v5304_v21  ;;  %v4596_v46 = vsel %vm4567_vm10, %v4593_v0, %v4595_v31  ;;  %v4026_v21 = vsel %vm3919_vm12, %v4023_v49, %v4025_v43 }
 0x2f8   : > { %v6396_v33 = vadd.f32 %v12482_v4, %v6395_v20  ;;  %4541 = vrot.lane.b32.xlu0 %v4388_v39, %s8562_s11  ;;  %7901 = vmatprep.mubr.msk.bf16.mxu1 %vm5601_vm15, %v6075_v55  ;;  %v4264_v0 = vsel %vm4177_vm14, %v12426_v37, %v12519_v61  ;;  %v12546_v23 = vor.u32 %v4786_v57, %v4785_v6  ;;  %v15537_v6 = vld [vmem:[#allocation55_spill] sm:$0xff] }
 0x2f9   : > { %v4984_v9 = vpop.permute.xlu1 %4983  ;;  %v6397_v36 = vpop.f32.mrf.mxu0  ;;  %v3963_v57 = vrot.slane %v15537_v6, 1 }
 0x2fa   : > { %8180 = vtanh.f32 %v6396_v33  ;;  %v4528_v41 = vpop.permute.xlu0 %4527  ;;  %v5835_v52 = vsel %vm5343_vm13, %v4596_v46, %v4984_v9  ;;  %v5192_v33 = vsel %vm5085_vm4, %v5189_v29, %v5191_v7  ;;  %v15534_v36 = vld [vmem:[#allocation144_spill] sm:$0xff]  ;;  %v15535_v9 = vld [vmem:[#allocation143_spill] sm:$0xff]  ;;  %v4660_v29 = vsel %vm4567_vm10, %v4657_v58, %v4659_v14 }
 0x2fb   : > { %4089 = vrot.lane.b32.xlu1 %v3962_v35, %s8561_s10  ;;  %v6398_v51 = vpop.f32.mrf.mxu0  ;;  %v5735_v42 = vsel %vm5601_vm15, %v5562_v59, %v4528_v41  ;;  %v12555_v35 = vor.u32 %v4390_v45, %v4389_v26  ;;  %v4914_v59 = vrot.slane %v15535_v9, 3  ;;  %v15536_v41 = vld [vmem:[#allocation151_spill] sm:$0xff] }
 0x2fc   : > { %v6399_v50 = vadd.f32 %v12482_v4, %v6398_v51  ;;  %v6651_v1 = vpop.f32.mrf.mxu1  ;;  %5061 = vrot.lane.b32.xlu0 %v4912_v17, %s8560_s7  ;;  %6746 = vmatmul.mubr.bf16.gmra.mxu1 %v5735_v42  ;;  %v4913_v17 = vrot.slane %v15534_v36, 2  ;;  %v5371_v51 = vsel %vm5343_vm13, %v15477_v12, %v15536_v41  ;;  %v4788_v42 = vsel %vm4697_vm8, %v12449_v28, %v12546_v23 }
 0x2fd   : > { %v4076_v18 = vpop.permute.xlu1 %4075  ;;  %v6652_v39 = vadd.f32 %v12482_v4, %v6651_v1  ;;  %v6400_v8 = vpop.f32.mrf.mxu0  ;;  %v4392_v45 = vsel %vm4177_vm14, %v12459_v25, %v12555_v35 }
 0x2fe   : > { %8182 = vtanh.f32 %v6399_v50  ;;  %v6653_v30 = vpop.f32.mrf.mxu1  ;;  %v5048_v20 = vpop.permute.xlu0 %5047  ;;  %v5500_v12 = vsel %vm5472_vm1, %v5371_v51, %v4076_v18  ;;  %v12581_v46 = vor.u32 %v4914_v59, %v4913_v17  ;;  %v5129_v18 = vrot.slane %v15537_v6, 3 }
 0x2ff   : > { %5255 = vrot.lane.b32.xlu1 %v5128_v2, %s8561_s10  ;;  %8184 = vtanh.f32 %v6652_v39  ;;  %v5931_v39 = vsel %vm5343_vm13, %v4660_v29, %v5048_v20  ;;  %v4266_v30 = vrot.slane %v15533_v54, 2 }
 0x300   : > { %v6654_v55 = vpop.f32.mrf.mxu1  ;;  %4153 = vrot.lane.b32.xlu0 %v4026_v21, %s8561_s10  ;;  %v4265_v21 = vrot.slane %v15532_v10, 1  ;;  %v5130_v41 = vsel %vm5085_vm4, %v5127_v24, %v5129_v18 }
 0x301   : > { %v5242_v49 = vpop.permute.xlu1 %5241  ;;  %v6655_v34 = vadd.f32 %v12482_v4, %v6654_v55 }
 0x302   : > { %v6013_v37 = vsel %vm5472_vm1, %v5835_v52, %v5242_v49  ;;  %v6656_v2 = vpop.f32.mrf.mxu1  ;;  %v4140_v50 = vpop.permute.xlu0 %4139  ;;  %v15538_v52 = vld [vmem:[#allocation5_spill] sm:$0xff]  ;;  %v4597_v49 = vrot.slane %v15491_v53, 2  ;;  %v12616_v51 = vor.u32 %v4266_v30, %v4265_v21 }
 0x303   : > { %4479 = vrot.lane.b32.xlu1 %v4264_v0, %s8562_s11  ;;  %7870 = vmatprep.mubr.msk.bf16.mxu0 %vm5601_vm15, %v6013_v37  ;;  %8186 = vtanh.f32 %v6655_v34  ;;  %v3964_v0 = vsel %vm3919_vm12, %v3961_v38, %v3963_v57  ;;  %v5435_v10 = vsel %vm5343_vm13, %v15478_v44, %v15538_v52  ;;  %v15539_v34 = vld [vmem:[#allocation142_spill] sm:$0xff] }
 0x304   : > { %5319 = vrot.lane.b32.xlu0 %v5192_v33, %s8561_s10  ;;  %v4916_v33 = vsel %vm4697_vm8, %v12488_v19, %v12581_v46  ;;  %v4027_v38 = vrot.slane %v15539_v34, 1  ;;  %v5564_v17 = vsel %vm5472_vm1, %v5435_v10, %v4140_v50  ;;  %v15540_v50 = vld [vmem:[#allocation60_spill] sm:$0xff]  ;;  %v5193_v24 = vrot.slane %v15539_v34, 3 }
 0x305   : > { %v4466_v1 = vpop.permute.xlu1 %4465  ;;  %v4789_v29 = vrot.slane %v15540_v50, 2 }
 0x306   : > { %v5642_v26 = vsel %vm5601_vm15, %v5500_v12, %v4466_v1  ;;  %v5306_v8 = vpop.permute.xlu0 %5305 }
 0x307   : > { %v8181_v58 = vpop.eup %8180  ;;  %4999 = vrot.lane.b32.xlu1 %v4788_v42, %s8560_s7  ;;  %v6403_v28 = vpop.f32.mrf.mxu0  ;;  %6498 = vmatmul.mubr.bf16.gmra.mxu0 %v5642_v26  ;;  %v6077_v25 = vsel %vm5472_vm1, %v5931_v39, %v5306_v8  ;;  %v15541_v42 = vld [vmem:[#allocation59_spill] sm:$0xff]  ;;  %v4394_v39 = vrot.slane %v15535_v9, 2  ;;  %v4598_v8 = vsel %vm4567_vm10, %v4595_v31, %v4597_v49  ;;  %v4268_v31 = vsel %vm4177_vm14, %v12519_v61, %v12616_v51 }
 0x308   : > { %7034 = vst.msk [vmem:[%s12588_s16] sm:$0xff] %vm5343_vm13, %v8181_v58  ;;  %v6404_v20 = vadd.f32 %v12482_v4, %v6403_v28  ;;  %4543 = vrot.lane.b32.xlu0 %v4392_v45, %s8562_s11  ;;  %7902 = vmatprep.mubr.msk.bf16.mxu1 %vm5601_vm15, %v6077_v25  ;;  %v4790_v12 = vrot.slane %v15541_v42, 3  ;;  %v4393_v58 = vrot.slane %v15534_v36, 1  ;;  %v4028_v36 = vsel %vm3919_vm12, %v4025_v43, %v4027_v38 }
 0x309   : > { %v4986_v54 = vpop.permute.xlu1 %4985  ;;  %v6405_v55 = vpop.f32.mrf.mxu0  ;;  %v4661_v25 = vrot.slane %v15492_v27, 2 }
 0x30a   : > { %8188 = vtanh.f32 %v6404_v20  ;;  %v4530_v44 = vpop.permute.xlu0 %4529  ;;  %v12646_v20 = vor.u32 %v4790_v12, %v4789_v29  ;;  %v5838_v52 = vsel %vm5343_vm13, %v4598_v8, %v4986_v54  ;;  %v5194_v55 = vsel %vm5085_vm4, %v5191_v7, %v5193_v24 }
 0x30b   : > { %v8183_v37 = vpop.eup %8182  ;;  %4091 = vrot.lane.b32.xlu1 %v3964_v0, %s8561_s10  ;;  %v6406_v59 = vpop.f32.mrf.mxu0  ;;  %v5738_v2 = vsel %vm5601_vm15, %v5564_v17, %v4530_v44  ;;  %v15542_v17 = vld [vmem:[#allocation148_spill] sm:$0xff]  ;;  %v15543_v44 = vld [vmem:[#allocation147_spill] sm:$0xff]  ;;  %v4662_v29 = vsel %vm4567_vm10, %v4659_v14, %v4661_v25 }
 0x30c   : > { %7035 = vst.msk [vmem:[%s12588_s16 + $0x8] sm:$0xff] %vm5343_vm13, %v8183_v37  ;;  %v6407_v19 = vadd.f32 %v12482_v4, %v6406_v59  ;;  %v8185_v1 = vpop.eup %8184  ;;  %v6659_v26 = vpop.f32.mrf.mxu1  ;;  %5063 = vrot.lane.b32.xlu0 %v4916_v33, %s8560_s7  ;;  %6754 = vmatmul.mubr.bf16.gmra.mxu1 %v5738_v2  ;;  %v12655_v33 = vor.u32 %v4394_v39, %v4393_v58  ;;  %v4917_v54 = vrot.slane %v15542_v17, 2  ;;  %v4918_v59 = vrot.slane %v15543_v44, 3 }
 0x30d   : > { %v4078_v45 = vpop.permute.xlu1 %4077  ;;  %7098 = vst.msk [vmem:[%s12588_s16 + $0x200] sm:$0xff] %vm5343_vm13, %v8185_v1  ;;  %v6660_v28 = vadd.f32 %v12482_v4, %v6659_v26  ;;  %v6408_v21 = vpop.f32.mrf.mxu0  ;;  %v4792_v12 = vsel %vm4697_vm8, %v12546_v23, %v12646_v20  ;;  %v15545_v1 = vld [vmem:[#allocation58_spill] sm:$0xff] }
 0x30e   : > { %8190 = vtanh.f32 %v6407_v19  ;;  %v6661_v9 = vpop.f32.mrf.mxu1  ;;  %v5050_v30 = vpop.permute.xlu0 %5049  ;;  %v4396_v14 = vsel %vm4177_vm14, %v12555_v35, %v12655_v33  ;;  %v12685_v8 = vor.u32 %v4918_v59, %v4917_v54 }
 0x30f   : > { %5257 = vrot.lane.b32.xlu1 %v5130_v41, %s8561_s10  ;;  %8192 = vtanh.f32 %v6660_v28  ;;  %v15544_v41 = vld [vmem:[#allocation152_spill] sm:$0xff]  ;;  %v5934_v23 = vsel %vm5343_vm13, %v4662_v29, %v5050_v30  ;;  %v4269_v9 = vrot.slane %v15540_v50, 1 }
 0x310   : > { %v8187_v0 = vpop.eup %8186  ;;  %v6662_v10 = vpop.f32.mrf.mxu1  ;;  %4155 = vrot.lane.b32.xlu0 %v4028_v36, %s8561_s10  ;;  %v5373_v19 = vsel %vm5343_vm13, %v15484_v5, %v15544_v41  ;;  %v3965_v5 = vrot.slane %v15545_v1, 1  ;;  %v5131_v36 = vrot.slane %v15545_v1, 3 }
 0x311   : > { %v5244_v43 = vpop.permute.xlu1 %5243  ;;  %7099 = vst.msk [vmem:[%s12588_s16 + $0x208] sm:$0xff] %vm5343_vm13, %v8187_v0  ;;  %v6663_v61 = vadd.f32 %v12482_v4, %v6662_v10  ;;  %v5502_v26 = vsel %vm5472_vm1, %v5373_v19, %v4078_v45 }
 0x312   : > { %v6015_v37 = vsel %vm5472_vm1, %v5838_v52, %v5244_v43  ;;  %v6664_v2 = vpop.f32.mrf.mxu1  ;;  %v4142_v7 = vpop.permute.xlu0 %4141  ;;  %v3966_v30 = vsel %vm3919_vm12, %v3963_v57, %v3965_v5  ;;  %v15546_v52 = vld [vmem:[#allocation8_spill] sm:$0xff]  ;;  %v4599_v43 = vrot.slane %v15498_v15, 2  ;;  %v4920_v57 = vsel %vm4697_vm8, %v12581_v46, %v12685_v8 }
 0x313   : > { %4481 = vrot.lane.b32.xlu1 %v4268_v31, %s8562_s11  ;;  %7871 = vmatprep.mubr.msk.bf16.mxu0 %vm5601_vm15, %v6015_v37  ;;  %8194 = vtanh.f32 %v6663_v61  ;;  %v4270_v31 = vrot.slane %v15541_v42, 2  ;;  %v5437_v50 = vsel %vm5343_vm13, %v15485_v56, %v15546_v52  ;;  %v5132_v41 = vsel %vm5085_vm4, %v5129_v18, %v5131_v36 }
 0x314   : > { %5321 = vrot.lane.b32.xlu0 %v5194_v55, %s8561_s10  ;;  %v15547_v55 = vld [vmem:[#allocation146_spill] sm:$0xff]  ;;  %v5566_v56 = vsel %vm5472_vm1, %v5437_v50, %v4142_v7  ;;  %v15548_v7 = vld [vmem:[#allocation63_spill] sm:$0xff] }
 0x315   : > { %v4468_v58 = vpop.permute.xlu1 %4467  ;;  %v4029_v61 = vrot.slane %v15547_v55, 1  ;;  %v12718_v19 = vor.u32 %v4270_v31, %v4269_v9  ;;  %v4793_v29 = vrot.slane %v15548_v7, 2 }
 0x316   : > { %v5645_v39 = vsel %vm5601_vm15, %v5502_v26, %v4468_v58  ;;  %v5308_v21 = vpop.permute.xlu0 %5307 }
 0x317   : > { %v8189_v28 = vpop.eup %8188  ;;  %5001 = vrot.lane.b32.xlu1 %v4792_v12, %s8560_s7  ;;  %v6411_v45 = vpop.f32.mrf.mxu0  ;;  %6506 = vmatmul.mubr.bf16.gmra.mxu0 %v5645_v39  ;;  %v6079_v35 = vsel %vm5472_vm1, %v5934_v23, %v5308_v21  ;;  %v15549_v12 = vld [vmem:[#allocation62_spill] sm:$0xff]  ;;  %v4398_v23 = vrot.slane %v15543_v44, 2  ;;  %v4600_v21 = vsel %vm4567_vm10, %v4597_v49, %v4599_v43  ;;  %v4663_v49 = vrot.slane %v15499_v48, 2 }
 0x318   : > { %7036 = vst.msk [vmem:[%s12588_s16 + $0x10] sm:$0xff] %vm5343_vm13, %v8189_v28  ;;  %v6412_v0 = vadd.f32 %v12482_v4, %v6411_v45  ;;  %4545 = vrot.lane.b32.xlu0 %v4396_v14, %s8562_s11  ;;  %7903 = vmatprep.mubr.msk.bf16.mxu1 %vm5601_vm15, %v6079_v35  ;;  %v4794_v26 = vrot.slane %v15549_v12, 3  ;;  %v5195_v14 = vrot.slane %v15547_v55, 3  ;;  %v4397_v28 = vrot.slane %v15542_v17, 1 }
 0x319   : > { %v4988_v42 = vpop.permute.xlu1 %4987  ;;  %v6413_v10 = vpop.f32.mrf.mxu0  ;;  %v4030_v17 = vsel %vm3919_vm12, %v4027_v38, %v4029_v61  ;;  %v4272_v35 = vsel %vm4177_vm14, %v12616_v51, %v12718_v19 }
 0x31a   : > { %8196 = vtanh.f32 %v6412_v0  ;;  %v4532_v54 = vpop.permute.xlu0 %4531  ;;  %v12755_v0 = vor.u32 %v4794_v26, %v4793_v29  ;;  %v5841_v38 = vsel %vm5343_vm13, %v4600_v21, %v4988_v42  ;;  %v5196_v10 = vsel %vm5085_vm4, %v5193_v24, %v5195_v14 }
 0x31b   : > { %v8191_v37 = vpop.eup %8190  ;;  %4093 = vrot.lane.b32.xlu1 %v3966_v30, %s8561_s10  ;;  %v6414_v59 = vpop.f32.mrf.mxu0  ;;  %v5741_v2 = vsel %vm5601_vm15, %v5566_v56, %v4532_v54  ;;  %v15550_v56 = vld [vmem:[#allocation153_spill] sm:$0xff]  ;;  %v15551_v54 = vld [vmem:[#allocation150_spill] sm:$0xff]  ;;  %v4664_v24 = vsel %vm4567_vm10, %v4661_v25, %v4663_v49 }
 0x31c   : > { %7037 = vst.msk [vmem:[%s12588_s16 + $0x18] sm:$0xff] %vm5343_vm13, %v8191_v37  ;;  %v6415_v46 = vadd.f32 %v12482_v4, %v6414_v59  ;;  %v8193_v58 = vpop.eup %8192  ;;  %v6667_v39 = vpop.f32.mrf.mxu1  ;;  %5065 = vrot.lane.b32.xlu0 %v4920_v57, %s8560_s7  ;;  %6762 = vmatmul.mubr.bf16.gmra.mxu1 %v5741_v2  ;;  %v12764_v57 = vor.u32 %v4398_v23, %v4397_v28  ;;  %v4921_v42 = vrot.slane %v15550_v56, 2  ;;  %v4922_v59 = vrot.slane %v15551_v54, 3 }
 0x31d   : > { %v4080_v18 = vpop.permute.xlu1 %4079  ;;  %7100 = vst.msk [vmem:[%s12588_s16 + $0x210] sm:$0xff] %vm5343_vm13, %v8193_v58  ;;  %v6668_v45 = vadd.f32 %v12482_v4, %v6667_v39  ;;  %v6416_v9 = vpop.f32.mrf.mxu0  ;;  %v4796_v26 = vsel %vm4697_vm8, %v12646_v20, %v12755_v0  ;;  %v15553_v58 = vld [vmem:[#allocation61_spill] sm:$0xff] }
 0x31e   : > { %8198 = vtanh.f32 %v6415_v46  ;;  %v6669_v44 = vpop.f32.mrf.mxu1  ;;  %v5052_v31 = vpop.permute.xlu0 %5051  ;;  %v3967_v39 = vrot.slane %v15553_v58, 1  ;;  %v4400_v21 = vsel %vm4177_vm14, %v12655_v33, %v12764_v57  ;;  %v12792_v25 = vor.u32 %v4922_v59, %v4921_v42 }
 0x31f   : > { %5259 = vrot.lane.b32.xlu1 %v5132_v41, %s8561_s10  ;;  %8200 = vtanh.f32 %v6668_v45  ;;  %v15552_v41 = vld [vmem:[#allocation154_spill] sm:$0xff]  ;;  %v5937_v9 = vsel %vm5343_vm13, %v4664_v24, %v5052_v31  ;;  %v4273_v44 = vrot.slane %v15548_v7, 1  ;;  %v4601_v7 = vrot.slane %v15505_v16, 2 }
 0x320   : > { %v8195_v30 = vpop.eup %8194  ;;  %v6670_v52 = vpop.f32.mrf.mxu1  ;;  %4157 = vrot.lane.b32.xlu0 %v4030_v17, %s8561_s10  ;;  %v5375_v46 = vsel %vm5343_vm13, %v15491_v53, %v15552_v41  ;;  %v3968_v31 = vsel %vm3919_vm12, %v3965_v5, %v3967_v39  ;;  %v4924_v5 = vsel %vm4697_vm8, %v12685_v8, %v12792_v25 }
 0x321   : > { %v5246_v50 = vpop.permute.xlu1 %5245  ;;  %7101 = vst.msk [vmem:[%s12588_s16 + $0x218] sm:$0xff] %vm5343_vm13, %v8195_v30  ;;  %v6671_v51 = vadd.f32 %v12482_v4, %v6670_v52  ;;  %v5504_v53 = vsel %vm5472_vm1, %v5375_v46, %v4080_v18  ;;  %v5133_v18 = vrot.slane %v15553_v58, 3  ;;  %v15554_v52 = vld [vmem:[#allocation149_spill] sm:$0xff] }
 0x322   : > { %v6017_v37 = vsel %vm5472_vm1, %v5841_v38, %v5246_v50  ;;  %v6672_v2 = vpop.f32.mrf.mxu1  ;;  %v4144_v29 = vpop.permute.xlu0 %4143  ;;  %v4031_v50 = vrot.slane %v15554_v52, 1 }
 0x323   : > { %4483 = vrot.lane.b32.xlu1 %v4272_v35, %s8562_s11  ;;  %7872 = vmatprep.mubr.msk.bf16.mxu0 %vm5601_vm15, %v6017_v37  ;;  %8202 = vtanh.f32 %v6671_v51  ;;  %v4274_v35 = vrot.slane %v15549_v12, 2  ;;  %v5134_v46 = vsel %vm5085_vm4, %v5131_v36, %v5133_v18 }
 0x324   : > { %5323 = vrot.lane.b32.xlu0 %v5196_v10, %s8561_s10  ;;  %v15555_v10 = vld [vmem:[#allocation86_spill] sm:$0xff] }
 0x325   : > { %v4470_v28 = vpop.permute.xlu1 %4469  ;;  %v5439_v51 = vsel %vm5343_vm13, %v15492_v27, %v15555_v10  ;;  %v12825_v27 = vor.u32 %v4274_v35, %v4273_v44  ;;  %v4402_v44 = vrot.slane %v15551_v54, 2  ;;  %v15558_v10 = vld [vmem:[#allocation155_spill] sm:$0xff] }
 0x326   : > { %v5648_v23 = vsel %vm5601_vm15, %v5504_v53, %v4470_v28  ;;  %v5310_v20 = vpop.permute.xlu0 %5309  ;;  %v5568_v42 = vsel %vm5472_vm1, %v5439_v51, %v4144_v29  ;;  %v15556_v29 = vld [vmem:[#allocation66_spill] sm:$0xff] }
 0x327   : > { %v8197_v45 = vpop.eup %8196  ;;  %5003 = vrot.lane.b32.xlu1 %v4796_v26, %s8560_s7  ;;  %v6419_v17 = vpop.f32.mrf.mxu0  ;;  %6514 = vmatmul.mubr.bf16.gmra.mxu0 %v5648_v23  ;;  %v6081_v33 = vsel %vm5472_vm1, %v5937_v9, %v5310_v20  ;;  %v4797_v24 = vrot.slane %v15556_v29, 2  ;;  %v15557_v26 = vld [vmem:[#allocation65_spill] sm:$0xff]  ;;  %v4602_v23 = vsel %vm4567_vm10, %v4599_v43, %v4601_v7  ;;  %v5197_v9 = vrot.slane %v15554_v52, 3 }
 0x328   : > { %7038 = vst.msk [vmem:[%s12588_s16 + $0x20] sm:$0xff] %vm5343_vm13, %v8197_v45  ;;  %v6420_v30 = vadd.f32 %v12482_v4, %v6419_v17  ;;  %4547 = vrot.lane.b32.xlu0 %v4400_v21, %s8562_s11  ;;  %7904 = vmatprep.mubr.msk.bf16.mxu1 %vm5601_vm15, %v6081_v33  ;;  %v4798_v53 = vrot.slane %v15557_v26, 3  ;;  %v4032_v45 = vsel %vm3919_vm12, %v4029_v61, %v4031_v50  ;;  %v4401_v43 = vrot.slane %v15550_v56, 1 }
 0x329   : > { %v4990_v12 = vpop.permute.xlu1 %4989  ;;  %v6421_v38 = vpop.f32.mrf.mxu0  ;;  %v14973_v61 = vrot.slane %v15506_v32, 2  ;;  %v5377_v56 = vsel %vm5343_vm13, %v15498_v15, %v15558_v10  ;;  %v5198_v15 = vsel %vm5085_vm4, %v5195_v14, %v5197_v9 }
 0x32a   : > { %8204 = vtanh.f32 %v6420_v30  ;;  %v4534_v59 = vpop.permute.xlu0 %4533  ;;  %v4276_v30 = vsel %vm4177_vm14, %v12718_v19, %v12825_v27  ;;  %v5844_v54 = vsel %vm5343_vm13, %v4602_v23, %v4990_v12  ;;  %v12873_v12 = vor.u32 %v4402_v44, %v4401_v43  ;;  %v15565_v44 = vld [vmem:[#allocation169_spill] sm:$0xff] }
 0x32b   : > { %v8199_v37 = vpop.eup %8198  ;;  %4095 = vrot.lane.b32.xlu1 %v3968_v31, %s8561_s10  ;;  %v6422_v41 = vpop.f32.mrf.mxu0  ;;  %v5744_v2 = vsel %vm5601_vm15, %v5568_v42, %v4534_v59  ;;  %v12855_v31 = vor.u32 %v4798_v53, %v4797_v24  ;;  %v15560_v59 = vld [vmem:[#allocation158_spill] sm:$0xff]  ;;  %v15562_v24 = vld [vmem:[#allocation165_spill] sm:$0xff]  ;;  %v4666_v14 = vsel %vm4567_vm10, %v4663_v49, %v14973_v61 }
 0x32c   : > { %7039 = vst.msk [vmem:[%s12588_s16 + $0x28] sm:$0xff] %vm5343_vm13, %v8199_v37  ;;  %v6423_v8 = vadd.f32 %v12482_v4, %v6422_v41  ;;  %v8201_v28 = vpop.eup %8200  ;;  %v6675_v36 = vpop.f32.mrf.mxu1  ;;  %5067 = vrot.lane.b32.xlu0 %v4924_v5, %s8560_s7  ;;  %6770 = vmatmul.mubr.bf16.gmra.mxu1 %v5744_v2  ;;  %v15559_v37 = vld [vmem:[#allocation159_spill] sm:$0xff]  ;;  %v4926_v41 = vrot.slane %v15560_v59, 3  ;;  %v12883_v53 = vsel %vm5343_vm13, %v15518_v40, %v15562_v24 }
 0x32d   : > { %v4082_v21 = vpop.permute.xlu1 %4081  ;;  %7102 = vst.msk [vmem:[%s12588_s16 + $0x220] sm:$0xff] %vm5343_vm13, %v8201_v28  ;;  %v6676_v20 = vadd.f32 %v12482_v4, %v6675_v36  ;;  %v6424_v17 = vpop.f32.mrf.mxu0  ;;  %v4925_v42 = vrot.slane %v15559_v37, 2  ;;  %v15563_v28 = vld [vmem:[#allocation166_spill] sm:$0xff] }
 0x32e   : > { %8206 = vtanh.f32 %v6423_v8  ;;  %v6677_v35 = vpop.f32.mrf.mxu1  ;;  %v5054_v33 = vpop.permute.xlu0 %5053  ;;  %v15561_v8 = vld [vmem:[#allocation161_spill] sm:$0xff]  ;;  %v12888_v23 = vsel %vm5343_vm13, %v15511_v13, %v15563_v28  ;;  %v15564_v17 = vld [vmem:[#allocation64_spill] sm:$0xff] }
 0x32f   : > { %5261 = vrot.lane.b32.xlu1 %v5134_v46, %s8561_s10  ;;  %8208 = vtanh.f32 %v6676_v20  ;;  %v12878_v2 = vsel %vm5343_vm13, %v15505_v16, %v15561_v8  ;;  %v4800_v20 = vsel %vm4697_vm8, %v12755_v0, %v12855_v31  ;;  %v14970_v43 = vrot.slane %v15564_v17, 1 }
 0x330   : > { %v8203_v38 = vpop.eup %8202  ;;  %v6678_v51 = vpop.f32.mrf.mxu1  ;;  %4159 = vrot.lane.b32.xlu0 %v4032_v45, %s8561_s10  ;;  %v12904_v35 = vsel %vm5343_vm13, %v15530_v11, %v15565_v44  ;;  %v12908_v10 = vor.u32 %v4926_v41, %v4925_v42  ;;  %v14969_v49 = vrot.slane %v15564_v17, 3  ;;  %v4404_v0 = vsel %vm4177_vm14, %v12764_v57, %v12873_v12  ;;  %v15567_v42 = vld [vmem:[#allocation89_spill] sm:$0xff] }
 0x331   : > { %v5248_v5 = vpop.permute.xlu1 %5247  ;;  %7103 = vst.msk [vmem:[%s12588_s16 + $0x228] sm:$0xff] %vm5343_vm13, %v8203_v38  ;;  %v6679_v19 = vadd.f32 %v12482_v4, %v6678_v51  ;;  %v4277_v51 = vrot.slane %v15556_v29, 1  ;;  %v5441_v41 = vsel %vm5343_vm13, %v15499_v48, %v15567_v42  ;;  %v15568_v29 = vld [vmem:[#allocation6_spill] sm:$0xff]  ;;  %v3970_v48 = vsel %vm3919_vm12, %v3967_v39, %v14970_v43 }
 0x332   : > { %v6019_v46 = vsel %vm5472_vm1, %v5844_v54, %v5248_v5  ;;  %v6680_v36 = vpop.f32.mrf.mxu1  ;;  %v4146_v45 = vpop.permute.xlu0 %4145  ;;  %v4278_v5 = vrot.slane %v15557_v26, 2  ;;  %v12930_v26 = vsel %vm5343_vm13, %v15512_v3, %v15568_v29  ;;  %v5136_v39 = vsel %vm5085_vm4, %v5133_v18, %v14969_v49  ;;  %v8175_v29 = vld [vmem:[%s8687_s28 + $0x1e0] sm:$0xff]  }
 0x333   : > { %4485 = vrot.lane.b32.xlu1 %v4276_v30, %s8562_s11  ;;  %7873 = vmatprep.mubr.msk.bf16.mxu0 %vm5601_vm15, %v6019_v46  ;;  %8210 = vtanh.f32 %v6679_v19  ;;  %v5506_v30 = vsel %vm5472_vm1, %v5377_v56, %v4082_v21  ;;  %v15566_v21 = vld [vmem:[#allocation7_spill] sm:$0xff]  ;;  %v5940_v46 = vsel %vm5343_vm13, %v4666_v14, %v5054_v33  ;;  %v14971_v33 = vrot.slane %v15511_v13, 2 }
 0x334   : > { %5325 = vrot.lane.b32.xlu0 %v5198_v15, %s8561_s10  ;;  %v12920_v56 = vsel %vm5343_vm13, %v15506_v32, %v15566_v21  ;;  %v4928_v14 = vsel %vm4697_vm8, %v12792_v25, %v12908_v10  ;;  %v5570_v21 = vsel %vm5472_vm1, %v5441_v41, %v4146_v45  ;;  %v4405_v45 = vrot.slane %v15559_v37, 1  ;;  %v15573_v49 = vld [vmem:[#allocation163_spill] sm:$0xff] }
 0x335   : > { %v4472_v38 = vpop.permute.xlu1 %4471  ;;  %v4406_v41 = vrot.slane %v15560_v59, 2 }
 0x336   : > { %v5651_v54 = vsel %vm5601_vm15, %v5506_v30, %v4472_v38  ;;  %v5312_v15 = vpop.permute.xlu0 %5311  ;;  %v12953_v30 = vor.u32 %v4278_v5, %v4277_v51 }
 0x337   : > { %v8205_v19 = vpop.eup %8204  ;;  %5005 = vrot.lane.b32.xlu1 %v4800_v20, %s8560_s7  ;;  %v6427_v57 = vpop.f32.mrf.mxu0  ;;  %6522 = vmatmul.mubr.bf16.gmra.mxu0 %v5651_v54  ;;  %v6083_v8 = vsel %vm5472_vm1, %v5940_v46, %v5312_v15  ;;  %v15569_v20 = vld [vmem:[#allocation157_spill] sm:$0xff]  ;;  %v15570_v54 = vld [vmem:[#allocation3_spill] sm:$0xff] }
 0x338   : > { %7040 = vst.msk [vmem:[%s12588_s16 + $0x30] sm:$0xff] %vm5343_vm13, %v8205_v19  ;;  %v6428_v24 = vadd.f32 %v12482_v4, %v6427_v57  ;;  %4549 = vrot.lane.b32.xlu0 %v4404_v0, %s8562_s11  ;;  %7905 = vmatprep.mubr.msk.bf16.mxu1 %vm5601_vm15, %v6083_v8  ;;  %v14972_v44 = vrot.slane %v15569_v20, 1  ;;  %v14974_v38 = vrot.slane %v15569_v20, 3  ;;  %v1843_v0 = vadd.s32 960, %v15570_v54  ;;  %v15571_v46 = vld [vmem:[#allocation69_spill] sm:$0xff]  ;;  %v15572_v57 = vld [vmem:[#allocation68_spill] sm:$0xff] }
 0x339   : > { %v4992_v28 = vpop.permute.xlu1 %4991  ;;  %v6429_v36 = vpop.f32.mrf.mxu0  ;;  %v4801_v15 = vrot.slane %v15571_v46, 2  ;;  %v4802_v18 = vrot.slane %v15572_v57, 3  ;;  %v1844_v51 = vadd.s32 968, %v15570_v54 }
 0x33a   : > { %8212 = vtanh.f32 %v6428_v24  ;;  %v4536_v25 = vpop.permute.xlu0 %4535  ;;  %v4034_v16 = vsel %vm3919_vm12, %v4031_v50, %v14972_v44  ;;  %v4280_v50 = vsel %vm4177_vm14, %v12825_v27, %v12953_v30 }
 0x33b   : > { %v8207_v19 = vpop.eup %8206  ;;  %4097 = vrot.lane.b32.xlu1 %v3970_v48, %s8561_s10  ;;  %v6430_v42 = vpop.f32.mrf.mxu0  ;;  %v5747_v8 = vsel %vm5601_vm15, %v5570_v21, %v4536_v25  ;;  %v4604_v48 = vsel %vm4567_vm10, %v4601_v7, %v14971_v33  ;;  %v4929_v21 = vrot.slane %v15573_v49, 2  ;;  %v15574_v25 = vld [vmem:[#allocation162_spill] sm:$0xff]  ;;  %v15575_v7 = vld [vmem:[#allocation4_spill] sm:$0xff] }
 0x33c   : > { %7041 = vst.msk [vmem:[%s12588_s16 + $0x38] sm:$0xff] %vm5343_vm13, %v8207_v19  ;;  %v6431_v5 = vadd.f32 %v12482_v4, %v6430_v42  ;;  %v8209_v24 = vpop.eup %8208  ;;  %v6683_v36 = vpop.f32.mrf.mxu1  ;;  %5069 = vrot.lane.b32.xlu0 %v4928_v14, %s8560_s7  ;;  %6778 = vmatmul.mubr.bf16.gmra.mxu1 %v5747_v8  ;;  %v4667_v42 = vrot.slane %v15512_v3, 2  ;;  %v4930_v37 = vrot.slane %v15574_v25, 3  ;;  %v1973_v14 = vadd.s32 %v15575_v7, %v1843_v0 }
 0x33d   : > { %v4084_v19 = vpop.permute.xlu1 %4083  ;;  %7104 = vst.msk [vmem:[%s12588_s16 + $0x230] sm:$0xff] %vm5343_vm13, %v8209_v24  ;;  %v6684_v59 = vadd.f32 %v12482_v4, %v6683_v36  ;;  %v6432_v43 = vpop.f32.mrf.mxu0  ;;  %v1412_v24 = vshll.u32 %v8175_v29, 16  ;;  %v1974_v36 = vadd.s32 %v15575_v7, %v1844_v51  ;;  %v12997_v0 = vor.u32 %v4802_v18, %v4801_v15 }
 0x33e   : > { %8214 = vtanh.f32 %v6431_v5  ;;  %v6685_v8 = vpop.f32.mrf.mxu1  ;;  %v5056_v33 = vpop.permute.xlu0 %5055  ;;  %v5200_v5 = vsel %vm5085_vm4, %v5197_v9, %v14974_v38  ;;  %v1409_v43 = vshrl.u32 %v8175_v29, 16  ;;  %v5847_v44 = vsel %vm5343_vm13, %v4604_v48, %v4992_v28  ;;  %v15576_v38 = vld [vmem:[#allocation67_spill] sm:$0xff]  ;;  %v15577_v48 = vld [vmem:[#allocation88_spill] sm:$0xff] }
 0x33f   : > { %5263 = vrot.lane.b32.xlu1 %v5136_v39, %s8561_s10  ;;  %8216 = vtanh.f32 %v6684_v59  ;;  %v12999_v8 = vor.u32 %v4406_v41, %v4405_v45  ;;  %v14976_v29 = vrot.slane %v15518_v40, 2  ;;  %v14977_v51 = vrot.slane %v15576_v38, 1 }
 0x340   : > { %v8211_v39 = vpop.eup %8210  ;;  %v6686_v61 = vpop.f32.mrf.mxu1  ;;  %4161 = vrot.lane.b32.xlu0 %v4034_v16, %s8561_s10  ;;  %v13005_v59 = vor.u32 %v4930_v37, %v4929_v21  ;;  %vm2102_vm2 = vcmp.ge.s32.totalorder %v1973_v14, 0  ;;  %vm2231_vm3 = vcmp.lt.s32.totalorder %v1973_v14, 1200  ;;  %v1411_v45 = vrot.slane %v1409_v43, 6 }
 0x341   : > { %v5250_v9 = vpop.permute.xlu1 %5249  ;;  %7105 = vst.msk [vmem:[%s12588_s16 + $0x238] sm:$0xff] %vm5343_vm13, %v8211_v39  ;;  %v6687_v27 = vadd.f32 %v12482_v4, %v6686_v61  ;;  %v1414_v41 = vrot.slane %v1412_v24, 7  ;;  %vm2103_vm11 = vcmp.ge.s32.totalorder %v1974_v36, 0  ;;  %vm2232_vm5 = vcmp.lt.s32.totalorder %v1974_v36, 1200  ;;  %vm13046_vm7 = vmand %vm2102_vm2, %vm2231_vm3 }
 0x342   : > { %v6021_v15 = vsel %vm5472_vm1, %v5847_v44, %v5250_v9  ;;  %v6688_v18 = vpop.f32.mrf.mxu1  ;;  %v4148_v28 = vpop.permute.xlu0 %4147  ;;  %v13016_v21 = vsel %vm5343_vm13, %v15519_v47, %v15577_v48  ;;  %v15578_v61 = vrot.slane %v15506_v32, 2  ;;  %v4804_v37 = vsel %vm4697_vm8, %v12855_v31, %v12997_v0  ;;  %vm13056_vm6 = vmand %vm2103_vm11, %vm2232_vm5  ;;  %v15585_v48 = vld [vmem:[#allocation164_spill] sm:$0xff] }
 0x343   : > { %4487 = vrot.lane.b32.xlu1 %v4280_v50, %s8562_s11  ;;  %7874 = vmatprep.mubr.msk.bf16.mxu0 %vm5601_vm15, %v6021_v15  ;;  %8218 = vtanh.f32 %v6687_v27  ;;  %v5508_v16 = vsel %vm5472_vm1, %v12878_v2, %v4084_v19  ;;  %v4408_v24 = vsel %vm4177_vm14, %v12873_v12, %v12999_v8  ;;  %v15579_v32 = vrot.slane %v15511_v13, 2  ;;  %vm2747_vm2 = vmpackc.low %vm13046_vm7, %vm13046_vm7 }
 0x344   : > { %v4668_v44 = vsel %vm4567_vm10, %v15578_v61, %v4667_v42  ;;  %5327 = vrot.lane.b32.xlu0 %v5200_v5, %s8561_s10  ;;  %v15580_v31 = vrot.slane %v15564_v17, 1  ;;  %v14978_v13 = vrot.slane %v15576_v38, 3  ;;  %v4281_v5 = vrot.slane %v15571_v46, 1  ;;  %vm2748_vm3 = vmpackc.low %vm13056_vm6, %vm13056_vm6 }
 0x345   : > { %v4474_v43 = vpop.permute.xlu1 %4473  ;;  %v13037_v50 = vsel %vm4567_vm10, %v15579_v32, %v14976_v29  ;;  %v4282_v39 = vrot.slane %v15572_v57, 2  ;;  %v5943_v27 = vsel %vm5343_vm13, %v4668_v44, %v5056_v33  ;;  %v4932_v46 = vsel %vm4697_vm8, %v12908_v10, %v13005_v59  ;;  %v15588_v32 = vld [vmem:[#allocation71_spill] sm:$0xff] }
 0x346   : > { %v3972_v2 = vsel %vm3919_vm12, %v15580_v31, %v14977_v51  ;;  %v5654_v12 = vsel %vm5601_vm15, %v5508_v16, %v4474_v43  ;;  %v5314_v15 = vpop.permute.xlu0 %5313  ;;  %v13066_v57 = vshrl.u32 %v15585_v48, 16  ;;  %v13068_v36 = vor.u32 %v1414_v41, %v1411_v45  ;;  %v15587_v41 = vld [vmem:[#allocation72_spill] sm:$0xff]  ;;  %v15590_v29 = vld [vmem:[#allocation167_spill] sm:$0xff] }
 0x347   : > { %v8213_v14 = vpop.eup %8212  ;;  %5007 = vrot.lane.b32.xlu1 %v4804_v37, %s8560_s7  ;;  %v6435_v18 = vpop.f32.mrf.mxu0  ;;  %6530 = vmatmul.mubr.bf16.gmra.mxu0 %v5654_v12  ;;  %v6085_v61 = vsel %vm5472_vm1, %v5943_v27, %v5314_v15  ;;  %v4669_v44 = vrot.slane %v15519_v47, 2  ;;  %v15586_v37 = vld [vmem:[#allocation160_spill] sm:$0xff]  ;;  %v4805_v43 = vrot.slane %v15587_v41, 2  ;;  %v4806_v31 = vrot.slane %v15588_v32, 3 }
 0x348   : > { %7042 = vst.msk [vmem:[%s12588_s16 + $0x40] sm:$0xff] %vm5343_vm13, %v8213_v14  ;;  %v6436_v33 = vadd.f32 %v12482_v4, %v6435_v18  ;;  %4551 = vrot.lane.b32.xlu0 %v4408_v24, %s8562_s11  ;;  %7906 = vmatprep.mubr.msk.bf16.mxu1 %vm5601_vm15, %v6085_v61  ;;  %v4409_v12 = vrot.slane %v15573_v49, 1  ;;  %v4410_v14 = vrot.slane %v15574_v25, 2  ;;  %v15589_v24 = vrot.slane %v15564_v17, 3  ;;  %v15591_v16 = vld [vmem:[#allocation156_spill] sm:$0xff] }
 0x349   : > { %v4994_v10 = vpop.permute.xlu1 %4993  ;;  %v6437_v45 = vpop.f32.mrf.mxu0  ;;  %v13093_v15 = vor.u32 %v4282_v39, %v4281_v5  ;;  %v5572_v49 = vsel %vm5472_vm1, %v12920_v56, %v4148_v28  ;;  %v4934_v51 = vrot.slane %v15590_v29, 3  ;;  %v1416_v5 = vsel %vm868_vm0, %v15591_v16, %v13068_v36 }
 0x34a   : > { %8220 = vtanh.f32 %v6436_v33  ;;  %v5138_v27 = vsel %vm5085_vm4, %v15589_v24, %v14978_v13  ;;  %v4538_v25 = vpop.permute.xlu0 %4537  ;;  %v4933_v33 = vrot.slane %v13066_v57, 2  ;;  %v15592_v56 = vmov 0  }
 0x34b   : > { %v8215_v61 = vpop.eup %8214  ;;  %4099 = vrot.lane.b32.xlu1 %v3972_v2, %s8561_s10  ;;  %v6438_v45 = vpop.f32.mrf.mxu0  ;;  %v5750_v24 = vsel %vm5601_vm15, %v5572_v49, %v4538_v25  ;;  %v2876_v28 = vsel %vm2747_vm2, 65537, %v15592_v56  ;;  %v2877_v2 = vsel %vm2748_vm3, 65537, %v15592_v56  ;;  %v4670_v19 = vsel %vm4567_vm10, %v4667_v42, %v4669_v44 }
 0x34c   : > { %7043 = vst.msk [vmem:[%s12588_s16 + $0x48] sm:$0xff] %vm5343_vm13, %v8215_v61  ;;  %v6439_v39 = vadd.f32 %v12482_v4, %v6438_v45  ;;  %v8217_v16 = vpop.eup %8216  ;;  %v6691_v61 = vpop.f32.mrf.mxu1  ;;  %5071 = vrot.lane.b32.xlu0 %v4932_v46, %s8560_s7  ;;  %6786 = vmatmul.mubr.bf16.gmra.mxu1 %v5750_v24  ;;  %v13126_v25 = vor.u32 %v4806_v31, %v4805_v43  ;;  %v15593_v46 = vrot.slane %v15586_v37, 1  ;;  %v15594_v24 = vrot.slane %v15569_v20, 1 }
 0x34d   : > { %v4086_v49 = vpop.permute.xlu1 %4085  ;;  %v13128_v45 = vor.u32 %v4410_v14, %v4409_v12  ;;  %7106 = vst.msk [vmem:[%s12588_s16 + $0x240] sm:$0xff] %vm5343_vm13, %v8217_v16  ;;  %v6692_v9 = vadd.f32 %v12482_v4, %v6691_v61  ;;  %v6440_v13 = vpop.f32.mrf.mxu0  ;;  %v14982_v3 = vrot.slane %v15595_v63, 1  ;;  %v15596_v43 = vrot.slane %v15586_v37, 3 }
 0x34e   : > { %8222 = vtanh.f32 %v6439_v39  ;;  %v4036_v18 = vsel %vm3919_vm12, %v15594_v24, %v15593_v46  ;;  %v6693_v17 = vpop.f32.mrf.mxu1  ;;  %v5058_v42 = vpop.permute.xlu0 %5057  ;;  %v15597_v31 = vrot.slane %v15569_v20, 3  ;;  %v13145_v13 = vor.u32 %v4934_v51, %v4933_v33 }
 0x34f   : > { %5265 = vrot.lane.b32.xlu1 %v5138_v27, %s8561_s10  ;;  %v1650_v12 = vmul.bf16 1036860877, %v1416_v5  ;;  %v7837_v14 = vcombine.low %v2876_v28, %v2877_v2  ;;  %8224 = vtanh.f32 %v6692_v9  ;;  %v4284_v17 = vsel %vm4177_vm14, %v12953_v30, %v13093_v15  ;;  %v8176_v30 = vld [vmem:[%s8687_s28 + $0x1e8] sm:$0xff]  }
 0x350   : > { %v5202_v4 = vsel %vm5085_vm4, %v15597_v31, %v15596_v43  ;;  %vm1585_vm6 = vcmp.ge.bf16.partialorder %v1416_v5, 0  ;;  %v1845_v27 = vadd.s32 976, %v15570_v54  ;;  %v8219_v39 = vpop.eup %8218  ;;  %v5850_v16 = vsel %vm5343_vm13, %v13037_v50, %v4994_v10  ;;  %v6694_v61 = vpop.f32.mrf.mxu1  ;;  %4163 = vrot.lane.b32.xlu0 %v4036_v18, %s8561_s10  ;;  %v13167_v50 = vld [vmem:[%s14650_s4] ss:$0 sm:$0xff] }
 0x351   : > { %v5252_v51 = vpop.permute.xlu1 %5251  ;;  %v4808_v33 = vsel %vm4697_vm8, %v12997_v0, %v13126_v25  ;;  %v4412_v28 = vsel %vm4177_vm14, %v12999_v8, %v13128_v45  ;;  %v1846_v2 = vadd.s32 984, %v15570_v54  ;;  %7107 = vst.msk [vmem:[%s12588_s16 + $0x248] sm:$0xff] %vm5343_vm13, %v8219_v39  ;;  %v6695_v10 = vadd.f32 %v13167_v50, %v6694_v61 }
 0x352   : > { %v6023_v18 = vsel %vm5472_vm1, %v5850_v16, %v5252_v51  ;;  %v4607_v0 = vrot.slane %v15524_v60, 2  ;;  %v15598_v8 = vrot.slane %v15576_v38, 1  ;;  %v6696_v46 = vpop.f32.mrf.mxu1  ;;  %v4150_v24 = vpop.permute.xlu0 %4149  ;;  %v4936_v43 = vsel %vm4697_vm8, %v13005_v59, %v13145_v13 }
 0x353   : > { %4489 = vrot.lane.b32.xlu1 %v4284_v17, %s8562_s11  ;;  %7875 = vmatprep.mubr.msk.bf16.mxu0 %vm5601_vm15, %v6023_v18  ;;  %v14983_v31 = vrot.slane %v15595_v63, 3  ;;  %v1715_v39 = vsel %vm1585_vm6, %v1416_v5, %v1650_v12  ;;  %vm3139_vm11 = vcmp.ne.s16.totalorder %v7837_v14, 0  ;;  %8226 = vtanh.f32 %v6695_v10 }
 0x354   : > { %v3974_v9 = vsel %vm3919_vm12, %v15598_v8, %v14982_v3  ;;  %v4671_v16 = vrot.slane %v15525_v22, 2  ;;  %v4037_v61 = vrot.slane %v15585_v48, 1  ;;  %v1975_v51 = vadd.s32 %v15575_v7, %v1845_v27  ;;  %5329 = vrot.lane.b32.xlu0 %v5202_v4, %s8561_s10 }
 0x355   : > { %v5510_v17 = vsel %vm5472_vm1, %v12888_v23, %v4086_v49  ;;  %v4476_v18 = vpop.permute.xlu1 %4475  ;;  %v1418_v8 = vshrl.u32 %v8176_v30, 16  ;;  %v1421_v59 = vshll.u32 %v8176_v30, 16  ;;  %v1976_v46 = vadd.s32 %v15575_v7, %v1846_v2 }
 0x356   : > { %v5657_v5 = vsel %vm5601_vm15, %v5510_v17, %v4476_v18  ;;  %v4285_v12 = vrot.slane %v15587_v41, 1  ;;  %v4286_v14 = vrot.slane %v15588_v32, 2  ;;  %v13194_v10 = vsel %vm3139_vm11, %v1715_v39, 0  ;;  %v5316_v23 = vpop.permute.xlu0 %5315 }
 0x357   : > { %v8221_v27 = vpop.eup %8220  ;;  %v5946_v3 = vsel %vm5343_vm13, %v4670_v19, %v5058_v42  ;;  %5009 = vrot.lane.b32.xlu1 %v4808_v33, %s8560_s7  ;;  %v6443_v49 = vpop.f32.mrf.mxu0  ;;  %6538 = vmatmul.mubr.bf16.gmra.mxu0 %v5657_v5  ;;  %v15599_v4 = vrot.slane %v15576_v38, 3  ;;  %v13205_v32 = vshrl.u32 %v13194_v10, 16  ;;  %vm2104_vm5 = vcmp.ge.s32.totalorder %v1975_v51, 0 }
 0x358   : > { %7044 = vst.msk [vmem:[%s12588_s16 + $0x50] sm:$0xff] %vm5343_vm13, %v8221_v27  ;;  %v6087_v19 = vsel %vm5472_vm1, %v5946_v3, %v5316_v23  ;;  %v6444_v42 = vadd.f32 %v13167_v50, %v6443_v49  ;;  %vm2233_vm7 = vcmp.lt.s32.totalorder %v1975_v51, 1200  ;;  %4553 = vrot.lane.b32.xlu0 %v4412_v28, %s8562_s11  ;;  %v1420_v39 = vrot.slane %v1418_v8, 6  ;;  %v15600_v49 = vld [vmem:[#allocation75_spill] sm:$0xff] }
 0x359   : > { %v5140_v30 = vsel %vm5085_vm4, %v15599_v4, %v14983_v31  ;;  %7907 = vmatprep.mubr.msk.bf16.mxu1 %vm5601_vm15, %v6087_v19  ;;  %v4996_v33 = vpop.permute.xlu1 %4995  ;;  %v6445_v2 = vpop.f32.mrf.mxu0  ;;  %v1423_v17 = vrot.slane %v1421_v59, 7  ;;  %vm2105_vm2 = vcmp.ge.s32.totalorder %v1976_v46, 0  ;;  %vm2234_vm3 = vcmp.lt.s32.totalorder %v1976_v46, 1200  ;;  %v15601_v19 = vld [vmem:[#allocation74_spill] sm:$0xff]  ;;  %vm13227_vm6 = vmand %vm2104_vm5, %vm2233_vm7 }
 0x35a   : > { %8228 = vtanh.f32 %v6444_v42  ;;  %v13213_v18 = vor.u32 %v4286_v14, %v4285_v12  ;;  %v13216_v3 = vshll.u32 %v13194_v10, 16  ;;  %v4413_v5 = vrot.slane %v13066_v57, 1  ;;  %v4540_v23 = vpop.permute.xlu0 %4539  ;;  %vm13239_vm11 = vmand %vm2105_vm2, %vm2234_vm3 }
 0x35b   : > { %v8223_v27 = vpop.eup %8222  ;;  %v5574_v28 = vsel %vm5472_vm1, %v12930_v26, %v4150_v24  ;;  %4101 = vrot.lane.b32.xlu1 %v3974_v9, %s8561_s10  ;;  %v6446_v8 = vpop.f32.mrf.mxu0  ;;  %v4414_v59 = vrot.slane %v15590_v29, 2  ;;  %v4809_v4 = vrot.slane %v15600_v49, 2  ;;  %v4810_v12 = vrot.slane %v15601_v19, 3  ;;  %vm2749_vm5 = vmpackc.low %vm13227_vm6, %vm13227_vm6 }
 0x35c   : > { %7045 = vst.msk [vmem:[%s12588_s16 + $0x58] sm:$0xff] %vm5343_vm13, %v8223_v27  ;;  %v6447_v26 = vadd.f32 %v13167_v50, %v6446_v8  ;;  %v5753_v9 = vsel %vm5601_vm15, %v5574_v28, %v4540_v23  ;;  %v4937_v24 = vrot.slane %v13205_v32, 2  ;;  %v4938_v42 = vrot.slane %v13216_v3, 3  ;;  %v8225_v51 = vpop.eup %8224  ;;  %v6699_v8 = vpop.f32.mrf.mxu1  ;;  %5073 = vrot.lane.b32.xlu0 %v4936_v43, %s8560_s7  ;;  %vm2750_vm7 = vmpackc.low %vm13239_vm11, %vm13239_vm11 }
 0x35d   : > { %v15606_v31 = vrot.slane %v15518_v40, 2  ;;  %6794 = vmatmul.mubr.bf16.gmra.mxu1 %v5753_v9  ;;  %v4088_v28 = vpop.permute.xlu1 %4087  ;;  %v4672_v46 = vsel %vm4567_vm10, %v4669_v44, %v4671_v16  ;;  %v13254_v23 = vor.u32 %v1423_v17, %v1420_v39  ;;  %7108 = vst.msk [vmem:[%s12588_s16 + $0x250] sm:$0xff] %vm5343_vm13, %v8225_v51  ;;  %v6700_v40 = vadd.f32 %v13167_v50, %v6699_v8  ;;  %v6448_v41 = vpop.f32.mrf.mxu0 }
 0x35e   : > { %8230 = vtanh.f32 %v6447_v26  ;;  %v15607_v43 = vrot.slane %v15586_v37, 1  ;;  %v15608_v9 = vrot.slane %v15585_v48, 3  ;;  %v15609_v47 = vrot.slane %v15586_v37, 3  ;;  %v6701_v39 = vpop.f32.mrf.mxu1  ;;  %v5060_v17 = vpop.permute.xlu0 %5059 }
 0x35f   : > { %v4608_v27 = vsel %vm4567_vm10, %v15606_v31, %v4607_v0  ;;  %5267 = vrot.lane.b32.xlu1 %v5140_v30, %s8561_s10  ;;  %v15610_v41 = vrot.slane %v15590_v29, 1  ;;  %v14985_v51 = vrot.slane %v13216_v3, 1  ;;  %v13277_v8 = vor.u32 %v4414_v59, %v4413_v5 }
 0x360   : > { %v4038_v31 = vsel %vm3919_vm12, %v15607_v43, %v4037_v61  ;;  %v5204_v44 = vsel %vm5085_vm4, %v15609_v47, %v15608_v9  ;;  %v13279_v43 = vor.u32 %v4810_v12, %v4809_v4  ;;  %8232 = vtanh.f32 %v6700_v40  ;;  %v6702_v5 = vpop.f32.mrf.mxu1 }
 0x361   : > { %v3688_v26 = vor.u32 %v13066_v57, %v15610_v41  ;;  %v4288_v30 = vsel %vm4177_vm14, %v13093_v15, %v13213_v18  ;;  %v13287_v9 = vor.u32 %v4938_v42, %v4937_v24  ;;  %v14984_v29 = vrot.slane %v13194_v10, 1  ;;  %v8227_v57 = vpop.eup %8226  ;;  %4165 = vrot.lane.b32.xlu0 %v4038_v31, %s8561_s10  ;;  %v5254_v59 = vpop.permute.xlu1 %5253  ;;  %v8177_v41 = vld [vmem:[%s8687_s28 + $0x1f0] sm:$0xff]  }
 0x362   : > { %v5853_v47 = vsel %vm5343_vm13, %v4608_v27, %v4996_v33  ;;  %v1425_v4 = vsel %vm868_vm0, %v13068_v36, %v13254_v23  ;;  %v2878_v15 = vsel %vm2749_vm5, 65537, %v15592_v56  ;;  %v1847_v12 = vadd.s32 992, %v15570_v54  ;;  %7109 = vst.msk [vmem:[%s12588_s16 + $0x258] sm:$0xff] %vm5343_vm13, %v8227_v57  ;;  %v6704_v42 = vpop.f32.mrf.mxu1  ;;  %v4152_v27 = vpop.permute.xlu0 %4151 }
 0x363   : > { %v6703_v33 = vadd.f32 %v13167_v50, %v6702_v5  ;;  %v6025_v24 = vsel %vm5472_vm1, %v5853_v47, %v5254_v59  ;;  %v2879_v36 = vsel %vm2750_vm7, 65537, %v15592_v56  ;;  %v1848_v14 = vadd.s32 1000, %v15570_v54  ;;  %4491 = vrot.lane.b32.xlu1 %v4288_v30, %s8562_s11 }
 0x364   : > { %7876 = vmatprep.mubr.msk.bf16.mxu0 %vm5601_vm15, %v6025_v24  ;;  %vm15611_vm2 = vsmask.f32 7424  ;;  %v4416_v31 = vsel %vm4177_vm14, %v13128_v45, %v13277_v8  ;;  %v4609_v2 = vrot.slane %v15530_v11, 2  ;;  %v4812_v39 = vsel %vm4697_vm8, %v13126_v25, %v13279_v43  ;;  %v15612_v45 = vld [vmem:[#allocation73_spill] sm:$0xff] }
 0x365   : > { %v3693_v40 = vsel %vm15611_vm2, %v3688_v26, %v14985_v51  ;;  %8234 = vtanh.f32 %v6703_v33  ;;  %v4940_v30 = vsel %vm4697_vm8, %v13145_v13, %v13287_v9  ;;  %v13334_v26 = vsel %vm3919_vm12, %v4037_v61, %v14984_v29  ;;  %5331 = vrot.lane.b32.xlu0 %v5204_v44, %s8561_s10  ;;  %v4478_v25 = vpop.permute.xlu1 %4477 }
 0x366   : > { %v3975_v57 = vrot.slane %v15612_v45, 1  ;;  %v5512_v47 = vsel %vm5472_vm1, %v12883_v53, %v4088_v28  ;;  %v1651_v5 = vmul.bf16 1036860877, %v1425_v4  ;;  %v7838_v59 = vcombine.low %v2878_v15, %v2879_v36  ;;  %v5318_v51 = vpop.permute.xlu0 %5317 }
 0x367   : > { %v1977_v13 = vadd.s32 %v15575_v7, %v1847_v12  ;;  %v5660_v33 = vsel %vm5601_vm15, %v5512_v47, %v4478_v25  ;;  %v5205_v24 = vrot.slane %v13194_v10, 3  ;;  %vm1586_vm3 = vcmp.ge.bf16.partialorder %v1425_v4, 0  ;;  %v8229_v42 = vpop.eup %8228  ;;  %3844 = vrot.lane.b32.xlu1 %v3693_v40, %s8560_s7  ;;  %v6451_v53 = vpop.f32.mrf.mxu0  ;;  %v15615_v25 = vld [vmem:[#allocation78_spill] sm:$0xff] }
 0x368   : > { %v1978_v61 = vadd.s32 %v15575_v7, %v1848_v14  ;;  %v5949_v29 = vsel %vm5343_vm13, %v4672_v46, %v5060_v17  ;;  %6546 = vmatmul.mubr.bf16.gmra.mxu0 %v5660_v33  ;;  %v4417_v28 = vrot.slane %v13205_v32, 1  ;;  %v1427_v44 = vshrl.u32 %v8177_v41, 16  ;;  %7046 = vst.msk [vmem:[%s12588_s16 + $0x60] sm:$0xff] %vm5343_vm13, %v8229_v42 }
 0x369   : > { %v1430_v15 = vshll.u32 %v8177_v41, 16  ;;  %v6089_v12 = vsel %vm5472_vm1, %v5949_v29, %v5318_v51  ;;  %v6452_v36 = vadd.f32 %v13167_v50, %v6451_v53  ;;  %v4418_v14 = vrot.slane %v13216_v3, 2  ;;  %4555 = vrot.lane.b32.xlu0 %v4416_v31, %s8562_s11  ;;  %v4998_v46 = vpop.permute.xlu1 %4997  ;;  %v6453_v17 = vpop.f32.mrf.mxu0  ;;  %v15616_v53 = vld [vmem:[#allocation77_spill] sm:$0xff] }
 0x36a   : > { %v4289_v47 = vrot.slane %v15600_v49, 1  ;;  %7908 = vmatprep.mubr.msk.bf16.mxu1 %vm5601_vm15, %v6089_v12  ;;  %v1716_v40 = vsel %vm1586_vm3, %v1425_v4, %v1651_v5  ;;  %vm13356_vm6 = vcmp.ne.s16.totalorder %v7838_v59, 0  ;;  %vm2106_vm11 = vcmp.ge.s32.totalorder %v1977_v13, 0  ;;  %v4542_v31 = vpop.permute.xlu0 %4541 }
 0x36b   : > { %vm2235_vm5 = vcmp.lt.s32.totalorder %v1977_v13, 1200  ;;  %8236 = vtanh.f32 %v6452_v36  ;;  %v4290_v51 = vrot.slane %v15601_v19, 2  ;;  %vm2107_vm7 = vcmp.ge.s32.totalorder %v1978_v61, 0  ;;  %v8231_v49 = vpop.eup %8230  ;;  %5075 = vrot.lane.b32.xlu1 %v4940_v30, %s8560_s7  ;;  %v6454_v4 = vpop.f32.mrf.mxu0 }
 0x36c   : > { %vm2236_vm2 = vcmp.lt.s32.totalorder %v1978_v61, 1200  ;;  %v5576_v29 = vsel %vm5472_vm1, %v13016_v21, %v4152_v27  ;;  %v4813_v5 = vrot.slane %v15615_v25, 2  ;;  %v1429_v59 = vrot.slane %v1427_v44, 6  ;;  %7047 = vst.msk [vmem:[%s12588_s16 + $0x68] sm:$0xff] %vm5343_vm13, %v8231_v49  ;;  %vm13376_vm3 = vmand %vm2106_vm11, %vm2235_vm5  ;;  %v15619_v44 = vld [vmem:[#allocation170_spill] sm:$0xff]  ;;  %v6707_v17 = vpop.f32.mrf.mxu1 }
 0x36d   : > { %v1432_v33 = vrot.slane %v1430_v15, 7  ;;  %v6455_v42 = vadd.f32 %v13167_v50, %v6454_v4  ;;  %v5756_v19 = vsel %vm5601_vm15, %v5576_v29, %v4542_v31  ;;  %v4814_v12 = vrot.slane %v15616_v53, 3  ;;  %v8233_v30 = vpop.eup %8232  ;;  %5011 = vrot.lane.b32.xlu0 %v4812_v39, %s8560_s7  ;;  %v4090_v13 = vpop.permute.xlu1 %4089  ;;  %v15623_v4 = vld [vmem:[#allocation11_spill] sm:$0xff]  ;;  %vm2751_vm11 = vmpackc.low %vm13376_vm3, %vm13376_vm3 }
 0x36e   : > { %v13372_v21 = vsel %vm13356_vm6, %v1716_v40, 0  ;;  %v5385_v15 = vsel %vm5343_vm13, %v15524_v60, %v15619_v44  ;;  %v4610_v36 = vsel %vm4567_vm10, %v4607_v0, %v4609_v2  ;;  %6802 = vmatmul.mubr.bf16.gmra.mxu1 %v5756_v19  ;;  %v4673_v40 = vrot.slane %v15531_v62, 2  ;;  %vm13393_vm6 = vmand %vm2107_vm7, %vm2236_vm2  ;;  %7110 = vst.msk [vmem:[%s12588_s16 + $0x260] sm:$0xff] %vm5343_vm13, %v8233_v30  ;;  %v6456_v0 = vpop.f32.mrf.mxu0  ;;  %v6709_v19 = vpop.f32.mrf.mxu1 }
 0x36f   : > { %v5141_v41 = vrot.slane %v15612_v45, 3  ;;  %8238 = vtanh.f32 %v6455_v42  ;;  %v6708_v60 = vadd.f32 %v13167_v50, %v6707_v17  ;;  %v15622_v39 = vrot.slane %v15595_v63, 1  ;;  %v5062_v44 = vpop.permute.xlu0 %5061  ;;  %4167 = vrot.lane.b32.xlu1 %v13334_v26, %s8561_s10  ;;  %vm2752_vm5 = vmpackc.low %vm13393_vm6, %vm13393_vm6 }
 0x370   : > { %v13405_v31 = vor.u32 %v4418_v14, %v4417_v28  ;;  %v13410_v61 = vsel %vm5343_vm13, %v15525_v22, %v15623_v4  ;;  %v15624_v42 = vrot.slane %v15585_v48, 3  ;;  %v13420_v17 = vshll.u32 %v13372_v21, 16 }
 0x371   : > { %v3976_v29 = vsel %vm3919_vm12, %v15622_v39, %v3975_v57  ;;  %v13422_v28 = vor.u32 %v1432_v33, %v1429_v59  ;;  %8240 = vtanh.f32 %v6708_v60  ;;  %v13427_v14 = vor.u32 %v4290_v51, %v4289_v47  ;;  %v6710_v33 = vpop.f32.mrf.mxu1  ;;  %v5256_v47 = vpop.permute.xlu1 %5255 }
 0x372   : > { %v5206_v30 = vsel %vm5085_vm4, %v15624_v42, %v5205_v24  ;;  %v4611_v26 = vrot.slane %v15537_v6, 2  ;;  %v13430_v0 = vor.u32 %v4814_v12, %v4813_v5  ;;  %v8235_v39 = vpop.eup %8234  ;;  %v5856_v4 = vsel %vm5343_vm13, %v4610_v36, %v4998_v46  ;;  %4103 = vrot.lane.b32.xlu0 %v3976_v29, %s8561_s10 }
 0x373   : > { %v4674_v59 = vsel %vm4567_vm10, %v4671_v16, %v4673_v40  ;;  %v15625_v51 = vrot.slane %v15595_v63, 3  ;;  %v13448_v12 = vshrl.u32 %v13372_v21, 16  ;;  %7111 = vst.msk [vmem:[%s12588_s16 + $0x268] sm:$0xff] %vm5343_vm13, %v8235_v39  ;;  %v6711_v46 = vadd.f32 %v13167_v50, %v6710_v33  ;;  %v6712_v29 = vpop.f32.mrf.mxu1  ;;  %v4154_v19 = vpop.permute.xlu0 %4153  ;;  %5333 = vrot.lane.b32.xlu1 %v5206_v30, %s8561_s10 }
 0x374   : > { %v6027_v22 = vsel %vm5472_vm1, %v5856_v4, %v5256_v47  ;;  %v4420_v16 = vsel %vm4177_vm14, %v13277_v8, %v13405_v31  ;;  %v15626_v36 = vrot.slane %v13216_v3, 1  ;;  %v3700_v42 = vrot.slane %v13420_v17, 1 }
 0x375   : > { %v5142_v5 = vsel %vm5085_vm4, %v15625_v51, %v5141_v41  ;;  %7877 = vmatprep.mubr.msk.bf16.mxu0 %vm5601_vm15, %v6027_v22  ;;  %v1434_v39 = vsel %vm868_vm0, %v13254_v23, %v13422_v28  ;;  %v2880_v3 = vsel %vm2751_vm11, 65537, %v15592_v56  ;;  %8242 = vtanh.f32 %v6711_v46  ;;  %v4480_v30 = vpop.permute.xlu1 %4479  ;;  %v8178_v22 = vld [vmem:[%s8687_s28 + $0x1f8] sm:$0xff]  }
 0x376   : > { %v3696_v60 = vor.u32 %v13205_v32, %v15626_v36  ;;  %v2881_v32 = vsel %vm2752_vm5, 65537, %v15592_v56  ;;  %v4292_v23 = vsel %vm4177_vm14, %v13213_v18, %v13427_v14  ;;  %v13486_v8 = vsel %vm4567_vm10, %v4609_v2, %v4611_v26  ;;  %5269 = vrot.lane.b32.xlu0 %v5142_v5, %s8561_s10  ;;  %v15627_v2 = vld [vmem:[#allocation76_spill] sm:$0xff] }
 0x377   : > { %v4816_v27 = vsel %vm4697_vm8, %v13279_v43, %v13430_v0  ;;  %v5514_v49 = vsel %vm5472_vm1, %v5385_v15, %v4090_v13  ;;  %v4675_v4 = vrot.slane %v15539_v34, 2  ;;  %v4941_v18 = vrot.slane %v13448_v12, 2  ;;  %v5320_v13 = vpop.permute.xlu0 %5319  ;;  %4557 = vrot.lane.b32.xlu1 %v4420_v16, %s8562_s11  ;;  %v6459_v5 = vpop.f32.mrf.mxu0 }
 0x378   : > { %v4942_v33 = vrot.slane %v13420_v17, 3  ;;  %v5663_v11 = vsel %vm5601_vm15, %v5514_v49, %v4480_v30  ;;  %v3977_v47 = vrot.slane %v15627_v2, 1  ;;  %v1652_v51 = vmul.bf16 1036860877, %v1434_v39  ;;  %v8237_v43 = vpop.eup %8236 }
 0x379   : > { %v7839_v46 = vcombine.low %v2880_v3, %v2881_v32  ;;  %v5952_v15 = vsel %vm5343_vm13, %v4674_v59, %v5062_v44  ;;  %6554 = vmatmul.mubr.bf16.gmra.mxu0 %v5663_v11  ;;  %vm15628_vm7 = vsmask.f32 7424  ;;  %vm1587_vm2 = vcmp.ge.bf16.partialorder %v1434_v39, 0  ;;  %7048 = vst.msk [vmem:[%s12588_s16 + $0x70] sm:$0xff] %vm5343_vm13, %v8237_v43  ;;  %v5000_v16 = vpop.permute.xlu1 %4999  ;;  %v6461_v49 = vpop.f32.mrf.mxu0 }
 0x37a   : > { %v3701_v36 = vsel %vm15628_vm7, %v3696_v60, %v3700_v42  ;;  %v1849_v29 = vadd.s32 1008, %v15570_v54  ;;  %v6091_v3 = vsel %vm5472_vm1, %v5952_v15, %v5320_v13  ;;  %v6460_v32 = vadd.f32 %v13167_v50, %v6459_v5  ;;  %4493 = vrot.lane.b32.xlu0 %v4292_v23, %s8562_s11 }
 0x37b   : > { %v14986_v44 = vrot.slane %v15627_v2, 3  ;;  %v1850_v59 = vadd.s32 1016, %v15570_v54  ;;  %7909 = vmatprep.mubr.msk.bf16.mxu1 %vm5601_vm15, %v6091_v3  ;;  %v13513_v60 = vor.u32 %v4942_v33, %v4941_v18  ;;  %v4041_v30 = vrot.slane %v13372_v21, 1  ;;  %v4544_v33 = vpop.permute.xlu0 %4543  ;;  %5013 = vrot.lane.b32.xlu1 %v4816_v27, %s8560_s7  ;;  %v6462_v3 = vpop.f32.mrf.mxu0 }
 0x37c   : > { %v4293_v11 = vrot.slane %v15615_v25, 1  ;;  %v4294_v43 = vrot.slane %v15616_v53, 2  ;;  %8244 = vtanh.f32 %v6460_v32  ;;  %v1717_v15 = vsel %vm1587_vm2, %v1434_v39, %v1652_v51  ;;  %v8239_v5 = vpop.eup %8238 }
 0x37d   : > { %vm13519_vm3 = vcmp.ne.s16.totalorder %v7839_v46, 0  ;;  %v1436_v23 = vshrl.u32 %v8178_v22, 16  ;;  %v5578_v18 = vsel %vm5472_vm1, %v13410_v61, %v4154_v19  ;;  %v3978_v25 = vsel %vm3919_vm12, %v3975_v57, %v3977_v47  ;;  %7049 = vst.msk [vmem:[%s12588_s16 + $0x78] sm:$0xff] %vm5343_vm13, %v8239_v5  ;;  %v6715_v57 = vpop.f32.mrf.mxu1  ;;  %v6464_v5 = vpop.f32.mrf.mxu0 }
 0x37e   : > { %v1439_v53 = vshll.u32 %v8178_v22, 16  ;;  %v1979_v39 = vadd.s32 %v15575_v7, %v1849_v29  ;;  %v6463_v51 = vadd.f32 %v13167_v50, %v6462_v3  ;;  %v5759_v61 = vsel %vm5601_vm15, %v5578_v18, %v4544_v33  ;;  %v8241_v46 = vpop.eup %8240  ;;  %3846 = vrot.lane.b32.xlu0 %v3701_v36, %s8560_s7  ;;  %v4092_v22 = vpop.permute.xlu1 %4091 }
 0x37f   : > { %v5144_v19 = vsel %vm5085_vm4, %v5141_v41, %v14986_v44  ;;  %v1980_v27 = vadd.s32 %v15575_v7, %v1850_v59  ;;  %6810 = vmatmul.mubr.bf16.gmra.mxu1 %v5759_v61  ;;  %v4944_v29 = vsel %vm4697_vm8, %v13287_v9, %v13513_v60  ;;  %v15631_v32 = vrot.slane %v13194_v10, 1  ;;  %7112 = vst.msk [vmem:[%s12588_s16 + $0x270] sm:$0xff] %vm5343_vm13, %v8241_v46  ;;  %v6717_v33 = vpop.f32.mrf.mxu1  ;;  %v5064_v3 = vpop.permute.xlu0 %5063 }
 0x380   : > { %v5207_v41 = vrot.slane %v13372_v21, 3  ;;  %v13554_v59 = vsel %vm13519_vm3, %v1717_v15, 0  ;;  %8246 = vtanh.f32 %v6463_v51  ;;  %v6716_v36 = vadd.f32 %v13167_v50, %v6715_v57  ;;  %4105 = vrot.lane.b32.xlu1 %v3978_v25, %s8561_s10  ;;  %v15633_v33 = vld [vmem:[#allocation80_spill] sm:$0xff] }
 0x381   : > { %v4042_v49 = vsel %vm3919_vm12, %v15631_v32, %v4041_v30  ;;  %v13559_v18 = vor.u32 %v4294_v43, %v4293_v11  ;;  %v1438_v9 = vrot.slane %v1436_v23, 6  ;;  %v13563_v61 = vshrl.u32 %v13554_v59, 16  ;;  %v6718_v23 = vpop.f32.mrf.mxu1 }
 0x382   : > { %v1441_v13 = vrot.slane %v1439_v53, 7  ;;  %vm2108_vm6 = vcmp.ge.s32.totalorder %v1979_v39, 0  ;;  %vm2237_vm11 = vcmp.lt.s32.totalorder %v1979_v39, 1200  ;;  %8248 = vtanh.f32 %v6716_v36  ;;  %v8243_v11 = vpop.eup %8242  ;;  %5077 = vrot.lane.b32.xlu0 %v4944_v29, %s8560_s7  ;;  %v5258_v25 = vpop.permute.xlu1 %5257  ;;  %v15632_v36 = vld [vmem:[#allocation81_spill] sm:$0xff] }
 0x383   : > { %v13566_v15 = vshll.u32 %v13554_v59, 16  ;;  %vm2109_vm5 = vcmp.ge.s32.totalorder %v1980_v27, 0  ;;  %vm2238_vm7 = vcmp.lt.s32.totalorder %v1980_v27, 1200  ;;  %v5859_v43 = vsel %vm5343_vm13, %v13486_v8, %v5000_v16  ;;  %7113 = vst.msk [vmem:[%s12588_s16 + $0x278] sm:$0xff] %vm5343_vm13, %v8243_v11  ;;  %vm13582_vm2 = vmand %vm2108_vm6, %vm2237_vm11  ;;  %v6720_v11 = vpop.f32.mrf.mxu1 }
 0x384   : > { %v4613_v51 = vrot.slane %v15545_v1, 2  ;;  %v4421_v53 = vrot.slane %v13448_v12, 1  ;;  %v4422_v46 = vrot.slane %v13420_v17, 2  ;;  %v6719_v57 = vadd.f32 %v13167_v50, %v6718_v23  ;;  %v4156_v23 = vpop.permute.xlu0 %4155  ;;  %5271 = vrot.lane.b32.xlu1 %v5144_v19, %s8561_s10  ;;  %vm13599_vm3 = vmand %vm2109_vm5, %vm2238_vm7  ;;  %v8179_v27 = vld [vmem:[%s391_s12] ss:$0 sps:$4 sm:$0x33]  }
 0x385   : > { %v6029_v32 = vsel %vm5472_vm1, %v5859_v43, %v5258_v25  ;;  %v4817_v5 = vrot.slane %v15632_v36, 2  ;;  %v4818_v8 = vrot.slane %v15633_v33, 3  ;;  %v4676_v29 = vsel %vm4567_vm10, %v4673_v40, %v4675_v4  ;;  %vm2753_vm6 = vmpackc.low %vm13582_vm2, %vm13582_vm2 }
 0x386   : > { %7878 = vmatprep.mubr.msk.bf16.mxu0 %vm5601_vm15, %v6029_v32  ;;  %v4945_v43 = vrot.slane %v13563_v61, 2  ;;  %v4946_v39 = vrot.slane %v13566_v15, 3  ;;  %v13595_v25 = vor.u32 %v1441_v13, %v1438_v9  ;;  %8250 = vtanh.f32 %v6719_v57  ;;  %v15638_v9 = vld [vmem:[#allocation87_spill] sm:$0xff]  ;;  %4169 = vrot.lane.b32.xlu0 %v4042_v49, %s8561_s10  ;;  %vm2754_vm11 = vmpackc.low %vm13599_vm3, %vm13599_vm3 }
 0x387   : > { %v4296_v40 = vsel %vm4177_vm14, %v13427_v14, %v13559_v18  ;;  %v3704_v19 = vor.u32 %v13448_v12, %v3700_v42  ;;  %v3708_v32 = vrot.slane %v13566_v15, 1  ;;  %v5451_v13 = vsel %vm5343_vm13, %v15531_v62, %v15638_v9  ;;  %v4482_v14 = vpop.permute.xlu1 %4481  ;;  %v6467_v11 = vpop.f32.mrf.mxu0 }
 0x388   : > { %v5516_v57 = vsel %vm5472_vm1, %v12904_v35, %v4092_v22  ;;  %v5208_v17 = vsel %vm5085_vm4, %v5205_v24, %v5207_v41  ;;  %v1851_v12 = vadd.s32 1024, %v15570_v54  ;;  %v13636_v35 = vsel %vm4567_vm10, %v4611_v26, %v4613_v51  ;;  %v5322_v49 = vpop.permute.xlu0 %5321  ;;  %4495 = vrot.lane.b32.xlu1 %v4296_v40, %s8562_s11 }
 0x389   : > { %v5666_v62 = vsel %vm5601_vm15, %v5516_v57, %v4482_v14  ;;  %v13638_v42 = vor.u32 %v4422_v46, %v4421_v53  ;;  %v13640_v22 = vor.u32 %v4818_v8, %v4817_v5  ;;  %v8245_v24 = vpop.eup %8244  ;;  %v5955_v54 = vsel %vm5343_vm13, %v4676_v29, %v5064_v3  ;;  %v6469_v29 = vpop.f32.mrf.mxu0 }
 0x38a   : > { %6562 = vmatmul.mubr.bf16.gmra.mxu0 %v5666_v62  ;;  %v13647_v9 = vor.u32 %v4946_v39, %v4945_v43  ;;  %v1443_v26 = vsel %vm868_vm0, %v13422_v28, %v13595_v25  ;;  %7050 = vst.msk [vmem:[%s12588_s16 + $0x80] sm:$0xff] %vm5343_vm13, %v8245_v24  ;;  %v6093_v53 = vsel %vm5472_vm1, %v5955_v54, %v5322_v49  ;;  %vm15639_vm5 = vsmask.f32 7424 }
 0x38b   : > { %v6468_v46 = vadd.f32 %v13167_v50, %v6467_v11  ;;  %v3709_v3 = vsel %vm15639_vm5, %v3704_v19, %v3708_v32  ;;  %v1513_v5 = vshrl.u32 %v8179_v27, 16  ;;  %5335 = vrot.lane.b32.xlu0 %v5208_v17, %s8561_s10  ;;  %7910 = vmatprep.mubr.msk.bf16.mxu1 %vm5601_vm15, %v6093_v53  ;;  %v5002_v8 = vpop.permute.xlu1 %5001  ;;  %v2882_v28 = vsel %vm2753_vm6, 65537, %v15592_v56  ;;  %v6470_v44 = vpop.f32.mrf.mxu0 }
 0x38c   : > { %v2883_v43 = vsel %vm2754_vm11, 65537, %v15592_v56  ;;  %v1516_v39 = vshll.u32 %v8179_v27, 16  ;;  %v1981_v40 = vadd.s32 %v15575_v7, %v1851_v12  ;;  %v4424_v19 = vsel %vm4177_vm14, %v13405_v31, %v13638_v42  ;;  %v4546_v62 = vpop.permute.xlu0 %4545  ;;  %3848 = vrot.lane.b32.xlu1 %v3709_v3, %s8560_s7  ;;  %v6723_v54 = vpop.f32.mrf.mxu1  ;;  %v15640_v3 = vld [vmem:[#allocation79_spill] sm:$0xff] }
 0x38d   : > { %8252 = vtanh.f32 %v6468_v46  ;;  %v4677_v16 = vrot.slane %v15547_v55, 2  ;;  %v4043_v57 = vrot.slane %v13554_v59, 1  ;;  %v8247_v14 = vpop.eup %8246  ;;  %v5580_v17 = vsel %vm5472_vm1, %v5451_v13, %v4156_v23  ;;  %v6472_v53 = vpop.f32.mrf.mxu0 }
 0x38e   : > { %v4948_v7 = vsel %vm4697_vm8, %v13513_v60, %v13647_v9  ;;  %v4820_v27 = vsel %vm4697_vm8, %v13430_v0, %v13640_v22  ;;  %vm1588_vm0 = vcmp.ge.bf16.partialorder %v1443_v26, 0  ;;  %7051 = vst.msk [vmem:[%s12588_s16 + $0x88] sm:$0xff] %vm5343_vm13, %v8247_v14  ;;  %v6471_v31 = vadd.f32 %v13167_v50, %v6470_v44  ;;  %v15647_v53 = vld [vmem:[#allocation83_spill] sm:$0xff] }
 0x38f   : > { %v5762_v23 = vsel %vm5601_vm15, %v5580_v17, %v4546_v62  ;;  %v1653_v13 = vmul.bf16 1036860877, %v1443_v26  ;;  %v7840_v12 = vcombine.low %v2882_v28, %v2883_v43  ;;  %v8249_v24 = vpop.eup %8248  ;;  %4559 = vrot.lane.b32.xlu0 %v4424_v19, %s8562_s11  ;;  %v4094_v60 = vpop.permute.xlu1 %4093  ;;  %v1515_v49 = vrot.slane %v1513_v5, 6 }
 0x390   : > { %6818 = vmatmul.mubr.bf16.gmra.mxu1 %v5762_v23  ;;  %v1518_v11 = vrot.slane %v1516_v39, 7  ;;  %vm2110_vm7 = vcmp.ge.s32.totalorder %v1981_v40, 0  ;;  %vm2239_vm2 = vcmp.lt.s32.totalorder %v1981_v40, 1200  ;;  %7114 = vst.msk [vmem:[%s12588_s16 + $0x280] sm:$0xff] %vm5343_vm13, %v8249_v24  ;;  %8254 = vtanh.f32 %v6471_v31  ;;  %v6725_v28 = vpop.f32.mrf.mxu1  ;;  %v5066_v43 = vpop.permute.xlu0 %5065  ;;  %5079 = vrot.lane.b32.xlu1 %v4948_v7, %s8560_s7 }
 0x391   : > { %v6724_v0 = vadd.f32 %v13167_v50, %v6723_v54  ;;  %v4044_v46 = vsel %vm3919_vm12, %v4041_v30, %v4043_v57  ;;  %v3979_v29 = vrot.slane %v15640_v3, 1  ;;  %v5209_v5 = vrot.slane %v13554_v59, 3  ;;  %vm13714_vm6 = vmand %vm2110_vm7, %vm2239_vm2 }
 0x392   : > { %v4425_v39 = vrot.slane %v13563_v61, 1  ;;  %v4426_v19 = vrot.slane %v13566_v15, 2  ;;  %v4297_v14 = vrot.slane %v15632_v36, 1  ;;  %v4298_v17 = vrot.slane %v15633_v33, 2  ;;  %v6726_v36 = vpop.f32.mrf.mxu1  ;;  %vm2755_vm11 = vmpackc.low %vm13714_vm6, %vm13714_vm6 }
 0x393   : > { %8256 = vtanh.f32 %v6724_v0  ;;  %v1718_v30 = vsel %vm1588_vm0, %v1443_v26, %v1653_v13  ;;  %vm13708_vm3 = vcmp.ne.s16.totalorder %v7840_v12, 0  ;;  %v8251_v7 = vpop.eup %8250  ;;  %v5862_v31 = vsel %vm5343_vm13, %v13636_v35, %v5002_v8  ;;  %5015 = vrot.lane.b32.xlu0 %v4820_v27, %s8560_s7  ;;  %v5260_v33 = vpop.permute.xlu1 %5259  ;;  %v15645_v13 = vld [vmem:[#allocation172_spill] sm:$0xff] }
 0x394   : > { %v5145_v26 = vrot.slane %v15640_v3, 3  ;;  %v1519_v23 = vor.u32 %v1518_v11, %v1515_v49  ;;  %v5389_v12 = vsel %vm5343_vm13, %v15537_v6, %v15645_v13  ;;  %7115 = vst.msk [vmem:[%s12588_s16 + $0x288] sm:$0xff] %vm5343_vm13, %v8251_v7  ;;  %v6727_v40 = vadd.f32 %v13167_v50, %v6726_v36  ;;  %v6728_v27 = vpop.f32.mrf.mxu1  ;;  %v4158_v6 = vpop.permute.xlu0 %4157  ;;  %4171 = vrot.lane.b32.xlu1 %v4044_v46, %s8561_s10  ;;  %v15646_v11 = vld [vmem:[#allocation84_spill] sm:$0xff] }
 0x395   : > { %v6031_v24 = vsel %vm5472_vm1, %v5862_v31, %v5260_v33  ;;  %v3980_v35 = vsel %vm3919_vm12, %v3977_v47, %v3979_v29  ;;  %v4678_v8 = vsel %vm4567_vm10, %v4675_v4, %v4677_v16  ;;  %v5210_v54 = vsel %vm5085_vm4, %v5207_v41, %v5209_v5  ;;  %v15650_v31 = vld [vmem:[#allocation92_spill] sm:$0xff] }
 0x396   : > { %7879 = vmatprep.mubr.msk.bf16.mxu0 %vm5601_vm15, %v6031_v24  ;;  %v13746_v49 = vor.u32 %v4426_v19, %v4425_v39  ;;  %v13750_v47 = vsel %vm13708_vm3, %v1718_v30, 0  ;;  %8258 = vtanh.f32 %v6727_v40  ;;  %v13755_v4 = vor.u32 %v4298_v17, %v4297_v14 }
 0x397   : > { %v4821_v0 = vrot.slane %v15646_v11, 2  ;;  %v4822_v46 = vrot.slane %v15647_v53, 3  ;;  %v5518_v28 = vsel %vm5472_vm1, %v5389_v12, %v4094_v60  ;;  %4107 = vrot.lane.b32.xlu0 %v3980_v35, %s8561_s10  ;;  %v4484_v41 = vpop.permute.xlu1 %4483  ;;  %v15648_v39 = vrot.slane %v15627_v2, 3 }
 0x398   : > { %v1524_v14 = vsel %vm9269_vm9, %v13595_v25, %v1519_v23  ;;  %v5669_v17 = vsel %vm5601_vm15, %v5518_v28, %v4484_v41  ;;  %v13771_v62 = vshll.u32 %v13750_v47, 16  ;;  %v13774_v60 = vshrl.u32 %v13750_v47, 16  ;;  %v5324_v13 = vpop.permute.xlu0 %5323  ;;  %5337 = vrot.lane.b32.xlu1 %v5210_v54, %s8561_s10  ;;  %v6475_v25 = vpop.f32.mrf.mxu0 }
 0x399   : > { %v5146_v19 = vsel %vm5085_vm4, %v15648_v39, %v5145_v26  ;;  %v2884_v44 = vsel %vm2755_vm11, 65537, %v15592_v56  ;;  %v5453_v36 = vsel %vm5343_vm13, %v15539_v34, %v15650_v31  ;;  %v5958_v33 = vsel %vm5343_vm13, %v4678_v8, %v5066_v43  ;;  %6570 = vmatmul.mubr.bf16.gmra.mxu0 %v5669_v17 }
 0x39a   : > { %v8253_v7 = vpop.eup %8252  ;;  %v4615_v23 = vrot.slane %v15553_v58, 2  ;;  %v4428_v12 = vsel %vm4177_vm14, %v13638_v42, %v13746_v49  ;;  %v6095_v56 = vsel %vm5472_vm1, %v5958_v33, %v5324_v13  ;;  %v6476_v40 = vadd.f32 %v13167_v50, %v6475_v25  ;;  %v6477_v35 = vpop.f32.mrf.mxu0 }
 0x39b   : > { %7052 = vst.msk [vmem:[%s12588_s16 + $0x90] sm:$0xff] %vm5343_vm13, %v8253_v7  ;;  %v4300_v34 = vsel %vm4177_vm14, %v13559_v18, %v13755_v4  ;;  %v13793_v43 = vor.u32 %v4822_v46, %v4821_v0  ;;  %5273 = vrot.lane.b32.xlu0 %v5146_v19, %s8561_s10  ;;  %7911 = vmatprep.mubr.msk.bf16.mxu1 %vm5601_vm15, %v6095_v56  ;;  %v5004_v24 = vpop.permute.xlu1 %5003  ;;  %vm1589_vm9 = vcmp.ge.bf16.partialorder %v1524_v14, 0  ;;  %v1654_v8 = vmul.bf16 1036860877, %v1524_v14  ;;  %v15651_v19 = vld [vmem:[#allocation82_spill] sm:$0xff] }
 0x39c   : > { %v3712_v42 = vor.u32 %v13563_v61, %v3708_v32  ;;  %v7841_v27 = vcombine.low %v2884_v44, %v2884_v44  ;;  %8260 = vtanh.f32 %v6476_v40  ;;  %v3716_v54 = vrot.slane %v13771_v62, 1  ;;  %v4548_v41 = vpop.permute.xlu0 %4547  ;;  %4561 = vrot.lane.b32.xlu1 %v4428_v12, %s8562_s11  ;;  %v6478_v15 = vpop.f32.mrf.mxu0 }
 0x39d   : > { %v4949_v18 = vrot.slane %v13774_v60, 2  ;;  %v4950_v0 = vrot.slane %v13771_v62, 3  ;;  %v8255_v46 = vpop.eup %8254  ;;  %v5582_v28 = vsel %vm5472_vm1, %v5453_v36, %v4158_v6  ;;  %v6479_v61 = vadd.f32 %v13167_v50, %v6478_v15  ;;  %v6731_v44 = vpop.f32.mrf.mxu1 }
 0x39e   : > { %7053 = vst.msk [vmem:[%s12588_s16 + $0x98] sm:$0xff] %vm5343_vm13, %v8255_v46  ;;  %v5765_v32 = vsel %vm5601_vm15, %v5582_v28, %v4548_v41  ;;  %v4824_v39 = vsel %vm4697_vm8, %v13640_v22, %v13793_v43  ;;  %v3981_v30 = vrot.slane %v15651_v19, 1  ;;  %v4616_v6 = vsel %vm4567_vm10, %v4613_v51, %v4615_v23  ;;  %v6480_v33 = vpop.f32.mrf.mxu0  ;;  %v15655_v28 = vld [vmem:[#allocation171_spill] sm:$0xff] }
 0x39f   : > { %4497 = vrot.lane.b32.xlu0 %v4300_v34, %s8562_s11  ;;  %6826 = vmatmul.mubr.bf16.gmra.mxu1 %v5765_v32  ;;  %v4096_v7 = vpop.permute.xlu1 %4095  ;;  %v1719_v31 = vsel %vm1589_vm9, %v1524_v14, %v1654_v8  ;;  %vm13820_vm5 = vcmp.ne.s16.totalorder %v7841_v27, 0  ;;  %8262 = vtanh.f32 %v6479_v61  ;;  %v6732_v22 = vadd.f32 %v13167_v50, %v6731_v44  ;;  %v6733_v25 = vpop.f32.mrf.mxu1 }
 0x3a0   : > { %v8257_v17 = vpop.eup %8256  ;;  %vm15654_vm0 = vsmask.f32 7424  ;;  %v13830_v13 = vor.u32 %v4950_v0, %v4949_v18  ;;  %v4679_v14 = vrot.slane %v15554_v52, 2  ;;  %v5068_v12 = vpop.permute.xlu0 %5067  ;;  %5017 = vrot.lane.b32.xlu1 %v4824_v39, %s8560_s7  ;;  %v4301_v56 = vrot.slane %v15646_v11, 1 }
 0x3a1   : > { %7116 = vst.msk [vmem:[%s12588_s16 + $0x290] sm:$0xff] %vm5343_vm13, %v8257_v17  ;;  %v3717_v51 = vsel %vm15654_vm0, %v3712_v42, %v3716_v54  ;;  %v4302_v40 = vrot.slane %v15647_v53, 2  ;;  %8264 = vtanh.f32 %v6732_v22  ;;  %v3982_v34 = vsel %vm3919_vm12, %v3979_v29, %v3981_v30  ;;  %v6734_v18 = vpop.f32.mrf.mxu1  ;;  %vm15658_vm7 = vmmov %vm15654_vm0 }
 0x3a2   : > { %v5147_v35 = vrot.slane %v15651_v19, 3  ;;  %v13844_v42 = vsel %vm13820_vm5, %v1719_v31, 0  ;;  %v5865_v27 = vsel %vm5343_vm13, %v4616_v6, %v5004_v24  ;;  %v6735_v53 = vadd.f32 %v13167_v50, %v6734_v18 }
 0x3a3   : > { %v8259_v8 = vpop.eup %8258  ;;  %3850 = vrot.lane.b32.xlu0 %v3717_v51, %s8560_s7  ;;  %v5262_v11 = vpop.permute.xlu1 %5261  ;;  %v4952_v29 = vsel %vm4697_vm8, %v13647_v9, %v13830_v13  ;;  %v4045_v46 = vrot.slane %v13750_v47, 1  ;;  %v5391_v24 = vsel %vm5343_vm13, %v15545_v1, %v15655_v28  ;;  %v13861_v61 = vor.u32 %v4302_v40, %v4301_v56 }
 0x3a4   : > { %7117 = vst.msk [vmem:[%s12588_s16 + $0x298] sm:$0xff] %vm5343_vm13, %v8259_v8  ;;  %v6033_v0 = vsel %vm5472_vm1, %v5865_v27, %v5262_v11  ;;  %v6736_v41 = vpop.f32.mrf.mxu1  ;;  %v4160_v15 = vpop.permute.xlu0 %4159  ;;  %4109 = vrot.lane.b32.xlu1 %v3982_v34, %s8561_s10  ;;  %v13864_v50 = vshll.u32 %v13844_v42, 16  ;;  %v4680_v9 = vsel %vm4567_vm10, %v4677_v16, %v4679_v14  ;;  %8266 = vtanh.f32 %v6735_v53  ;;  %v15657_v27 = vld [vmem:[#allocation64_spill] sm:$0xff] }
 0x3a5   : > { %7880 = vmatprep.mubr.msk.bf16.mxu0 %vm5601_vm15, %v6033_v0  ;;  %v5148_v1 = vsel %vm5085_vm4, %v5145_v26, %v5147_v35  ;;  %v4433_v32 = vshrl.u32 %v13844_v42, 16  ;;  %v5520_v39 = vsel %vm5472_vm1, %v5391_v24, %v4096_v7  ;;  %v5211_v6 = vrot.slane %v13750_v47, 3 }
 0x3a6   : > { %v4046_v16 = vsel %vm3919_vm12, %v4043_v57, %v4045_v46  ;;  %v4429_v26 = vrot.slane %v13774_v60, 1  ;;  %v4430_v31 = vrot.slane %v13771_v62, 2  ;;  %v5961_v7 = vsel %vm5343_vm13, %v4680_v9, %v5068_v12  ;;  %v13903_v12 = vld [vmem:[%s14650_s4] ss:$0 sm:$0xff] }
 0x3a7   : > { %5081 = vrot.lane.b32.xlu0 %v4952_v29, %s8560_s7  ;;  %v4486_v17 = vpop.permute.xlu1 %4485  ;;  %v6483_v33 = vpop.f32.mrf.mxu0  ;;  %v4304_v51 = vsel %vm4177_vm14, %v13755_v4, %v13861_v61  ;;  %v3720_v57 = vor.u32 %v13774_v60, %v3716_v54  ;;  %v3724_v25 = vrot.slane %v13864_v50, 1  ;;  %v4953_v4 = vrot.slane %v4433_v32, 2  ;;  %v15656_v60 = vld [vmem:[#allocation10_spill] sm:$0xff] }
 0x3a8   : > { %v5672_v44 = vsel %vm5601_vm15, %v5520_v39, %v4486_v17  ;;  %v5326_v22 = vpop.permute.xlu0 %5325  ;;  %5275 = vrot.lane.b32.xlu1 %v5148_v1, %s8561_s10  ;;  %v6484_v40 = vadd.f32 %v13903_v12, %v6483_v33  ;;  %v4954_v62 = vrot.slane %v13864_v50, 3  ;;  %v5455_v54 = vsel %vm5343_vm13, %v15547_v55, %v15656_v60 }
 0x3a9   : > { %v8261_v36 = vpop.eup %8260  ;;  %6578 = vmatmul.mubr.bf16.gmra.mxu0 %v5672_v44  ;;  %v6097_v56 = vsel %vm5472_vm1, %v5961_v7, %v5326_v22  ;;  %v6485_v8 = vpop.f32.mrf.mxu0  ;;  %v4617_v18 = vrot.slane %v15657_v27, 2  ;;  %v5212_v11 = vsel %vm5085_vm4, %v5209_v5, %v5211_v6  ;;  %v13920_v53 = vor.u32 %v4430_v31, %v4429_v26 }
 0x3aa   : > { %7054 = vst.msk [vmem:[%s12588_s16 + $0xa0] sm:$0xff] %vm5343_vm13, %v8261_v36  ;;  %7912 = vmatprep.mubr.msk.bf16.mxu1 %vm5601_vm15, %v6097_v56  ;;  %8268 = vtanh.f32 %v6484_v40  ;;  %v5584_v55 = vsel %vm5472_vm1, %v5455_v54, %v4160_v15  ;;  %v3725_v9 = vsel %vm15658_vm7, %v3720_v57, %v3724_v25  ;;  %v4955_v1 = vor.u32 %v4954_v62, %v4953_v4  ;;  %v15659_v40 = vld [vmem:[#allocation168_spill] sm:$0xff]  ;;  %v15660_v62 = vld [vmem:[#allocation175_spill] sm:$0xff] }
 0x3ab   : > { %4173 = vrot.lane.b32.xlu0 %v4046_v16, %s8561_s10  ;;  %v5006_v34 = vpop.permute.xlu1 %5005  ;;  %v6486_v28 = vpop.f32.mrf.mxu0  ;;  %v4618_v15 = vsel %vm4567_vm10, %v4615_v23, %v4617_v18  ;;  %v4432_v26 = vsel %vm4177_vm14, %v13746_v49, %v13920_v53  ;;  %v4681_v36 = vrot.slane %v15569_v20, 2  ;;  %v4047_v22 = vrot.slane %v13844_v42, 1 }
 0x3ac   : > { %v8263_v0 = vpop.eup %8262  ;;  %v4550_v29 = vpop.permute.xlu0 %4549  ;;  %4499 = vrot.lane.b32.xlu1 %v4304_v51, %s8562_s11  ;;  %v6487_v24 = vadd.f32 %v13903_v12, %v6486_v28  ;;  %v4956_v23 = vsel %vm4697_vm8, %v13830_v13, %v4955_v1  ;;  %v5868_v51 = vsel %vm5343_vm13, %v4618_v15, %v5006_v34  ;;  %v4828_v4 = vsel %vm4697_vm8, %v13793_v43, %v15659_v40  ;;  %v15663_v15 = vld [vmem:[#allocation9_spill] sm:$0xff] }
 0x3ad   : > { %7055 = vst.msk [vmem:[%s12588_s16 + $0xa8] sm:$0xff] %vm5343_vm13, %v8263_v0  ;;  %v5768_v41 = vsel %vm5601_vm15, %v5584_v55, %v4550_v29  ;;  %v6739_v39 = vpop.f32.mrf.mxu1  ;;  %v6488_v16 = vpop.f32.mrf.mxu0  ;;  %v5393_v13 = vsel %vm5343_vm13, %v15553_v58, %v15660_v62  ;;  %v4682_v60 = vsel %vm4567_vm10, %v4679_v14, %v4681_v36  ;;  %v4048_v43 = vsel %vm3919_vm12, %v4045_v46, %v4047_v22  ;;  %v15661_v29 = vld [vmem:[#allocation85_spill] sm:$0xff] }
 0x3ae   : > { %v8265_v5 = vpop.eup %8264  ;;  %6834 = vmatmul.mubr.bf16.gmra.mxu1 %v5768_v41  ;;  %8270 = vtanh.f32 %v6487_v24  ;;  %v6740_v44 = vadd.f32 %v13903_v12, %v6739_v39  ;;  %v5213_v58 = vrot.slane %v13844_v42, 3  ;;  %v4435_v8 = vrot.slane %v4433_v32, 1 }
 0x3af   : > { %5339 = vrot.lane.b32.xlu0 %v5212_v11, %s8561_s10  ;;  %v4098_v17 = vpop.permute.xlu1 %4097  ;;  %7118 = vst.msk [vmem:[%s12588_s16 + $0x2a0] sm:$0xff] %vm5343_vm13, %v8265_v5  ;;  %v6741_v31 = vpop.f32.mrf.mxu1  ;;  %v4436_v11 = vrot.slane %v13864_v50, 2  ;;  %v15662_v28 = vrot.slane %v15661_v29, 1  ;;  %v4619_v16 = vrot.slane %v15576_v38, 2 }
 0x3b0   : > { %v5070_v7 = vpop.permute.xlu0 %5069  ;;  %3852 = vrot.lane.b32.xlu1 %v3725_v9, %s8560_s7  ;;  %8272 = vtanh.f32 %v6740_v44  ;;  %v5522_v14 = vsel %vm5472_vm1, %v5393_v13, %v4098_v17  ;;  %v5214_v5 = vsel %vm5085_vm4, %v5211_v6, %v5213_v58  ;;  %v5457_v44 = vsel %vm5343_vm13, %v15554_v52, %v15663_v15 }
 0x3b1   : > { %v8267_v33 = vpop.eup %8266  ;;  %v6742_v57 = vpop.f32.mrf.mxu1  ;;  %v3984_v46 = vsel %vm3919_vm12, %v3981_v30, %v15662_v28  ;;  %v5964_v41 = vsel %vm5343_vm13, %v4682_v60, %v5070_v7  ;;  %v4437_v30 = vor.u32 %v4436_v11, %v4435_v8  ;;  %v4683_v60 = vrot.slane %v15586_v37, 2 }
 0x3b2   : > { %7119 = vst.msk [vmem:[%s12588_s16 + $0x2a8] sm:$0xff] %vm5343_vm13, %v8267_v33  ;;  %v6743_v49 = vadd.f32 %v13903_v12, %v6742_v57 }
 0x3b3   : > { %4563 = vrot.lane.b32.xlu0 %v4432_v26, %s8562_s11  ;;  %v5264_v25 = vpop.permute.xlu1 %5263  ;;  %v6744_v54 = vpop.f32.mrf.mxu1  ;;  %v15664_v26 = vrot.slane %v15661_v29, 3 }
 0x3b4   : > { %v6035_v56 = vsel %vm5472_vm1, %v5868_v51, %v5264_v25  ;;  %v4162_v34 = vpop.permute.xlu0 %4161  ;;  %5083 = vrot.lane.b32.xlu1 %v4956_v23, %s8560_s7  ;;  %8274 = vtanh.f32 %v6743_v49  ;;  %v4438_v51 = vsel %vm4177_vm14, %v13920_v53, %v4437_v30  ;;  %v4620_v49 = vsel %vm4567_vm10, %v4617_v18, %v4619_v16  ;;  %v15665_v53 = vld [vmem:[#allocation173_spill] sm:$0xff]  ;;  %v15667_v30 = vld [vmem:[#allocation91_spill] sm:$0xff] }
 0x3b5   : > { %7881 = vmatprep.mubr.msk.bf16.mxu0 %vm5601_vm15, %v6035_v56  ;;  %v5150_v6 = vsel %vm5085_vm4, %v5147_v35, %v15664_v26  ;;  %v5586_v7 = vsel %vm5472_vm1, %v5457_v44, %v4162_v34 }
 0x3b7   : > { %5019 = vrot.lane.b32.xlu0 %v4828_v4, %s8560_s7  ;;  %v4488_v0 = vpop.permute.xlu1 %4487  ;;  %v8269_v24 = vpop.eup %8268  ;;  %v4308_v4 = vsel %vm4177_vm14, %v13861_v61, %v15665_v53 }
 0x3b8   : > { %v5675_v55 = vsel %vm5601_vm15, %v5522_v14, %v4488_v0  ;;  %v5328_v9 = vpop.permute.xlu0 %5327  ;;  %4175 = vrot.lane.b32.xlu1 %v4048_v43, %s8561_s10  ;;  %v6491_v50 = vpop.f32.mrf.mxu0  ;;  %7056 = vst.msk [vmem:[%s12588_s16 + $0xb0] sm:$0xff] %vm5343_vm13, %v8269_v24  ;;  %v15666_v14 = vld [vmem:[#allocation174_spill] sm:$0xff] }
 0x3b9   : > { %6586 = vmatmul.mubr.bf16.gmra.mxu0 %v5675_v55  ;;  %v6099_v32 = vsel %vm5472_vm1, %v5964_v41, %v5328_v9  ;;  %v6492_v1 = vadd.f32 %v13903_v12, %v6491_v50  ;;  %v5395_v0 = vsel %vm5343_vm13, %v15657_v27, %v15666_v14  ;;  %v4684_v55 = vsel %vm4567_vm10, %v4681_v36, %v4683_v60 }
 0x3ba   : > { %7913 = vmatprep.mubr.msk.bf16.mxu1 %vm5601_vm15, %v6099_v32  ;;  %v6493_v17 = vpop.f32.mrf.mxu0 }
 0x3bb   : > { %4111 = vrot.lane.b32.xlu0 %v3984_v46, %s8561_s10  ;;  %v5008_v39 = vpop.permute.xlu1 %5007  ;;  %8276 = vtanh.f32 %v6492_v1  ;;  %v8271_v31 = vpop.eup %8270  ;;  %v4621_v17 = vrot.slane %v15595_v63, 2 }
 0x3bc   : > { %v4552_v22 = vpop.permute.xlu0 %4551  ;;  %5341 = vrot.lane.b32.xlu1 %v5214_v5, %s8561_s10  ;;  %v6494_v23 = vpop.f32.mrf.mxu0  ;;  %7057 = vst.msk [vmem:[%s12588_s16 + $0xb8] sm:$0xff] %vm5343_vm13, %v8271_v31  ;;  %v5871_v34 = vsel %vm5343_vm13, %v4620_v49, %v5008_v39  ;;  %v5459_v39 = vsel %vm5343_vm13, %v15569_v20, %v15667_v30 }
 0x3bd   : > { %v6495_v52 = vadd.f32 %v13903_v12, %v6494_v23  ;;  %v5771_v33 = vsel %vm5601_vm15, %v5586_v7, %v4552_v22  ;;  %v8273_v57 = vpop.eup %8272  ;;  %v6747_v25 = vpop.f32.mrf.mxu1  ;;  %v4622_v20 = vsel %vm4567_vm10, %v4619_v16, %v4621_v17 }
 0x3be   : > { %6842 = vmatmul.mubr.bf16.gmra.mxu1 %v5771_v33  ;;  %7120 = vst.msk [vmem:[%s12588_s16 + $0x2b0] sm:$0xff] %vm5343_vm13, %v8273_v57  ;;  %v6748_v56 = vadd.f32 %v13903_v12, %v6747_v25  ;;  %v6496_v40 = vpop.f32.mrf.mxu0 }
 0x3bf   : > { %5277 = vrot.lane.b32.xlu0 %v5150_v6, %s8561_s10  ;;  %v4100_v35 = vpop.permute.xlu1 %4099  ;;  %8278 = vtanh.f32 %v6495_v52  ;;  %v6749_v62 = vpop.f32.mrf.mxu1 }
 0x3c0   : > { %v5072_v13 = vpop.permute.xlu0 %5071  ;;  %4565 = vrot.lane.b32.xlu1 %v4438_v51, %s8562_s11  ;;  %8280 = vtanh.f32 %v6748_v56  ;;  %v5524_v28 = vsel %vm5472_vm1, %v5395_v0, %v4100_v35  ;;  %v4685_v35 = vrot.slane %v15585_v48, 2 }
 0x3c1   : > { %v8275_v54 = vpop.eup %8274  ;;  %v6750_v43 = vpop.f32.mrf.mxu1  ;;  %v5967_v9 = vsel %vm5343_vm13, %v4684_v55, %v5072_v13 }
 0x3c2   : > { %7121 = vst.msk [vmem:[%s12588_s16 + $0x2b8] sm:$0xff] %vm5343_vm13, %v8275_v54  ;;  %v6751_v58 = vadd.f32 %v13903_v12, %v6750_v43  ;;  %v15668_v54 = vld [vmem:[#allocation177_spill] sm:$0xff]  ;;  %v4686_v43 = vsel %vm4567_vm10, %v4683_v60, %v4685_v35 }
 0x3c3   : > { %4501 = vrot.lane.b32.xlu0 %v4308_v4, %s8562_s11  ;;  %v5266_v18 = vpop.permute.xlu1 %5265  ;;  %v6752_v8 = vpop.f32.mrf.mxu1  ;;  %s7170_s11 = ssub.s32 (%p8639_p5), 150, %s8654_s9 }
 0x3c4   : > { %v6037_v61 = vsel %vm5472_vm1, %v5871_v34, %v5266_v18  ;;  %v4164_v11 = vpop.permute.xlu0 %4163  ;;  %8282 = vtanh.f32 %v6751_v58  ;;  %v5397_v34 = vsel %vm5343_vm13, %v15576_v38, %v15668_v54  ;;  %p7171_p1 = scmp.lt.s32.totalorder (%p8639_p5), %s7170_s11, 128 }
 0x3c5   : > { %7882 = vmatprep.mubr.msk.bf16.mxu0 %vm5601_vm15, %v6037_v61  ;;  %v5588_v44 = vsel %vm5472_vm1, %v5459_v39, %v4164_v11  ;;  %v4687_v39 = vrot.slane %v13194_v10, 2 }
 0x3c7   : > { %v4490_v46 = vpop.permute.xlu1 %4489  ;;  %v6499_v32 = vpop.f32.mrf.mxu0 }
 0x3c8   : > { %v5678_v24 = vsel %vm5601_vm15, %v5524_v28, %v4490_v46  ;;  %v8277_v41 = vpop.eup %8276  ;;  %v5330_v50 = vpop.permute.xlu0 %5329  ;;  %v6500_v1 = vadd.f32 %v13903_v12, %v6499_v32  ;;  %v15669_v46 = vld [vmem:[#allocation90_spill] sm:$0xff] }
 0x3c9   : > { %6594 = vmatmul.mubr.bf16.gmra.mxu0 %v5678_v24  ;;  %7058 = vst.msk [vmem:[%s12588_s16 + $0xc0] sm:$0xff] %vm5343_vm13, %v8277_v41  ;;  %v6101_v27 = vsel %vm5472_vm1, %v5967_v9, %v5330_v50  ;;  %v6501_v5 = vpop.f32.mrf.mxu0  ;;  %v5461_v24 = vsel %vm5343_vm13, %v15586_v37, %v15669_v46 }
 0x3ca   : > { %7914 = vmatprep.mubr.msk.bf16.mxu1 %vm5601_vm15, %v6101_v27  ;;  %8284 = vtanh.f32 %v6500_v1 }
 0x3cb   : > { %v5010_v36 = vpop.permute.xlu1 %5009  ;;  %v6502_v6 = vpop.f32.mrf.mxu0 }
 0x3cc   : > { %v8279_v15 = vpop.eup %8278  ;;  %v4554_v26 = vpop.permute.xlu0 %4553  ;;  %v6503_v31 = vadd.f32 %v13903_v12, %v6502_v6  ;;  %v5874_v56 = vsel %vm5343_vm13, %v4622_v20, %v5010_v36  ;;  %v4623_v6 = vrot.slane %v15612_v45, 2 }
 0x3cd   : > { %7059 = vst.msk [vmem:[%s12588_s16 + $0xc8] sm:$0xff] %vm5343_vm13, %v8279_v15  ;;  %v5774_v7 = vsel %vm5601_vm15, %v5588_v44, %v4554_v26  ;;  %v8281_v22 = vpop.eup %8280  ;;  %v6755_v23 = vpop.f32.mrf.mxu1 }
 0x3ce   : > { %6850 = vmatmul.mubr.bf16.gmra.mxu1 %v5774_v7  ;;  %7122 = vst.msk [vmem:[%s12588_s16 + $0x2c0] sm:$0xff] %vm5343_vm13, %v8281_v22  ;;  %8286 = vtanh.f32 %v6503_v31  ;;  %v6756_v33 = vadd.f32 %v13903_v12, %v6755_v23  ;;  %v6504_v51 = vpop.f32.mrf.mxu0  ;;  %v4688_v23 = vsel %vm4567_vm10, %v4685_v35, %v4687_v39 }
 0x3cf   : > { %v4102_v52 = vpop.permute.xlu1 %4101  ;;  %v6757_v57 = vpop.f32.mrf.mxu1  ;;  %v4624_v51 = vsel %vm4567_vm10, %v4621_v17, %v4623_v6 }
 0x3d0   : > { %v5074_v25 = vpop.permute.xlu0 %5073  ;;  %8288 = vtanh.f32 %v6756_v33  ;;  %v5526_v18 = vsel %vm5472_vm1, %v5397_v34, %v4102_v52  ;;  %v15670_v34 = vld [vmem:[#allocation176_spill] sm:$0xff] }
 0x3d1   : > { %v8283_v49 = vpop.eup %8282  ;;  %v6758_v40 = vpop.f32.mrf.mxu1  ;;  %v5970_v11 = vsel %vm5343_vm13, %v4686_v43, %v5074_v25  ;;  %v5399_v43 = vsel %vm5343_vm13, %v15595_v63, %v15670_v34 }
 0x3d2   : > { %7123 = vst.msk [vmem:[%s12588_s16 + $0x2c8] sm:$0xff] %vm5343_vm13, %v8283_v49  ;;  %v6759_v4 = vadd.f32 %v13903_v12, %v6758_v40 }
 0x3d3   : > { %v5268_v53 = vpop.permute.xlu1 %5267  ;;  %v6760_v62 = vpop.f32.mrf.mxu1 }
 0x3d4   : > { %v6039_v16 = vsel %vm5472_vm1, %v5874_v56, %v5268_v53  ;;  %v4166_v13 = vpop.permute.xlu0 %4165  ;;  %8290 = vtanh.f32 %v6759_v4 }
 0x3d5   : > { %7883 = vmatprep.mubr.msk.bf16.mxu0 %vm5601_vm15, %v6039_v16  ;;  %v5590_v9 = vsel %vm5472_vm1, %v5461_v24, %v4166_v13 }
 0x3d7   : > { %v4492_v58 = vpop.permute.xlu1 %4491  ;;  %v8285_v8 = vpop.eup %8284 }
 0x3d8   : > { %v5681_v61 = vsel %vm5601_vm15, %v5526_v18, %v4492_v58  ;;  %v5332_v14 = vpop.permute.xlu0 %5331  ;;  %v6507_v0 = vpop.f32.mrf.mxu0  ;;  %7060 = vst.msk [vmem:[%s12588_s16 + $0xd0] sm:$0xff] %vm5343_vm13, %v8285_v8 }
 0x3d9   : > { %6602 = vmatmul.mubr.bf16.gmra.mxu0 %v5681_v61  ;;  %v6103_v38 = vsel %vm5472_vm1, %v5970_v11, %v5332_v14  ;;  %v6508_v55 = vadd.f32 %v13903_v12, %v6507_v0 }
 0x3da   : > { %7915 = vmatprep.mubr.msk.bf16.mxu1 %vm5601_vm15, %v6103_v38  ;;  %v6509_v28 = vpop.f32.mrf.mxu0 }
 0x3db   : > { %v3845_v60 = vpop.permute.xlu1 %3844  ;;  %8292 = vtanh.f32 %v6508_v55  ;;  %v8287_v41 = vpop.eup %8286 }
 0x3dc   : > { %v4556_v50 = vpop.permute.xlu0 %4555  ;;  %v6510_v32 = vpop.f32.mrf.mxu0  ;;  %7061 = vst.msk [vmem:[%s12588_s16 + $0xd8] sm:$0xff] %vm5343_vm13, %v8287_v41  ;;  %v5463_v35 = vsel %vm5343_vm13, %v15585_v48, %v3845_v60  ;;  %v4625_v60 = vrot.slane %v15627_v2, 2 }
 0x3dd   : > { %v6511_v27 = vadd.f32 %v13903_v12, %v6510_v32  ;;  %v5777_v1 = vsel %vm5601_vm15, %v5590_v9, %v4556_v50  ;;  %v8289_v36 = vpop.eup %8288  ;;  %v6763_v5 = vpop.f32.mrf.mxu1 }
 0x3de   : > { %6858 = vmatmul.mubr.bf16.gmra.mxu1 %v5777_v1  ;;  %7124 = vst.msk [vmem:[%s12588_s16 + $0x2d0] sm:$0xff] %vm5343_vm13, %v8289_v36  ;;  %v6764_v37 = vadd.f32 %v13903_v12, %v6763_v5  ;;  %v6512_v15 = vpop.f32.mrf.mxu0  ;;  %v4626_v32 = vsel %vm4567_vm10, %v4623_v6, %v4625_v60  ;;  %v4689_v5 = vrot.slane %v13372_v21, 2 }
 0x3df   : > { %v5076_v30 = vpop.permute.xlu1 %5075  ;;  %8294 = vtanh.f32 %v6511_v27  ;;  %v6765_v44 = vpop.f32.mrf.mxu1 }
 0x3e0   : > { %v5012_v26 = vpop.permute.xlu0 %5011  ;;  %8296 = vtanh.f32 %v6764_v37  ;;  %v5973_v57 = vsel %vm5343_vm13, %v4688_v23, %v5076_v30 }
 0x3e1   : > { %v8291_v31 = vpop.eup %8290  ;;  %v6766_v7 = vpop.f32.mrf.mxu1  ;;  %v5877_v40 = vsel %vm5343_vm13, %v4624_v51, %v5012_v26 }
 0x3e2   : > { %7125 = vst.msk [vmem:[%s12588_s16 + $0x2d8] sm:$0xff] %vm5343_vm13, %v8291_v31  ;;  %v6767_v52 = vadd.f32 %v13903_v12, %v6766_v7  ;;  %v15671_v7 = vld [vmem:[#allocation179_spill] sm:$0xff] }
 0x3e3   : > { %v4168_v22 = vpop.permute.xlu1 %4167  ;;  %v6768_v20 = vpop.f32.mrf.mxu1  ;;  %v5401_v6 = vsel %vm5343_vm13, %v15612_v45, %v15671_v7 }
 0x3e4   : > { %v4104_v33 = vpop.permute.xlu0 %4103  ;;  %8298 = vtanh.f32 %v6767_v52  ;;  %v5592_v62 = vsel %vm5472_vm1, %v5463_v35, %v4168_v22  ;;  %v4690_v22 = vsel %vm4567_vm10, %v4687_v39, %v4689_v5 }
 0x3e5   : > { %v5528_v48 = vsel %vm5472_vm1, %v5399_v43, %v4104_v33 }
 0x3e7   : > { %v5334_v25 = vpop.permute.xlu1 %5333  ;;  %v6515_v4 = vpop.f32.mrf.mxu0 }
 0x3e8   : > { %v6105_v49 = vsel %vm5472_vm1, %v5973_v57, %v5334_v25  ;;  %v8293_v56 = vpop.eup %8292  ;;  %v5270_v53 = vpop.permute.xlu0 %5269  ;;  %v6516_v16 = vadd.f32 %v13903_v12, %v6515_v4 }
 0x3e9   : > { %7916 = vmatprep.mubr.msk.bf16.mxu1 %vm5601_vm15, %v6105_v49  ;;  %7062 = vst.msk [vmem:[%s12588_s16 + $0xe0] sm:$0xff] %vm5343_vm13, %v8293_v56  ;;  %v6041_v17 = vsel %vm5472_vm1, %v5877_v40, %v5270_v53  ;;  %v6517_v54 = vpop.f32.mrf.mxu0 }
 0x3ea   : > { %7884 = vmatprep.mubr.msk.bf16.mxu0 %vm5601_vm15, %v6041_v17  ;;  %8300 = vtanh.f32 %v6516_v16 }
 0x3eb   : > { %v4558_v13 = vpop.permute.xlu1 %4557  ;;  %v6518_v8 = vpop.f32.mrf.mxu0 }
 0x3ec   : > { %v5780_v18 = vsel %vm5601_vm15, %v5592_v62, %v4558_v13  ;;  %v8295_v58 = vpop.eup %8294  ;;  %v4494_v61 = vpop.permute.xlu0 %4493  ;;  %v6519_v11 = vadd.f32 %v13903_v12, %v6518_v8 }
 0x3ed   : > { %6866 = vmatmul.mubr.bf16.gmra.mxu1 %v5780_v18  ;;  %7063 = vst.msk [vmem:[%s12588_s16 + $0xe8] sm:$0xff] %vm5343_vm13, %v8295_v58  ;;  %v5684_v14 = vsel %vm5601_vm15, %v5528_v48, %v4494_v61  ;;  %v8297_v0 = vpop.eup %8296  ;;  %v6771_v38 = vpop.f32.mrf.mxu1  ;;  %v4691_v48 = vrot.slane %v13554_v59, 2 }
 0x3ee   : > { %6610 = vmatmul.mubr.bf16.gmra.mxu0 %v5684_v14  ;;  %7126 = vst.msk [vmem:[%s12588_s16 + $0x2e0] sm:$0xff] %vm5343_vm13, %v8297_v0  ;;  %8302 = vtanh.f32 %v6519_v11  ;;  %v6772_v55 = vadd.f32 %v13903_v12, %v6771_v38  ;;  %v6520_v28 = vpop.f32.mrf.mxu0  ;;  %v4627_v11 = vrot.slane %v15640_v3, 2 }
 0x3ef   : > { %v5014_v63 = vpop.permute.xlu1 %5013  ;;  %v6773_v46 = vpop.f32.mrf.mxu1  ;;  %v4692_v0 = vsel %vm4567_vm10, %v4689_v5, %v4691_v48 }
 0x3f0   : > { %v3847_v24 = vpop.permute.xlu0 %3846  ;;  %8304 = vtanh.f32 %v6772_v55  ;;  %v5880_v30 = vsel %vm5343_vm13, %v4626_v32, %v5014_v63  ;;  %v4628_v28 = vsel %vm4567_vm10, %v4625_v60, %v4627_v11 }
 0x3f1   : > { %v8299_v41 = vpop.eup %8298  ;;  %v6774_v9 = vpop.f32.mrf.mxu1  ;;  %v5465_v35 = vsel %vm5343_vm13, %v13194_v10, %v3847_v24 }
 0x3f2   : > { %7127 = vst.msk [vmem:[%s12588_s16 + $0x2e8] sm:$0xff] %vm5343_vm13, %v8299_v41  ;;  %v6775_v27 = vadd.f32 %v13903_v12, %v6774_v9 }
 0x3f3   : > { %v4106_v50 = vpop.permute.xlu1 %4105  ;;  %v6776_v1 = vpop.f32.mrf.mxu1 }
 0x3f4   : > { %v5078_v36 = vpop.permute.xlu0 %5077  ;;  %8306 = vtanh.f32 %v6775_v27  ;;  %v5530_v52 = vsel %vm5472_vm1, %v5401_v6, %v4106_v50 }
 0x3f5   : > { %v5976_v25 = vsel %vm5343_vm13, %v4690_v22, %v5078_v36 }
 0x3f7   : > { %v5272_v37 = vpop.permute.xlu1 %5271  ;;  %v8301_v44 = vpop.eup %8300 }
 0x3f8   : > { %v6043_v15 = vsel %vm5472_vm1, %v5880_v30, %v5272_v37  ;;  %v4170_v26 = vpop.permute.xlu0 %4169  ;;  %v6523_v31 = vpop.f32.mrf.mxu0  ;;  %7064 = vst.msk [vmem:[%s12588_s16 + $0xf0] sm:$0xff] %vm5343_vm13, %v8301_v44 }
 0x3f9   : > { %7885 = vmatprep.mubr.msk.bf16.mxu0 %vm5601_vm15, %v6043_v15  ;;  %v6524_v23 = vadd.f32 %v13903_v12, %v6523_v31  ;;  %v5594_v62 = vsel %vm5472_vm1, %v5465_v35, %v4170_v26  ;;  %v15672_v31 = vld [vmem:[#allocation178_spill] sm:$0xff] }
 0x3fa   : > { %v6525_v33 = vpop.f32.mrf.mxu0  ;;  %v5403_v7 = vsel %vm5343_vm13, %v15627_v2, %v15672_v31 }
 0x3fb   : > { %v4496_v20 = vpop.permute.xlu1 %4495  ;;  %8308 = vtanh.f32 %v6524_v23  ;;  %v8303_v57 = vpop.eup %8302 }
 0x3fc   : > { %v5687_v51 = vsel %vm5601_vm15, %v5530_v52, %v4496_v20  ;;  %v6526_v49 = vpop.f32.mrf.mxu0  ;;  %7065 = vst.msk [vmem:[%s12588_s16 + $0xf8] sm:$0xff] %vm5343_vm13, %v8303_v57  ;;  %v6779_v53 = vpop.f32.mrf.mxu1 }
 0x3fd   : > { %v5336_v45 = vpop.permute.xlu0 %5335  ;;  %6618 = vmatmul.mubr.bf16.gmra.mxu0 %v5687_v51  ;;  %v6527_v56 = vadd.f32 %v13903_v12, %v6526_v49  ;;  %v8305_v40 = vpop.eup %8304  ;;  %v6780_v17 = vadd.f32 %v13903_v12, %v6779_v53 }
 0x3fe   : > { %v6107_v39 = vsel %vm5472_vm1, %v5976_v25, %v5336_v45  ;;  %7128 = vst.msk [vmem:[%s12588_s16 + $0x2f0] sm:$0xff] %vm5343_vm13, %v8305_v40  ;;  %v6528_v16 = vpop.f32.mrf.mxu0  ;;  %v6781_v13 = vpop.f32.mrf.mxu1  ;;  %v4629_v45 = vrot.slane %v15651_v19, 2 }
 0x3ff   : > { %7917 = vmatprep.mubr.msk.bf16.mxu1 %vm5601_vm15, %v6107_v39  ;;  %v3849_v4 = vpop.permute.xlu1 %3848  ;;  %8310 = vtanh.f32 %v6527_v56 }
 0x400   : > { %8312 = vtanh.f32 %v6780_v17  ;;  %v6782_v18 = vpop.f32.mrf.mxu1  ;;  %v5467_v60 = vsel %vm5343_vm13, %v13372_v21, %v3849_v4  ;;  %v4630_v40 = vsel %vm4567_vm10, %v4627_v11, %v4629_v45  ;;  %v4693_v17 = vrot.slane %v13750_v47, 2 }
 0x401   : > { %v4560_v54 = vpop.permute.xlu0 %4559  ;;  %v8307_v43 = vpop.eup %8306  ;;  %v6783_v10 = vadd.f32 %v13903_v12, %v6782_v18 }
 0x402   : > { %v5783_v34 = vsel %vm5601_vm15, %v5594_v62, %v4560_v54  ;;  %7129 = vst.msk [vmem:[%s12588_s16 + $0x2f8] sm:$0xff] %vm5343_vm13, %v8307_v43  ;;  %v6784_v61 = vpop.f32.mrf.mxu1 }
 0x403   : > { %6874 = vmatmul.mubr.bf16.gmra.mxu1 %v5783_v34  ;;  %v5080_v58 = vpop.permute.xlu1 %5079  ;;  %8314 = vtanh.f32 %v6783_v10  ;;  %v15673_v10 = vld [vmem:[#allocation181_spill] sm:$0xff] }
 0x404   : > { %v5979_v24 = vsel %vm5343_vm13, %v4692_v0, %v5080_v58  ;;  %v5405_v61 = vsel %vm5343_vm13, %v15640_v3, %v15673_v10 }
 0x405   : > { %v5016_v8 = vpop.permute.xlu0 %5015 }
 0x406   : > { %v5883_v27 = vsel %vm5343_vm13, %v4628_v28, %v5016_v8  ;;  %v4694_v8 = vsel %vm4567_vm10, %v4691_v48, %v4693_v17 }
 0x407   : > { %v4172_v14 = vpop.permute.xlu1 %4171  ;;  %v6531_v55 = vpop.f32.mrf.mxu0 }
 0x408   : > { %v8309_v38 = vpop.eup %8308  ;;  %v6532_v46 = vadd.f32 %v13903_v12, %v6531_v55  ;;  %v5596_v15 = vsel %vm5472_vm1, %v5467_v60, %v4172_v14 }
 0x409   : > { %v4108_v63 = vpop.permute.xlu0 %4107  ;;  %7066 = vst.msk [vmem:[%s12588_s16 + $0x100] sm:$0xff] %vm5343_vm13, %v8309_v38  ;;  %v6533_v9 = vpop.f32.mrf.mxu0 }
 0x40a   : > { %8316 = vtanh.f32 %v6532_v46  ;;  %v5532_v23 = vsel %vm5472_vm1, %v5403_v7, %v4108_v63 }
 0x40b   : > { %v5338_v41 = vpop.permute.xlu1 %5337  ;;  %v6534_v36 = vpop.f32.mrf.mxu0 }
 0x40c   : > { %v6109_v50 = vsel %vm5472_vm1, %v5979_v24, %v5338_v41  ;;  %v8311_v32 = vpop.eup %8310  ;;  %v6535_v30 = vadd.f32 %v13903_v12, %v6534_v36  ;;  %v6787_v44 = vpop.f32.mrf.mxu1 }
 0x40d   : > { %v5274_v1 = vpop.permute.xlu0 %5273  ;;  %7918 = vmatprep.mubr.msk.bf16.mxu1 %vm5601_vm15, %v6109_v50  ;;  %7067 = vst.msk [vmem:[%s12588_s16 + $0x108] sm:$0xff] %vm5343_vm13, %v8311_v32  ;;  %v8313_v37 = vpop.eup %8312  ;;  %v6788_v21 = vadd.f32 %v13903_v12, %v6787_v44 }
 0x40e   : > { %v6045_v5 = vsel %vm5472_vm1, %v5883_v27, %v5274_v1  ;;  %7130 = vst.msk [vmem:[%s12588_s16 + $0x300] sm:$0xff] %vm5343_vm13, %v8313_v37  ;;  %8318 = vtanh.f32 %v6535_v30  ;;  %v6536_v22 = vpop.f32.mrf.mxu0  ;;  %v6789_v52 = vpop.f32.mrf.mxu1 }
 0x40f   : > { %7886 = vmatprep.mubr.msk.bf16.mxu0 %vm5601_vm15, %v6045_v5  ;;  %v4562_v26 = vpop.permute.xlu1 %4561  ;;  %8320 = vtanh.f32 %v6788_v21 }
 0x410   : > { %v5786_v6 = vsel %vm5601_vm15, %v5596_v15, %v4562_v26  ;;  %v8315_v51 = vpop.eup %8314  ;;  %v6790_v2 = vpop.f32.mrf.mxu1  ;;  %v4695_v15 = vrot.slane %v13844_v42, 2  ;;  %v15674_v42 = vrot.slane %v15661_v29, 2 }
 0x411   : > { %v4498_v20 = vpop.permute.xlu0 %4497  ;;  %6882 = vmatmul.mubr.bf16.gmra.mxu1 %v5786_v6  ;;  %7131 = vst.msk [vmem:[%s12588_s16 + $0x308] sm:$0xff] %vm5343_vm13, %v8315_v51  ;;  %v6791_v25 = vadd.f32 %v13903_v12, %v6790_v2 }
 0x412   : > { %v5690_v33 = vsel %vm5601_vm15, %v5532_v23, %v4498_v20  ;;  %v6792_v49 = vpop.f32.mrf.mxu1  ;;  %v4696_v6 = vsel %vm4567_vm10, %v4693_v17, %v4695_v15  ;;  %v4632_v20 = vsel %vm4567_vm10, %v4629_v45, %v15674_v42 }
 0x413   : > { %6626 = vmatmul.mubr.bf16.gmra.mxu0 %v5690_v33  ;;  %v5018_v57 = vpop.permute.xlu1 %5017  ;;  %8322 = vtanh.f32 %v6791_v25 }
 0x414   : > { %v5886_v62 = vsel %vm5343_vm13, %v4630_v40, %v5018_v57 }
 0x415   : > { %v3851_v39 = vpop.permute.xlu0 %3850 }
 0x416   : > { %v5469_v27 = vsel %vm5343_vm13, %v13554_v59, %v3851_v39 }
 0x417   : > { %v4110_v56 = vpop.permute.xlu1 %4109  ;;  %v8317_v53 = vpop.eup %8316 }
 0x418   : > { %v6539_v35 = vpop.f32.mrf.mxu0  ;;  %7068 = vst.msk [vmem:[%s12588_s16 + $0x110] sm:$0xff] %vm5343_vm13, %v8317_v53  ;;  %v5534_v0 = vsel %vm5472_vm1, %v5405_v61, %v4110_v56 }
 0x419   : > { %v5082_v4 = vpop.permute.xlu0 %5081  ;;  %v6540_v16 = vadd.f32 %v13903_v12, %v6539_v35 }
 0x41a   : > { %v6541_v54 = vpop.f32.mrf.mxu0  ;;  %v5982_v46 = vsel %vm5343_vm13, %v4694_v8, %v5082_v4 }
 0x41b   : > { %v5276_v13 = vpop.permute.xlu1 %5275  ;;  %8324 = vtanh.f32 %v6540_v16  ;;  %v8319_v43 = vpop.eup %8318 }
 0x41c   : > { %v6047_v34 = vsel %vm5472_vm1, %v5886_v62, %v5276_v13  ;;  %v6542_v58 = vpop.f32.mrf.mxu0  ;;  %7069 = vst.msk [vmem:[%s12588_s16 + $0x118] sm:$0xff] %vm5343_vm13, %v8319_v43  ;;  %v8321_v14 = vpop.eup %8320  ;;  %v15675_v13 = vld [vmem:[#allocation180_spill] sm:$0xff] }
 0x41d   : > { %v4174_v18 = vpop.permute.xlu0 %4173  ;;  %7887 = vmatprep.mubr.msk.bf16.mxu0 %vm5601_vm15, %v6047_v34  ;;  %v6543_v11 = vadd.f32 %v13903_v12, %v6542_v58  ;;  %v6795_v38 = vpop.f32.mrf.mxu1  ;;  %7132 = vst.msk [vmem:[%s12588_s16 + $0x310] sm:$0xff] %vm5343_vm13, %v8321_v14  ;;  %v5407_v54 = vsel %vm5343_vm13, %v15651_v19, %v15675_v13 }
 0x41e   : > { %v6796_v55 = vadd.f32 %v13903_v12, %v6795_v38  ;;  %v6544_v28 = vpop.f32.mrf.mxu0  ;;  %v5598_v36 = vsel %vm5472_vm1, %v5469_v27, %v4174_v18 }
 0x41f   : > { %v4500_v63 = vpop.permute.xlu1 %4499  ;;  %8326 = vtanh.f32 %v6543_v11  ;;  %v6797_v24 = vpop.f32.mrf.mxu1 }
 0x420   : > { %v5693_v3 = vsel %vm5601_vm15, %v5534_v0, %v4500_v63  ;;  %8328 = vtanh.f32 %v6796_v55  ;;  %v8323_v9 = vpop.eup %8322 }
 0x421   : > { %v5340_v48 = vpop.permute.xlu0 %5339  ;;  %6634 = vmatmul.mubr.bf16.gmra.mxu0 %v5693_v3  ;;  %v6798_v50 = vpop.f32.mrf.mxu1  ;;  %7133 = vst.msk [vmem:[%s12588_s16 + $0x318] sm:$0xff] %vm5343_vm13, %v8323_v9 }
 0x422   : > { %v6111_v41 = vsel %vm5472_vm1, %v5982_v46, %v5340_v48  ;;  %v6799_v1 = vadd.f32 %v13903_v12, %v6798_v50 }
 0x423   : > { %7919 = vmatprep.mubr.msk.bf16.mxu1 %vm5601_vm15, %v6111_v41  ;;  %v3853_v32 = vpop.permute.xlu1 %3852  ;;  %v6800_v60 = vpop.f32.mrf.mxu1 }
 0x424   : > { %8330 = vtanh.f32 %v6799_v1  ;;  %v5471_v53 = vsel %vm5343_vm13, %v13750_v47, %v3853_v32 }
 0x425   : > { %v4564_v5 = vpop.permute.xlu0 %4563 }
 0x426   : > { %v5789_v30 = vsel %vm5601_vm15, %v5598_v36, %v4564_v5 }
 0x427   : > { %6890 = vmatmul.mubr.bf16.gmra.mxu1 %v5789_v30  ;;  %v5084_v37 = vpop.permute.xlu1 %5083 }
 0x428   : > { %v8325_v44 = vpop.eup %8324  ;;  %v6547_v31 = vpop.f32.mrf.mxu0  ;;  %v5985_v2 = vsel %vm5343_vm13, %v4696_v6, %v5084_v37 }
 0x429   : > { %v5020_v26 = vpop.permute.xlu0 %5019  ;;  %7070 = vst.msk [vmem:[%s12588_s16 + $0x120] sm:$0xff] %vm5343_vm13, %v8325_v44  ;;  %v6548_v59 = vadd.f32 %v13903_v12, %v6547_v31 }
 0x42a   : > { %v6549_v21 = vpop.f32.mrf.mxu0  ;;  %v5889_v56 = vsel %vm5343_vm13, %v4632_v20, %v5020_v26 }
 0x42b   : > { %v4176_v7 = vpop.permute.xlu1 %4175  ;;  %8332 = vtanh.f32 %v6548_v59 }
 0x42c   : > { %v8327_v22 = vpop.eup %8326  ;;  %v6550_v52 = vpop.f32.mrf.mxu0  ;;  %v5600_v17 = vsel %vm5472_vm1, %v5471_v53, %v4176_v7 }
 0x42d   : > { %v4112_v23 = vpop.permute.xlu0 %4111  ;;  %7071 = vst.msk [vmem:[%s12588_s16 + $0x128] sm:$0xff] %vm5343_vm13, %v8327_v22  ;;  %v6551_v33 = vadd.f32 %v13903_v12, %v6550_v52  ;;  %v8329_v51 = vpop.eup %8328 }
 0x42e   : > { %v6803_v57 = vpop.f32.mrf.mxu1  ;;  %7134 = vst.msk [vmem:[%s12588_s16 + $0x320] sm:$0xff] %vm5343_vm13, %v8329_v51  ;;  %v6552_v29 = vpop.f32.mrf.mxu0  ;;  %v5536_v43 = vsel %vm5472_vm1, %v5407_v54, %v4112_v23  ;;  %v14300_v23 = vld [vmem:[%s14650_s4] ss:$0 sm:$0xff] }
 0x42f   : > { %v5342_v25 = vpop.permute.xlu1 %5341  ;;  %8334 = vtanh.f32 %v6551_v33  ;;  %v6804_v49 = vadd.f32 %v13903_v12, %v6803_v57 }
 0x430   : > { %v6113_v39 = vsel %vm5472_vm1, %v5985_v2, %v5342_v25  ;;  %v6805_v40 = vpop.f32.mrf.mxu1 }
 0x431   : > { %v5278_v45 = vpop.permute.xlu0 %5277  ;;  %7920 = vmatprep.mubr.msk.bf16.mxu1 %vm5601_vm15, %v6113_v39  ;;  %8336 = vtanh.f32 %v6804_v49  ;;  %v8331_v35 = vpop.eup %8330 }
 0x432   : > { %v6049_v4 = vsel %vm5472_vm1, %v5889_v56, %v5278_v45  ;;  %v6806_v16 = vpop.f32.mrf.mxu1  ;;  %7135 = vst.msk [vmem:[%s12588_s16 + $0x328] sm:$0xff] %vm5343_vm13, %v8331_v35 }
 0x433   : > { %7888 = vmatprep.mubr.msk.bf16.mxu0 %vm5601_vm15, %v6049_v4  ;;  %v4566_v62 = vpop.permute.xlu1 %4565  ;;  %v6807_v34 = vadd.f32 %v13903_v12, %v6806_v16 }
 0x434   : > { %v5792_v47 = vsel %vm5601_vm15, %v5600_v17, %v4566_v62  ;;  %v6808_v18 = vpop.f32.mrf.mxu1 }
 0x435   : > { %v4502_v58 = vpop.permute.xlu0 %4501  ;;  %6898 = vmatmul.mubr.bf16.gmra.mxu1 %v5792_v47  ;;  %8338 = vtanh.f32 %v6807_v34 }
 0x436   : > { %v5696_v10 = vsel %vm5601_vm15, %v5536_v43, %v4502_v58 }
 0x437   : > { %6642 = vmatmul.mubr.bf16.gmra.mxu0 %v5696_v10 }
 0x438   : > { %v8333_v61 = vpop.eup %8332 }
 0x439   : > { %v6555_v8 = vpop.f32.mrf.mxu0  ;;  %7072 = vst.msk [vmem:[%s12588_s16 + $0x130] sm:$0xff] %vm5343_vm13, %v8333_v61 }
 0x43a   : > { %v6556_v19 = vadd.f32 %v13903_v12, %v6555_v8 }
 0x43b   : > { %v6557_v11 = vpop.f32.mrf.mxu0 }
 0x43c   : > { %8340 = vtanh.f32 %v6556_v19  ;;  %v8335_v14 = vpop.eup %8334 }
 0x43d   : > { %v6558_v0 = vpop.f32.mrf.mxu0  ;;  %7073 = vst.msk [vmem:[%s12588_s16 + $0x138] sm:$0xff] %vm5343_vm13, %v8335_v14 }
 0x43e   : > { %v6559_v38 = vadd.f32 %v13903_v12, %v6558_v0  ;;  %v8337_v63 = vpop.eup %8336 }
 0x43f   : > { %v6811_v55 = vpop.f32.mrf.mxu1  ;;  %v6560_v3 = vpop.f32.mrf.mxu0  ;;  %7136 = vst.msk [vmem:[%s12588_s16 + $0x330] sm:$0xff] %vm5343_vm13, %v8337_v63 }
 0x440   : > { %8342 = vtanh.f32 %v6559_v38  ;;  %v6812_v28 = vadd.f32 %v13903_v12, %v6811_v55 }
 0x441   : > { %v6813_v46 = vpop.f32.mrf.mxu1 }
 0x442   : > { %8344 = vtanh.f32 %v6812_v28  ;;  %v8339_v24 = vpop.eup %8338 }
 0x443   : > { %v6814_v48 = vpop.f32.mrf.mxu1  ;;  %7137 = vst.msk [vmem:[%s12588_s16 + $0x338] sm:$0xff] %vm5343_vm13, %v8339_v24 }
 0x444   : > { %v6815_v41 = vadd.f32 %v13903_v12, %v6814_v48 }
 0x445   : > { %v6816_v9 = vpop.f32.mrf.mxu1 }
 0x446   : > { %8346 = vtanh.f32 %v6815_v41 }
 0x449   : > { %v8341_v50 = vpop.eup %8340 }
 0x44a   : > { %v6563_v32 = vpop.f32.mrf.mxu0  ;;  %7074 = vst.msk [vmem:[%s12588_s16 + $0x140] sm:$0xff] %vm5343_vm13, %v8341_v50 }
 0x44b   : > { %v6564_v27 = vadd.f32 %v13903_v12, %v6563_v32 }
 0x44c   : > { %v6565_v1 = vpop.f32.mrf.mxu0 }
 0x44d   : > { %8348 = vtanh.f32 %v6564_v27  ;;  %v8343_v36 = vpop.eup %8342 }
 0x44e   : > { %v6566_v60 = vpop.f32.mrf.mxu0  ;;  %7075 = vst.msk [vmem:[%s12588_s16 + $0x148] sm:$0xff] %vm5343_vm13, %v8343_v36 }
 0x44f   : > { %v6567_v5 = vadd.f32 %v13903_v12, %v6566_v60  ;;  %v8345_v30 = vpop.eup %8344 }
 0x450   : > { %v6819_v37 = vpop.f32.mrf.mxu1  ;;  %v6568_v15 = vpop.f32.mrf.mxu0  ;;  %7138 = vst.msk [vmem:[%s12588_s16 + $0x340] sm:$0xff] %vm5343_vm13, %v8345_v30 }
 0x451   : > { %8350 = vtanh.f32 %v6567_v5  ;;  %v6820_v44 = vadd.f32 %v13903_v12, %v6819_v37 }
 0x452   : > { %v6821_v26 = vpop.f32.mrf.mxu1 }
 0x453   : > { %8352 = vtanh.f32 %v6820_v44  ;;  %v8347_v31 = vpop.eup %8346 }
 0x454   : > { %v6822_v59 = vpop.f32.mrf.mxu1  ;;  %7139 = vst.msk [vmem:[%s12588_s16 + $0x348] sm:$0xff] %vm5343_vm13, %v8347_v31 }
 0x455   : > { %v6823_v7 = vadd.f32 %v13903_v12, %v6822_v59 }
 0x456   : > { %v6824_v21 = vpop.f32.mrf.mxu1 }
 0x457   : > { %8354 = vtanh.f32 %v6823_v7 }
 0x459   : > { %v6571_v22 = vpop.f32.mrf.mxu0 }
 0x45a   : > { %v8349_v6 = vpop.eup %8348  ;;  %v6572_v52 = vadd.f32 %v14300_v23, %v6571_v22 }
 0x45b   : > { %7076 = vst.msk [vmem:[%s12588_s16 + $0x150] sm:$0xff] %vm5343_vm13, %v8349_v6  ;;  %v6573_v42 = vpop.f32.mrf.mxu0 }
 0x45c   : > { %8356 = vtanh.f32 %v6572_v52 }
 0x45d   : > { %v6574_v33 = vpop.f32.mrf.mxu0 }
 0x45e   : > { %v8351_v20 = vpop.eup %8350  ;;  %v6575_v12 = vadd.f32 %v14300_v23, %v6574_v33 }
 0x45f   : > { %7077 = vst.msk [vmem:[%s12588_s16 + $0x158] sm:$0xff] %vm5343_vm13, %v8351_v20  ;;  %v6827_v2 = vpop.f32.mrf.mxu1  ;;  %v6576_v57 = vpop.f32.mrf.mxu0 }
 0x460   : > { %v8353_v51 = vpop.eup %8352  ;;  %8358 = vtanh.f32 %v6575_v12  ;;  %v6828_v25 = vadd.f32 %v14300_v23, %v6827_v2 }
 0x461   : > { %7140 = vst.msk [vmem:[%s12588_s16 + $0x350] sm:$0xff] %vm5343_vm13, %v8353_v51  ;;  %v6829_v49 = vpop.f32.mrf.mxu1 }
 0x462   : > { %8360 = vtanh.f32 %v6828_v25 }
 0x463   : > { %v6830_v29 = vpop.f32.mrf.mxu1 }
 0x464   : > { %v8355_v39 = vpop.eup %8354  ;;  %v6831_v56 = vadd.f32 %v14300_v23, %v6830_v29 }
 0x465   : > { %7141 = vst.msk [vmem:[%s12588_s16 + $0x358] sm:$0xff] %vm5343_vm13, %v8355_v39  ;;  %v6832_v40 = vpop.f32.mrf.mxu1 }
 0x466   : > { %8362 = vtanh.f32 %v6831_v56 }
 0x469   : > { %v8357_v45 = vpop.eup %8356  ;;  %v6579_v53 = vpop.f32.mrf.mxu0 }
 0x46a   : > { %7078 = vst.msk [vmem:[%s12588_s16 + $0x160] sm:$0xff] %vm5343_vm13, %v8357_v45  ;;  %v6580_v4 = vadd.f32 %v14300_v23, %v6579_v53 }
 0x46b   : > { %v6581_v35 = vpop.f32.mrf.mxu0 }
 0x46c   : > { %8364 = vtanh.f32 %v6580_v4 }
 0x46d   : > { %v8359_v17 = vpop.eup %8358  ;;  %v6582_v16 = vpop.f32.mrf.mxu0 }
 0x46e   : > { %7079 = vst.msk [vmem:[%s12588_s16 + $0x168] sm:$0xff] %vm5343_vm13, %v8359_v17  ;;  %v6583_v62 = vadd.f32 %v14300_v23, %v6582_v16  ;;  %v6835_v54 = vpop.f32.mrf.mxu1 }
 0x46f   : > { %v8361_v13 = vpop.eup %8360  ;;  %v6584_v34 = vpop.f32.mrf.mxu0  ;;  %v6836_v47 = vadd.f32 %v14300_v23, %v6835_v54 }
 0x470   : > { %7142 = vst.msk [vmem:[%s12588_s16 + $0x360] sm:$0xff] %vm5343_vm13, %v8361_v13  ;;  %8366 = vtanh.f32 %v6583_v62  ;;  %v6837_v43 = vpop.f32.mrf.mxu1 }
 0x471   : > { %8368 = vtanh.f32 %v6836_v47 }
 0x472   : > { %v6838_v58 = vpop.f32.mrf.mxu1 }
 0x473   : > { %v8363_v18 = vpop.eup %8362  ;;  %v6839_v10 = vadd.f32 %v14300_v23, %v6838_v58 }
 0x474   : > { %7143 = vst.msk [vmem:[%s12588_s16 + $0x368] sm:$0xff] %vm5343_vm13, %v8363_v18  ;;  %v6840_v61 = vpop.f32.mrf.mxu1 }
 0x475   : > { %8370 = vtanh.f32 %v6839_v10 }
 0x479   : > { %v8365_v8 = vpop.eup %8364  ;;  %v6587_v19 = vpop.f32.mrf.mxu0 }
 0x47a   : > { %7080 = vst.msk [vmem:[%s12588_s16 + $0x170] sm:$0xff] %vm5343_vm13, %v8365_v8  ;;  %v6588_v11 = vadd.f32 %v14300_v23, %v6587_v19 }
 0x47b   : > { %v6589_v14 = vpop.f32.mrf.mxu0 }
 0x47c   : > { %8372 = vtanh.f32 %v6588_v11 }
 0x47d   : > { %v8367_v0 = vpop.eup %8366  ;;  %v6590_v38 = vpop.f32.mrf.mxu0 }
 0x47e   : > { %7081 = vst.msk [vmem:[%s12588_s16 + $0x178] sm:$0xff] %vm5343_vm13, %v8367_v0  ;;  %v6591_v63 = vadd.f32 %v14300_v23, %v6590_v38  ;;  %v8369_v55 = vpop.eup %8368  ;;  %v6843_v3 = vpop.f32.mrf.mxu1 }
 0x47f   : > { %v6592_v28 = vpop.f32.mrf.mxu0  ;;  %7144 = vst.msk [vmem:[%s12588_s16 + $0x370] sm:$0xff] %vm5343_vm13, %v8369_v55  ;;  %v6844_v46 = vadd.f32 %v14300_v23, %v6843_v3 }
 0x480   : > { %8374 = vtanh.f32 %v6591_v63  ;;  %v6845_v24 = vpop.f32.mrf.mxu1 }
 0x481   : > { %8376 = vtanh.f32 %v6844_v46 }
 0x482   : > { %v8371_v48 = vpop.eup %8370  ;;  %v6846_v41 = vpop.f32.mrf.mxu1 }
 0x483   : > { %7145 = vst.msk [vmem:[%s12588_s16 + $0x378] sm:$0xff] %vm5343_vm13, %v8371_v48  ;;  %v6847_v9 = vadd.f32 %v14300_v23, %v6846_v41 }
 0x484   : > { %v6848_v50 = vpop.f32.mrf.mxu1 }
 0x485   : > { %8378 = vtanh.f32 %v6847_v9 }
 0x489   : > { %v8373_v32 = vpop.eup %8372  ;;  %v6595_v27 = vpop.f32.mrf.mxu0 }
 0x48a   : > { %7082 = vst.msk [vmem:[%s12588_s16 + $0x180] sm:$0xff] %vm5343_vm13, %v8373_v32  ;;  %v6596_v1 = vadd.f32 %v14300_v23, %v6595_v27 }
 0x48b   : > { %v6597_v36 = vpop.f32.mrf.mxu0 }
 0x48c   : > { %8380 = vtanh.f32 %v6596_v1 }
 0x48d   : > { %v8375_v60 = vpop.eup %8374  ;;  %v6598_v5 = vpop.f32.mrf.mxu0 }
 0x48e   : > { %7083 = vst.msk [vmem:[%s12588_s16 + $0x188] sm:$0xff] %vm5343_vm13, %v8375_v60  ;;  %v6599_v30 = vadd.f32 %v14300_v23, %v6598_v5  ;;  %v8377_v37 = vpop.eup %8376  ;;  %v6851_v15 = vpop.f32.mrf.mxu1 }
 0x48f   : > { %v6600_v44 = vpop.f32.mrf.mxu0  ;;  %7146 = vst.msk [vmem:[%s12588_s16 + $0x380] sm:$0xff] %vm5343_vm13, %v8377_v37  ;;  %v6852_v26 = vadd.f32 %v14300_v23, %v6851_v15 }
 0x490   : > { %8382 = vtanh.f32 %v6599_v30  ;;  %v6853_v31 = vpop.f32.mrf.mxu1 }
 0x491   : > { %8384 = vtanh.f32 %v6852_v26 }
 0x492   : > { %v8379_v59 = vpop.eup %8378  ;;  %v6854_v7 = vpop.f32.mrf.mxu1 }
 0x493   : > { %7147 = vst.msk [vmem:[%s12588_s16 + $0x388] sm:$0xff] %vm5343_vm13, %v8379_v59  ;;  %v6855_v21 = vadd.f32 %v14300_v23, %v6854_v7 }
 0x494   : > { %v6856_v6 = vpop.f32.mrf.mxu1 }
 0x495   : > { %8386 = vtanh.f32 %v6855_v21 }
 0x499   : > { %v8381_v22 = vpop.eup %8380  ;;  %v6603_v52 = vpop.f32.mrf.mxu0 }
 0x49a   : > { %7084 = vst.msk [vmem:[%s12588_s16 + $0x190] sm:$0xff] %vm5343_vm13, %v8381_v22  ;;  %v6604_v42 = vadd.f32 %v14300_v23, %v6603_v52 }
 0x49b   : > { %v6605_v20 = vpop.f32.mrf.mxu0 }
 0x49c   : > { %8388 = vtanh.f32 %v6604_v42 }
 0x49d   : > { %v8383_v33 = vpop.eup %8382  ;;  %v6606_v12 = vpop.f32.mrf.mxu0 }
 0x49e   : > { %7085 = vst.msk [vmem:[%s12588_s16 + $0x198] sm:$0xff] %vm5343_vm13, %v8383_v33  ;;  %v6607_v51 = vadd.f32 %v14300_v23, %v6606_v12  ;;  %v8385_v2 = vpop.eup %8384  ;;  %v6859_v57 = vpop.f32.mrf.mxu1 }
 0x49f   : > { %v6608_v25 = vpop.f32.mrf.mxu0  ;;  %7148 = vst.msk [vmem:[%s12588_s16 + $0x390] sm:$0xff] %vm5343_vm13, %v8385_v2  ;;  %v6860_v49 = vadd.f32 %v14300_v23, %v6859_v57 }
 0x4a0   : > { %8390 = vtanh.f32 %v6607_v51  ;;  %v6861_v39 = vpop.f32.mrf.mxu1 }
 0x4a1   : > { %8392 = vtanh.f32 %v6860_v49 }
 0x4a2   : > { %v8387_v29 = vpop.eup %8386  ;;  %v6862_v56 = vpop.f32.mrf.mxu1 }
 0x4a3   : > { %7149 = vst.msk [vmem:[%s12588_s16 + $0x398] sm:$0xff] %vm5343_vm13, %v8387_v29  ;;  %v6863_v40 = vadd.f32 %v14300_v23, %v6862_v56 }
 0x4a4   : > { %v6864_v45 = vpop.f32.mrf.mxu1 }
 0x4a5   : > { %8394 = vtanh.f32 %v6863_v40 }
 0x4a9   : > { %v8389_v53 = vpop.eup %8388 }
 0x4aa   : > { %7086 = vst.msk [vmem:[%s12588_s16 + $0x1a0] sm:$0xff] %vm5343_vm13, %v8389_v53 }
 0x4ad   : > { %v8391_v4 = vpop.eup %8390  ;;  %v6867_v35 = vpop.f32.mrf.mxu1 }
 0x4ae   : > { %7087 = vst.msk [vmem:[%s12588_s16 + $0x1a8] sm:$0xff] %vm5343_vm13, %v8391_v4  ;;  %v6868_v17 = vadd.f32 %v14300_v23, %v6867_v35  ;;  %v8393_v16 = vpop.eup %8392  ;;  %v6611_v62 = vpop.f32.mrf.mxu0 }
 0x4af   : > { %v6869_v13 = vpop.f32.mrf.mxu1  ;;  %7150 = vst.msk [vmem:[%s12588_s16 + $0x3a0] sm:$0xff] %vm5343_vm13, %v8393_v16  ;;  %v6612_v54 = vadd.f32 %v14300_v23, %v6611_v62 }
 0x4b0   : > { %8396 = vtanh.f32 %v6868_v17  ;;  %v6613_v34 = vpop.f32.mrf.mxu0 }
 0x4b1   : > { %v6870_v47 = vpop.f32.mrf.mxu1  ;;  %8398 = vtanh.f32 %v6612_v54 }
 0x4b2   : > { %v6871_v43 = vadd.f32 %v14300_v23, %v6870_v47  ;;  %v8395_v18 = vpop.eup %8394  ;;  %v6614_v58 = vpop.f32.mrf.mxu0 }
 0x4b3   : > { %v6872_v10 = vpop.f32.mrf.mxu1  ;;  %7151 = vst.msk [vmem:[%s12588_s16 + $0x3a8] sm:$0xff] %vm5343_vm13, %v8395_v18  ;;  %v6615_v61 = vadd.f32 %v14300_v23, %v6614_v58 }
 0x4b4   : > { %8400 = vtanh.f32 %v6871_v43  ;;  %v6616_v8 = vpop.f32.mrf.mxu0 }
 0x4b5   : > { %8402 = vtanh.f32 %v6615_v61 }
 0x4bd   : > { %v8397_v19 = vpop.eup %8396  ;;  %v6619_v11 = vpop.f32.mrf.mxu0 }
 0x4be   : > { %7152 = vst.msk [vmem:[%s12588_s16 + $0x3b0] sm:$0xff] %vm5343_vm13, %v8397_v19  ;;  %v6620_v14 = vadd.f32 %v14300_v23, %v6619_v11  ;;  %v8399_v0 = vpop.eup %8398 }
 0x4bf   : > { %v6621_v38 = vpop.f32.mrf.mxu0  ;;  %7088 = vst.msk [vmem:[%s12588_s16 + $0x1b0] sm:$0xff] %vm5343_vm13, %v8399_v0 }
 0x4c0   : > { %8404 = vtanh.f32 %v6620_v14 }
 0x4c1   : > { %v8401_v63 = vpop.eup %8400  ;;  %v6622_v55 = vpop.f32.mrf.mxu0 }
 0x4c2   : > { %7153 = vst.msk [vmem:[%s12588_s16 + $0x3b8] sm:$0xff] %vm5343_vm13, %v8401_v63  ;;  %v6623_v3 = vadd.f32 %v14300_v23, %v6622_v55  ;;  %v8403_v28 = vpop.eup %8402 }
 0x4c3   : > { %v6875_v46 = vpop.f32.mrf.mxu1  ;;  %v6624_v24 = vpop.f32.mrf.mxu0  ;;  %7089 = vst.msk [vmem:[%s12588_s16 + $0x1b8] sm:$0xff] %vm5343_vm13, %v8403_v28 }
 0x4c4   : > { %8406 = vtanh.f32 %v6623_v3  ;;  %v6876_v48 = vadd.f32 %v14300_v23, %v6875_v46 }
 0x4c5   : > { %v6877_v41 = vpop.f32.mrf.mxu1 }
 0x4c6   : > { %8408 = vtanh.f32 %v6876_v48 }
 0x4c7   : > { %v6878_v9 = vpop.f32.mrf.mxu1 }
 0x4c8   : > { %v6879_v50 = vadd.f32 %v14300_v23, %v6878_v9 }
 0x4c9   : > { %v6880_v32 = vpop.f32.mrf.mxu1 }
 0x4ca   : > { %8410 = vtanh.f32 %v6879_v50 }
 0x4cd   : > { %v8405_v27 = vpop.eup %8404 }
 0x4ce   : > { %7090 = vst.msk [vmem:[%s12588_s16 + $0x1c0] sm:$0xff] %vm5343_vm13, %v8405_v27 }
 0x4d1   : > { %v8407_v1 = vpop.eup %8406  ;;  %v6883_v36 = vpop.f32.mrf.mxu1 }
 0x4d2   : > { %7091 = vst.msk [vmem:[%s12588_s16 + $0x1c8] sm:$0xff] %vm5343_vm13, %v8407_v1  ;;  %v6884_v60 = vadd.f32 %v14300_v23, %v6883_v36 }
 0x4d3   : > { %v8409_v5 = vpop.eup %8408  ;;  %v6627_v30 = vpop.f32.mrf.mxu0 }
 0x4d4   : > { %v6885_v37 = vpop.f32.mrf.mxu1  ;;  %7154 = vst.msk [vmem:[%s12588_s16 + $0x3c0] sm:$0xff] %vm5343_vm13, %v8409_v5  ;;  %v6628_v15 = vadd.f32 %v14300_v23, %v6627_v30  ;;  %8412 = vtanh.f32 %v6884_v60 }
 0x4d5   : > { %v6629_v44 = vpop.f32.mrf.mxu0 }
 0x4d6   : > { %v6886_v26 = vpop.f32.mrf.mxu1  ;;  %8414 = vtanh.f32 %v6628_v15 }
 0x4d7   : > { %v6887_v31 = vadd.f32 %v14300_v23, %v6886_v26  ;;  %v8411_v59 = vpop.eup %8410  ;;  %v6630_v7 = vpop.f32.mrf.mxu0 }
 0x4d8   : > { %v6888_v21 = vpop.f32.mrf.mxu1  ;;  %7155 = vst.msk [vmem:[%s12588_s16 + $0x3c8] sm:$0xff] %vm5343_vm13, %v8411_v59  ;;  %v6631_v6 = vadd.f32 %v14300_v23, %v6630_v7 }
 0x4d9   : > { %8416 = vtanh.f32 %v6887_v31  ;;  %v6632_v22 = vpop.f32.mrf.mxu0 }
 0x4da   : > { %8418 = vtanh.f32 %v6631_v6 }
 0x4e1   : > { %v8413_v52 = vpop.eup %8412  ;;  %v6635_v42 = vpop.f32.mrf.mxu0 }
 0x4e2   : > { %7156 = vst.msk [vmem:[%s12588_s16 + $0x3d0] sm:$0xff] %vm5343_vm13, %v8413_v52  ;;  %v6636_v20 = vadd.f32 %v14300_v23, %v6635_v42 }
 0x4e3   : > { %v8415_v33 = vpop.eup %8414  ;;  %v6637_v12 = vpop.f32.mrf.mxu0 }
 0x4e4   : > { %7092 = vst.msk [vmem:[%s12588_s16 + $0x1d0] sm:$0xff] %vm5343_vm13, %v8415_v33  ;;  %8420 = vtanh.f32 %v6636_v20 }
 0x4e5   : > { %v6638_v2 = vpop.f32.mrf.mxu0 }
 0x4e6   : > { %v8417_v51 = vpop.eup %8416  ;;  %v6639_v57 = vadd.f32 %v14300_v23, %v6638_v2 }
 0x4e7   : > { %7157 = vst.msk [vmem:[%s12588_s16 + $0x3d8] sm:$0xff] %vm5343_vm13, %v8417_v51  ;;  %v8419_v25 = vpop.eup %8418  ;;  %v6891_v49 = vpop.f32.mrf.mxu1 }
 0x4e8   : > { %v6640_v39 = vpop.f32.mrf.mxu0  ;;  %7093 = vst.msk [vmem:[%s12588_s16 + $0x1d8] sm:$0xff] %vm5343_vm13, %v8419_v25  ;;  %8422 = vtanh.f32 %v6639_v57  ;;  %v6892_v29 = vadd.f32 %v14300_v23, %v6891_v49 }
 0x4e9   : > { %v6893_v56 = vpop.f32.mrf.mxu1 }
 0x4ea   : > { %8424 = vtanh.f32 %v6892_v29 }
 0x4eb   : > { %v6894_v40 = vpop.f32.mrf.mxu1 }
 0x4ec   : > { %v6895_v45 = vadd.f32 %v14300_v23, %v6894_v40 }
 0x4ed   : > { %v6896_v53 = vpop.f32.mrf.mxu1 }
 0x4ee   : > { %8426 = vtanh.f32 %v6895_v45 }
 0x4f1   : > { %v8421_v4 = vpop.eup %8420 }
 0x4f2   : > { %7094 = vst.msk [vmem:[%s12588_s16 + $0x1e0] sm:$0xff] %vm5343_vm13, %v8421_v4 }
 0x4f5   : > { %v8423_v35 = vpop.eup %8422  ;;  %v6899_v17 = vpop.f32.mrf.mxu1 }
 0x4f6   : > { %7095 = vst.msk [vmem:[%s12588_s16 + $0x1e8] sm:$0xff] %vm5343_vm13, %v8423_v35  ;;  %v6900_v16 = vadd.f32 %v14300_v23, %v6899_v17 }
 0x4f7   : > { %v8425_v62 = vpop.eup %8424  ;;  %v6643_v13 = vpop.f32.mrf.mxu0 }
 0x4f8   : > { %v6901_v54 = vpop.f32.mrf.mxu1  ;;  %7158 = vst.msk [vmem:[%s12588_s16 + $0x3e0] sm:$0xff] %vm5343_vm13, %v8425_v62  ;;  %v6644_v34 = vadd.f32 %v14300_v23, %v6643_v13  ;;  %8428 = vtanh.f32 %v6900_v16 }
 0x4f9   : > { %v6645_v47 = vpop.f32.mrf.mxu0 }
 0x4fa   : > { %v6902_v43 = vpop.f32.mrf.mxu1  ;;  %8430 = vtanh.f32 %v6644_v34 }
 0x4fb   : > { %v6903_v18 = vadd.f32 %v14300_v23, %v6902_v43  ;;  %v8427_v58 = vpop.eup %8426  ;;  %v6646_v10 = vpop.f32.mrf.mxu0 }
 0x4fc   : > { %v6904_v61 = vpop.f32.mrf.mxu1  ;;  %7159 = vst.msk [vmem:[%s12588_s16 + $0x3e8] sm:$0xff] %vm5343_vm13, %v8427_v58  ;;  %v6647_v8 = vadd.f32 %v14300_v23, %v6646_v10 }
 0x4fd   : > { %8432 = vtanh.f32 %v6903_v18  ;;  %v6648_v19 = vpop.f32.mrf.mxu0 }
 0x4fe   : > { %8434 = vtanh.f32 %v6647_v8 }
 0x505   : > { %v8429_v11 = vpop.eup %8428 }
 0x506   : > { %7160 = vst.msk [vmem:[%s12588_s16 + $0x3f0] sm:$0xff] %vm5343_vm13, %v8429_v11 }
 0x507   : > { %v8431_v14 = vpop.eup %8430 }
 0x508   : > { %7096 = vst.msk [vmem:[%s12588_s16 + $0x1f0] sm:$0xff] %vm5343_vm13, %v8431_v14  ;;  %7168 = sbr.rel (!%p8639_p5) target bundleno = 1357 (0x54d), region = 44 }
 0x50a   : > { %v8433_v0 = vpop.eup %8432 }
 0x50b   : > { %7161 = vst.msk [vmem:[%s12588_s16 + $0x3f8] sm:$0xff] %vm5343_vm13, %v8433_v0  ;;  %v8435_v38 = vpop.eup %8434 }
 0x50c   : > { %7097 = vst.msk [vmem:[%s12588_s16 + $0x1f8] sm:$0xff] %vm5343_vm13, %v8435_v38 }
 0x50d   : > { %s15702_s11 = smov (!%p7171_p1, %s7170_s11), 128 }
 0x50e   : > { %s7923_s6 = sshll.u32 %s15702_s11, 7 }
 0x50f   : > { %p7926_p2 = scmp.eq.s32.totalorder %s7923_s6, 0 }
 0x510   : > { %s14442_s29 = sshrl.u32 (!%p7926_p2), %s15702_s11, 6 }
 0x511   : > { %7181 = sbr.rel (%p7926_p2) target bundleno = 1357 (0x54d), region = 48  ;;  %p7927_p3 = scmp.le.s32.totalorder (!%p7926_p2), %s14442_s29, 0 }
 0x516   : > { %7621 = sbr.rel (%p7927_p3) target bundleno = 1340 (0x53c), region = 130  ;;  %s15676_s21 = smov (!%p7927_p3), %s14439_s15 }
 0x517   : > { %s15677_s9 = smov (!%p7927_p3), %s12588_s16  ;;  %s14451_s28 = smov (!%p7927_p3), 0  }
 0x518   : > { %s14453_s18 = smov (!%p7927_p3), 0  }
 0x51b LB: >> { %v7370_v23 = vld [vmem:[%s8533_s9] sm:$0xff]  ;;  %v7372_v63 = vld [vmem:[%s8533_s9 + $0x8] sm:$0xff]  ;;  %v7374_v55 = vld [vmem:[%s8533_s9 + $0x10] sm:$0xff]  ;;  %s7498_s17 = sadd.s32 1, %s8537_s28  ;;  %s7364_s18 = sadd.s32 1, %s8541_s18   ;;  %s8541_s18 = sphi %s14453_s18, %s7364_s18   ;;  %s8537_s28 = sphi %s14451_s28, %s15680_s28   ;;  %s8533_s9 = sphi %s15677_s9, %s15679_s9   ;;  %s8529_s21 = sphi %s15676_s21, %s15678_s21  }
 0x51c   : >> { %7371 = vst [vmem:[%s8529_s21] sm:$0xff] %v7370_v23  ;;  %7373 = vst [vmem:[%s8529_s21 + $0x8] sm:$0xff] %v7372_v63  ;;  %v7376_v3 = vld [vmem:[%s8533_s9 + $0x18] sm:$0xff]  ;;  %v7378_v28 = vld [vmem:[%s8533_s9 + $0x20] sm:$0xff]  ;;  %p7499_p4 = scmp.ge.s32.totalorder %s7498_s17, %s14442_s29  ;;  %p7363_p5 = scmp.ge.s32.totalorder %s7364_s18, %s14442_s29 }
 0x51d   : >> { %7375 = vst [vmem:[%s8529_s21 + $0x10] sm:$0xff] %v7374_v55  ;;  %v7380_v46 = vld [vmem:[%s8533_s9 + $0x28] sm:$0xff]  ;;  %7377 = vst [vmem:[%s8529_s21 + $0x18] sm:$0xff] %v7376_v3  ;;  %v7382_v24 = vld [vmem:[%s8533_s9 + $0x30] sm:$0xff] }
 0x51e   : >> { %7379 = vst [vmem:[%s8529_s21 + $0x20] sm:$0xff] %v7378_v28  ;;  %7381 = vst [vmem:[%s8529_s21 + $0x28] sm:$0xff] %v7380_v46  ;;  %v7384_v48 = vld [vmem:[%s8533_s9 + $0x38] sm:$0xff]  ;;  %v7386_v41 = vld [vmem:[%s8533_s9 + $0x40] sm:$0xff]  ;;  %s15704_s17 = smov (%p7499_p4, %s7498_s17), 0 }
 0x51f   : >> { %7383 = vst [vmem:[%s8529_s21 + $0x30] sm:$0xff] %v7382_v24  ;;  %7385 = vst [vmem:[%s8529_s21 + $0x38] sm:$0xff] %v7384_v48  ;;  %v7388_v9 = vld [vmem:[%s8533_s9 + $0x48] sm:$0xff]  ;;  %v7390_v50 = vld [vmem:[%s8533_s9 + $0x50] sm:$0xff]  ;;  %s7928_s20 = sshll.u32 %s15704_s17, 9  ;;  %s15680_s28 = smov %s15704_s17 }
 0x520   : >> { %7387 = vst [vmem:[%s8529_s21 + $0x40] sm:$0xff] %v7386_v41  ;;  %v7392_v32 = vld [vmem:[%s8533_s9 + $0x58] sm:$0xff]  ;;  %7389 = vst [vmem:[%s8529_s21 + $0x48] sm:$0xff] %v7388_v9  ;;  %v7394_v27 = vld [vmem:[%s8533_s9 + $0x60] sm:$0xff]  ;;  %s14509_s7 = scalar_lea.vmem %s12588_s16, %s7928_s20 [#allocation2]   ;;  %s14512_s10 = scalar_lea.vmem %s14439_s15, %s7928_s20  }
 0x521   : >> { %7391 = vst [vmem:[%s8529_s21 + $0x50] sm:$0xff] %v7390_v50  ;;  %7393 = vst [vmem:[%s8529_s21 + $0x58] sm:$0xff] %v7392_v32  ;;  %v7396_v1 = vld [vmem:[%s8533_s9 + $0x68] sm:$0xff]  ;;  %v7398_v36 = vld [vmem:[%s8533_s9 + $0x70] sm:$0xff] }
 0x522   : >> { %7395 = vst [vmem:[%s8529_s21 + $0x60] sm:$0xff] %v7394_v27  ;;  %7397 = vst [vmem:[%s8529_s21 + $0x68] sm:$0xff] %v7396_v1  ;;  %v7400_v60 = vld [vmem:[%s8533_s9 + $0x78] sm:$0xff]  ;;  %v7402_v5 = vld [vmem:[%s8533_s9 + $0x80] sm:$0xff] }
 0x523   : >> { %7399 = vst [vmem:[%s8529_s21 + $0x70] sm:$0xff] %v7398_v36  ;;  %v7404_v30 = vld [vmem:[%s8533_s9 + $0x88] sm:$0xff]  ;;  %7401 = vst [vmem:[%s8529_s21 + $0x78] sm:$0xff] %v7400_v60  ;;  %v7406_v37 = vld [vmem:[%s8533_s9 + $0x90] sm:$0xff] }
 0x524   : >> { %7403 = vst [vmem:[%s8529_s21 + $0x80] sm:$0xff] %v7402_v5  ;;  %7405 = vst [vmem:[%s8529_s21 + $0x88] sm:$0xff] %v7404_v30  ;;  %v7408_v15 = vld [vmem:[%s8533_s9 + $0x98] sm:$0xff]  ;;  %v7410_v44 = vld [vmem:[%s8533_s9 + $0xa0] sm:$0xff] }
 0x525   : >> { %7407 = vst [vmem:[%s8529_s21 + $0x90] sm:$0xff] %v7406_v37  ;;  %7409 = vst [vmem:[%s8529_s21 + $0x98] sm:$0xff] %v7408_v15  ;;  %v7412_v26 = vld [vmem:[%s8533_s9 + $0xa8] sm:$0xff]  ;;  %v7414_v31 = vld [vmem:[%s8533_s9 + $0xb0] sm:$0xff] }
 0x526   : >> { %7411 = vst [vmem:[%s8529_s21 + $0xa0] sm:$0xff] %v7410_v44  ;;  %v7416_v59 = vld [vmem:[%s8533_s9 + $0xb8] sm:$0xff]  ;;  %7413 = vst [vmem:[%s8529_s21 + $0xa8] sm:$0xff] %v7412_v26  ;;  %v7418_v7 = vld [vmem:[%s8533_s9 + $0xc0] sm:$0xff] }
 0x527   : >> { %7415 = vst [vmem:[%s8529_s21 + $0xb0] sm:$0xff] %v7414_v31  ;;  %7417 = vst [vmem:[%s8529_s21 + $0xb8] sm:$0xff] %v7416_v59  ;;  %v7420_v21 = vld [vmem:[%s8533_s9 + $0xc8] sm:$0xff]  ;;  %v7422_v6 = vld [vmem:[%s8533_s9 + $0xd0] sm:$0xff] }
 0x528   : >> { %7419 = vst [vmem:[%s8529_s21 + $0xc0] sm:$0xff] %v7418_v7  ;;  %7421 = vst [vmem:[%s8529_s21 + $0xc8] sm:$0xff] %v7420_v21  ;;  %v7424_v22 = vld [vmem:[%s8533_s9 + $0xd8] sm:$0xff]  ;;  %v7426_v52 = vld [vmem:[%s8533_s9 + $0xe0] sm:$0xff] }
 0x529   : >> { %7423 = vst [vmem:[%s8529_s21 + $0xd0] sm:$0xff] %v7422_v6  ;;  %v7428_v42 = vld [vmem:[%s8533_s9 + $0xe8] sm:$0xff]  ;;  %7425 = vst [vmem:[%s8529_s21 + $0xd8] sm:$0xff] %v7424_v22  ;;  %v7430_v20 = vld [vmem:[%s8533_s9 + $0xf0] sm:$0xff] }
 0x52a   : >> { %7427 = vst [vmem:[%s8529_s21 + $0xe0] sm:$0xff] %v7426_v52  ;;  %7429 = vst [vmem:[%s8529_s21 + $0xe8] sm:$0xff] %v7428_v42  ;;  %v7432_v33 = vld [vmem:[%s8533_s9 + $0xf8] sm:$0xff]  ;;  %v7434_v12 = vld [vmem:[%s8533_s9 + $0x100] sm:$0xff] }
 0x52b   : >> { %7431 = vst [vmem:[%s8529_s21 + $0xf0] sm:$0xff] %v7430_v20  ;;  %7433 = vst [vmem:[%s8529_s21 + $0xf8] sm:$0xff] %v7432_v33  ;;  %v7436_v51 = vld [vmem:[%s8533_s9 + $0x108] sm:$0xff]  ;;  %v7438_v2 = vld [vmem:[%s8533_s9 + $0x110] sm:$0xff] }
 0x52c   : >> { %7435 = vst [vmem:[%s8529_s21 + $0x100] sm:$0xff] %v7434_v12  ;;  %v7440_v57 = vld [vmem:[%s8533_s9 + $0x118] sm:$0xff]  ;;  %7437 = vst [vmem:[%s8529_s21 + $0x108] sm:$0xff] %v7436_v51  ;;  %v7442_v25 = vld [vmem:[%s8533_s9 + $0x120] sm:$0xff] }
 0x52d   : >> { %7439 = vst [vmem:[%s8529_s21 + $0x110] sm:$0xff] %v7438_v2  ;;  %7441 = vst [vmem:[%s8529_s21 + $0x118] sm:$0xff] %v7440_v57  ;;  %v7444_v49 = vld [vmem:[%s8533_s9 + $0x128] sm:$0xff]  ;;  %v7446_v39 = vld [vmem:[%s8533_s9 + $0x130] sm:$0xff] }
 0x52e   : >> { %7443 = vst [vmem:[%s8529_s21 + $0x120] sm:$0xff] %v7442_v25  ;;  %7445 = vst [vmem:[%s8529_s21 + $0x128] sm:$0xff] %v7444_v49  ;;  %v7448_v29 = vld [vmem:[%s8533_s9 + $0x138] sm:$0xff]  ;;  %v7450_v56 = vld [vmem:[%s8533_s9 + $0x140] sm:$0xff] }
 0x52f   : >> { %7447 = vst [vmem:[%s8529_s21 + $0x130] sm:$0xff] %v7446_v39  ;;  %v7452_v40 = vld [vmem:[%s8533_s9 + $0x148] sm:$0xff]  ;;  %7449 = vst [vmem:[%s8529_s21 + $0x138] sm:$0xff] %v7448_v29  ;;  %v7454_v45 = vld [vmem:[%s8533_s9 + $0x150] sm:$0xff] }
 0x530   : >> { %7451 = vst [vmem:[%s8529_s21 + $0x140] sm:$0xff] %v7450_v56  ;;  %7453 = vst [vmem:[%s8529_s21 + $0x148] sm:$0xff] %v7452_v40  ;;  %v7456_v53 = vld [vmem:[%s8533_s9 + $0x158] sm:$0xff]  ;;  %v7458_v4 = vld [vmem:[%s8533_s9 + $0x160] sm:$0xff] }
 0x531   : >> { %7455 = vst [vmem:[%s8529_s21 + $0x150] sm:$0xff] %v7454_v45  ;;  %7457 = vst [vmem:[%s8529_s21 + $0x158] sm:$0xff] %v7456_v53  ;;  %v7460_v35 = vld [vmem:[%s8533_s9 + $0x168] sm:$0xff]  ;;  %v7462_v17 = vld [vmem:[%s8533_s9 + $0x170] sm:$0xff] }
 0x532   : >> { %7459 = vst [vmem:[%s8529_s21 + $0x160] sm:$0xff] %v7458_v4  ;;  %v7464_v16 = vld [vmem:[%s8533_s9 + $0x178] sm:$0xff]  ;;  %7461 = vst [vmem:[%s8529_s21 + $0x168] sm:$0xff] %v7460_v35  ;;  %v7466_v62 = vld [vmem:[%s8533_s9 + $0x180] sm:$0xff] }
 0x533   : >> { %7463 = vst [vmem:[%s8529_s21 + $0x170] sm:$0xff] %v7462_v17  ;;  %7465 = vst [vmem:[%s8529_s21 + $0x178] sm:$0xff] %v7464_v16  ;;  %v7468_v13 = vld [vmem:[%s8533_s9 + $0x188] sm:$0xff]  ;;  %v7470_v54 = vld [vmem:[%s8533_s9 + $0x190] sm:$0xff] }
 0x534   : >> { %7467 = vst [vmem:[%s8529_s21 + $0x180] sm:$0xff] %v7466_v62  ;;  %7469 = vst [vmem:[%s8529_s21 + $0x188] sm:$0xff] %v7468_v13  ;;  %v7472_v34 = vld [vmem:[%s8533_s9 + $0x198] sm:$0xff]  ;;  %v7474_v47 = vld [vmem:[%s8533_s9 + $0x1a0] sm:$0xff] }
 0x535   : >> { %7471 = vst [vmem:[%s8529_s21 + $0x190] sm:$0xff] %v7470_v54  ;;  %v7476_v43 = vld [vmem:[%s8533_s9 + $0x1a8] sm:$0xff]  ;;  %7473 = vst [vmem:[%s8529_s21 + $0x198] sm:$0xff] %v7472_v34  ;;  %v7478_v18 = vld [vmem:[%s8533_s9 + $0x1b0] sm:$0xff] }
 0x536   : >> { %7475 = vst [vmem:[%s8529_s21 + $0x1a0] sm:$0xff] %v7474_v47  ;;  %7477 = vst [vmem:[%s8529_s21 + $0x1a8] sm:$0xff] %v7476_v43  ;;  %v7480_v58 = vld [vmem:[%s8533_s9 + $0x1b8] sm:$0xff]  ;;  %v7482_v10 = vld [vmem:[%s8533_s9 + $0x1c0] sm:$0xff] }
 0x537   : >> { %7479 = vst [vmem:[%s8529_s21 + $0x1b0] sm:$0xff] %v7478_v18  ;;  %7481 = vst [vmem:[%s8529_s21 + $0x1b8] sm:$0xff] %v7480_v58  ;;  %v7484_v61 = vld [vmem:[%s8533_s9 + $0x1c8] sm:$0xff]  ;;  %v7486_v8 = vld [vmem:[%s8533_s9 + $0x1d0] sm:$0xff]  ;;  %7366 = sbr.rel (!%p7363_p5) target bundleno = 1307 (0x51b), region = 136 }
 0x538   : >> { %7483 = vst [vmem:[%s8529_s21 + $0x1c0] sm:$0xff] %v7482_v10  ;;  %v7488_v19 = vld [vmem:[%s8533_s9 + $0x1d8] sm:$0xff]  ;;  %7485 = vst [vmem:[%s8529_s21 + $0x1c8] sm:$0xff] %v7484_v61  ;;  %v7490_v11 = vld [vmem:[%s8533_s9 + $0x1e0] sm:$0xff] }
 0x539   : >> { %7487 = vst [vmem:[%s8529_s21 + $0x1d0] sm:$0xff] %v7486_v8  ;;  %7489 = vst [vmem:[%s8529_s21 + $0x1d8] sm:$0xff] %v7488_v19  ;;  %v7492_v14 = vld [vmem:[%s8533_s9 + $0x1e8] sm:$0xff]  ;;  %v7494_v0 = vld [vmem:[%s8533_s9 + $0x1f0] sm:$0xff] }
 0x53a   : >> { %7491 = vst [vmem:[%s8529_s21 + $0x1e0] sm:$0xff] %v7490_v11  ;;  %7493 = vst [vmem:[%s8529_s21 + $0x1e8] sm:$0xff] %v7492_v14  ;;  %v7496_v38 = vld [vmem:[%s8533_s9 + $0x1f8] sm:$0xff]  ;;  %s15679_s9 = smov %s14509_s7 }
 0x53b   : >> { %7495 = vst [vmem:[%s8529_s21 + $0x1f0] sm:$0xff] %v7494_v0  ;;  %7497 = vst [vmem:[%s8529_s21 + $0x1f8] sm:$0xff] %v7496_v38  ;;  %s15678_s21 = smov %s14512_s10 }
 0x53c PF: > { %s14617_s30 = sand.u32 63, %s15702_s11   ;;  %s7944_s27 = sshll.u32 %s14442_s29, 9 }
 0x53d   : > { %s7509_s13 = scalar_lea.vmem %s12588_s16, %s7944_s27 [#allocation2]   ;;  %s7511_s6 = scalar_lea.vmem %s14439_s15, %s7944_s27  }
 0x53e   : > { %p7933_p6 = scmp.le.s32.totalorder %s14617_s30, 0 }
 0x53f   : > { %s8543_s12 = smov (!%p7933_p6), %s7511_s6   ;;  %s8547_s14 = smov (!%p7933_p6), %s7509_s13  }
 0x540   : > { %7635 = sbr.rel (%p7933_p6) target bundleno = 1357 (0x54d), region = 141  ;;  %s8551_s20 = smov (!%p7933_p6), 0  }
 0x541   : > { %s8555_s17 = smov (!%p7933_p6), 0  }
 0x545 LB: >> { %v7521_v23 = vld [vmem:[%s8549_s14] sm:$0xff]  ;;  %s7523_s11 = sadd.s32 1, %s8553_s20  ;;  %s7515_s17 = sadd.s32 1, %s8557_s17   ;;  %s8557_s17 = sphi %s8555_s17, %s7515_s17   ;;  %s8553_s20 = sphi %s8551_s20, %s8552_s20   ;;  %s8549_s14 = sphi %s8547_s14, %s7528_s14   ;;  %s8545_s12 = sphi %s8543_s12, %s7529_s12  }
 0x546   : >> { %7522 = vst [vmem:[%s8545_s12] sm:$0xff] %v7521_v23  ;;  %p7524_p7 = scmp.ge.s32.totalorder %s7523_s11, %s14617_s30  ;;  %p7514_p8 = scmp.ge.s32.totalorder %s7515_s17, %s14617_s30 }
 0x548   : >> { %s15706_s11 = smov (%p7524_p7, %s7523_s11), 0  ;;  %7517 = sbr.rel (!%p7514_p8) target bundleno = 1349 (0x545), region = 147 }
 0x549   : >> { %s7934_s16 = sshll.u32 %s15706_s11, 3  ;;  %s8552_s20 = smov %s15706_s11  }
 0x54a   : >> { %s7528_s14 = scalar_lea.vmem %s7509_s13, %s7934_s16 [#allocation2]   ;;  %s7529_s12 = scalar_lea.vmem %s7511_s6, %s7934_s16  }
 0x54d PF: > { %s15_s24 = sadd.s32 1, %s8525_s24   ;;  %s15681_s18 = smov %s8505_s19 }
 0x54e   : > { %p12_p9 = scmp.ge.s32.totalorder %s15_s24, 6   ;;  %s15682_s19 = smov %s8650_s8 }
 0x54f   : > { %s15683_s20 = smov %s8517_s22  ;;  %s15684_s21 = smov %s8521_s23 }
 0x550   : > { %s15685_s22 = smov %s15688_s25  ;;  %s15686_s23 = smov %s15692_s26 }
 0x551   :  { %14 = sbr.rel (!%p12_p9) target bundleno = 4 (0x4), region = 158 }

</bundles_post_ra>
